<compile_context>
chip_gen: v5e
topology: v5e:2x2
jax: 0.10.0
libtpu: 0.0.40
codegen_flags: <defaults>
</compile_context>

<pallas_src>
import jax
import jax.numpy as jnp
from jax import lax
from jax.experimental import pallas as pl
from jax.experimental.pallas import tpu as pltpu


def _flash_attn_kernel(scale_ref, q_ref, kt_ref, v_ref, o_ref,
                       q_sc, m_sc, l_sc, acc_sc):
    # q_ref: (tq, D), kt_ref: (D, tk), v_ref: (tk, Dv), o_ref: (tq, Dv)
    ki = pl.program_id(2)

    @pl.when(ki == 0)
    def _():
        # Hoisted per-query-tile work: scale Q by 1/scale in f32, then cast to
        # the MXU operand dtype once; reused across all KV steps.
        inv_scale = 1.0 / scale_ref[0].astype(jnp.float32)
        q_sc[...] = (q_ref[...].astype(jnp.float32) * inv_scale).astype(q_sc.dtype)
        m_sc[...] = jnp.full(m_sc.shape, -jnp.inf, dtype=m_sc.dtype)
        l_sc[...] = jnp.zeros(l_sc.shape, dtype=l_sc.dtype)
        acc_sc[...] = jnp.zeros(acc_sc.shape, dtype=acc_sc.dtype)

    # s = (Q/scale) @ K^T with K already laid out as (D, tk): plain matmul,
    # no in-kernel transpose. f32 accumulation on the MXU.
    s = jnp.dot(q_sc[...], kt_ref[...], preferred_element_type=jnp.float32)

    # Online softmax; stats stay in f32.
    m_prev = m_sc[...]
    m_new = jnp.maximum(m_prev, jnp.max(s, axis=-1, keepdims=True))
    alpha = jnp.exp(m_prev - m_new)
    p = jnp.exp(s - m_new)

    l_sc[...] = alpha * l_sc[...] + jnp.sum(p, axis=-1, keepdims=True)
    acc_sc[...] = alpha * acc_sc[...] + jnp.dot(
        p.astype(v_ref.dtype), v_ref[...], preferred_element_type=jnp.float32
    )
    m_sc[...] = m_new

    # dropout(p=0.0) is identity -> nothing to do.

    @pl.when(ki == pl.num_programs(2) - 1)
    def _():
        # Exact normalization (approx EUP reciprocal was ~1% off -> failed check).
        o_ref[...] = (acc_sc[...] / l_sc[...]).astype(o_ref.dtype)


def scaled_attention(query, key, value, scale_factor, *, tq=512, tk=256,
                     mxu_dtype=None):
    B, S, D = query.shape
    Bk, T, Dk = key.shape
    Bv, Tv, Dv = value.shape
    assert B == Bk == Bv and D == Dk and T == Tv

    out_dtype = query.dtype
    if mxu_dtype is None:
        # Keep input precision by default (matches the f32 PyTorch module).
        # Pass mxu_dtype=jnp.bfloat16 for the bf16-MXU / half-HBM fast path.
        mxu_dtype = query.dtype
    if query.dtype != mxu_dtype:
        query = query.astype(mxu_dtype)
    if key.dtype != mxu_dtype:
        key = key.astype(mxu_dtype)
    if value.dtype != mxu_dtype:
        value = value.astype(mxu_dtype)

    # Pre-transpose K to (B, D, T) in the wrapper (one cheap layout pass) so the
    # kernel never transposes the K tile on the XLU.
    key_t = jnp.swapaxes(key, -1, -2)

    tq = min(tq, S)
    tk = min(tk, T)
    assert S % tq == 0 and T % tk == 0, "S and T must be divisible by the tiles"

    grid = (B, S // tq, T // tk)

    return pl.pallas_call(
        _flash_attn_kernel,
        out_shape=jax.ShapeDtypeStruct((B, S, Dv), out_dtype),
        grid_spec=pltpu.PrefetchScalarGridSpec(
            num_scalar_prefetch=0,
            grid=grid,
            in_specs=[
                pl.BlockSpec(memory_space=pltpu.SMEM),  # scale_factor (1,)
                pl.BlockSpec((pl.Squeezed(), tq, D), lambda b, qi, ki: (b, qi, 0)),
                pl.BlockSpec((pl.Squeezed(), D, tk), lambda b, qi, ki: (b, 0, ki)),
                pl.BlockSpec((pl.Squeezed(), tk, Dv), lambda b, qi, ki: (b, ki, 0)),
            ],
            out_specs=pl.BlockSpec(
                (pl.Squeezed(), tq, Dv), lambda b, qi, ki: (b, qi, 0)
            ),
            scratch_shapes=[
                pltpu.VMEM((tq, D), mxu_dtype),     # pre-scaled Q (hoisted)
                pltpu.VMEM((tq, 1), jnp.float32),   # running max
                pltpu.VMEM((tq, 1), jnp.float32),   # running sum
                pltpu.VMEM((tq, Dv), jnp.float32),  # output accumulator
            ],
        ),
        compiler_params=pltpu.CompilerParams(
            dimension_semantics=("parallel", "parallel", "arbitrary"),
        ),
    )(scale_factor, query, key_t, value)


if __name__ == "__main__":
    # Small shapes consistent with the module's (B, seq, dim) convention
    # (the spec's literal shapes are mutually inconsistent for query @ key^T);
    # chosen so the grid exercises batch, megacore-parallel query tiles, and
    # multiple KV reduction steps.
    B, S, T, D, Dv = 2, 512, 512, 128, 128

    k0, k1, k2, k3 = jax.random.split(jax.random.PRNGKey(0), 4)
    query = jax.random.normal(k0, (B, S, D), dtype=jnp.float32)
    key = jax.random.normal(k1, (B, T, D), dtype=jnp.float32)
    value = jax.random.normal(k2, (B, T, Dv), dtype=jnp.float32)
    # Module uses randn(1) as the divisor; test uses a positive, away-from-zero
    # scale so softmax is well behaved (kernel does not guard against scale≈0).
    scale_factor = jnp.abs(jax.random.normal(k3, (1,), dtype=jnp.float32)) + 0.5

    out = scaled_attention(query, key, value, scale_factor)
    out = jax.block_until_ready(out)

    # Pure-JAX reference in full f32 precision (HIGHEST so the TPU reference
    # matmuls do not silently drop to low-precision passes).
    s = jnp.einsum("bsd,btd->bst", query, key,
                   precision=lax.Precision.HIGHEST) / scale_factor[0]
    p = jax.nn.softmax(s, axis=-1)
    ref = jnp.einsum("bst,btv->bsv", p, value, precision=lax.Precision.HIGHEST)

    assert out.shape == (B, S, Dv)
    assert out.dtype == query.dtype
    max_err = float(jnp.max(jnp.abs(out - ref)))
    assert jnp.allclose(out, ref, atol=2e-3, rtol=2e-3), max_err

    print("KERNEL_OK")
</pallas_src>

<mosaic_0001>
module attributes {stable_mosaic.version = 11 : i64} {
  func.func @_flash_attn_kernel(%arg0: i32, %arg1: i32, %arg2: i32, %arg3: memref<1xf32, #tpu.memory_space<smem>>, %arg4: memref<1x512x128xf32, #tpu.memory_space<vmem>>, %arg5: memref<1x128x256xf32, #tpu.memory_space<vmem>>, %arg6: memref<1x256x128xf32, #tpu.memory_space<vmem>>, %arg7: memref<1x512x128xf32, #tpu.memory_space<vmem>>, %arg8: memref<512x128xf32, #tpu.memory_space<vmem>>, %arg9: memref<512x1xf32, #tpu.memory_space<vmem>>, %arg10: memref<512x1xf32, #tpu.memory_space<vmem>>, %arg11: memref<512x128xf32, #tpu.memory_space<vmem>>) attributes {dimension_semantics = [#tpu.dimension_semantics<parallel>, #tpu.dimension_semantics<parallel>, #tpu.dimension_semantics<arbitrary>], iteration_bounds = array<i64: 2, 1, 2>, scalar_prefetch = 0 : i64, scratch_operands = 4 : i64, tpu.core_type = #tpu.core_type<tc>, window_params = [{transform_indices = @transform_0, window_bounds = array<i64: 1>}, {transform_indices = @transform_1, window_bounds = array<i64: 1, 512, 128>}, {transform_indices = @transform_2, window_bounds = array<i64: 1, 128, 256>}, {transform_indices = @transform_3, window_bounds = array<i64: 1, 256, 128>}, {transform_indices = @transform_4, window_bounds = array<i64: 1, 512, 128>}]} {
    %c0_i32 = arith.constant 0 : i32
    %0 = arith.cmpi eq, %arg2, %c0_i32 : i32
    %1 = arith.extui %0 : i1 to i32
    %c0_i32_0 = arith.constant 0 : i32
    %2 = arith.cmpi ne, %1, %c0_i32_0 : i32
    scf.if %2 {
      %c0_24 = arith.constant 0 : index
      %34 = memref.load %arg3[%c0_24] : memref<1xf32, #tpu.memory_space<smem>>
      %cst_25 = arith.constant 1.000000e+00 : f32
      %35 = arith.divf %cst_25, %34 : f32
      %c0_26 = arith.constant 0 : index
      %c0_27 = arith.constant 0 : index
      %c0_28 = arith.constant 0 : index
      %36 = vector.load %arg4[%c0_26, %c0_27, %c0_28] : memref<1x512x128xf32, #tpu.memory_space<vmem>>, vector<1x512x128xf32>
      %37 = vector.shape_cast %36 : vector<1x512x128xf32> to vector<512x128xf32>
      %38 = vector.broadcast %35 : f32 to vector<512x128xf32>
      %39 = arith.mulf %37, %38 : vector<512x128xf32>
      %c0_29 = arith.constant 0 : index
      %c0_30 = arith.constant 0 : index
      %40 = vector.load %arg8[%c0_29, %c0_30] : memref<512x128xf32, #tpu.memory_space<vmem>>, vector<512x128xf32>
      tpu.vector_store %arg8[%c0_29, %c0_30], %39 {strides = array<i32>} : memref<512x128xf32, #tpu.memory_space<vmem>>, vector<512x128xf32>,
      %cst_31 = arith.constant 0xFF800000 : f32
      %41 = vector.broadcast %cst_31 : f32 to vector<512x1xf32>
      %c0_32 = arith.constant 0 : index
      %c0_33 = arith.constant 0 : index
      %42 = vector.load %arg9[%c0_32, %c0_33] : memref<512x1xf32, #tpu.memory_space<vmem>>, vector<512x1xf32>
      tpu.vector_store %arg9[%c0_32, %c0_33], %41 {strides = array<i32>} : memref<512x1xf32, #tpu.memory_space<vmem>>, vector<512x1xf32>,
      %cst_34 = arith.constant 0.000000e+00 : f32
      %43 = vector.broadcast %cst_34 : f32 to vector<512x1xf32>
      %c0_35 = arith.constant 0 : index
      %c0_36 = arith.constant 0 : index
      %44 = vector.load %arg10[%c0_35, %c0_36] : memref<512x1xf32, #tpu.memory_space<vmem>>, vector<512x1xf32>
      tpu.vector_store %arg10[%c0_35, %c0_36], %43 {strides = array<i32>} : memref<512x1xf32, #tpu.memory_space<vmem>>, vector<512x1xf32>,
      %cst_37 = arith.constant 0.000000e+00 : f32
      %45 = vector.broadcast %cst_37 : f32 to vector<512x128xf32>
      %c0_38 = arith.constant 0 : index
      %c0_39 = arith.constant 0 : index
      %46 = vector.load %arg11[%c0_38, %c0_39] : memref<512x128xf32, #tpu.memory_space<vmem>>, vector<512x128xf32>
      tpu.vector_store %arg11[%c0_38, %c0_39], %45 {strides = array<i32>} : memref<512x128xf32, #tpu.memory_space<vmem>>, vector<512x128xf32>,
    } else {
    }
    %c0 = arith.constant 0 : index
    %c0_1 = arith.constant 0 : index
    %3 = vector.load %arg8[%c0, %c0_1] : memref<512x128xf32, #tpu.memory_space<vmem>>, vector<512x128xf32>
    %c0_2 = arith.constant 0 : index
    %c0_3 = arith.constant 0 : index
    %c0_4 = arith.constant 0 : index
    %4 = vector.load %arg5[%c0_2, %c0_3, %c0_4] : memref<1x128x256xf32, #tpu.memory_space<vmem>>, vector<1x128x256xf32>
    %5 = vector.shape_cast %4 : vector<1x128x256xf32> to vector<128x256xf32>
    %cst = arith.constant dense<0.000000e+00> : vector<512x256xf32>
    %6 = tpu.matmul %3, %5, %cst {dimension_numbers = #tpu.dot_dimension_numbers<[1], [0], [0], [1], [0, 0, 1, 1], [], []>} : vector<512x128xf32>, vector<128x256xf32>, vector<512x256xf32> -> vector<512x256xf32>
    %c0_5 = arith.constant 0 : index
    %c0_6 = arith.constant 0 : index
    %7 = vector.load %arg9[%c0_5, %c0_6] : memref<512x1xf32, #tpu.memory_space<vmem>>, vector<512x1xf32>
    %cst_7 = arith.constant dense<0xFF800000> : vector<512xf32>
    %8 = vector.multi_reduction <maximumf>, %6, %cst_7 [1] : vector<512x256xf32> to vector<512xf32>
    %9 = vector.shape_cast %8 : vector<512xf32> to vector<512x1xf32>
    %10 = arith.maximumf %7, %9 : vector<512x1xf32>
    %11 = arith.subf %7, %10 : vector<512x1xf32>
    %12 = math.exp %11 : vector<512x1xf32>
    %13 = vector.broadcast %10 : vector<512x1xf32> to vector<512x256xf32>
    %14 = arith.subf %6, %13 : vector<512x256xf32>
    %15 = math.exp %14 : vector<512x256xf32>
    %c0_8 = arith.constant 0 : index
    %c0_9 = arith.constant 0 : index
    %16 = vector.load %arg10[%c0_8, %c0_9] : memref<512x1xf32, #tpu.memory_space<vmem>>, vector<512x1xf32>
    %17 = arith.mulf %12, %16 : vector<512x1xf32>
    %cst_10 = arith.constant dense<0.000000e+00> : vector<512xf32>
    %18 = vector.multi_reduction <add>, %15, %cst_10 [1] : vector<512x256xf32> to vector<512xf32>
    %19 = vector.shape_cast %18 : vector<512xf32> to vector<512x1xf32>
    %20 = arith.addf %17, %19 : vector<512x1xf32>
    %c0_11 = arith.constant 0 : index
    %c0_12 = arith.constant 0 : index
    %21 = vector.load %arg10[%c0_11, %c0_12] : memref<512x1xf32, #tpu.memory_space<vmem>>, vector<512x1xf32>
    tpu.vector_store %arg10[%c0_11, %c0_12], %20 {strides = array<i32>} : memref<512x1xf32, #tpu.memory_space<vmem>>, vector<512x1xf32>,
    %c0_13 = arith.constant 0 : index
    %c0_14 = arith.constant 0 : index
    %22 = vector.load %arg11[%c0_13, %c0_14] : memref<512x128xf32, #tpu.memory_space<vmem>>, vector<512x128xf32>
    %23 = vector.broadcast %12 : vector<512x1xf32> to vector<512x128xf32>
    %24 = arith.mulf %23, %22 : vector<512x128xf32>
    %c0_15 = arith.constant 0 : index
    %c0_16 = arith.constant 0 : index
    %c0_17 = arith.constant 0 : index
    %25 = vector.load %arg6[%c0_15, %c0_16, %c0_17] : memref<1x256x128xf32, #tpu.memory_space<vmem>>, vector<1x256x128xf32>
    %26 = vector.shape_cast %25 : vector<1x256x128xf32> to vector<256x128xf32>
    %cst_18 = arith.constant dense<0.000000e+00> : vector<512x128xf32>
    %27 = tpu.matmul %15, %26, %cst_18 {dimension_numbers = #tpu.dot_dimension_numbers<[1], [0], [0], [1], [0, 0, 1, 1], [], []>} : vector<512x256xf32>, vector<256x128xf32>, vector<512x128xf32> -> vector<512x128xf32>
    %28 = arith.addf %24, %27 : vector<512x128xf32>
    %c0_19 = arith.constant 0 : index
    %c0_20 = arith.constant 0 : index
    %29 = vector.load %arg11[%c0_19, %c0_20] : memref<512x128xf32, #tpu.memory_space<vmem>>, vector<512x128xf32>
    tpu.vector_store %arg11[%c0_19, %c0_20], %28 {strides = array<i32>} : memref<512x128xf32, #tpu.memory_space<vmem>>, vector<512x128xf32>,
    %c0_21 = arith.constant 0 : index
    %c0_22 = arith.constant 0 : index
    %30 = vector.load %arg9[%c0_21, %c0_22] : memref<512x1xf32, #tpu.memory_space<vmem>>, vector<512x1xf32>
    tpu.vector_store %arg9[%c0_21, %c0_22], %10 {strides = array<i32>} : memref<512x1xf32, #tpu.memory_space<vmem>>, vector<512x1xf32>,
    %c1_i32 = arith.constant 1 : i32
    %31 = arith.cmpi eq, %arg2, %c1_i32 : i32
    %32 = arith.extui %31 : i1 to i32
    %c0_i32_23 = arith.constant 0 : i32
    %33 = arith.cmpi ne, %32, %c0_i32_23 : i32
    scf.if %33 {
      %c0_24 = arith.constant 0 : index
      %c0_25 = arith.constant 0 : index
      %34 = vector.load %arg11[%c0_24, %c0_25] : memref<512x128xf32, #tpu.memory_space<vmem>>, vector<512x128xf32>
      %c0_26 = arith.constant 0 : index
      %c0_27 = arith.constant 0 : index
      %35 = vector.load %arg10[%c0_26, %c0_27] : memref<512x1xf32, #tpu.memory_space<vmem>>, vector<512x1xf32>
      %36 = vector.broadcast %35 : vector<512x1xf32> to vector<512x128xf32>
      %37 = arith.divf %34, %36 : vector<512x128xf32>
      %c0_28 = arith.constant 0 : index
      %c0_29 = arith.constant 0 : index
      %c0_30 = arith.constant 0 : index
      %38 = vector.load %arg7[%c0_28, %c0_29, %c0_30] : memref<1x512x128xf32, #tpu.memory_space<vmem>>, vector<1x512x128xf32>
      %39 = vector.shape_cast %38 : vector<1x512x128xf32> to vector<512x128xf32>
      %40 = vector.shape_cast %37 : vector<512x128xf32> to vector<1x512x128xf32>
      tpu.vector_store %arg7[%c0_28, %c0_29, %c0_30], %40 {strides = array<i32>} : memref<1x512x128xf32, #tpu.memory_space<vmem>>, vector<1x512x128xf32>,
    } else {
    }
    return
  }
  func.func @transform_0(%arg0: i32, %arg1: i32, %arg2: i32) -> i32 {
    %c0_i32 = arith.constant 0 : i32
    %c0_i32_0 = arith.constant 0 : i32
    return %c0_i32 : i32
  }
  func.func @transform_1(%arg0: i32, %arg1: i32, %arg2: i32) -> (i32, i32, i32) {
    %c0_i32 = arith.constant 0 : i32
    %c0_i32_0 = arith.constant 0 : i32
    return %arg0, %arg1, %c0_i32 : i32, i32, i32
  }
  func.func @transform_2(%arg0: i32, %arg1: i32, %arg2: i32) -> (i32, i32, i32) {
    %c0_i32 = arith.constant 0 : i32
    %c0_i32_0 = arith.constant 0 : i32
    return %arg0, %c0_i32, %arg2 : i32, i32, i32
  }
  func.func @transform_3(%arg0: i32, %arg1: i32, %arg2: i32) -> (i32, i32, i32) {
    %c0_i32 = arith.constant 0 : i32
    %c0_i32_0 = arith.constant 0 : i32
    return %arg0, %arg2, %c0_i32 : i32, i32, i32
  }
  func.func @transform_4(%arg0: i32, %arg1: i32, %arg2: i32) -> (i32, i32, i32) {
    %c0_i32 = arith.constant 0 : i32
    %c0_i32_0 = arith.constant 0 : i32
    return %arg0, %arg1, %c0_i32 : i32, i32, i32
  }
}

</mosaic_0001>

<bundles_post_ra>
// kernel: tpu_custom_call.1
= control target key start
LH: loop header
LB: loop body
LE: loop exit
PB: predicated region body
PF: predicated region fallthrough
CT: control target
= control target key end

     0   :  { %s10267_s0 = inlined_call_operand.<no memory space> [shape: f32[1], index: 0, kind: input, shape index: {}]   ;;  %s10268_s1 = inlined_call_operand.hbm [shape: f32[2,512,128], index: 1, kind: input, shape index: {}]   ;;  %s10269_s2 = inlined_call_operand.hbm [shape: f32[2,128,512], index: 2, kind: input, shape index: {}]   ;;  %s10270_s3 = inlined_call_operand.hbm [shape: f32[2,512,128], index: 3, kind: input, shape index: {}]   ;;  %s10271_s4 = inlined_call_operand.hbm [shape: f32[2,512,128], index: 4, kind: output, shape index: {}]  }
   0x1   :  { %10441 = sst [smem:[#allocation101_spill]] %s10269_s2 }
   0x2   :  { %10442 = sst [smem:[#allocation102_spill]] %s10271_s4 }
   0x3   :  { %9 = sst [smem:[#allocation6]] %s10267_s0 }
   0x4   :  { %10 = vsyncpa [#allocation8], 0 }
   0x5   :  { %12 = vsyncpa [#allocation8 + $0x1], 0 }
   0x6   :  { %13 = vsyncpa [#allocation11], 0 }
   0x7   :  { %15 = vsyncpa [#allocation11 + $0x1], 0 }
   0x8   :  { %16 = vsyncpa [#allocation9], 0 }
   0x9   :  { %18 = vsyncpa [#allocation9 + $0x1], 0  ;;  %s6580_s17 = smov 0   ;;  %s6582_s18 = smov 0  }
   0xa   :  { %s6584_s19 = smov 0   ;;  %s6586_s20 = smov 0  }
   0xb   :  { %s6588_s21 = smov 0   ;;  %s6590_s22 = smov 0  }
   0xc   :  { %s6592_s23 = smov 0   ;;  %s6594_s0 = smov 0  }
   0xd   :  { %s6596_s24 = smov 0   ;;  %s6598_s25 = smov 0  }
   0xe   :  { %s6600_s26 = smov 0  }
   0xf LB: > { %10443 = sst [smem:[#allocation17_spill]] %s6507_s19  ;;  %s36_s27 = sadd.s32 1, %s6531_s24  ;;  %s6539_s26 = sphi %s6600_s26, %s24_s26   ;;  %s6535_s25 = sphi %s6598_s25, %s10885_s25   ;;  %s6531_s24 = sphi %s6596_s24, %s10884_s24   ;;  %s6527_s0 = sphi %s6594_s0, %s10883_s0   ;;  %s6523_s23 = sphi %s6592_s23, %s10882_s23   ;;  %s6519_s22 = sphi %s6590_s22, %s10875_s22   ;;  %s6515_s21 = sphi %s6588_s21, %s10881_s21   ;;  %s6511_s20 = sphi %s6586_s20, %s10880_s20   ;;  %s6507_s19 = sphi %s6584_s19, %s10873_s19   ;;  %s6503_s18 = sphi %s6582_s18, %s10879_s18   ;;  %s6499_s17 = sphi %s6580_s17, %s10878_s17  }
  0x10   : > { %10444 = sst [smem:[#allocation18_spill]] %s6511_s20  ;;  %s43_s28 = sadd.s32 1, %s6535_s25 }
  0x11   : > { %10445 = sst [smem:[#allocation19_spill]] %s6519_s22  ;;  %p37_p0 = scmp.ge.s32.totalorder %s36_s27, 2 }
  0x12   : > { %10446 = sst [smem:[#allocation20_spill]] %s6523_s23  ;;  %p81_p1 = scmp.eq.s32.totalorder %s6539_s26, 0 }
  0x13   : > { %10447 = sst [smem:[#allocation21_spill]] %s6527_s0  ;;  %s101_s29 = sadd.s32 1, %s6507_s19 }
  0x14   : > { %p108_p2 = scmp.ne.s32.totalorder %s6507_s19, %s6503_s18  ;;  %s10887_s27 = smov (%p37_p0, %s36_s27), 0 }
  0x15   : > { %10448 = sst [smem:[#allocation22_spill]] %s10887_s27  ;;  %s10889_s28 = smov (!%p37_p0, %s43_s28), %s6535_s25 }
  0x16   : > { %s97_s30 = ssub.s32 %s6531_s24, %s10887_s27  ;;  %p6648_p3 = por %p108_p2, %p81_p1 }
  0x17   : > { %p45_p4 = scmp.ge.s32.totalorder %s10889_s28, 2  ;;  %p114_p5 = scmp.ne.s32.totalorder %s6503_s18, %s6499_s17 }
  0x18   : > { %p5702_p6 = scmp.lt.s32.totalorder %s6539_s26, 4  ;;  %s221_s6 = sand.u32 1, %s6539_s26  }
  0x19   : > { %s10891_s28 = smov (%p45_p4, %s10889_s28), 0  ;;  %s223_s7 = sand.u32 1, %s6507_s19  }
  0x1a   : > { %10450 = sst [smem:[#allocation23_spill]] %s10891_s28  ;;  %s6661_s8 = ssub.s32 %s6535_s25, %s10891_s28 }
  0x1b   : > { %s98_s9 = sor.u32 %s97_s30, %s6661_s8  ;;  %s6664_s10 = sshll.u32 %s223_s7, 8 }
  0x1c   : > { %p99_p7 = scmp.eq.s32.totalorder %s98_s9, 0  ;;  %s5657_s11 = sshll.u32 %s6531_s24, 1 }
  0x1d   : > { %s10273_s12 = sshll.u32 %s6535_s25, 6  ;;  %s225_s15 = scalar_lea.vmem [#allocation10], %s6664_s10 }
  0x1e   : > { %s6669_s13 = scalar_select %p99_p7, %s6507_s19, %s101_s29  }
  0x1f   : > { %s230_s14 = sadd.s32 %s10273_s12, %s5657_s11  ;;  %s235_s16 = sshll.u32 %s225_s15, 4  ;;  %s236_s16 = int_to_ptr.vmem [resolvable:$true] %s235_s16 }
  0x20   : > { %10451 = sst [smem:[#allocation24_spill]] %s6669_s13  ;;  %s5659_s28 = sshll.u32 %s230_s14, 3 }
  0x21   : > { %s10452_s2 = sld [smem:[#allocation101_spill]]  ;;  %p6681_p8 = pnand %p5702_p6, %p6648_p3 }
  0x22   : > { %s6685_s14 = scalar_lea.sflag [#allocation11], %s221_s6  ;;  %s6541_s15 = smov 512  }
  0x23   : > { %s6543_s5 = smov 16   ;;  %p5664_p9 = scmp.ge.s32.totalorder %s6539_s26, 1 }
  0x24   : > { %p267_p10 = scmp.lt.s32.totalorder %s6539_s26, 5  ;;  %s6697_s7 = sadd.s32 4294967295, %s6539_s26  }
  0x25   : > { %s5650_s6 = sadd.s32 4294967294, %s6539_s26   ;;  %p71_p12 = scmp.eq.s32.totalorder %s6661_s8, 0 }
  0x26   : > { %p6692_p11 = pnand %p5664_p9, %p267_p10  ;;  %p80_p13 = scmp.ne.s32.totalorder %s6519_s22, %s6515_s21 }
  0x27   : > { %s232_s9 = scalar_lea.hbm %s10452_s2, %s5659_s28  ;;  %s6542_s28 = smov 256  }
  0x28   : > { %s233_s11 = sshll.u32 %s232_s9, 4  ;;  %s73_s9 = sadd.s32 1, %s6519_s22  ;;  %s234_s11 = int_to_ptr.hbm [resolvable:$true] %s233_s11 }
  0x29   : > { %5694 = dma.hbm_to_vmem [thread:$0]  (!%p6681_p8), %s234_s11, 4096, %s236_s16, %s6685_s14, %s6541_s15, %s6542_s28, %s6543_s5  }
  0x2a   : > { %s6705_s12 = scalar_select %p71_p12, %s6519_s22, %s73_s9  }
  0x2b   : > { %p6709_p0 = por %p81_p1, %p80_p13  ;;  %p86_p2 = scmp.ne.s32.totalorder %s6515_s21, %s6511_s20 }
  0x2c   : > { %10455 = sst [smem:[#allocation25_spill]] %s6705_s12  ;;  %p87_p3 = scmp.eq.s32.totalorder %s6697_s7, 0 }
  0x2d   : > { %p168_p4 = scmp.eq.s32.totalorder %s6697_s7, 3  ;;  %p174_p7 = scmp.eq.s32.totalorder %s5650_s6, 3 }
  0x2e   : > { %s197_s11 = sand.u32 1, %s6519_s22   ;;  %p6718_p9 = por %p87_p3, %p86_p2 }
  0x2f   : > { %p6725_p10 = por %p114_p5, %p87_p3  ;;  %p6729_p1 = por %p168_p4, %p80_p13 }
  0x30   : > { %p6733_p12 = por %p174_p7, %p86_p2  ;;  %s5653_s6 = sshll.u32 %s197_s11, 9 }
  0x31   : > { %s10459_s28 = scalar_select %p6729_p1, 1, 0 }
  0x32   : > { %s10461_s5 = scalar_select %p6733_p12, 1, 0 }
  0x33   : > { %10460 = sst [smem:[#allocation26_spill]] %s10459_s28  ;;  %s5676_s9 = sshll.u32 %s6535_s25, 9 }
  0x34   : > { %10462 = sst [smem:[#allocation27_spill]] %s10461_s5  ;;  %s208_s17 = scalar_lea.hbm %s10268_s1, %s5676_s9 }
  0x35   : > { %s201_s12 = scalar_lea.vmem [#allocation7], %s5653_s6  ;;  %s209_s13 = sshll.u32 %s208_s17, 4  ;;  %s210_s13 = int_to_ptr.hbm [resolvable:$true] %s209_s13 }
  0x36   : > { %s211_s22 = sshll.u32 %s201_s12, 4  ;;  %p5689_p5 = pnand %p5702_p6, %p6709_p0  ;;  %s212_s22 = int_to_ptr.vmem [resolvable:$true] %s211_s22 }
  0x37   : > { %s198_s19 = scalar_lea.sflag [#allocation8], %s197_s11  ;;  %s6544_s20 = smov 128  }
  0x38   : > { %s6545_s5 = smov 8   ;;  %s5661_s4 = sshll.u32 %s6531_s24, 5 }
  0x39   : > { %5691 = dma.hbm_to_vmem [thread:$0]  (!%p5689_p5), %s210_s13, 8192, %s212_s22, %s198_s19, %s6544_s20, %s6544_s20, %s6545_s5  }
  0x3a   : > { %s249_s28 = scalar_lea.vmem [#allocation12], %s6664_s10  ;;  %s10463_s23 = sshll.u32 %s6535_s25, 6 }
  0x3b   : > { %s259_s0 = sshll.u32 %s249_s28, 4  ;;  %s254_s2 = sadd.s32 %s5661_s4, %s10463_s23  ;;  %s260_s0 = int_to_ptr.vmem [resolvable:$true] %s259_s0 }
  0x3c   : > { %s5663_s27 = sshll.u32 %s254_s2, 3  ;;  %271 = sbr.rel (%p6692_p11) target bundleno = 3000 (0xbb8), region = 36 }
  0x3d   : > { %s256_s9 = scalar_lea.hbm %s10270_s3, %s5663_s27 }
  0x3e   : > { %s257_s17 = sshll.u32 %s256_s9, 4  ;;  %s258_s17 = int_to_ptr.hbm [resolvable:$true] %s257_s17 }
  0x3f   : > { %5697 = dma.hbm_to_vmem [thread:$0]  (!%p6681_p8), %s258_s17, 4096, %s260_s0, %s6685_s14, %s6544_s20, %s6544_s20, %s6545_s5  }
  0x41   : > { %s6758_s19 = sand.u32 1, %s6515_s21  }
  0x42   : > { %s5665_s4 = sshll.u32 %s6758_s19, 9  ;;  %s274_s22 = scalar_lea.sflag [#allocation8], %s6758_s19 }
  0x43   : > { %s6762_s23 = scalar_lea.vmem [#allocation7], %s5665_s4 }
  0x44   : > { %6486 = dma.done.wait (%p6718_p9), %s274_s22, 8192  }
  0x45   : > { %6488 = vsyncadd (%p6718_p9), %s274_s22, 4294959104  ;;  %s283_s20 = sand.u32 1, %s6697_s7   ;;  %s285_s0 = sand.u32 1, %s6503_s18  }
  0x46   : > { %s5666_s10 = sshll.u32 %s285_s0, 8  ;;  %s284_s13 = scalar_lea.sflag [#allocation11], %s283_s20 }
  0x47   : > { %s6770_s29 = scalar_lea.vmem [#allocation10], %s5666_s10 }
  0x48   : > { %6490 = dma.done.wait (%p6725_p10), %s284_s13, 8192  }
  0x49   : > { %6492 = vsyncadd (%p6725_p10), %s284_s13, 4294959104  ;;  %s6776_s14 = scalar_lea.vmem [#allocation12], %s5666_s10  ;;  %s6778_s30 = scalar_lea.vmem [#allocation13], %s5665_s4 }
  0x4a   : > { %s10464_s16 = sld [smem:[#allocation20_spill]] }
  0x50   : > { %p5669_p6 = scmp.ne.s32.totalorder %s10464_s16, 0 }
  0x51   : > { %s341_s11 = sld [smem:[#allocation6]] (!%p5669_p6) }
  0x52   : > { %340 = sbr.rel (%p5669_p6) target bundleno = 414 (0x19e), region = 52 }
  0x57   : > { %v342_v0 = vstv %s341_s11  ;;  %v358_v11 = vld [vmem:[%s6762_s23] sm:$0xff]  ;;  %v359_v12 = vld [vmem:[%s6762_s23 + $0x8] sm:$0xff]  ;;  %v360_v13 = vld [vmem:[%s6762_s23 + $0x10] sm:$0xff]  ;;  %vm551_vm4 = vcmask 7168  }
  0x58   : > { %5803 = vrcp.f32 %v342_v0  ;;  %v354_v3 = vand.u32 2147483648, %v342_v0  ;;  %vm348_vm0 = vweird.f32 %v342_v0  ;;  %v352_v5 = vand.u32 2147483647, %v342_v0  ;;  %v361_v14 = vld [vmem:[%s6762_s23 + $0x18] sm:$0xff]  ;;  %v362_v15 = vld [vmem:[%s6762_s23 + $0x20] sm:$0xff]  ;;  %v363_v17 = vld [vmem:[%s6762_s23 + $0x28] sm:$0xff] }
  0x59   : > { %v364_v21 = vld [vmem:[%s6762_s23 + $0x30] sm:$0xff]  ;;  %v365_v23 = vld [vmem:[%s6762_s23 + $0x38] sm:$0xff]  ;;  %v366_v25 = vld [vmem:[%s6762_s23 + $0x40] sm:$0xff] }
  0x5a   : > { %v355_v7 = vor.u32 1.1754944e-38, %v354_v3  ;;  %vm353_vm3 = vcmp.eq.f32.partialorder %v352_v5, 8.507059e+37  ;;  %v367_v27 = vld [vmem:[%s6762_s23 + $0x48] sm:$0xff]  ;;  %v368_v29 = vld [vmem:[%s6762_s23 + $0x50] sm:$0xff]  ;;  %v369_v31 = vld [vmem:[%s6762_s23 + $0x58] sm:$0xff] }
  0x5b   : > { %v370_v33 = vld [vmem:[%s6762_s23 + $0x60] sm:$0xff]  ;;  %v371_v35 = vld [vmem:[%s6762_s23 + $0x68] sm:$0xff]  ;;  %v372_v37 = vld [vmem:[%s6762_s23 + $0x70] sm:$0xff] }
  0x5c   : > { %v373_v39 = vld [vmem:[%s6762_s23 + $0x78] sm:$0xff]  ;;  %v374_v41 = vld [vmem:[%s6762_s23 + $0x80] sm:$0xff]  ;;  %v375_v43 = vld [vmem:[%s6762_s23 + $0x88] sm:$0xff] }
  0x5d   : > { %v376_v45 = vld [vmem:[%s6762_s23 + $0x90] sm:$0xff]  ;;  %v377_v47 = vld [vmem:[%s6762_s23 + $0x98] sm:$0xff]  ;;  %v378_v49 = vld [vmem:[%s6762_s23 + $0xa0] sm:$0xff] }
  0x5e   : > { %v5804_v1 = vpop.eup %5803  ;;  %v379_v51 = vld [vmem:[%s6762_s23 + $0xa8] sm:$0xff]  ;;  %v380_v53 = vld [vmem:[%s6762_s23 + $0xb0] sm:$0xff]  ;;  %v381_v55 = vld [vmem:[%s6762_s23 + $0xb8] sm:$0xff] }
  0x5f   : > { %v344_v2 = vmul.f32 %v5804_v1, %v342_v0  ;;  %vm349_vm1 = vweird.f32 %v5804_v1  ;;  %v382_v57 = vld [vmem:[%s6762_s23 + $0xc0] sm:$0xff]  ;;  %v383_v59 = vld [vmem:[%s6762_s23 + $0xc8] sm:$0xff]  ;;  %v384_v61 = vld [vmem:[%s6762_s23 + $0xd0] sm:$0xff] }
  0x60   : > { %vm350_vm2 = vmor %vm348_vm0, %vm349_vm1  ;;  %v385_v63 = vld [vmem:[%s6762_s23 + $0xd8] sm:$0xff]  ;;  %v387_v3 = vld [vmem:[%s6762_s23 + $0xe8] sm:$0xff] }
  0x61   : > { %v345_v4 = vsub.f32 1.0, %v344_v2  ;;  %v388_v5 = vld [vmem:[%s6762_s23 + $0xf0] sm:$0xff] }
  0x63   : > { %v346_v6 = vmul.f32 %v5804_v1, %v345_v4 }
  0x65   : > { %v347_v8 = vadd.f32 %v5804_v1, %v346_v6 }
  0x67   : > { %v351_v9 = vsel %vm350_vm2, %v5804_v1, %v347_v8  ;;  %v386_v1 = vld [vmem:[%s6762_s23 + $0xe0] sm:$0xff] }
  0x68   : > { %v356_v10 = vsel %vm353_vm3, %v355_v7, %v351_v9  ;;  %v389_v7 = vld [vmem:[%s6762_s23 + $0xf8] sm:$0xff]  ;;  %v390_v9 = vld [vmem:[%s6762_s23 + $0x100] sm:$0xff] }
  0x69   : > { %5678 = vpush %v356_v10 }
  0x9a   : > { %s5679_s7 = spop %5678 }
  0x9b   : > { %v6786_v16 = vstv %s5679_s7 }
  0x9c   : > { %v423_v18 = vmul.f32 %v6786_v16, %v358_v11  ;;  %v424_v19 = vmul.f32 %v6786_v16, %v359_v12  ;;  %v425_v20 = vmul.f32 %v6786_v16, %v360_v13  ;;  %v426_v22 = vmul.f32 %v6786_v16, %v361_v14  ;;  %v391_v11 = vld [vmem:[%s6762_s23 + $0x108] sm:$0xff]  ;;  %v392_v13 = vld [vmem:[%s6762_s23 + $0x110] sm:$0xff] }
  0x9d   : > { %v427_v24 = vmul.f32 %v6786_v16, %v362_v15  ;;  %v428_v26 = vmul.f32 %v6786_v16, %v363_v17  ;;  %v429_v28 = vmul.f32 %v6786_v16, %v364_v21  ;;  %v430_v30 = vmul.f32 %v6786_v16, %v365_v23  ;;  %v393_v15 = vld [vmem:[%s6762_s23 + $0x118] sm:$0xff] }
  0x9e   : > { %487 = vst [vmem:[#allocation2 + $0xb0] sm:$0xff] %v423_v18  ;;  %v431_v32 = vmul.f32 %v6786_v16, %v366_v25  ;;  %v432_v34 = vmul.f32 %v6786_v16, %v367_v27  ;;  %v433_v36 = vmul.f32 %v6786_v16, %v368_v29  ;;  %v434_v38 = vmul.f32 %v6786_v16, %v369_v31  ;;  %v394_v18 = vld [vmem:[%s6762_s23 + $0x120] sm:$0xff] }
  0x9f   : > { %488 = vst [vmem:[#allocation2 + $0x1b0] sm:$0xff] %v424_v19  ;;  %v435_v40 = vmul.f32 %v6786_v16, %v370_v33  ;;  %v436_v42 = vmul.f32 %v6786_v16, %v371_v35  ;;  %v437_v44 = vmul.f32 %v6786_v16, %v372_v37  ;;  %v438_v46 = vmul.f32 %v6786_v16, %v373_v39 }
  0xa0   : > { %489 = vst [vmem:[#allocation2 + $0xd8] sm:$0xff] %v425_v20  ;;  %v439_v48 = vmul.f32 %v6786_v16, %v374_v41  ;;  %v440_v50 = vmul.f32 %v6786_v16, %v375_v43  ;;  %v441_v52 = vmul.f32 %v6786_v16, %v376_v45  ;;  %v442_v54 = vmul.f32 %v6786_v16, %v377_v47  ;;  %v395_v20 = vld [vmem:[%s6762_s23 + $0x128] sm:$0xff] }
  0xa1   : > { %490 = vst [vmem:[#allocation2 + $0x18] sm:$0xff] %v426_v22  ;;  %v443_v56 = vmul.f32 %v6786_v16, %v378_v49  ;;  %v444_v58 = vmul.f32 %v6786_v16, %v379_v51  ;;  %v445_v60 = vmul.f32 %v6786_v16, %v380_v53  ;;  %v446_v62 = vmul.f32 %v6786_v16, %v381_v55  ;;  %v396_v22 = vld [vmem:[%s6762_s23 + $0x130] sm:$0xff] }
  0xa2   : > { %491 = vst [vmem:[#allocation2 + $0x50] sm:$0xff] %v427_v24  ;;  %v447_v0 = vmul.f32 %v6786_v16, %v382_v57  ;;  %v448_v2 = vmul.f32 %v6786_v16, %v383_v59  ;;  %v449_v4 = vmul.f32 %v6786_v16, %v384_v61  ;;  %v450_v6 = vmul.f32 %v6786_v16, %v385_v63  ;;  %v397_v24 = vld [vmem:[%s6762_s23 + $0x138] sm:$0xff] }
  0xa3   : > { %492 = vst [vmem:[#allocation2 + $0x168] sm:$0xff] %v428_v26  ;;  %v451_v8 = vmul.f32 %v6786_v16, %v386_v1  ;;  %v452_v10 = vmul.f32 %v6786_v16, %v387_v3  ;;  %v453_v12 = vmul.f32 %v6786_v16, %v388_v5  ;;  %v454_v14 = vmul.f32 %v6786_v16, %v389_v7  ;;  %v398_v26 = vld [vmem:[%s6762_s23 + $0x140] sm:$0xff] }
  0xa4   : > { %493 = vst [vmem:[#allocation2 + $0x130] sm:$0xff] %v429_v28  ;;  %v455_v17 = vmul.f32 %v6786_v16, %v390_v9  ;;  %v456_v19 = vmul.f32 %v6786_v16, %v391_v11  ;;  %v457_v21 = vmul.f32 %v6786_v16, %v392_v13  ;;  %v458_v23 = vmul.f32 %v6786_v16, %v393_v15  ;;  %v399_v28 = vld [vmem:[%s6762_s23 + $0x148] sm:$0xff] }
  0xa5   : > { %494 = vst [vmem:[#allocation2 + $0x48] sm:$0xff] %v430_v30  ;;  %v459_v25 = vmul.f32 %v6786_v16, %v394_v18  ;;  %v460_v27 = vmul.f32 %v6786_v16, %v395_v20  ;;  %v461_v29 = vmul.f32 %v6786_v16, %v396_v22  ;;  %v400_v30 = vld [vmem:[%s6762_s23 + $0x150] sm:$0xff]  ;;  %v462_v31 = vmul.f32 %v6786_v16, %v397_v24 }
  0xa6   : > { %495 = vst [vmem:[#allocation2 + $0x180] sm:$0xff] %v431_v32  ;;  %v401_v32 = vld [vmem:[%s6762_s23 + $0x158] sm:$0xff]  ;;  %v463_v33 = vmul.f32 %v6786_v16, %v398_v26  ;;  %v464_v35 = vmul.f32 %v6786_v16, %v399_v28  ;;  %v465_v37 = vmul.f32 %v6786_v16, %v400_v30  ;;  %v6546_v13 = vmov -inf  }
  0xa7   : > { %496 = vst [vmem:[#allocation2 + $0x110] sm:$0xff] %v432_v34  ;;  %v402_v34 = vld [vmem:[%s6762_s23 + $0x160] sm:$0xff]  ;;  %v466_v39 = vmul.f32 %v6786_v16, %v401_v32 }
  0xa8   : > { %497 = vst [vmem:[#allocation2 + $0x118] sm:$0xff] %v433_v36  ;;  %v403_v36 = vld [vmem:[%s6762_s23 + $0x168] sm:$0xff]  ;;  %v467_v41 = vmul.f32 %v6786_v16, %v402_v34 }
  0xa9   : > { %498 = vst [vmem:[#allocation2 + $0x98] sm:$0xff] %v434_v38  ;;  %v404_v38 = vld [vmem:[%s6762_s23 + $0x170] sm:$0xff]  ;;  %v468_v43 = vmul.f32 %v6786_v16, %v403_v36 }
  0xaa   : > { %499 = vst [vmem:[#allocation2 + $0x120] sm:$0xff] %v435_v40  ;;  %v405_v40 = vld [vmem:[%s6762_s23 + $0x178] sm:$0xff]  ;;  %v469_v45 = vmul.f32 %v6786_v16, %v404_v38 }
  0xab   : > { %500 = vst [vmem:[#allocation2 + $0x150] sm:$0xff] %v436_v42  ;;  %v406_v42 = vld [vmem:[%s6762_s23 + $0x180] sm:$0xff]  ;;  %v470_v47 = vmul.f32 %v6786_v16, %v405_v40 }
  0xac   : > { %501 = vst [vmem:[#allocation2 + $0x108] sm:$0xff] %v437_v44  ;;  %v407_v44 = vld [vmem:[%s6762_s23 + $0x188] sm:$0xff]  ;;  %v471_v49 = vmul.f32 %v6786_v16, %v406_v42 }
  0xad   : > { %502 = vst [vmem:[#allocation2 + $0x60] sm:$0xff] %v438_v46  ;;  %v408_v46 = vld [vmem:[%s6762_s23 + $0x190] sm:$0xff]  ;;  %v472_v51 = vmul.f32 %v6786_v16, %v407_v44 }
  0xae   : > { %503 = vst [vmem:[#allocation2 + $0xe0] sm:$0xff] %v439_v48  ;;  %v409_v48 = vld [vmem:[%s6762_s23 + $0x198] sm:$0xff]  ;;  %v473_v53 = vmul.f32 %v6786_v16, %v408_v46 }
  0xaf   : > { %504 = vst [vmem:[#allocation2 + $0x188] sm:$0xff] %v440_v50  ;;  %v410_v50 = vld [vmem:[%s6762_s23 + $0x1a0] sm:$0xff]  ;;  %v474_v55 = vmul.f32 %v6786_v16, %v409_v48 }
  0xb0   : > { %505 = vst [vmem:[#allocation2 + $0x138] sm:$0xff] %v441_v52  ;;  %v411_v52 = vld [vmem:[%s6762_s23 + $0x1a8] sm:$0xff]  ;;  %v475_v57 = vmul.f32 %v6786_v16, %v410_v50 }
  0xb1   : > { %506 = vst [vmem:[#allocation2 + $0x140] sm:$0xff] %v442_v54  ;;  %v412_v54 = vld [vmem:[%s6762_s23 + $0x1b0] sm:$0xff]  ;;  %v476_v59 = vmul.f32 %v6786_v16, %v411_v52 }
  0xb2   : > { %507 = vst [vmem:[#allocation2 + $0x80] sm:$0xff] %v443_v56  ;;  %v413_v56 = vld [vmem:[%s6762_s23 + $0x1b8] sm:$0xff]  ;;  %v477_v61 = vmul.f32 %v6786_v16, %v412_v54 }
  0xb3   : > { %508 = vst [vmem:[#allocation2 + $0x1a8] sm:$0xff] %v444_v58  ;;  %v414_v58 = vld [vmem:[%s6762_s23 + $0x1c0] sm:$0xff]  ;;  %v478_v63 = vmul.f32 %v6786_v16, %v413_v56 }
  0xb4   : > { %509 = vst [vmem:[#allocation2 + $0x1b8] sm:$0xff] %v445_v60  ;;  %v415_v60 = vld [vmem:[%s6762_s23 + $0x1c8] sm:$0xff]  ;;  %v479_v1 = vmul.f32 %v6786_v16, %v414_v58 }
  0xb5   : > { %510 = vst [vmem:[#allocation2 + $0x28] sm:$0xff] %v446_v62  ;;  %v416_v62 = vld [vmem:[%s6762_s23 + $0x1d0] sm:$0xff]  ;;  %v480_v3 = vmul.f32 %v6786_v16, %v415_v60 }
  0xb6   : > { %511 = vst [vmem:[#allocation2 + $0x1e8] sm:$0xff] %v447_v0  ;;  %v417_v0 = vld [vmem:[%s6762_s23 + $0x1d8] sm:$0xff]  ;;  %v481_v5 = vmul.f32 %v6786_v16, %v416_v62 }
  0xb7   : > { %512 = vst [vmem:[#allocation2 + $0xf8] sm:$0xff] %v448_v2  ;;  %v418_v2 = vld [vmem:[%s6762_s23 + $0x1e0] sm:$0xff]  ;;  %v482_v7 = vmul.f32 %v6786_v16, %v417_v0 }
  0xb8   : > { %513 = vst [vmem:[#allocation2 + $0x160] sm:$0xff] %v449_v4  ;;  %v419_v4 = vld [vmem:[%s6762_s23 + $0x1e8] sm:$0xff]  ;;  %v483_v9 = vmul.f32 %v6786_v16, %v418_v2 }
  0xb9   : > { %514 = vst [vmem:[#allocation2 + $0x30] sm:$0xff] %v450_v6  ;;  %v420_v6 = vld [vmem:[%s6762_s23 + $0x1f0] sm:$0xff] }
  0xba   : > { %515 = vst [vmem:[#allocation2 + $0x1e0] sm:$0xff] %v451_v8  ;;  %v421_v8 = vld [vmem:[%s6762_s23 + $0x1f8] sm:$0xff]  ;;  %v485_v11 = vmul.f32 %v6786_v16, %v420_v6 }
  0xbb   : > { %516 = vst [vmem:[#allocation2] sm:$0xff] %v452_v10  ;;  %v484_v10 = vmul.f32 %v6786_v16, %v419_v4 }
  0xbc   : > { %517 = vst [vmem:[#allocation2 + $0xf0] sm:$0xff] %v453_v12  ;;  %v486_v12 = vmul.f32 %v6786_v16, %v421_v8  ;;  %v6547_v16 = vmov 0.0  }
  0xbd   : > { %518 = vst [vmem:[#allocation2 + $0x8] sm:$0xff] %v454_v14 }
  0xbe   : > { %519 = vst [vmem:[#allocation2 + $0x148] sm:$0xff] %v455_v17 }
  0xbf   : > { %520 = vst [vmem:[#allocation2 + $0x1d0] sm:$0xff] %v456_v19 }
  0xc0   : > { %521 = vst [vmem:[#allocation2 + $0x100] sm:$0xff] %v457_v21 }
  0xc1   : > { %522 = vst [vmem:[#allocation2 + $0xc8] sm:$0xff] %v458_v23 }
  0xc2   : > { %523 = vst [vmem:[#allocation2 + $0x40] sm:$0xff] %v459_v25 }
  0xc3   : > { %524 = vst [vmem:[#allocation2 + $0x1f8] sm:$0xff] %v460_v27 }
  0xc4   : > { %525 = vst [vmem:[#allocation2 + $0x20] sm:$0xff] %v461_v29 }
  0xc5   : > { %526 = vst [vmem:[#allocation2 + $0x128] sm:$0xff] %v462_v31 }
  0xc6   : > { %527 = vst [vmem:[#allocation2 + $0x1a0] sm:$0xff] %v463_v33 }
  0xc7   : > { %528 = vst [vmem:[#allocation2 + $0x1f0] sm:$0xff] %v464_v35 }
  0xc8   : > { %529 = vst [vmem:[#allocation2 + $0xe8] sm:$0xff] %v465_v37 }
  0xc9   : > { %530 = vst [vmem:[#allocation2 + $0x78] sm:$0xff] %v466_v39 }
  0xca   : > { %531 = vst [vmem:[#allocation2 + $0x70] sm:$0xff] %v467_v41 }
  0xcb   : > { %532 = vst [vmem:[#allocation2 + $0x90] sm:$0xff] %v468_v43 }
  0xcc   : > { %533 = vst [vmem:[#allocation2 + $0x1d8] sm:$0xff] %v469_v45 }
  0xcd   : > { %534 = vst [vmem:[#allocation2 + $0xd0] sm:$0xff] %v470_v47 }
  0xce   : > { %535 = vst [vmem:[#allocation2 + $0xb8] sm:$0xff] %v471_v49 }
  0xcf   : > { %536 = vst [vmem:[#allocation2 + $0x88] sm:$0xff] %v472_v51 }
  0xd0   : > { %537 = vst [vmem:[#allocation2 + $0xa8] sm:$0xff] %v473_v53 }
  0xd1   : > { %538 = vst [vmem:[#allocation2 + $0x1c8] sm:$0xff] %v474_v55 }
  0xd2   : > { %539 = vst [vmem:[#allocation2 + $0x170] sm:$0xff] %v475_v57 }
  0xd3   : > { %540 = vst [vmem:[#allocation2 + $0x178] sm:$0xff] %v476_v59 }
  0xd4   : > { %541 = vst [vmem:[#allocation2 + $0x68] sm:$0xff] %v477_v61 }
  0xd5   : > { %542 = vst [vmem:[#allocation2 + $0x190] sm:$0xff] %v478_v63 }
  0xd6   : > { %543 = vst [vmem:[#allocation2 + $0x198] sm:$0xff] %v479_v1 }
  0xd7   : > { %544 = vst [vmem:[#allocation2 + $0x38] sm:$0xff] %v480_v3 }
  0xd8   : > { %545 = vst [vmem:[#allocation2 + $0xc0] sm:$0xff] %v481_v5 }
  0xd9   : > { %546 = vst [vmem:[#allocation2 + $0x1c0] sm:$0xff] %v482_v7 }
  0xda   : > { %547 = vst [vmem:[#allocation2 + $0x158] sm:$0xff] %v483_v9 }
  0xdb   : > { %548 = vst [vmem:[#allocation2 + $0x10] sm:$0xff] %v484_v10 }
  0xdc   : > { %549 = vst [vmem:[#allocation2 + $0x58] sm:$0xff] %v485_v11 }
  0xdd   : > { %550 = vst [vmem:[#allocation2 + $0xa0] sm:$0xff] %v486_v12 }
  0xde   : > { %552 = vst.msk [vmem:[#allocation3] sm:$0xff] %vm551_vm4, %v6546_v13 }
  0xdf   : > { %553 = vst.msk [vmem:[#allocation3 + $0x8] sm:$0xff] %vm551_vm4, %v6546_v13 }
  0xe0   : > { %554 = vst.msk [vmem:[#allocation3 + $0x10] sm:$0xff] %vm551_vm4, %v6546_v13 }
  0xe1   : > { %555 = vst.msk [vmem:[#allocation3 + $0x18] sm:$0xff] %vm551_vm4, %v6546_v13 }
  0xe2   : > { %556 = vst.msk [vmem:[#allocation3 + $0x20] sm:$0xff] %vm551_vm4, %v6546_v13 }
  0xe3   : > { %557 = vst.msk [vmem:[#allocation3 + $0x28] sm:$0xff] %vm551_vm4, %v6546_v13 }
  0xe4   : > { %558 = vst.msk [vmem:[#allocation3 + $0x30] sm:$0xff] %vm551_vm4, %v6546_v13 }
  0xe5   : > { %559 = vst.msk [vmem:[#allocation3 + $0x38] sm:$0xff] %vm551_vm4, %v6546_v13 }
  0xe6   : > { %560 = vst.msk [vmem:[#allocation3 + $0x40] sm:$0xff] %vm551_vm4, %v6546_v13 }
  0xe7   : > { %561 = vst.msk [vmem:[#allocation3 + $0x48] sm:$0xff] %vm551_vm4, %v6546_v13 }
  0xe8   : > { %562 = vst.msk [vmem:[#allocation3 + $0x50] sm:$0xff] %vm551_vm4, %v6546_v13 }
  0xe9   : > { %563 = vst.msk [vmem:[#allocation3 + $0x58] sm:$0xff] %vm551_vm4, %v6546_v13 }
  0xea   : > { %564 = vst.msk [vmem:[#allocation3 + $0x60] sm:$0xff] %vm551_vm4, %v6546_v13 }
  0xeb   : > { %565 = vst.msk [vmem:[#allocation3 + $0x68] sm:$0xff] %vm551_vm4, %v6546_v13 }
  0xec   : > { %566 = vst.msk [vmem:[#allocation3 + $0x70] sm:$0xff] %vm551_vm4, %v6546_v13 }
  0xed   : > { %567 = vst.msk [vmem:[#allocation3 + $0x78] sm:$0xff] %vm551_vm4, %v6546_v13 }
  0xee   : > { %568 = vst.msk [vmem:[#allocation3 + $0x80] sm:$0xff] %vm551_vm4, %v6546_v13 }
  0xef   : > { %569 = vst.msk [vmem:[#allocation3 + $0x88] sm:$0xff] %vm551_vm4, %v6546_v13 }
  0xf0   : > { %570 = vst.msk [vmem:[#allocation3 + $0x90] sm:$0xff] %vm551_vm4, %v6546_v13 }
  0xf1   : > { %571 = vst.msk [vmem:[#allocation3 + $0x98] sm:$0xff] %vm551_vm4, %v6546_v13 }
  0xf2   : > { %572 = vst.msk [vmem:[#allocation3 + $0xa0] sm:$0xff] %vm551_vm4, %v6546_v13 }
  0xf3   : > { %573 = vst.msk [vmem:[#allocation3 + $0xa8] sm:$0xff] %vm551_vm4, %v6546_v13 }
  0xf4   : > { %574 = vst.msk [vmem:[#allocation3 + $0xb0] sm:$0xff] %vm551_vm4, %v6546_v13 }
  0xf5   : > { %575 = vst.msk [vmem:[#allocation3 + $0xb8] sm:$0xff] %vm551_vm4, %v6546_v13 }
  0xf6   : > { %576 = vst.msk [vmem:[#allocation3 + $0xc0] sm:$0xff] %vm551_vm4, %v6546_v13 }
  0xf7   : > { %577 = vst.msk [vmem:[#allocation3 + $0xc8] sm:$0xff] %vm551_vm4, %v6546_v13 }
  0xf8   : > { %578 = vst.msk [vmem:[#allocation3 + $0xd0] sm:$0xff] %vm551_vm4, %v6546_v13 }
  0xf9   : > { %579 = vst.msk [vmem:[#allocation3 + $0xd8] sm:$0xff] %vm551_vm4, %v6546_v13 }
  0xfa   : > { %580 = vst.msk [vmem:[#allocation3 + $0xe0] sm:$0xff] %vm551_vm4, %v6546_v13 }
  0xfb   : > { %581 = vst.msk [vmem:[#allocation3 + $0xe8] sm:$0xff] %vm551_vm4, %v6546_v13 }
  0xfc   : > { %582 = vst.msk [vmem:[#allocation3 + $0xf0] sm:$0xff] %vm551_vm4, %v6546_v13 }
  0xfd   : > { %583 = vst.msk [vmem:[#allocation3 + $0xf8] sm:$0xff] %vm551_vm4, %v6546_v13 }
  0xfe   : > { %584 = vst.msk [vmem:[#allocation3 + $0x100] sm:$0xff] %vm551_vm4, %v6546_v13 }
  0xff   : > { %585 = vst.msk [vmem:[#allocation3 + $0x108] sm:$0xff] %vm551_vm4, %v6546_v13 }
 0x100   : > { %586 = vst.msk [vmem:[#allocation3 + $0x110] sm:$0xff] %vm551_vm4, %v6546_v13 }
 0x101   : > { %587 = vst.msk [vmem:[#allocation3 + $0x118] sm:$0xff] %vm551_vm4, %v6546_v13 }
 0x102   : > { %588 = vst.msk [vmem:[#allocation3 + $0x120] sm:$0xff] %vm551_vm4, %v6546_v13 }
 0x103   : > { %589 = vst.msk [vmem:[#allocation3 + $0x128] sm:$0xff] %vm551_vm4, %v6546_v13 }
 0x104   : > { %590 = vst.msk [vmem:[#allocation3 + $0x130] sm:$0xff] %vm551_vm4, %v6546_v13 }
 0x105   : > { %591 = vst.msk [vmem:[#allocation3 + $0x138] sm:$0xff] %vm551_vm4, %v6546_v13 }
 0x106   : > { %592 = vst.msk [vmem:[#allocation3 + $0x140] sm:$0xff] %vm551_vm4, %v6546_v13 }
 0x107   : > { %593 = vst.msk [vmem:[#allocation3 + $0x148] sm:$0xff] %vm551_vm4, %v6546_v13 }
 0x108   : > { %594 = vst.msk [vmem:[#allocation3 + $0x150] sm:$0xff] %vm551_vm4, %v6546_v13 }
 0x109   : > { %595 = vst.msk [vmem:[#allocation3 + $0x158] sm:$0xff] %vm551_vm4, %v6546_v13 }
 0x10a   : > { %596 = vst.msk [vmem:[#allocation3 + $0x160] sm:$0xff] %vm551_vm4, %v6546_v13 }
 0x10b   : > { %597 = vst.msk [vmem:[#allocation3 + $0x168] sm:$0xff] %vm551_vm4, %v6546_v13 }
 0x10c   : > { %598 = vst.msk [vmem:[#allocation3 + $0x170] sm:$0xff] %vm551_vm4, %v6546_v13 }
 0x10d   : > { %599 = vst.msk [vmem:[#allocation3 + $0x178] sm:$0xff] %vm551_vm4, %v6546_v13 }
 0x10e   : > { %600 = vst.msk [vmem:[#allocation3 + $0x180] sm:$0xff] %vm551_vm4, %v6546_v13 }
 0x10f   : > { %601 = vst.msk [vmem:[#allocation3 + $0x188] sm:$0xff] %vm551_vm4, %v6546_v13 }
 0x110   : > { %602 = vst.msk [vmem:[#allocation3 + $0x190] sm:$0xff] %vm551_vm4, %v6546_v13 }
 0x111   : > { %603 = vst.msk [vmem:[#allocation3 + $0x198] sm:$0xff] %vm551_vm4, %v6546_v13 }
 0x112   : > { %604 = vst.msk [vmem:[#allocation3 + $0x1a0] sm:$0xff] %vm551_vm4, %v6546_v13 }
 0x113   : > { %605 = vst.msk [vmem:[#allocation3 + $0x1a8] sm:$0xff] %vm551_vm4, %v6546_v13 }
 0x114   : > { %606 = vst.msk [vmem:[#allocation3 + $0x1b0] sm:$0xff] %vm551_vm4, %v6546_v13 }
 0x115   : > { %607 = vst.msk [vmem:[#allocation3 + $0x1b8] sm:$0xff] %vm551_vm4, %v6546_v13 }
 0x116   : > { %608 = vst.msk [vmem:[#allocation3 + $0x1c0] sm:$0xff] %vm551_vm4, %v6546_v13 }
 0x117   : > { %609 = vst.msk [vmem:[#allocation3 + $0x1c8] sm:$0xff] %vm551_vm4, %v6546_v13 }
 0x118   : > { %610 = vst.msk [vmem:[#allocation3 + $0x1d0] sm:$0xff] %vm551_vm4, %v6546_v13 }
 0x119   : > { %611 = vst.msk [vmem:[#allocation3 + $0x1d8] sm:$0xff] %vm551_vm4, %v6546_v13 }
 0x11a   : > { %612 = vst.msk [vmem:[#allocation3 + $0x1e0] sm:$0xff] %vm551_vm4, %v6546_v13 }
 0x11b   : > { %613 = vst.msk [vmem:[#allocation3 + $0x1e8] sm:$0xff] %vm551_vm4, %v6546_v13 }
 0x11c   : > { %614 = vst.msk [vmem:[#allocation3 + $0x1f0] sm:$0xff] %vm551_vm4, %v6546_v13 }
 0x11d   : > { %615 = vst.msk [vmem:[#allocation3 + $0x1f8] sm:$0xff] %vm551_vm4, %v6546_v13 }
 0x11e   : > { %616 = vst.msk [vmem:[#allocation4] sm:$0xff] %vm551_vm4, %v6547_v16 }
 0x11f   : > { %617 = vst.msk [vmem:[#allocation4 + $0x8] sm:$0xff] %vm551_vm4, %v6547_v16 }
 0x120   : > { %618 = vst.msk [vmem:[#allocation4 + $0x10] sm:$0xff] %vm551_vm4, %v6547_v16 }
 0x121   : > { %619 = vst.msk [vmem:[#allocation4 + $0x18] sm:$0xff] %vm551_vm4, %v6547_v16 }
 0x122   : > { %620 = vst.msk [vmem:[#allocation4 + $0x20] sm:$0xff] %vm551_vm4, %v6547_v16 }
 0x123   : > { %621 = vst.msk [vmem:[#allocation4 + $0x28] sm:$0xff] %vm551_vm4, %v6547_v16 }
 0x124   : > { %622 = vst.msk [vmem:[#allocation4 + $0x30] sm:$0xff] %vm551_vm4, %v6547_v16 }
 0x125   : > { %623 = vst.msk [vmem:[#allocation4 + $0x38] sm:$0xff] %vm551_vm4, %v6547_v16 }
 0x126   : > { %624 = vst.msk [vmem:[#allocation4 + $0x40] sm:$0xff] %vm551_vm4, %v6547_v16 }
 0x127   : > { %625 = vst.msk [vmem:[#allocation4 + $0x48] sm:$0xff] %vm551_vm4, %v6547_v16 }
 0x128   : > { %626 = vst.msk [vmem:[#allocation4 + $0x50] sm:$0xff] %vm551_vm4, %v6547_v16 }
 0x129   : > { %627 = vst.msk [vmem:[#allocation4 + $0x58] sm:$0xff] %vm551_vm4, %v6547_v16 }
 0x12a   : > { %628 = vst.msk [vmem:[#allocation4 + $0x60] sm:$0xff] %vm551_vm4, %v6547_v16 }
 0x12b   : > { %629 = vst.msk [vmem:[#allocation4 + $0x68] sm:$0xff] %vm551_vm4, %v6547_v16 }
 0x12c   : > { %630 = vst.msk [vmem:[#allocation4 + $0x70] sm:$0xff] %vm551_vm4, %v6547_v16 }
 0x12d   : > { %631 = vst.msk [vmem:[#allocation4 + $0x78] sm:$0xff] %vm551_vm4, %v6547_v16 }
 0x12e   : > { %632 = vst.msk [vmem:[#allocation4 + $0x80] sm:$0xff] %vm551_vm4, %v6547_v16 }
 0x12f   : > { %633 = vst.msk [vmem:[#allocation4 + $0x88] sm:$0xff] %vm551_vm4, %v6547_v16 }
 0x130   : > { %634 = vst.msk [vmem:[#allocation4 + $0x90] sm:$0xff] %vm551_vm4, %v6547_v16 }
 0x131   : > { %635 = vst.msk [vmem:[#allocation4 + $0x98] sm:$0xff] %vm551_vm4, %v6547_v16 }
 0x132   : > { %636 = vst.msk [vmem:[#allocation4 + $0xa0] sm:$0xff] %vm551_vm4, %v6547_v16 }
 0x133   : > { %637 = vst.msk [vmem:[#allocation4 + $0xa8] sm:$0xff] %vm551_vm4, %v6547_v16 }
 0x134   : > { %638 = vst.msk [vmem:[#allocation4 + $0xb0] sm:$0xff] %vm551_vm4, %v6547_v16 }
 0x135   : > { %639 = vst.msk [vmem:[#allocation4 + $0xb8] sm:$0xff] %vm551_vm4, %v6547_v16 }
 0x136   : > { %640 = vst.msk [vmem:[#allocation4 + $0xc0] sm:$0xff] %vm551_vm4, %v6547_v16 }
 0x137   : > { %641 = vst.msk [vmem:[#allocation4 + $0xc8] sm:$0xff] %vm551_vm4, %v6547_v16 }
 0x138   : > { %642 = vst.msk [vmem:[#allocation4 + $0xd0] sm:$0xff] %vm551_vm4, %v6547_v16 }
 0x139   : > { %643 = vst.msk [vmem:[#allocation4 + $0xd8] sm:$0xff] %vm551_vm4, %v6547_v16 }
 0x13a   : > { %644 = vst.msk [vmem:[#allocation4 + $0xe0] sm:$0xff] %vm551_vm4, %v6547_v16 }
 0x13b   : > { %645 = vst.msk [vmem:[#allocation4 + $0xe8] sm:$0xff] %vm551_vm4, %v6547_v16 }
 0x13c   : > { %646 = vst.msk [vmem:[#allocation4 + $0xf0] sm:$0xff] %vm551_vm4, %v6547_v16 }
 0x13d   : > { %647 = vst.msk [vmem:[#allocation4 + $0xf8] sm:$0xff] %vm551_vm4, %v6547_v16 }
 0x13e   : > { %648 = vst.msk [vmem:[#allocation4 + $0x100] sm:$0xff] %vm551_vm4, %v6547_v16 }
 0x13f   : > { %649 = vst.msk [vmem:[#allocation4 + $0x108] sm:$0xff] %vm551_vm4, %v6547_v16 }
 0x140   : > { %650 = vst.msk [vmem:[#allocation4 + $0x110] sm:$0xff] %vm551_vm4, %v6547_v16 }
 0x141   : > { %651 = vst.msk [vmem:[#allocation4 + $0x118] sm:$0xff] %vm551_vm4, %v6547_v16 }
 0x142   : > { %652 = vst.msk [vmem:[#allocation4 + $0x120] sm:$0xff] %vm551_vm4, %v6547_v16 }
 0x143   : > { %653 = vst.msk [vmem:[#allocation4 + $0x128] sm:$0xff] %vm551_vm4, %v6547_v16 }
 0x144   : > { %654 = vst.msk [vmem:[#allocation4 + $0x130] sm:$0xff] %vm551_vm4, %v6547_v16 }
 0x145   : > { %655 = vst.msk [vmem:[#allocation4 + $0x138] sm:$0xff] %vm551_vm4, %v6547_v16 }
 0x146   : > { %656 = vst.msk [vmem:[#allocation4 + $0x140] sm:$0xff] %vm551_vm4, %v6547_v16 }
 0x147   : > { %657 = vst.msk [vmem:[#allocation4 + $0x148] sm:$0xff] %vm551_vm4, %v6547_v16 }
 0x148   : > { %658 = vst.msk [vmem:[#allocation4 + $0x150] sm:$0xff] %vm551_vm4, %v6547_v16 }
 0x149   : > { %659 = vst.msk [vmem:[#allocation4 + $0x158] sm:$0xff] %vm551_vm4, %v6547_v16 }
 0x14a   : > { %660 = vst.msk [vmem:[#allocation4 + $0x160] sm:$0xff] %vm551_vm4, %v6547_v16 }
 0x14b   : > { %661 = vst.msk [vmem:[#allocation4 + $0x168] sm:$0xff] %vm551_vm4, %v6547_v16 }
 0x14c   : > { %662 = vst.msk [vmem:[#allocation4 + $0x170] sm:$0xff] %vm551_vm4, %v6547_v16 }
 0x14d   : > { %663 = vst.msk [vmem:[#allocation4 + $0x178] sm:$0xff] %vm551_vm4, %v6547_v16 }
 0x14e   : > { %664 = vst.msk [vmem:[#allocation4 + $0x180] sm:$0xff] %vm551_vm4, %v6547_v16 }
 0x14f   : > { %665 = vst.msk [vmem:[#allocation4 + $0x188] sm:$0xff] %vm551_vm4, %v6547_v16 }
 0x150   : > { %666 = vst.msk [vmem:[#allocation4 + $0x190] sm:$0xff] %vm551_vm4, %v6547_v16 }
 0x151   : > { %667 = vst.msk [vmem:[#allocation4 + $0x198] sm:$0xff] %vm551_vm4, %v6547_v16 }
 0x152   : > { %668 = vst.msk [vmem:[#allocation4 + $0x1a0] sm:$0xff] %vm551_vm4, %v6547_v16 }
 0x153   : > { %669 = vst.msk [vmem:[#allocation4 + $0x1a8] sm:$0xff] %vm551_vm4, %v6547_v16 }
 0x154   : > { %670 = vst.msk [vmem:[#allocation4 + $0x1b0] sm:$0xff] %vm551_vm4, %v6547_v16 }
 0x155   : > { %671 = vst.msk [vmem:[#allocation4 + $0x1b8] sm:$0xff] %vm551_vm4, %v6547_v16 }
 0x156   : > { %672 = vst.msk [vmem:[#allocation4 + $0x1c0] sm:$0xff] %vm551_vm4, %v6547_v16 }
 0x157   : > { %673 = vst.msk [vmem:[#allocation4 + $0x1c8] sm:$0xff] %vm551_vm4, %v6547_v16 }
 0x158   : > { %674 = vst.msk [vmem:[#allocation4 + $0x1d0] sm:$0xff] %vm551_vm4, %v6547_v16 }
 0x159   : > { %675 = vst.msk [vmem:[#allocation4 + $0x1d8] sm:$0xff] %vm551_vm4, %v6547_v16 }
 0x15a   : > { %676 = vst.msk [vmem:[#allocation4 + $0x1e0] sm:$0xff] %vm551_vm4, %v6547_v16 }
 0x15b   : > { %677 = vst.msk [vmem:[#allocation4 + $0x1e8] sm:$0xff] %vm551_vm4, %v6547_v16 }
 0x15c   : > { %678 = vst.msk [vmem:[#allocation4 + $0x1f0] sm:$0xff] %vm551_vm4, %v6547_v16 }
 0x15d   : > { %679 = vst.msk [vmem:[#allocation4 + $0x1f8] sm:$0xff] %vm551_vm4, %v6547_v16 }
 0x15e   : > { %680 = vst [vmem:[#allocation5 + $0x68] sm:$0xff] %v6547_v16 }
 0x15f   : > { %681 = vst [vmem:[#allocation5 + $0x150] sm:$0xff] %v6547_v16 }
 0x160   : > { %682 = vst [vmem:[#allocation5 + $0x70] sm:$0xff] %v6547_v16 }
 0x161   : > { %683 = vst [vmem:[#allocation5 + $0x160] sm:$0xff] %v6547_v16 }
 0x162   : > { %684 = vst [vmem:[#allocation5 + $0xd0] sm:$0xff] %v6547_v16 }
 0x163   : > { %685 = vst [vmem:[#allocation5 + $0xd8] sm:$0xff] %v6547_v16 }
 0x164   : > { %686 = vst [vmem:[#allocation5 + $0x1e0] sm:$0xff] %v6547_v16 }
 0x165   : > { %687 = vst [vmem:[#allocation5 + $0x30] sm:$0xff] %v6547_v16 }
 0x166   : > { %688 = vst [vmem:[#allocation5 + $0x148] sm:$0xff] %v6547_v16 }
 0x167   : > { %689 = vst [vmem:[#allocation5 + $0x50] sm:$0xff] %v6547_v16 }
 0x168   : > { %690 = vst [vmem:[#allocation5 + $0x1f0] sm:$0xff] %v6547_v16 }
 0x169   : > { %691 = vst [vmem:[#allocation5 + $0x130] sm:$0xff] %v6547_v16 }
 0x16a   : > { %692 = vst [vmem:[#allocation5 + $0x190] sm:$0xff] %v6547_v16 }
 0x16b   : > { %693 = vst [vmem:[#allocation5 + $0x8] sm:$0xff] %v6547_v16 }
 0x16c   : > { %694 = vst [vmem:[#allocation5 + $0x88] sm:$0xff] %v6547_v16 }
 0x16d   : > { %695 = vst [vmem:[#allocation5 + $0x38] sm:$0xff] %v6547_v16 }
 0x16e   : > { %696 = vst [vmem:[#allocation5 + $0xe0] sm:$0xff] %v6547_v16 }
 0x16f   : > { %697 = vst [vmem:[#allocation5 + $0x10] sm:$0xff] %v6547_v16 }
 0x170   : > { %698 = vst [vmem:[#allocation5 + $0x1a8] sm:$0xff] %v6547_v16 }
 0x171   : > { %699 = vst [vmem:[#allocation5 + $0xa0] sm:$0xff] %v6547_v16 }
 0x172   : > { %700 = vst [vmem:[#allocation5 + $0x1c0] sm:$0xff] %v6547_v16 }
 0x173   : > { %701 = vst [vmem:[#allocation5 + $0x78] sm:$0xff] %v6547_v16 }
 0x174   : > { %702 = vst [vmem:[#allocation5 + $0x108] sm:$0xff] %v6547_v16 }
 0x175   : > { %703 = vst [vmem:[#allocation5 + $0x80] sm:$0xff] %v6547_v16 }
 0x176   : > { %704 = vst [vmem:[#allocation5 + $0x58] sm:$0xff] %v6547_v16 }
 0x177   : > { %705 = vst [vmem:[#allocation5 + $0x48] sm:$0xff] %v6547_v16 }
 0x178   : > { %706 = vst [vmem:[#allocation5 + $0x40] sm:$0xff] %v6547_v16 }
 0x179   : > { %707 = vst [vmem:[#allocation5 + $0x1a0] sm:$0xff] %v6547_v16 }
 0x17a   : > { %708 = vst [vmem:[#allocation5 + $0x198] sm:$0xff] %v6547_v16 }
 0x17b   : > { %709 = vst [vmem:[#allocation5 + $0xe8] sm:$0xff] %v6547_v16 }
 0x17c   : > { %710 = vst [vmem:[#allocation5 + $0x168] sm:$0xff] %v6547_v16 }
 0x17d   : > { %711 = vst [vmem:[#allocation5 + $0x158] sm:$0xff] %v6547_v16 }
 0x17e   : > { %712 = vst [vmem:[#allocation5 + $0x1d8] sm:$0xff] %v6547_v16 }
 0x17f   : > { %713 = vst [vmem:[#allocation5 + $0x28] sm:$0xff] %v6547_v16 }
 0x180   : > { %714 = vst [vmem:[#allocation5] sm:$0xff] %v6547_v16 }
 0x181   : > { %715 = vst [vmem:[#allocation5 + $0x1c8] sm:$0xff] %v6547_v16 }
 0x182   : > { %716 = vst [vmem:[#allocation5 + $0x1e8] sm:$0xff] %v6547_v16 }
 0x183   : > { %717 = vst [vmem:[#allocation5 + $0x140] sm:$0xff] %v6547_v16 }
 0x184   : > { %718 = vst [vmem:[#allocation5 + $0x60] sm:$0xff] %v6547_v16 }
 0x185   : > { %719 = vst [vmem:[#allocation5 + $0x98] sm:$0xff] %v6547_v16 }
 0x186   : > { %720 = vst [vmem:[#allocation5 + $0x1b8] sm:$0xff] %v6547_v16 }
 0x187   : > { %721 = vst [vmem:[#allocation5 + $0x100] sm:$0xff] %v6547_v16 }
 0x188   : > { %722 = vst [vmem:[#allocation5 + $0xc8] sm:$0xff] %v6547_v16 }
 0x189   : > { %723 = vst [vmem:[#allocation5 + $0xf8] sm:$0xff] %v6547_v16 }
 0x18a   : > { %724 = vst [vmem:[#allocation5 + $0x178] sm:$0xff] %v6547_v16 }
 0x18b   : > { %725 = vst [vmem:[#allocation5 + $0x180] sm:$0xff] %v6547_v16 }
 0x18c   : > { %726 = vst [vmem:[#allocation5 + $0xb0] sm:$0xff] %v6547_v16 }
 0x18d   : > { %727 = vst [vmem:[#allocation5 + $0x110] sm:$0xff] %v6547_v16 }
 0x18e   : > { %728 = vst [vmem:[#allocation5 + $0x20] sm:$0xff] %v6547_v16 }
 0x18f   : > { %729 = vst [vmem:[#allocation5 + $0xb8] sm:$0xff] %v6547_v16 }
 0x190   : > { %730 = vst [vmem:[#allocation5 + $0x120] sm:$0xff] %v6547_v16 }
 0x191   : > { %731 = vst [vmem:[#allocation5 + $0x90] sm:$0xff] %v6547_v16 }
 0x192   : > { %732 = vst [vmem:[#allocation5 + $0xa8] sm:$0xff] %v6547_v16 }
 0x193   : > { %733 = vst [vmem:[#allocation5 + $0xc0] sm:$0xff] %v6547_v16 }
 0x194   : > { %734 = vst [vmem:[#allocation5 + $0x138] sm:$0xff] %v6547_v16 }
 0x195   : > { %735 = vst [vmem:[#allocation5 + $0x188] sm:$0xff] %v6547_v16 }
 0x196   : > { %736 = vst [vmem:[#allocation5 + $0x1b0] sm:$0xff] %v6547_v16 }
 0x197   : > { %737 = vst [vmem:[#allocation5 + $0x18] sm:$0xff] %v6547_v16 }
 0x198   : > { %738 = vst [vmem:[#allocation5 + $0xf0] sm:$0xff] %v6547_v16 }
 0x199   : > { %739 = vst [vmem:[#allocation5 + $0x128] sm:$0xff] %v6547_v16 }
 0x19a   : > { %740 = vst [vmem:[#allocation5 + $0x1f8] sm:$0xff] %v6547_v16 }
 0x19b   : > { %741 = vst [vmem:[#allocation5 + $0x170] sm:$0xff] %v6547_v16 }
 0x19c   : > { %742 = vst [vmem:[#allocation5 + $0x1d0] sm:$0xff] %v6547_v16 }
 0x19d   : > { %743 = vst [vmem:[#allocation5 + $0x118] sm:$0xff] %v6547_v16 }
 0x19e PF: > { %v838_v14 = vld [vmem:[%s6770_s29 + $0xf0] sm:$0xff]  ;;  %v839_v15 = vld [vmem:[%s6770_s29 + $0xf8] sm:$0xff]  ;;  %v836_v17 = vld [vmem:[%s6770_s29 + $0xe0] sm:$0xff]  ;;  %vm2858_vm5 = vcmask 7168   ;;  %s10794_s15 = sld [smem:[#allocation20_spill]] }
 0x19f   : > { %840 = vmatpush.msra.mxu0 %v838_v14  ;;  %1049 = vmatpush.msra.mxu1 %v839_v15  ;;  %v837_v18 = vld [vmem:[%s6770_s29 + $0xe8] sm:$0xff]  ;;  %v834_v19 = vld [vmem:[%s6770_s29 + $0xd0] sm:$0xff]  ;;  %v835_v20 = vld [vmem:[%s6770_s29 + $0xd8] sm:$0xff] }
 0x1a0   : > { %v832_v21 = vld [vmem:[%s6770_s29 + $0xc0] sm:$0xff]  ;;  %v833_v22 = vld [vmem:[%s6770_s29 + $0xc8] sm:$0xff]  ;;  %v830_v23 = vld [vmem:[%s6770_s29 + $0xb0] sm:$0xff] }
 0x1a1   : > { %841 = vmatpush.msra.mxu0 %v836_v17  ;;  %1050 = vmatpush.msra.mxu1 %v837_v18  ;;  %v831_v24 = vld [vmem:[%s6770_s29 + $0xb8] sm:$0xff]  ;;  %v828_v25 = vld [vmem:[%s6770_s29 + $0xa0] sm:$0xff]  ;;  %v829_v26 = vld [vmem:[%s6770_s29 + $0xa8] sm:$0xff] }
 0x1a2   : > { %v826_v27 = vld [vmem:[%s6770_s29 + $0x90] sm:$0xff]  ;;  %v827_v28 = vld [vmem:[%s6770_s29 + $0x98] sm:$0xff]  ;;  %v824_v29 = vld [vmem:[%s6770_s29 + $0x80] sm:$0xff] }
 0x1a3   : > { %842 = vmatpush.msra.mxu0 %v834_v19  ;;  %1051 = vmatpush.msra.mxu1 %v835_v20  ;;  %v825_v30 = vld [vmem:[%s6770_s29 + $0x88] sm:$0xff]  ;;  %v822_v31 = vld [vmem:[%s6770_s29 + $0x70] sm:$0xff]  ;;  %v823_v32 = vld [vmem:[%s6770_s29 + $0x78] sm:$0xff] }
 0x1a4   : > { %v820_v33 = vld [vmem:[%s6770_s29 + $0x60] sm:$0xff]  ;;  %v821_v34 = vld [vmem:[%s6770_s29 + $0x68] sm:$0xff]  ;;  %v818_v35 = vld [vmem:[%s6770_s29 + $0x50] sm:$0xff]  ;;  %p5670_p8 = scmp.ne.s32.totalorder %s10794_s15, 1 }
 0x1a5   : > { %843 = vmatpush.msra.mxu0 %v832_v21  ;;  %1052 = vmatpush.msra.mxu1 %v833_v22  ;;  %v819_v36 = vld [vmem:[%s6770_s29 + $0x58] sm:$0xff]  ;;  %v816_v37 = vld [vmem:[%s6770_s29 + $0x40] sm:$0xff]  ;;  %v817_v38 = vld [vmem:[%s6770_s29 + $0x48] sm:$0xff] }
 0x1a6   : > { %v814_v39 = vld [vmem:[%s6770_s29 + $0x30] sm:$0xff]  ;;  %v815_v40 = vld [vmem:[%s6770_s29 + $0x38] sm:$0xff]  ;;  %v812_v41 = vld [vmem:[%s6770_s29 + $0x20] sm:$0xff] }
 0x1a7   : > { %844 = vmatpush.msra.mxu0 %v830_v23  ;;  %1053 = vmatpush.msra.mxu1 %v831_v24  ;;  %v813_v42 = vld [vmem:[%s6770_s29 + $0x28] sm:$0xff]  ;;  %v810_v43 = vld [vmem:[%s6770_s29 + $0x10] sm:$0xff]  ;;  %v811_v44 = vld [vmem:[%s6770_s29 + $0x18] sm:$0xff] }
 0x1a8   : > { %v808_v45 = vld [vmem:[%s6770_s29] sm:$0xff]  ;;  %v809_v46 = vld [vmem:[%s6770_s29 + $0x8] sm:$0xff]  ;;  %v744_v47 = vld [vmem:[#allocation2 + $0xb0] sm:$0xff] }
 0x1a9   : > { %845 = vmatpush.msra.mxu0 %v828_v25  ;;  %1054 = vmatpush.msra.mxu1 %v829_v26  ;;  %v745_v48 = vld [vmem:[#allocation2 + $0x1b0] sm:$0xff]  ;;  %v746_v49 = vld [vmem:[#allocation2 + $0xd8] sm:$0xff]  ;;  %v749_v52 = vld [vmem:[#allocation2 + $0x168] sm:$0xff] }
 0x1aa   : > { %v747_v50 = vld [vmem:[#allocation2 + $0x18] sm:$0xff]  ;;  %v748_v51 = vld [vmem:[#allocation2 + $0x50] sm:$0xff]  ;;  %v751_v54 = vld [vmem:[#allocation2 + $0x48] sm:$0xff] }
 0x1ab   : > { %846 = vmatpush.msra.mxu0 %v826_v27  ;;  %1055 = vmatpush.msra.mxu1 %v827_v28  ;;  %v750_v53 = vld [vmem:[#allocation2 + $0x130] sm:$0xff]  ;;  %v752_v55 = vld [vmem:[#allocation2 + $0x180] sm:$0xff]  ;;  %v754_v57 = vld [vmem:[#allocation2 + $0x118] sm:$0xff] }
 0x1ac   : > { %v753_v56 = vld [vmem:[#allocation2 + $0x110] sm:$0xff]  ;;  %v755_v58 = vld [vmem:[#allocation2 + $0x98] sm:$0xff]  ;;  %v756_v59 = vld [vmem:[#allocation2 + $0x120] sm:$0xff] }
 0x1ad   : > { %847 = vmatpush.msra.mxu0 %v824_v29  ;;  %1056 = vmatpush.msra.mxu1 %v825_v30  ;;  %v757_v60 = vld [vmem:[#allocation2 + $0x150] sm:$0xff]  ;;  %v758_v61 = vld [vmem:[#allocation2 + $0x108] sm:$0xff]  ;;  %v759_v62 = vld [vmem:[#allocation2 + $0x60] sm:$0xff] }
 0x1ae   : > { %v760_v4 = vld [vmem:[#allocation2 + $0xe0] sm:$0xff]  ;;  %v761_v8 = vld [vmem:[#allocation2 + $0x188] sm:$0xff]  ;;  %v762_v12 = vld [vmem:[#allocation2 + $0x138] sm:$0xff] }
 0x1af   : > { %848 = vmatpush.msra.mxu0 %v822_v31  ;;  %1057 = vmatpush.msra.mxu1 %v823_v32  ;;  %v763_v32 = vld [vmem:[#allocation2 + $0x140] sm:$0xff] }
 0x1b1   : > { %849 = vmatpush.msra.mxu0 %v820_v33  ;;  %1058 = vmatpush.msra.mxu1 %v821_v34 }
 0x1b3   : > { %850 = vmatpush.msra.mxu0 %v818_v35  ;;  %1059 = vmatpush.msra.mxu1 %v819_v36  ;;  %v764_v36 = vld [vmem:[#allocation2 + $0x80] sm:$0xff] }
 0x1b5   : > { %851 = vmatpush.msra.mxu0 %v816_v37  ;;  %1060 = vmatpush.msra.mxu1 %v817_v38 }
 0x1b7   : > { %852 = vmatpush.msra.mxu0 %v814_v39  ;;  %1061 = vmatpush.msra.mxu1 %v815_v40  ;;  %v765_v40 = vld [vmem:[#allocation2 + $0x1a8] sm:$0xff] }
 0x1b9   : > { %853 = vmatpush.msra.mxu0 %v812_v41  ;;  %1062 = vmatpush.msra.mxu1 %v813_v42 }
 0x1bb   : > { %854 = vmatpush.msra.mxu0 %v810_v43  ;;  %1063 = vmatpush.msra.mxu1 %v811_v44  ;;  %v6548_v44 = vmov 0  }
 0x1bc   : > { %5805 = vset.pattern.permute.xlu1 %v6548_v44  ;;  %5806 = vset.pattern.permute.xlu2 %v6548_v44 }
 0x1bd   : > { %855 = vmatpush.msra.mxu0 %v808_v45  ;;  %1064 = vmatpush.msra.mxu1 %v809_v46 }
 0x1be   : > { %856 = vmatmul.f32.vlgmr.msra.gmra.mxu0 %v744_v47  ;;  %1065 = vmatmul.f32.vlgmr.msra.gmra.mxu1 %v744_v47 }
 0x1bf   : > { %5807 = vset.pattern.permute.xlu0 %v6548_v44 }
 0x1c6   : > { %859 = vmatmul.f32.gmra.mxu0 %v745_v48  ;;  %1068 = vmatmul.f32.gmra.mxu1 %v745_v48 }
 0x1ce   : > { %862 = vmatmul.f32.gmra.mxu0 %v746_v49  ;;  %1071 = vmatmul.f32.gmra.mxu1 %v746_v49 }
 0x1d6   : > { %865 = vmatmul.f32.gmra.mxu0 %v747_v50  ;;  %1074 = vmatmul.f32.gmra.mxu1 %v747_v50 }
 0x1de   : > { %868 = vmatmul.f32.gmra.mxu0 %v748_v51  ;;  %1077 = vmatmul.f32.gmra.mxu1 %v748_v51  ;;  %v7353_v51 = vld [vmem:[#allocation3] sm:$0xff] }
 0x1e6   : > { %871 = vmatmul.f32.gmra.mxu0 %v749_v52  ;;  %1080 = vmatmul.f32.gmra.mxu1 %v749_v52 }
 0x1ee   : > { %874 = vmatmul.f32.gmra.mxu0 %v750_v53  ;;  %1083 = vmatmul.f32.gmra.mxu1 %v750_v53 }
 0x1f6   : > { %877 = vmatmul.f32.gmra.mxu0 %v751_v54  ;;  %1086 = vmatmul.f32.gmra.mxu1 %v751_v54 }
 0x1fe   : > { %880 = vmatmul.f32.gmra.mxu0 %v752_v55  ;;  %1089 = vmatmul.f32.gmra.mxu1 %v752_v55 }
 0x206   : > { %883 = vmatmul.f32.gmra.mxu0 %v753_v56  ;;  %1092 = vmatmul.f32.gmra.mxu1 %v753_v56 }
 0x20e   : > { %886 = vmatmul.f32.gmra.mxu0 %v754_v57  ;;  %1095 = vmatmul.f32.gmra.mxu1 %v754_v57 }
 0x216   : > { %889 = vmatmul.f32.gmra.mxu0 %v755_v58  ;;  %1098 = vmatmul.f32.gmra.mxu1 %v755_v58  ;;  %v7368_v58 = vld [vmem:[#allocation3 + $0x8] sm:$0xff] }
 0x21e   : > { %892 = vmatmul.f32.gmra.mxu0 %v756_v59  ;;  %1101 = vmatmul.f32.gmra.mxu1 %v756_v59 }
 0x226   : > { %895 = vmatmul.f32.gmra.mxu0 %v757_v60  ;;  %1104 = vmatmul.f32.gmra.mxu1 %v757_v60 }
 0x22e   : > { %898 = vmatmul.f32.gmra.mxu0 %v758_v61  ;;  %1107 = vmatmul.f32.gmra.mxu1 %v758_v61 }
 0x236   : > { %901 = vmatmul.f32.gmra.mxu0 %v759_v62  ;;  %1110 = vmatmul.f32.gmra.mxu1 %v759_v62  ;;  %v1260_v62 = vld [vmem:[#allocation3 + $0x10] sm:$0xff] }
 0x23b   : > { %v7263_v63 = vpop.f32.mrf.mxu0  ;;  %v7265_v0 = vpop.f32.mrf.mxu1 }
 0x23c   : > { %v1322_v1 = vmax.f32 %v7263_v63, %v7265_v0 }
 0x23e   : > { %1323 = vmax.xlane.f32.xlu0 %v1322_v1  ;;  %904 = vmatmul.f32.gmra.mxu0 %v760_v4 }
 0x23f   : > { %1113 = vmatmul.f32.gmra.mxu1 %v760_v4 }
 0x243   : > { %v7269_v2 = vpop.f32.mrf.mxu0  ;;  %v7271_v3 = vpop.f32.mrf.mxu1 }
 0x244   : > { %v1325_v5 = vmax.f32 %v7269_v2, %v7271_v3 }
 0x246   : > { %1326 = vmax.xlane.f32.xlu0 %v1325_v5  ;;  %907 = vmatmul.f32.gmra.mxu0 %v761_v8  ;;  %v7375_v5 = vld [vmem:[#allocation3 + $0x18] sm:$0xff] }
 0x247   : > { %1116 = vmatmul.f32.gmra.mxu1 %v761_v8 }
 0x24b   : > { %v7275_v6 = vpop.f32.mrf.mxu0  ;;  %v7277_v7 = vpop.f32.mrf.mxu1 }
 0x24c   : > { %v1328_v9 = vmax.f32 %v7275_v6, %v7277_v7 }
 0x24e   : > { %1329 = vmax.xlane.f32.xlu1 %v1328_v9  ;;  %910 = vmatmul.f32.gmra.mxu0 %v762_v12 }
 0x24f   : > { %1119 = vmatmul.f32.gmra.mxu1 %v762_v12  ;;  %v7382_v12 = vld [vmem:[#allocation3 + $0x20] sm:$0xff] }
 0x253   : > { %v7281_v10 = vpop.f32.mrf.mxu0  ;;  %v7283_v11 = vpop.f32.mrf.mxu1 }
 0x254   : > { %v1331_v13 = vmax.f32 %v7281_v10, %v7283_v11 }
 0x256   : > { %1332 = vmax.xlane.f32.xlu1 %v1331_v13  ;;  %913 = vmatmul.f32.gmra.mxu0 %v763_v32  ;;  %v766_v13 = vld [vmem:[#allocation2 + $0x1b8] sm:$0xff] }
 0x257   : > { %1122 = vmatmul.f32.gmra.mxu1 %v763_v32 }
 0x25b   : > { %v7287_v16 = vpop.f32.mrf.mxu0  ;;  %v7289_v14 = vpop.f32.mrf.mxu1 }
 0x25c   : > { %v1334_v15 = vmax.f32 %v7287_v16, %v7289_v14 }
 0x25e   : > { %1335 = vmax.xlane.f32.xlu2 %v1334_v15  ;;  %916 = vmatmul.f32.gmra.mxu0 %v764_v36 }
 0x25f   : > { %1125 = vmatmul.f32.gmra.mxu1 %v764_v36  ;;  %v3402_v36 = vld [vmem:[%s6776_s14 + $0xf8] sm:$0xff] }
 0x260   : > { %3612 = vmatpush.msra.mxu3 %v3402_v36  ;;  %v3400_v36 = vld [vmem:[%s6776_s14 + $0xe8] sm:$0xff] }
 0x263   : > { %v7293_v17 = vpop.f32.mrf.mxu0  ;;  %v7295_v18 = vpop.f32.mrf.mxu1 }
 0x264   : > { %v1337_v19 = vmax.f32 %v7293_v17, %v7295_v18 }
 0x266   : > { %1338 = vmax.xlane.f32.xlu2 %v1337_v19  ;;  %919 = vmatmul.f32.gmra.mxu0 %v765_v40 }
 0x267   : > { %1128 = vmatmul.f32.gmra.mxu1 %v765_v40  ;;  %v768_v40 = vld [vmem:[#allocation2 + $0x1e8] sm:$0xff] }
 0x26b   : > { %v7299_v20 = vpop.f32.mrf.mxu0  ;;  %v7301_v21 = vpop.f32.mrf.mxu1 }
 0x26c   : > { %v1340_v22 = vmax.f32 %v7299_v20, %v7301_v21 }
 0x26e   : > { %1341 = vmax.xlane.f32.xlu0 %v1340_v22  ;;  %922 = vmatmul.f32.gmra.mxu0 %v766_v13  ;;  %v7389_v22 = vld [vmem:[#allocation3 + $0x28] sm:$0xff] }
 0x26f   : > { %1131 = vmatmul.f32.gmra.mxu1 %v766_v13 }
 0x273   : > { %v7305_v23 = vpop.f32.mrf.mxu0  ;;  %v7307_v24 = vpop.f32.mrf.mxu1 }
 0x274   : > { %v1343_v25 = vmax.f32 %v7305_v23, %v7307_v24 }
 0x276   : > { %1344 = vmax.xlane.f32.xlu1 %v1343_v25  ;;  %v767_v25 = vld [vmem:[#allocation2 + $0x28] sm:$0xff] }
 0x277   : > { %925 = vmatmul.f32.gmra.mxu0 %v767_v25  ;;  %1134 = vmatmul.f32.gmra.mxu1 %v767_v25 }
 0x27b   : > { %v7311_v26 = vpop.f32.mrf.mxu0  ;;  %v7313_v27 = vpop.f32.mrf.mxu1 }
 0x27c   : > { %v1346_v28 = vmax.f32 %v7311_v26, %v7313_v27 }
 0x27e   : > { %1347 = vmax.xlane.f32.xlu2 %v1346_v28 }
 0x27f   : > { %928 = vmatmul.f32.gmra.mxu0 %v768_v40  ;;  %1137 = vmatmul.f32.gmra.mxu1 %v768_v40 }
 0x283   : > { %v7317_v29 = vpop.f32.mrf.mxu0  ;;  %v7319_v30 = vpop.f32.mrf.mxu1 }
 0x284   : > { %v1349_v31 = vmax.f32 %v7317_v29, %v7319_v30 }
 0x286   : > { %1350 = vmax.xlane.f32.xlu0 %v1349_v31 }
 0x28b   : > { %v7323_v33 = vpop.f32.mrf.mxu0  ;;  %v7325_v34 = vpop.f32.mrf.mxu1 }
 0x28c   : > { %v1352_v35 = vmax.f32 %v7323_v33, %v7325_v34 }
 0x28e   : > { %1353 = vmax.xlane.f32.xlu1 %v1352_v35 }
 0x293   : > { %v7329_v37 = vpop.f32.mrf.mxu0  ;;  %v7331_v38 = vpop.f32.mrf.mxu1 }
 0x294   : > { %v1355_v39 = vmax.f32 %v7329_v37, %v7331_v38 }
 0x296   : > { %1356 = vmax.xlane.f32.xlu2 %v1355_v39  ;;  %v7402_v39 = vld [vmem:[#allocation3 + $0x30] sm:$0xff] }
 0x29b   : > { %v7335_v41 = vpop.f32.mrf.mxu0  ;;  %v7337_v42 = vpop.f32.mrf.mxu1 }
 0x29c   : > { %10465 = vst [vmem:[#allocation28_spill] sm:$0xff] %v7335_v41  ;;  %v1358_v43 = vmax.f32 %v7335_v41, %v7337_v42 }
 0x29d   : > { %10466 = vst [vmem:[#allocation29_spill] sm:$0xff] %v7337_v42 }
 0x29e   : > { %1359 = vmax.xlane.f32.xlu0 %v1358_v43 }
 0x2a3   : > { %v7341_v45 = vpop.f32.mrf.mxu0  ;;  %v7343_v46 = vpop.f32.mrf.mxu1 }
 0x2a4   : > { %v1361_v47 = vmax.f32 %v7341_v45, %v7343_v46 }
 0x2a6   : > { %1362 = vmax.xlane.f32.xlu1 %v1361_v47 }
 0x2ab   : > { %v7347_v48 = vpop.f32.mrf.mxu0  ;;  %v7349_v49 = vpop.f32.mrf.mxu1 }
 0x2ac   : > { %10467 = vst [vmem:[#allocation30_spill] sm:$0xff] %v7347_v48  ;;  %v1364_v50 = vmax.f32 %v7347_v48, %v7349_v49 }
 0x2ad   : > { %10468 = vst [vmem:[#allocation31_spill] sm:$0xff] %v7349_v49 }
 0x2ae   : > { %1365 = vmax.xlane.f32.xlu2 %v1364_v50 }
 0x2b1   : > { %v1324_v52 = vpop.xlane.xlu0 %1323 }
 0x2b2   : > { %v7356_v53 = vmax.f32 %v7353_v51, %v1324_v52  ;;  %v7415_v52 = vld [vmem:[#allocation3 + $0x38] sm:$0xff] }
 0x2b3   : > { %v7358_v54 = vpop.f32.mrf.mxu0  ;;  %v7360_v55 = vpop.f32.mrf.mxu1 }
 0x2b4   : > { %10469 = vst [vmem:[#allocation32_spill] sm:$0xff] %v7358_v54  ;;  %v1578_v56 = vsub.f32 %v7353_v51, %v7356_v53  ;;  %v1367_v57 = vmax.f32 %v7358_v54, %v7360_v55 }
 0x2b5   : > { %10470 = vst [vmem:[#allocation33_spill] sm:$0xff] %v7360_v55 }
 0x2b6   : > { %3949 = vst.msk [vmem:[#allocation3] sm:$0xff] %vm2858_vm5, %v7356_v53  ;;  %1368 = vmax.xlane.f32.xlu0 %v1367_v57  ;;  %v1642_v25 = vmul.f32 1.442695, %v1578_v56  ;;  %v7446_v56 = vld [vmem:[#allocation3 + $0x50] sm:$0xff] }
 0x2b8   : > { %5808 = vpow2.f32 %v1642_v25 }
 0x2b9   : > { %v1327_v59 = vpop.xlane.xlu0 %1326 }
 0x2ba   : > { %v1515_v60 = vmax.f32 %v7368_v58, %v1327_v59 }
 0x2bb   : > { %v7393_v32 = vpop.f32.mrf.mxu0 }
 0x2bc   : > { %v1579_v61 = vsub.f32 %v7368_v58, %v1515_v60  ;;  %3950 = vst.msk [vmem:[#allocation3 + $0x8] sm:$0xff] %vm2858_vm5, %v1515_v60  ;;  %v7391_v28 = vpop.f32.mrf.mxu1 }
 0x2bd   : > { %10471 = vst [vmem:[#allocation34_spill] sm:$0xff] %v7391_v28  ;;  %v1370_v51 = vmax.f32 %v7393_v32, %v7391_v28 }
 0x2be   : > { %10472 = vst [vmem:[#allocation35_spill] sm:$0xff] %v7393_v32 }
 0x2bf   : > { %1772 = vperm.xlu1 %5805, %v7356_v53  }
 0x2c1   : > { %v1330_v1 = vpop.xlane.xlu1 %1329 }
 0x2c2   : > { %v1516_v4 = vmax.f32 %v1260_v62, %v1330_v1  ;;  %v7428_v1 = vld [vmem:[#allocation3 + $0x40] sm:$0xff] }
 0x2c3   : > { %v7409_v50 = vpop.f32.mrf.mxu0 }
 0x2c4   : > { %3951 = vst.msk [vmem:[#allocation3 + $0x10] sm:$0xff] %vm2858_vm5, %v1516_v4  ;;  %v7407_v47 = vpop.f32.mrf.mxu1  ;;  %v1580_v40 = vsub.f32 %v1260_v62, %v1516_v4  ;;  %v3385_v62 = vld [vmem:[%s6776_s14 + $0x70] sm:$0xff] }
 0x2c5   : > { %10473 = vst [vmem:[#allocation36_spill] sm:$0xff] %v7407_v47  ;;  %v1373_v58 = vmax.f32 %v7409_v50, %v7407_v47 }
 0x2c6   : > { %1777 = vperm.xlu2 %5806, %v1515_v60   ;;  %10474 = vst [vmem:[#allocation37_spill] sm:$0xff] %v7409_v50  ;;  %v3372_v50 = vld [vmem:[%s6776_s14 + $0x8] sm:$0xff] }
 0x2c9   : > { %v1333_v8 = vpop.xlane.xlu1 %1332 }
 0x2ca   : > { %v7378_v9 = vmax.f32 %v7375_v5, %v1333_v8  ;;  %1782 = vperm.xlu0 %5807, %v1516_v4   ;;  %v3401_v4 = vld [vmem:[%s6776_s14 + $0xf0] sm:$0xff] }
 0x2cb   : > { %v7426_v60 = vpop.f32.mrf.mxu0  ;;  %3613 = vmatpush.msra.mxu3 %v3401_v4 }
 0x2cc   : > { %3952 = vst.msk [vmem:[#allocation3 + $0x18] sm:$0xff] %vm2858_vm5, %v7378_v9  ;;  %v7424_v59 = vpop.f32.mrf.mxu1 }
 0x2cd   : > { %10475 = vst [vmem:[#allocation38_spill] sm:$0xff] %v7424_v59  ;;  %v1376_v8 = vmax.f32 %v7426_v60, %v7424_v59  ;;  %3614 = vmatpush.msra.mxu3 %v3400_v36  ;;  %v3381_v36 = vld [vmem:[%s6776_s14 + $0x50] sm:$0xff]  ;;  %v3376_v59 = vld [vmem:[%s6776_s14 + $0x28] sm:$0xff] }
 0x2ce   : > { %10476 = vst [vmem:[#allocation39_spill] sm:$0xff] %v7426_v60  ;;  %v3392_v60 = vld [vmem:[%s6776_s14 + $0xa8] sm:$0xff] }
 0x2d1   : > { %v1336_v15 = vpop.xlane.xlu2 %1335 }
 0x2d2   : > { %v7385_v19 = vmax.f32 %v7382_v12, %v1336_v15 }
 0x2d3   : > { %v7521_v55 = vpop.f32.mrf.mxu0 }
 0x2d4   : > { %3953 = vst.msk [vmem:[#allocation3 + $0x20] sm:$0xff] %vm2858_vm5, %v7385_v19 }
 0x2d5   : > { %10481 = vst [vmem:[#allocation44_spill] sm:$0xff] %v7521_v55 }
 0x2d9   : > { %v1339_v31 = vpop.xlane.xlu2 %1338 }
 0x2da   : > { %v7396_v35 = vmax.f32 %v7389_v22, %v1339_v31  ;;  %v7437_v31 = vld [vmem:[#allocation3 + $0x48] sm:$0xff] }
 0x2dc   : > { %3954 = vst.msk [vmem:[#allocation3 + $0x28] sm:$0xff] %vm2858_vm5, %v7396_v35 }
 0x2e1   : > { %v1342_v43 = vpop.xlane.xlu0 %1341 }
 0x2e2   : > { %v7405_v44 = vmax.f32 %v7402_v39, %v1342_v43 }
 0x2e4   : > { %3955 = vst.msk [vmem:[#allocation3 + $0x30] sm:$0xff] %vm2858_vm5, %v7405_v44 }
 0x2e9   : > { %v1345_v53 = vpop.xlane.xlu1 %1344  ;;  %1371 = vmax.xlane.f32.xlu1 %v1370_v51 }
 0x2ea   : > { %v7418_v57 = vmax.f32 %v7415_v52, %v1345_v53  ;;  %v1644_v53 = vmul.f32 1.442695, %v1579_v61  ;;  %v7450_v61 = vpop.eup %5808 }
 0x2eb   : > { %10477 = vst [vmem:[#allocation40_spill] sm:$0xff] %v7450_v61 }
 0x2ec   : > { %3956 = vst.msk [vmem:[#allocation3 + $0x38] sm:$0xff] %vm2858_vm5, %v7418_v57  ;;  %5810 = vpow2.f32 %v1644_v53  ;;  %v3383_v53 = vld [vmem:[%s6776_s14 + $0x60] sm:$0xff] }
 0x2ef   : > { %1374 = vmax.xlane.f32.xlu2 %v1373_v58  ;;  %v1646_v58 = vmul.f32 1.442695, %v1580_v40  ;;  %v3384_v40 = vld [vmem:[%s6776_s14 + $0x68] sm:$0xff] }
 0x2f1   : > { %v1348_v13 = vpop.xlane.xlu2 %1347  ;;  %5812 = vpow2.f32 %v1646_v58 }
 0x2f2   : > { %v7433_v15 = vmax.f32 %v7428_v1, %v1348_v13  ;;  %v3386_v13 = vld [vmem:[%s6776_s14 + $0x78] sm:$0xff]  ;;  %v7466_v4 = vpop.eup %5810 }
 0x2f3   : > { %3403 = vmatpush.msra.mxu2 %v3386_v13  ;;  %v3399_v13 = vld [vmem:[%s6776_s14 + $0xe0] sm:$0xff]  ;;  %10478 = vst [vmem:[#allocation41_spill] sm:$0xff] %v7466_v4 }
 0x2f4   : > { %3957 = vst.msk [vmem:[#allocation3 + $0x40] sm:$0xff] %vm2858_vm5, %v7433_v15  ;;  %1377 = vmax.xlane.f32.xlu0 %v1376_v8  ;;  %v1582_v8 = vsub.f32 %v7382_v12, %v7385_v19  ;;  %3615 = vmatpush.msra.mxu3 %v3399_v13  ;;  %v3382_v12 = vld [vmem:[%s6776_s14 + $0x58] sm:$0xff] }
 0x2f5   : > { %3404 = vmatpush.msra.mxu2 %v3385_v62  ;;  %v3398_v62 = vld [vmem:[%s6776_s14 + $0xd8] sm:$0xff] }
 0x2f6   : > { %v1650_v58 = vmul.f32 1.442695, %v1582_v8  ;;  %3616 = vmatpush.msra.mxu3 %v3398_v62  ;;  %v3396_v62 = vld [vmem:[%s6776_s14 + $0xc8] sm:$0xff] }
 0x2f7   : > { %3405 = vmatpush.msra.mxu2 %v3384_v40  ;;  %v7471_v40 = vld [vmem:[#allocation3 + $0x58] sm:$0xff] }
 0x2f8   : > { %5814 = vpow2.f32 %v1650_v58  ;;  %v3378_v58 = vld [vmem:[%s6776_s14 + $0x38] sm:$0xff] }
 0x2f9   : > { %v1351_v43 = vpop.xlane.xlu0 %1350  ;;  %3406 = vmatpush.msra.mxu2 %v3383_v53  ;;  %v3397_v53 = vld [vmem:[%s6776_s14 + $0xd0] sm:$0xff] }
 0x2fa   : > { %v7440_v51 = vmax.f32 %v7437_v31, %v1351_v43  ;;  %3617 = vmatpush.msra.mxu3 %v3397_v53  ;;  %v3394_v53 = vld [vmem:[%s6776_s14 + $0xb8] sm:$0xff] }
 0x2fb   : > { %3407 = vmatpush.msra.mxu2 %v3382_v12  ;;  %v3380_v12 = vld [vmem:[%s6776_s14 + $0x48] sm:$0xff] }
 0x2fc   : > { %3958 = vst.msk [vmem:[#allocation3 + $0x48] sm:$0xff] %vm2858_vm5, %v7440_v51  ;;  %3618 = vmatpush.msra.mxu3 %v3396_v62  ;;  %v3393_v62 = vld [vmem:[%s6776_s14 + $0xb0] sm:$0xff] }
 0x2fd   : > { %3408 = vmatpush.msra.mxu2 %v3381_v36  ;;  %v3395_v36 = vld [vmem:[%s6776_s14 + $0xc0] sm:$0xff] }
 0x2fe   : > { %3619 = vmatpush.msra.mxu3 %v3395_v36 }
 0x2ff   : > { %3409 = vmatpush.msra.mxu2 %v3380_v12  ;;  %v3377_v12 = vld [vmem:[%s6776_s14 + $0x30] sm:$0xff] }
 0x300   : > { %3620 = vmatpush.msra.mxu3 %v3394_v53  ;;  %v769_v53 = vld [vmem:[#allocation2 + $0xf8] sm:$0xff] }
 0x301   : > { %v1354_v25 = vpop.xlane.xlu1 %1353  ;;  %931 = vmatmul.f32.gmra.mxu0 %v769_v53  ;;  %1140 = vmatmul.f32.gmra.mxu1 %v769_v53  ;;  %v7523_v53 = vpop.f32.mrf.mxu1 }
 0x302   : > { %v7457_v43 = vmax.f32 %v7446_v56, %v1354_v25  ;;  %2989 = vperm.xlu1 %5805, %v7450_v61   ;;  %v7468_v25 = vpop.eup %5812  ;;  %3621 = vmatpush.msra.mxu3 %v3393_v62  ;;  %v7508_v62 = vld [vmem:[#allocation3 + $0x68] sm:$0xff]  ;;  %v3371_v61 = vld [vmem:[%s6776_s14] sm:$0xff]  ;;  %10482 = vst [vmem:[#allocation45_spill] sm:$0xff] %v7523_v53  ;;  %v1379_v32 = vmax.f32 %v7521_v55, %v7523_v53 }
 0x303   : > { %10479 = vst [vmem:[#allocation42_spill] sm:$0xff] %v7468_v25 }
 0x304   : > { %3959 = vst.msk [vmem:[#allocation3 + $0x50] sm:$0xff] %vm2858_vm5, %v7457_v43  ;;  %3622 = vmatpush.msra.mxu3 %v3392_v60  ;;  %v3389_v60 = vld [vmem:[%s6776_s14 + $0x90] sm:$0xff] }
 0x307   : > { %2994 = vperm.xlu2 %5806, %v7466_v4   ;;  %v3379_v4 = vld [vmem:[%s6776_s14 + $0x40] sm:$0xff] }
 0x308   : > { %2999 = vperm.xlu0 %5807, %v7468_v25   ;;  %3410 = vmatpush.msra.mxu2 %v3379_v4  ;;  %v3387_v25 = vld [vmem:[%s6776_s14 + $0x80] sm:$0xff] }
 0x309   : > { %v1357_v8 = vpop.xlane.xlu2 %1356 }
 0x30a   : > { %v7477_v13 = vmax.f32 %v7471_v40, %v1357_v8  ;;  %1792 = vperm.xlu1 %5805, %v7385_v19   ;;  %v7488_v8 = vpop.eup %5814  ;;  %v7491_v19 = vld [vmem:[#allocation3 + $0x60] sm:$0xff]  ;;  %3411 = vmatpush.msra.mxu2 %v3378_v58 }
 0x30b   : > { %10480 = vst [vmem:[#allocation43_spill] sm:$0xff] %v7488_v8  ;;  %v3375_v58 = vld [vmem:[%s6776_s14 + $0x20] sm:$0xff] }
 0x30c   : > { %3960 = vst.msk [vmem:[#allocation3 + $0x58] sm:$0xff] %vm2858_vm5, %v7477_v13  ;;  %3412 = vmatpush.msra.mxu2 %v3377_v12  ;;  %v3374_v12 = vld [vmem:[%s6776_s14 + $0x18] sm:$0xff] }
 0x30e   : > { %3413 = vmatpush.msra.mxu2 %v3376_v59  ;;  %v3373_v59 = vld [vmem:[%s6776_s14 + $0x10] sm:$0xff] }
 0x30f   : > { %1787 = vperm.xlu2 %5806, %v7378_v9  }
 0x310   : > { %3009 = vperm.xlu0 %5807, %v7488_v8   ;;  %v3391_v8 = vld [vmem:[%s6776_s14 + $0xa0] sm:$0xff]  ;;  %3414 = vmatpush.msra.mxu2 %v3375_v58  ;;  %v3388_v58 = vld [vmem:[%s6776_s14 + $0x88] sm:$0xff] }
 0x311   : > { %v1360_v4 = vpop.xlane.xlu0 %1359  ;;  %3623 = vmatpush.msra.mxu3 %v3391_v8 }
 0x312   : > { %v7497_v36 = vmax.f32 %v7491_v19, %v1360_v4  ;;  %v3390_v4 = vld [vmem:[%s6776_s14 + $0x98] sm:$0xff]  ;;  %3415 = vmatpush.msra.mxu2 %v3374_v12  ;;  %v770_v12 = vld [vmem:[#allocation2 + $0x160] sm:$0xff] }
 0x313   : > { %3624 = vmatpush.msra.mxu3 %v3390_v4  ;;  %v7525_v4 = vld [vmem:[#allocation3 + $0x70] sm:$0xff]  ;;  %934 = vmatmul.f32.gmra.mxu0 %v770_v12 }
 0x314   : > { %3961 = vst.msk [vmem:[#allocation3 + $0x60] sm:$0xff] %vm2858_vm5, %v7497_v36  ;;  %3416 = vmatpush.msra.mxu2 %v3373_v59  ;;  %1143 = vmatmul.f32.gmra.mxu1 %v770_v12 }
 0x315   : > { %3625 = vmatpush.msra.mxu3 %v3389_v60  ;;  %v7532_v60 = vld [vmem:[#allocation3 + $0x78] sm:$0xff] }
 0x316   : > { %3417 = vmatpush.msra.mxu2 %v3372_v50  ;;  %v771_v50 = vld [vmem:[#allocation2 + $0x30] sm:$0xff] }
 0x317   : > { %1797 = vperm.xlu2 %5806, %v7396_v35   ;;  %3626 = vmatpush.msra.mxu3 %v3388_v58  ;;  %v7534_v58 = vpop.f32.mrf.mxu0 }
 0x318   : > { %3418 = vmatpush.msra.mxu2 %v3371_v61  ;;  %10483 = vst [vmem:[#allocation46_spill] sm:$0xff] %v7534_v58  ;;  %v7536_v61 = vpop.f32.mrf.mxu1 }
 0x319   : > { %v1363_v47 = vpop.xlane.xlu1 %1362  ;;  %3627 = vmatpush.msra.mxu3 %v3387_v25  ;;  %10484 = vst [vmem:[#allocation47_spill] sm:$0xff] %v7536_v61 }
 0x31a   : > { %v7514_v8 = vmax.f32 %v7508_v62, %v1363_v47 }
 0x31b   : > { %937 = vmatmul.f32.gmra.mxu0 %v771_v50 }
 0x31c   : > { %3962 = vst.msk [vmem:[#allocation3 + $0x68] sm:$0xff] %vm2858_vm5, %v7514_v8  ;;  %1146 = vmatmul.f32.gmra.mxu1 %v771_v50 }
 0x31f   : > { %v7549_v41 = vpop.f32.mrf.mxu0 }
 0x320   : > { %10485 = vst [vmem:[#allocation48_spill] sm:$0xff] %v7549_v41 }
 0x321   : > { %v1366_v47 = vpop.xlane.xlu2 %1365 }
 0x322   : > { %v7528_v59 = vmax.f32 %v7525_v4, %v1366_v47 }
 0x324   : > { %3963 = vst.msk [vmem:[#allocation3 + $0x70] sm:$0xff] %vm2858_vm5, %v7528_v59 }
 0x329   : > { %v1778_v54 = vpop.permute.xlu2 %1777  ;;  %v1369_v25 = vpop.xlane.xlu0 %1368 }
 0x32a   : > { %v2092_v12 = vsub.f32 %v7269_v2, %v1778_v54  ;;  %v2093_v49 = vsub.f32 %v7271_v3, %v1778_v54  ;;  %v7541_v47 = vmax.f32 %v7532_v60, %v1369_v25  ;;  %v7551_v3 = vpop.f32.mrf.mxu1 }
 0x32b   : > { %10486 = vst [vmem:[#allocation49_spill] sm:$0xff] %v7551_v3 }
 0x32c   : > { %v2222_v48 = vmul.f32 1.442695, %v2092_v12  ;;  %v2224_v28 = vmul.f32 1.442695, %v2093_v49  ;;  %3964 = vst.msk [vmem:[#allocation3 + $0x78] sm:$0xff] %vm2858_vm5, %v7541_v47 }
 0x32e   : > { %5816 = vpow2.f32 %v2222_v48  ;;  %v1385_v48 = vmax.f32 %v7549_v41, %v7551_v3 }
 0x32f   : > { %5818 = vpow2.f32 %v2224_v28 }
 0x331   : > { %v1773_v50 = vpop.permute.xlu1 %1772 }
 0x332   : > { %v2090_v42 = vsub.f32 %v7263_v63, %v1773_v50  ;;  %v2091_v2 = vsub.f32 %v7265_v0, %v1773_v50  ;;  %v1382_v0 = vmax.f32 %v7534_v58, %v7536_v61 }
 0x334   : > { %v5817_v54 = vpop.eup %5816  ;;  %v2218_v25 = vmul.f32 1.442695, %v2090_v42  ;;  %v2220_v49 = vmul.f32 1.442695, %v2091_v2  ;;  %1380 = vmax.xlane.f32.xlu1 %v1379_v32  ;;  %v1581_v32 = vsub.f32 %v7375_v5, %v7378_v9 }
 0x335   : > { %v5819_v12 = vpop.eup %5818 }
 0x336   : > { %5820 = vpow2.f32 %v2218_v25  ;;  %v7555_v28 = vadd.f32 %v5819_v12, %v5817_v54  ;;  %v1585_v25 = vsub.f32 %v7415_v52, %v7418_v57  ;;  %v1648_v3 = vmul.f32 1.442695, %v1581_v32  ;;  %v7600_v32 = vpop.f32.mrf.mxu1 }
 0x337   : > { %5822 = vpow2.f32 %v2220_v49  ;;  %10493 = vst [vmem:[#allocation55_spill] sm:$0xff] %v7600_v32 }
 0x338   : > { %10487 = vst [vmem:[#allocation50_spill] sm:$0xff] %v7555_v28  ;;  %v1656_v41 = vmul.f32 1.442695, %v1585_v25  ;;  %v7602_v25 = vld [vmem:[#allocation3 + $0x90] sm:$0xff] }
 0x339   : > { %10494 = vst [vmem:[#allocation56_spill] sm:$0xff] %v7602_v25 }
 0x33a   : > { %1386 = vmax.xlane.f32.xlu0 %v1385_v48 }
 0x33c   : > { %v5821_v63 = vpop.eup %5820  ;;  %v1783_v53 = vpop.permute.xlu0 %1782 }
 0x33d   : > { %v5823_v50 = vpop.eup %5822  ;;  %v2094_v55 = vsub.f32 %v7275_v6, %v1783_v53  ;;  %v2095_v42 = vsub.f32 %v7277_v7, %v1783_v53  ;;  %3419 = vmatmul.f32.vlgmr.msra.gmra.mxu2 %v5821_v63 }
 0x33e   : > { %3628 = vmatmul.f32.vlgmr.msra.gmra.mxu3 %v5823_v50  ;;  %v7563_v2 = vadd.f32 %v5823_v50, %v5821_v63  ;;  %v773_v50 = vld [vmem:[#allocation2] sm:$0xff] }
 0x33f   : > { %v2226_v49 = vmul.f32 1.442695, %v2094_v55  ;;  %v2228_v48 = vmul.f32 1.442695, %v2095_v42  ;;  %v10490_v55 = vsub.f32 %v7389_v22, %v7396_v35  ;;  %v772_v22 = vld [vmem:[#allocation2 + $0x1e0] sm:$0xff]  ;;  %v7598_v42 = vpop.f32.mrf.mxu0 }
 0x340   : > { %1383 = vmax.xlane.f32.xlu2 %v1382_v0  ;;  %940 = vmatmul.f32.gmra.mxu0 %v772_v22  ;;  %10492 = vst [vmem:[#allocation54_spill] sm:$0xff] %v7598_v42 }
 0x341   : > { %5824 = vpow2.f32 %v2226_v49  ;;  %v1652_v52 = vmul.f32 1.442695, %v10490_v55  ;;  %1149 = vmatmul.f32.gmra.mxu1 %v772_v22  ;;  %v7613_v55 = vpop.f32.mrf.mxu1 }
 0x342   : > { %5826 = vpow2.f32 %v2228_v48  ;;  %10496 = vst [vmem:[#allocation58_spill] sm:$0xff] %v7613_v55 }
 0x343   : > { %5828 = vpow2.f32 %v1648_v3  ;;  %v7583_v3 = vld [vmem:[#allocation3 + $0x80] sm:$0xff] }
 0x344   : > { %5830 = vpow2.f32 %v1656_v41 }
 0x345   : > { %3422 = vmatmul.f32.gmra.mxu2 %v5817_v54  ;;  %5832 = vpow2.f32 %v1652_v52 }
 0x346   : > { %3631 = vmatmul.f32.gmra.mxu3 %v5819_v12  ;;  %v7591_v12 = vld [vmem:[#allocation3 + $0x88] sm:$0xff] }
 0x347   : > { %v5825_v6 = vpop.eup %5824 }
 0x348   : > { %v5827_v7 = vpop.eup %5826  ;;  %943 = vmatmul.f32.gmra.mxu0 %v773_v50 }
 0x349   : > { %v7567_v5 = vadd.f32 %v5827_v7, %v5825_v6  ;;  %v7569_v9 = vpop.eup %5828  ;;  %1152 = vmatmul.f32.gmra.mxu1 %v773_v50  ;;  %v7621_v61 = vpop.f32.mrf.mxu1 }
 0x34a   : > { %10488 = vst [vmem:[#allocation51_spill] sm:$0xff] %v7569_v9  ;;  %v7571_v53 = vpop.eup %5830 }
 0x34b   : > { %10489 = vst [vmem:[#allocation52_spill] sm:$0xff] %v7571_v53  ;;  %v7580_v41 = vpop.eup %5832 }
 0x34c   : > { %10491 = vst [vmem:[#allocation53_spill] sm:$0xff] %v7580_v41 }
 0x34d   : > { %3425 = vmatmul.f32.gmra.mxu2 %v5825_v6  ;;  %3004 = vperm.xlu1 %5805, %v7569_v9   ;;  %v774_v6 = vld [vmem:[#allocation2 + $0xf0] sm:$0xff]  ;;  %10498 = vst [vmem:[#allocation60_spill] sm:$0xff] %v7621_v61 }
 0x34e   : > { %3634 = vmatmul.f32.gmra.mxu3 %v5827_v7  ;;  %3024 = vperm.xlu0 %5807, %v7571_v53   ;;  %v7611_v7 = vpop.f32.mrf.mxu0 }
 0x34f   : > { %10495 = vst [vmem:[#allocation57_spill] sm:$0xff] %v7611_v7 }
 0x350   : > { %946 = vmatmul.f32.gmra.mxu0 %v774_v6 }
 0x351   : > { %1155 = vmatmul.f32.gmra.mxu1 %v774_v6 }
 0x355   : > { %1802 = vperm.xlu1 %5805, %v7405_v44  }
 0x356   : > { %1817 = vperm.xlu0 %5807, %v7440_v51   ;;  %v7619_v53 = vpop.f32.mrf.mxu0 }
 0x357   : > { %10497 = vst [vmem:[#allocation59_spill] sm:$0xff] %v7619_v53 }
 0x358   : > { %3014 = vperm.xlu2 %5806, %v7580_v41  }
 0x35c   : > { %v1372_v54 = vpop.xlane.xlu1 %1371 }
 0x35d   : > { %v7586_v35 = vmax.f32 %v7583_v3, %v1372_v54 }
 0x35f   : > { %3965 = vst.msk [vmem:[#allocation3 + $0x80] sm:$0xff] %vm2858_vm5, %v7586_v35 }
 0x360   : > { %1807 = vperm.xlu2 %5806, %v7418_v57  }
 0x362   : > { %v1375_v63 = vpop.xlane.xlu2 %1374 }
 0x363   : > { %v7594_v0 = vmax.f32 %v7591_v12, %v1375_v63 }
 0x365   : > { %3966 = vst.msk [vmem:[#allocation3 + $0x88] sm:$0xff] %vm2858_vm5, %v7594_v0 }
 0x367   : > { %v1378_v49 = vpop.xlane.xlu0 %1377 }
 0x368   : > { %v7605_v57 = vmax.f32 %v7602_v25, %v1378_v49 }
 0x36a   : > { %v7607_v48 = vpop.permute.xlu2 %2994  ;;  %3967 = vst.msk [vmem:[#allocation3 + $0x90] sm:$0xff] %vm2858_vm5, %v7605_v57 }
 0x372   : > { %v1788_v52 = vpop.permute.xlu2 %1787 }
 0x373   : > { %v2096_v54 = vsub.f32 %v7281_v10, %v1788_v52  ;;  %v2097_v22 = vsub.f32 %v7283_v11, %v1788_v52  ;;  %v1388_v10 = vmax.f32 %v7598_v42, %v7600_v32  ;;  %v1394_v11 = vmax.f32 %v7619_v53, %v7621_v61 }
 0x374   : > { %v7617_v63 = vpop.permute.xlu1 %2989 }
 0x375   : > { %v2230_v50 = vmul.f32 1.442695, %v2096_v54  ;;  %v2232_v49 = vmul.f32 1.442695, %v2097_v22 }
 0x377   : > { %5834 = vpow2.f32 %v2230_v50 }
 0x378   : > { %5836 = vpow2.f32 %v2232_v49 }
 0x37a   : > { %v1798_v6 = vpop.permute.xlu2 %1797 }
 0x37b   : > { %v2100_v58 = vsub.f32 %v7293_v17, %v1798_v6  ;;  %v2101_v41 = vsub.f32 %v7295_v18, %v1798_v6 }
 0x37c   : > { %v1793_v9 = vpop.permute.xlu1 %1792 }
 0x37d   : > { %v5835_v52 = vpop.eup %5834  ;;  %v2238_v54 = vmul.f32 1.442695, %v2100_v58  ;;  %v2240_v22 = vmul.f32 1.442695, %v2101_v41  ;;  %v2098_v50 = vsub.f32 %v7287_v16, %v1793_v9  ;;  %v2099_v49 = vsub.f32 %v7289_v14, %v1793_v9 }
 0x37e   : > { %v5837_v25 = vpop.eup %5836  ;;  %3428 = vmatmul.f32.gmra.mxu2 %v5835_v52  ;;  %v1588_v58 = vsub.f32 %v7446_v56, %v7457_v43  ;;  %v1391_v16 = vmax.f32 %v7611_v7, %v7613_v55  ;;  %v1586_v56 = vsub.f32 %v7428_v1, %v7433_v15 }
 0x37f   : > { %5838 = vpow2.f32 %v2238_v54  ;;  %v2234_v17 = vmul.f32 1.442695, %v2098_v50  ;;  %v2236_v28 = vmul.f32 1.442695, %v2099_v49  ;;  %3637 = vmatmul.f32.gmra.mxu3 %v5837_v25  ;;  %1389 = vmax.xlane.f32.xlu1 %v1388_v10  ;;  %v7631_v18 = vadd.f32 %v5837_v25, %v5835_v52  ;;  %v7660_v49 = vld [vmem:[#allocation3 + $0x98] sm:$0xff] }
 0x380   : > { %5840 = vpow2.f32 %v2240_v22  ;;  %1395 = vmax.xlane.f32.xlu0 %v1394_v11  ;;  %v1584_v25 = vsub.f32 %v7402_v39, %v7405_v44  ;;  %v1662_v10 = vmul.f32 1.442695, %v1588_v58  ;;  %v1658_v22 = vmul.f32 1.442695, %v1586_v56  ;;  %v7651_v39 = vpop.permute.xlu0 %2999  ;;  %v7668_v58 = vpop.f32.mrf.mxu0 }
 0x381   : > { %5842 = vpow2.f32 %v2234_v17 }
 0x382   : > { %5844 = vpow2.f32 %v2236_v28  ;;  %v1654_v11 = vmul.f32 1.442695, %v1584_v25 }
 0x383   : > { %5846 = vpow2.f32 %v1662_v10  ;;  %v776_v10 = vld [vmem:[#allocation2 + $0x148] sm:$0xff] }
 0x384   : > { %5848 = vpow2.f32 %v1654_v11 }
 0x385   : > { %v5839_v6 = vpop.eup %5838  ;;  %5850 = vpow2.f32 %v1658_v22 }
 0x386   : > { %v5841_v14 = vpop.eup %5840 }
 0x387   : > { %v5843_v9 = vpop.eup %5842  ;;  %v7637_v41 = vadd.f32 %v5841_v14, %v5839_v6 }
 0x388   : > { %v5845_v54 = vpop.eup %5844  ;;  %3431 = vmatmul.f32.gmra.mxu2 %v5843_v9  ;;  %v7658_v1 = vpop.permute.xlu0 %3009 }
 0x389   : > { %10499 = vst [vmem:[#allocation61_spill] sm:$0xff] %v7637_v41  ;;  %3640 = vmatmul.f32.gmra.mxu3 %v5845_v54  ;;  %1392 = vmax.xlane.f32.xlu2 %v1391_v16  ;;  %v7641_v28 = vadd.f32 %v5845_v54, %v5843_v9  ;;  %v7645_v52 = vpop.eup %5846  ;;  %v7670_v16 = vpop.f32.mrf.mxu1 }
 0x38a   : > { %10501 = vst [vmem:[#allocation63_spill] sm:$0xff] %v7645_v52  ;;  %v7648_v50 = vpop.eup %5848 }
 0x38b   : > { %10500 = vst [vmem:[#allocation62_spill] sm:$0xff] %v7641_v28  ;;  %v7654_v44 = vpop.eup %5850 }
 0x38c   : > { %10502 = vst [vmem:[#allocation64_spill] sm:$0xff] %v7648_v50 }
 0x38d   : > { %10503 = vst [vmem:[#allocation65_spill] sm:$0xff] %v7654_v44 }
 0x390   : > { %3434 = vmatmul.f32.gmra.mxu2 %v5839_v6  ;;  %v7684_v56 = vpop.f32.mrf.mxu0 }
 0x391   : > { %3643 = vmatmul.f32.gmra.mxu3 %v5841_v14  ;;  %v775_v14 = vld [vmem:[#allocation2 + $0x8] sm:$0xff]  ;;  %10507 = vst [vmem:[#allocation69_spill] sm:$0xff] %v7684_v56  ;;  %v7686_v22 = vpop.f32.mrf.mxu1 }
 0x392   : > { %949 = vmatmul.f32.gmra.mxu0 %v775_v14  ;;  %1158 = vmatmul.f32.gmra.mxu1 %v775_v14  ;;  %10508 = vst [vmem:[#allocation70_spill] sm:$0xff] %v7686_v22 }
 0x394   : > { %3039 = vperm.xlu0 %5807, %v7645_v52   ;;  %v2923_v52 = vld [vmem:[#allocation5 + $0x68] sm:$0xff] }
 0x398   : > { %3019 = vperm.xlu1 %5805, %v7648_v50  }
 0x39a   : > { %952 = vmatmul.f32.gmra.mxu0 %v776_v10  ;;  %1161 = vmatmul.f32.gmra.mxu1 %v776_v10  ;;  %v3307_v10 = vmul.f32 %v7617_v63, %v2923_v52  ;;  %v1591_v52 = vsub.f32 %v7508_v62, %v7514_v8 }
 0x39c   : > { %1832 = vperm.xlu0 %5807, %v7497_v36  }
 0x3a0   : > { %1812 = vperm.xlu1 %5805, %v7433_v15   ;;  %v7672_v15 = vld [vmem:[#allocation3 + $0xa8] sm:$0xff] }
 0x3a1   : > { %3029 = vperm.xlu2 %5806, %v7654_v44   ;;  %10504 = vst [vmem:[#allocation66_spill] sm:$0xff] %v7672_v15 }
 0x3a7   : > { %v1381_v17 = vpop.xlane.xlu1 %1380 }
 0x3a8   : > { %v7663_v6 = vmax.f32 %v7660_v49, %v1381_v17  ;;  %v777_v17 = vld [vmem:[#allocation2 + $0x1d0] sm:$0xff] }
 0x3a9   : > { %1822 = vperm.xlu2 %5806, %v7457_v43   ;;  %v7679_v43 = vld [vmem:[#allocation3 + $0xa0] sm:$0xff]  ;;  %955 = vmatmul.f32.gmra.mxu0 %v777_v17 }
 0x3aa   : > { %3968 = vst.msk [vmem:[#allocation3 + $0x98] sm:$0xff] %vm2858_vm5, %v7663_v6  ;;  %1164 = vmatmul.f32.gmra.mxu1 %v777_v17 }
 0x3ab   : > { %10505 = vst [vmem:[#allocation67_spill] sm:$0xff] %v7679_v43 }
 0x3ad   : > { %v1387_v9 = vpop.xlane.xlu0 %1386 }
 0x3ae   : > { %v7675_v54 = vmax.f32 %v7672_v15, %v1387_v9  ;;  %v7692_v9 = vpop.f32.mrf.mxu0 }
 0x3af   : > { %10509 = vst [vmem:[#allocation71_spill] sm:$0xff] %v7692_v9 }
 0x3b0   : > { %3970 = vst.msk [vmem:[#allocation3 + $0xa8] sm:$0xff] %vm2858_vm5, %v7675_v54 }
 0x3b3   : > { %v1384_v25 = vpop.xlane.xlu2 %1383 }
 0x3b4   : > { %v7682_v11 = vmax.f32 %v7679_v43, %v1384_v25  ;;  %v7696_v25 = vpop.f32.mrf.mxu1  ;;  %v1397_v43 = vmax.f32 %v7668_v58, %v7670_v16 }
 0x3b5   : > { %10510 = vst [vmem:[#allocation72_spill] sm:$0xff] %v7696_v25  ;;  %v1403_v44 = vmax.f32 %v7692_v9, %v7696_v25 }
 0x3b6   : > { %10506 = vst [vmem:[#allocation68_spill] sm:$0xff] %v7682_v11 }
 0x3b7   : > { %3969 = vst.msk [vmem:[#allocation3 + $0xa0] sm:$0xff] %vm2858_vm5, %v7682_v11  ;;  %v2924_v11 = vld [vmem:[#allocation5 + $0x150] sm:$0xff] }
 0x3bb   : > { %v7690_v14 = vpop.permute.xlu2 %3014 }
 0x3bf   : > { %v7694_v61 = vpop.permute.xlu1 %3004 }
 0x3c0   : > { %v3420_v53 = vpop.f32.mrf.mxu2 }
 0x3c1   : > { %v3629_v55 = vpop.f32.mrf.mxu3 }
 0x3c2   : > { %v3630_v7 = vadd.f32 %v3629_v55, %v3420_v53 }
 0x3c3   : > { %v1808_v32 = vpop.permute.xlu2 %1807 }
 0x3c4   : > { %v3821_v42 = vadd.f32 %v3630_v7, %v3307_v10  ;;  %v2104_v50 = vsub.f32 %v7305_v23, %v1808_v32  ;;  %v2105_v17 = vsub.f32 %v7307_v24, %v1808_v32  ;;  %v3308_v23 = vmul.f32 %v7607_v48, %v2924_v11 }
 0x3c6   : > { %3885 = vst [vmem:[#allocation5 + $0x68] sm:$0xff] %v3821_v42  ;;  %v2246_v15 = vmul.f32 1.442695, %v2104_v50  ;;  %v2248_v28 = vmul.f32 1.442695, %v2105_v17  ;;  %1404 = vmax.xlane.f32.xlu0 %v1403_v44 }
 0x3c7   : > { %v1803_v41 = vpop.permute.xlu1 %1802 }
 0x3c8   : > { %5852 = vpow2.f32 %v2246_v15  ;;  %v2102_v53 = vsub.f32 %v7299_v20, %v1803_v41  ;;  %v2103_v55 = vsub.f32 %v7301_v21, %v1803_v41  ;;  %v3423_v63 = vpop.f32.mrf.mxu2  ;;  %v1400_v20 = vmax.f32 %v7684_v56, %v7686_v22 }
 0x3c9   : > { %5854 = vpow2.f32 %v2248_v28  ;;  %v3632_v7 = vpop.f32.mrf.mxu3  ;;  %v1668_v41 = vmul.f32 1.442695, %v1591_v52  ;;  %v2925_v28 = vld [vmem:[#allocation5 + $0x70] sm:$0xff]  ;;  %v7738_v52 = vpop.f32.mrf.mxu0 }
 0x3ca   : > { %v2242_v24 = vmul.f32 1.442695, %v2102_v53  ;;  %v2244_v42 = vmul.f32 1.442695, %v2103_v55  ;;  %v3633_v32 = vadd.f32 %v3632_v7, %v3423_v63  ;;  %1398 = vmax.xlane.f32.xlu1 %v1397_v43  ;;  %v3309_v43 = vmul.f32 %v7651_v39, %v2925_v28  ;;  %10513 = vst [vmem:[#allocation75_spill] sm:$0xff] %v7738_v52 }
 0x3cb   : > { %v1587_v53 = vsub.f32 %v7437_v31, %v7440_v51  ;;  %v1589_v39 = vsub.f32 %v7471_v40, %v7477_v13  ;;  %v7736_v40 = vld [vmem:[#allocation3 + $0xb0] sm:$0xff] }
 0x3cc   : > { %5856 = vpow2.f32 %v2242_v24  ;;  %v3822_v50 = vadd.f32 %v3633_v32, %v3308_v23 }
 0x3cd   : > { %5858 = vpow2.f32 %v2244_v42  ;;  %v1660_v7 = vmul.f32 1.442695, %v1587_v53  ;;  %v1664_v24 = vmul.f32 1.442695, %v1589_v39  ;;  %v7724_v42 = vpop.permute.xlu0 %3024  ;;  %v2926_v53 = vld [vmem:[#allocation5 + $0x160] sm:$0xff] }
 0x3ce   : > { %v5853_v44 = vpop.eup %5852  ;;  %3886 = vst [vmem:[#allocation5 + $0x150] sm:$0xff] %v3822_v50  ;;  %5860 = vpow2.f32 %v1668_v41  ;;  %v7740_v50 = vpop.f32.mrf.mxu1  ;;  %v3310_v39 = vmul.f32 %v7694_v61, %v2926_v53 }
 0x3cf   : > { %v5855_v21 = vpop.eup %5854  ;;  %5862 = vpow2.f32 %v1660_v7  ;;  %10514 = vst [vmem:[#allocation76_spill] sm:$0xff] %v7740_v50 }
 0x3d0   : > { %v3426_v15 = vpop.f32.mrf.mxu2  ;;  %v7712_v48 = vadd.f32 %v5855_v21, %v5853_v44  ;;  %5864 = vpow2.f32 %v1664_v24 }
 0x3d1   : > { %v3635_v11 = vpop.f32.mrf.mxu3 }
 0x3d2   : > { %v5857_v10 = vpop.eup %5856  ;;  %v3636_v17 = vadd.f32 %v3635_v11, %v3426_v15  ;;  %1401 = vmax.xlane.f32.xlu2 %v1400_v20  ;;  %v778_v20 = vld [vmem:[#allocation2 + $0x100] sm:$0xff]  ;;  %v779_v15 = vld [vmem:[#allocation2 + $0xc8] sm:$0xff]  ;;  %v7755_v11 = vld [vmem:[#allocation3 + $0xb8] sm:$0xff] }
 0x3d3   : > { %v5859_v62 = vpop.eup %5858  ;;  %3437 = vmatmul.f32.gmra.mxu2 %v5857_v10  ;;  %958 = vmatmul.f32.gmra.mxu0 %v778_v20 }
 0x3d4   : > { %v3823_v55 = vadd.f32 %v3636_v17, %v3309_v43  ;;  %3646 = vmatmul.f32.gmra.mxu3 %v5859_v62  ;;  %v7717_v63 = vadd.f32 %v5859_v62, %v5857_v10  ;;  %v7719_v23 = vpop.eup %5860  ;;  %1167 = vmatmul.f32.gmra.mxu1 %v778_v20  ;;  %v780_v62 = vld [vmem:[#allocation2 + $0x40] sm:$0xff] }
 0x3d5   : > { %10511 = vst [vmem:[#allocation73_spill] sm:$0xff] %v7719_v23  ;;  %v7726_v31 = vpop.eup %5862  ;;  %v7733_v32 = vpop.permute.xlu0 %1817 }
 0x3d6   : > { %3887 = vst [vmem:[#allocation5 + $0x70] sm:$0xff] %v3823_v55  ;;  %v7730_v51 = vpop.eup %5864  ;;  %v7759_v10 = vpop.f32.mrf.mxu1 }
 0x3d7   : > { %10512 = vst [vmem:[#allocation74_spill] sm:$0xff] %v7730_v51 }
 0x3d8   : > { %10516 = vst [vmem:[#allocation78_spill] sm:$0xff] %v7759_v10 }
 0x3da   : > { %3054 = vperm.xlu0 %5807, %v7719_v23   ;;  %v2927_v23 = vld [vmem:[#allocation5 + $0xd0] sm:$0xff] }
 0x3db   : > { %3440 = vmatmul.f32.gmra.mxu2 %v5853_v44  ;;  %v7742_v44 = vld [vmem:[#allocation3 + $0xc0] sm:$0xff]  ;;  %961 = vmatmul.f32.gmra.mxu0 %v779_v15  ;;  %v3311_v61 = vmul.f32 %v7658_v1, %v2927_v23 }
 0x3dc   : > { %3649 = vmatmul.f32.gmra.mxu3 %v5855_v21  ;;  %1170 = vmatmul.f32.gmra.mxu1 %v779_v15 }
 0x3de   : > { %v7771_v15 = vpop.f32.mrf.mxu1 }
 0x3df   : > { %10518 = vst [vmem:[#allocation80_spill] sm:$0xff] %v7771_v15 }
 0x3e2   : > { %1847 = vperm.xlu0 %5807, %v7541_v47  }
 0x3e3   : > { %3034 = vperm.xlu1 %5805, %v7726_v31   ;;  %964 = vmatmul.f32.gmra.mxu0 %v780_v62 }
 0x3e4   : > { %1173 = vmatmul.f32.gmra.mxu1 %v780_v62 }
 0x3ea   : > { %3044 = vperm.xlu2 %5806, %v7730_v51  }
 0x3eb   : > { %1827 = vperm.xlu1 %5805, %v7477_v13  }
 0x3f2   : > { %v1390_v21 = vpop.xlane.xlu1 %1389  ;;  %1837 = vperm.xlu2 %5806, %v7514_v8   ;;  %v7757_v8 = vpop.f32.mrf.mxu0 }
 0x3f3   : > { %v7746_v41 = vmax.f32 %v7736_v40, %v1390_v21  ;;  %v1396_v28 = vpop.xlane.xlu0 %1395  ;;  %10515 = vst [vmem:[#allocation77_spill] sm:$0xff] %v7757_v8 }
 0x3f4   : > { %v7749_v13 = vmax.f32 %v7742_v44, %v1396_v28 }
 0x3f5   : > { %3971 = vst.msk [vmem:[#allocation3 + $0xb0] sm:$0xff] %vm2858_vm5, %v7746_v41 }
 0x3f6   : > { %3973 = vst.msk [vmem:[#allocation3 + $0xc0] sm:$0xff] %vm2858_vm5, %v7749_v13 }
 0x3fa   : > { %v7769_v28 = vpop.f32.mrf.mxu0 }
 0x3fb   : > { %10517 = vst [vmem:[#allocation79_spill] sm:$0xff] %v7769_v28 }
 0x3fc   : > { %v1393_v43 = vpop.xlane.xlu2 %1392 }
 0x3fd   : > { %v7762_v17 = vmax.f32 %v7755_v11, %v1393_v43  ;;  %v1412_v43 = vmax.f32 %v7769_v28, %v7771_v15  ;;  %v1406_v15 = vmax.f32 %v7738_v52, %v7740_v50  ;;  %v2928_v28 = vld [vmem:[#allocation5 + $0xd8] sm:$0xff]  ;;  %v2930_v50 = vld [vmem:[#allocation5 + $0x30] sm:$0xff] }
 0x3ff   : > { %3972 = vst.msk [vmem:[#allocation3 + $0xb8] sm:$0xff] %vm2858_vm5, %v7762_v17 }
 0x401   : > { %v3429_v55 = vpop.f32.mrf.mxu2 }
 0x402   : > { %v3638_v7 = vpop.f32.mrf.mxu3 }
 0x403   : > { %v3639_v24 = vadd.f32 %v3638_v7, %v3429_v55 }
 0x404   : > { %v7767_v20 = vpop.permute.xlu2 %3029 }
 0x405   : > { %v3824_v21 = vadd.f32 %v3639_v24, %v3310_v39 }
 0x407   : > { %3888 = vst [vmem:[#allocation5 + $0x160] sm:$0xff] %v3824_v21  ;;  %v1594_v21 = vsub.f32 %v7583_v3, %v7586_v35 }
 0x40a   : > { %v7775_v25 = vpop.permute.xlu1 %3019 }
 0x40b   : > { %v3432_v9 = vpop.f32.mrf.mxu2 }
 0x40c   : > { %v3641_v22 = vpop.f32.mrf.mxu3  ;;  %v1823_v56 = vpop.permute.xlu2 %1822  ;;  %1413 = vmax.xlane.f32.xlu0 %v1412_v43 }
 0x40d   : > { %v3642_v62 = vadd.f32 %v3641_v22, %v3432_v9  ;;  %v2110_v53 = vsub.f32 %v7323_v33, %v1823_v56  ;;  %v2111_v55 = vsub.f32 %v7325_v34, %v1823_v56  ;;  %v1674_v34 = vmul.f32 1.442695, %v1594_v21 }
 0x40e   : > { %v3312_v9 = vmul.f32 %v7690_v14, %v2928_v28  ;;  %v1590_v21 = vsub.f32 %v7491_v19, %v7497_v36 }
 0x40f   : > { %v3825_v7 = vadd.f32 %v3642_v62, %v3311_v61  ;;  %v2258_v39 = vmul.f32 1.442695, %v2110_v53  ;;  %v2260_v24 = vmul.f32 1.442695, %v2111_v55  ;;  %v2108_v53 = vsub.f32 %v7317_v29, %v7733_v32 }
 0x411   : > { %3889 = vst [vmem:[#allocation5 + $0xd0] sm:$0xff] %v3825_v7  ;;  %5866 = vpow2.f32 %v2258_v39  ;;  %v2254_v28 = vmul.f32 1.442695, %v2108_v53  ;;  %v7835_v53 = vpop.f32.mrf.mxu0 }
 0x412   : > { %5868 = vpow2.f32 %v2260_v24  ;;  %v1813_v43 = vpop.permute.xlu1 %1812  ;;  %10521 = vst [vmem:[#allocation83_spill] sm:$0xff] %v7835_v53 }
 0x413   : > { %v2106_v1 = vsub.f32 %v7311_v26, %v1813_v43  ;;  %v2107_v33 = vsub.f32 %v7313_v27, %v1813_v43  ;;  %v3435_v22 = vpop.f32.mrf.mxu2  ;;  %v1409_v26 = vmax.f32 %v7757_v8, %v7759_v10  ;;  %v2109_v27 = vsub.f32 %v7319_v30, %v7733_v32 }
 0x414   : > { %v3644_v56 = vpop.f32.mrf.mxu3  ;;  %v1666_v30 = vmul.f32 1.442695, %v1590_v21  ;;  %v1592_v32 = vsub.f32 %v7525_v4, %v7528_v59 }
 0x415   : > { %v2250_v23 = vmul.f32 1.442695, %v2106_v1  ;;  %v2252_v61 = vmul.f32 1.442695, %v2107_v33  ;;  %v3645_v3 = vadd.f32 %v3644_v56, %v3435_v22  ;;  %1407 = vmax.xlane.f32.xlu1 %v1406_v15  ;;  %v2256_v15 = vmul.f32 1.442695, %v2109_v27  ;;  %v7809_v22 = vpop.permute.xlu0 %3039 }
 0x416   : > { %v1670_v19 = vmul.f32 1.442695, %v1592_v32  ;;  %v7822_v56 = vld [vmem:[#allocation3 + $0xd8] sm:$0xff]  ;;  %v2929_v32 = vld [vmem:[#allocation5 + $0x1e0] sm:$0xff] }
 0x417   : > { %v5867_v62 = vpop.eup %5866  ;;  %5870 = vpow2.f32 %v2250_v23  ;;  %v3826_v55 = vadd.f32 %v3645_v3, %v3312_v9 }
 0x418   : > { %v5869_v7 = vpop.eup %5868  ;;  %5872 = vpow2.f32 %v2252_v61  ;;  %v7828_v61 = vld [vmem:[#allocation3 + $0xc8] sm:$0xff] }
 0x419   : > { %5874 = vpow2.f32 %v1674_v34  ;;  %3890 = vst [vmem:[#allocation5 + $0xd8] sm:$0xff] %v3826_v55  ;;  %v7793_v14 = vadd.f32 %v5869_v7, %v5867_v62  ;;  %v781_v55 = vld [vmem:[#allocation2 + $0x1f8] sm:$0xff] }
 0x41a   : > { %5876 = vpow2.f32 %v2254_v28  ;;  %967 = vmatmul.f32.gmra.mxu0 %v781_v55  ;;  %1176 = vmatmul.f32.gmra.mxu1 %v781_v55  ;;  %v7848_v28 = vpop.f32.mrf.mxu0 }
 0x41b   : > { %1410 = vmax.xlane.f32.xlu2 %v1409_v26  ;;  %5878 = vpow2.f32 %v2256_v15  ;;  %10523 = vst [vmem:[#allocation85_spill] sm:$0xff] %v7848_v28 }
 0x41c   : > { %5880 = vpow2.f32 %v1666_v30 }
 0x41d   : > { %v5871_v39 = vpop.eup %5870  ;;  %5882 = vpow2.f32 %v1670_v19  ;;  %v7816_v4 = vpop.permute.xlu0 %1832 }
 0x41e   : > { %v5873_v24 = vpop.eup %5872  ;;  %3443 = vmatmul.f32.gmra.mxu2 %v5871_v39 }
 0x41f   : > { %v7795_v29 = vpop.eup %5874  ;;  %3652 = vmatmul.f32.gmra.mxu3 %v5873_v24  ;;  %v7799_v43 = vadd.f32 %v5873_v24, %v5871_v39  ;;  %v783_v24 = vld [vmem:[#allocation2 + $0x128] sm:$0xff] }
 0x420   : > { %10519 = vst [vmem:[#allocation81_spill] sm:$0xff] %v7795_v29  ;;  %3069 = vperm.xlu0 %5807, %v7795_v29   ;;  %v7804_v1 = vpop.eup %5876 }
 0x421   : > { %v7806_v33 = vpop.eup %5878 }
 0x422   : > { %v7813_v36 = vpop.eup %5880 }
 0x423   : > { %v7818_v34 = vpop.eup %5882 }
 0x424   : > { %10520 = vst [vmem:[#allocation82_spill] sm:$0xff] %v7818_v34 }
 0x426   : > { %3446 = vmatmul.f32.gmra.mxu2 %v7804_v1  ;;  %v7855_v21 = vpop.f32.mrf.mxu0 }
 0x427   : > { %3655 = vmatmul.f32.gmra.mxu3 %v7806_v33  ;;  %10525 = vst [vmem:[#allocation87_spill] sm:$0xff] %v7855_v21 }
 0x428   : > { %1862 = vperm.xlu0 %5807, %v7605_v57  }
 0x42e   : > { %3449 = vmatmul.f32.gmra.mxu2 %v5867_v62  ;;  %3049 = vperm.xlu1 %5805, %v7813_v36  }
 0x42f   : > { %3658 = vmatmul.f32.gmra.mxu3 %v5869_v7  ;;  %v782_v7 = vld [vmem:[#allocation2 + $0x20] sm:$0xff] }
 0x430   : > { %970 = vmatmul.f32.gmra.mxu0 %v782_v7  ;;  %1179 = vmatmul.f32.gmra.mxu1 %v782_v7 }
 0x433   : > { %3059 = vperm.xlu2 %5806, %v7818_v34  }
 0x436   : > { %1842 = vperm.xlu1 %5805, %v7528_v59   ;;  %v7837_v59 = vpop.f32.mrf.mxu1 }
 0x437   : > { %10522 = vst [vmem:[#allocation84_spill] sm:$0xff] %v7837_v59 }
 0x438   : > { %973 = vmatmul.f32.gmra.mxu0 %v783_v24  ;;  %1182 = vmatmul.f32.gmra.mxu1 %v783_v24  ;;  %v3313_v24 = vmul.f32 %v7775_v25, %v2929_v32  ;;  %v1597_v25 = vsub.f32 %v7660_v49, %v7663_v6 }
 0x439   : > { %v1405_v9 = vpop.xlane.xlu0 %1404 }
 0x43a   : > { %v7825_v23 = vmax.f32 %v7822_v56, %v1405_v9 }
 0x43b   : > { %1852 = vperm.xlu2 %5806, %v7586_v35   ;;  %v7841_v35 = vld [vmem:[#allocation3 + $0xd0] sm:$0xff] }
 0x43c   : > { %3976 = vst.msk [vmem:[#allocation3 + $0xd8] sm:$0xff] %vm2858_vm5, %v7825_v23 }
 0x43d   : > { %v1399_v3 = vpop.xlane.xlu1 %1398 }
 0x43e   : > { %v7833_v62 = vmax.f32 %v7828_v61, %v1399_v3  ;;  %v7850_v15 = vpop.f32.mrf.mxu1 }
 0x43f   : > { %10524 = vst [vmem:[#allocation86_spill] sm:$0xff] %v7850_v15 }
 0x440   : > { %3974 = vst.msk [vmem:[#allocation3 + $0xc8] sm:$0xff] %vm2858_vm5, %v7833_v62 }
 0x445   : > { %v1402_v26 = vpop.xlane.xlu2 %1401 }
 0x446   : > { %v7844_v27 = vmax.f32 %v7841_v35, %v1402_v26  ;;  %v7857_v30 = vpop.f32.mrf.mxu1 }
 0x447   : > { %10526 = vst [vmem:[#allocation88_spill] sm:$0xff] %v7857_v30  ;;  %v1421_v7 = vmax.f32 %v7855_v21, %v7857_v30 }
 0x448   : > { %3975 = vst.msk [vmem:[#allocation3 + $0xd0] sm:$0xff] %vm2858_vm5, %v7844_v27 }
 0x44d   : > { %v7852_v39 = vpop.permute.xlu2 %3044 }
 0x452   : > { %2609 = vadd.xlane.f32.xlu0 %v7567_v5 }
 0x455   : > { %v7859_v19 = vpop.permute.xlu1 %3034  ;;  %v1838_v9 = vpop.permute.xlu2 %1837 }
 0x456   : > { %v2116_v3 = vsub.f32 %v7341_v45, %v1838_v9  ;;  %v2117_v55 = vsub.f32 %v7343_v46, %v1838_v9  ;;  %v3438_v26 = vpop.f32.mrf.mxu2  ;;  %v1415_v45 = vmax.f32 %v7835_v53, %v7837_v59 }
 0x457   : > { %v3647_v29 = vpop.f32.mrf.mxu3 }
 0x458   : > { %v2270_v5 = vmul.f32 1.442695, %v2116_v3  ;;  %v2272_v10 = vmul.f32 1.442695, %v2117_v55  ;;  %v3648_v8 = vadd.f32 %v3647_v29, %v3438_v26  ;;  %v10527_v26 = vld [vmem:[#allocation28_spill] sm:$0xff] }
 0x45a   : > { %v3827_v34 = vadd.f32 %v3648_v8, %v3313_v24  ;;  %1422 = vmax.xlane.f32.xlu0 %v1421_v7  ;;  %5884 = vpow2.f32 %v2270_v5  ;;  %v3314_v8 = vmul.f32 %v7724_v42, %v2930_v50  ;;  %v2114_v7 = vsub.f32 %v10527_v26, %v7816_v4 }
 0x45b   : > { %5886 = vpow2.f32 %v2272_v10  ;;  %v1680_v24 = vmul.f32 1.442695, %v1597_v25 }
 0x45c   : > { %3891 = vst [vmem:[#allocation5 + $0x1e0] sm:$0xff] %v3827_v34  ;;  %v2266_v42 = vmul.f32 1.442695, %v2114_v7 }
 0x45d   : > { %v1828_v46 = vpop.permute.xlu1 %1827 }
 0x45e   : > { %v2112_v9 = vsub.f32 %v7329_v37, %v1828_v46  ;;  %v2113_v30 = vsub.f32 %v7331_v38, %v1828_v46  ;;  %v3441_v21 = vpop.f32.mrf.mxu2  ;;  %v10528_v38 = vld [vmem:[#allocation29_spill] sm:$0xff]  ;;  %v1593_v46 = vsub.f32 %v7532_v60, %v7541_v47  ;;  %v1595_v60 = vsub.f32 %v7591_v12, %v7594_v0 }
 0x45f   : > { %v3650_v32 = vpop.f32.mrf.mxu3  ;;  %v2115_v5 = vsub.f32 %v10528_v38, %v7816_v4 }
 0x460   : > { %v2262_v29 = vmul.f32 1.442695, %v2112_v9  ;;  %v2264_v3 = vmul.f32 1.442695, %v2113_v30  ;;  %v3651_v10 = vadd.f32 %v3650_v32, %v3441_v21  ;;  %1416 = vmax.xlane.f32.xlu1 %v1415_v45  ;;  %v5885_v34 = vpop.eup %5884  ;;  %v1418_v30 = vmax.f32 %v7848_v28, %v7850_v15  ;;  %v2931_v15 = vld [vmem:[#allocation5 + $0x148] sm:$0xff] }
 0x461   : > { %v5887_v55 = vpop.eup %5886  ;;  %v2268_v50 = vmul.f32 1.442695, %v2115_v5  ;;  %v1672_v25 = vmul.f32 1.442695, %v1593_v46  ;;  %v784_v5 = vld [vmem:[#allocation2 + $0x1a0] sm:$0xff] }
 0x462   : > { %5888 = vpow2.f32 %v2262_v29  ;;  %v3828_v37 = vadd.f32 %v3651_v10, %v3314_v8  ;;  %v7877_v49 = vadd.f32 %v5887_v55, %v5885_v34  ;;  %v7905_v10 = vld [vmem:[#allocation3 + $0xf0] sm:$0xff]  ;;  %976 = vmatmul.f32.gmra.mxu0 %v784_v5  ;;  %1185 = vmatmul.f32.gmra.mxu1 %v784_v5 }
 0x463   : > { %5890 = vpow2.f32 %v2264_v3  ;;  %v1676_v3 = vmul.f32 1.442695, %v1595_v60  ;;  %10532 = vst [vmem:[#allocation90_spill] sm:$0xff] %v7905_v10  ;;  %v786_v60 = vld [vmem:[#allocation2 + $0xe8] sm:$0xff] }
 0x464   : > { %10529 = vst [vmem:[#allocation28_spill] sm:$0xff] %v7877_v49  ;;  %2603 = vadd.xlane.f32.xlu2 %v7563_v2  ;;  %5892 = vpow2.f32 %v1680_v24  ;;  %v7888_v2 = vpop.permute.xlu0 %3054  ;;  %v10545_v49 = vld [vmem:[#allocation31_spill] sm:$0xff] }
 0x465   : > { %3892 = vst [vmem:[#allocation5 + $0x30] sm:$0xff] %v3828_v37  ;;  %5894 = vpow2.f32 %v2266_v42  ;;  %v7918_v37 = vpop.f32.mrf.mxu1 }
 0x466   : > { %5896 = vpow2.f32 %v2268_v50  ;;  %10535 = vst [vmem:[#allocation93_spill] sm:$0xff] %v7918_v37 }
 0x467   : > { %5898 = vpow2.f32 %v1672_v25 }
 0x468   : > { %v5889_v21 = vpop.eup %5888  ;;  %5900 = vpow2.f32 %v1676_v3 }
 0x469   : > { %v5891_v45 = vpop.eup %5890  ;;  %3452 = vmatmul.f32.gmra.mxu2 %v5889_v21 }
 0x46a   : > { %3661 = vmatmul.f32.gmra.mxu3 %v5891_v45  ;;  %v7884_v4 = vadd.f32 %v5891_v45, %v5889_v21  ;;  %v7886_v9 = vpop.eup %5892  ;;  %v785_v45 = vld [vmem:[#allocation2 + $0x1f0] sm:$0xff] }
 0x46b   : > { %10530 = vst [vmem:[#allocation29_spill] sm:$0xff] %v7886_v9  ;;  %v7891_v32 = vpop.eup %5894  ;;  %979 = vmatmul.f32.gmra.mxu0 %v785_v45  ;;  %1188 = vmatmul.f32.gmra.mxu1 %v785_v45 }
 0x46c   : > { %1419 = vmax.xlane.f32.xlu2 %v1418_v30  ;;  %v7893_v8 = vpop.eup %5896  ;;  %v7900_v47 = vpop.permute.xlu0 %1847 }
 0x46d   : > { %v7902_v29 = vpop.eup %5898  ;;  %v7935_v30 = vpop.f32.mrf.mxu1 }
 0x46e   : > { %3084 = vperm.xlu0 %5807, %v7886_v9   ;;  %10531 = vst [vmem:[#allocation89_spill] sm:$0xff] %v7902_v29  ;;  %v7913_v12 = vpop.eup %5900 }
 0x46f   : > { %10533 = vst [vmem:[#allocation91_spill] sm:$0xff] %v7913_v12 }
 0x470   : > { %10539 = vst [vmem:[#allocation97_spill] sm:$0xff] %v7935_v30 }
 0x471   : > { %3455 = vmatmul.f32.gmra.mxu2 %v7891_v32 }
 0x472   : > { %3664 = vmatmul.f32.gmra.mxu3 %v7893_v8 }
 0x473   : > { %982 = vmatmul.f32.gmra.mxu0 %v786_v60  ;;  %1191 = vmatmul.f32.gmra.mxu1 %v786_v60 }
 0x475   : > { %v7943_v25 = vpop.f32.mrf.mxu1 }
 0x476   : > { %1877 = vperm.xlu0 %5807, %v7675_v54   ;;  %10541 = vst [vmem:[#allocation99_spill] sm:$0xff] %v7943_v25 }
 0x479   : > { %3458 = vmatmul.f32.gmra.mxu2 %v5885_v34  ;;  %3064 = vperm.xlu1 %5805, %v7902_v29   ;;  %v7916_v34 = vpop.f32.mrf.mxu0 }
 0x47a   : > { %3667 = vmatmul.f32.gmra.mxu3 %v5887_v55  ;;  %10534 = vst [vmem:[#allocation92_spill] sm:$0xff] %v7916_v34  ;;  %v7920_v55 = vld [vmem:[#allocation3 + $0xe0] sm:$0xff] }
 0x47f   : > { %v1414_v26 = vpop.xlane.xlu0 %1413 }
 0x480   : > { %v7908_v7 = vmax.f32 %v7905_v10, %v1414_v26  ;;  %v3315_v10 = vmul.f32 %v7767_v20, %v2931_v15 }
 0x481   : > { %1857 = vperm.xlu1 %5805, %v7594_v0   ;;  %v7928_v0 = vld [vmem:[#allocation3 + $0xe8] sm:$0xff]  ;;  %v7933_v21 = vpop.f32.mrf.mxu0 }
 0x482   : > { %3979 = vst.msk [vmem:[#allocation3 + $0xf0] sm:$0xff] %vm2858_vm5, %v7908_v7 }
 0x483   : > { %10536 = vst [vmem:[#allocation94_spill] sm:$0xff] %v7928_v0 }
 0x484   : > { %3074 = vperm.xlu2 %5806, %v7913_v12   ;;  %10538 = vst [vmem:[#allocation96_spill] sm:$0xff] %v7933_v21 }
 0x488   : > { %v1408_v24 = vpop.xlane.xlu1 %1407 }
 0x489   : > { %v7923_v38 = vmax.f32 %v7920_v55, %v1408_v24  ;;  %v10542_v24 = vld [vmem:[#allocation35_spill] sm:$0xff] }
 0x48b   : > { %3977 = vst.msk [vmem:[#allocation3 + $0xe0] sm:$0xff] %vm2858_vm5, %v7923_v38 }
 0x48c   : > { %1867 = vperm.xlu2 %5806, %v7663_v6   ;;  %v7941_v6 = vpop.f32.mrf.mxu0 }
 0x48d   : > { %10540 = vst [vmem:[#allocation98_spill] sm:$0xff] %v7941_v6  ;;  %v1430_v3 = vmax.f32 %v7941_v6, %v7943_v25  ;;  %v2932_v6 = vld [vmem:[#allocation5 + $0x50] sm:$0xff] }
 0x48e   : > { %v1411_v42 = vpop.xlane.xlu2 %1410  ;;  %v3316_v52 = vmul.f32 %v7859_v19, %v2932_v6  ;;  %v2933_v6 = vld [vmem:[#allocation5 + $0x1f0] sm:$0xff] }
 0x48f   : > { %v7931_v50 = vmax.f32 %v7928_v0, %v1411_v42  ;;  %v10543_v42 = vld [vmem:[#allocation34_spill] sm:$0xff]  ;;  %v10570_v0 = vld [vmem:[#allocation36_spill] sm:$0xff] }
 0x491   : > { %10537 = vst [vmem:[#allocation95_spill] sm:$0xff] %v7931_v50 }
 0x492   : > { %3978 = vst.msk [vmem:[#allocation3 + $0xe8] sm:$0xff] %vm2858_vm5, %v7931_v50 }
 0x496   : > { %v7939_v46 = vpop.permute.xlu2 %3059 }
 0x49e   : > { %v1853_v26 = vpop.permute.xlu2 %1852 }
 0x49f   : > { %v2122_v5 = vsub.f32 %v10542_v24, %v1853_v26  ;;  %v2123_v9 = vsub.f32 %v10543_v42, %v1853_v26  ;;  %v10544_v24 = vld [vmem:[#allocation30_spill] sm:$0xff] }
 0x4a0   : > { %v7949_v28 = vpop.permute.xlu1 %3049  ;;  %1431 = vmax.xlane.f32.xlu0 %v1430_v3 }
 0x4a1   : > { %v2282_v45 = vmul.f32 1.442695, %v2122_v5  ;;  %v2284_v12 = vmul.f32 1.442695, %v2123_v9  ;;  %v3444_v59 = vpop.f32.mrf.mxu2 }
 0x4a2   : > { %v3653_v53 = vpop.f32.mrf.mxu3 }
 0x4a3   : > { %5902 = vpow2.f32 %v2282_v45  ;;  %v3654_v29 = vadd.f32 %v3653_v53, %v3444_v59  ;;  %v10546_v59 = vld [vmem:[#allocation50_spill] sm:$0xff] }
 0x4a4   : > { %5904 = vpow2.f32 %v2284_v12 }
 0x4a5   : > { %v3829_v25 = vadd.f32 %v3654_v29, %v3315_v10  ;;  %v10548_v10 = vld [vmem:[#allocation32_spill] sm:$0xff] }
 0x4a6   : > { %v2120_v12 = vsub.f32 %v10548_v10, %v7900_v47 }
 0x4a7   : > { %3893 = vst [vmem:[#allocation5 + $0x148] sm:$0xff] %v3829_v25  ;;  %v10549_v25 = vld [vmem:[#allocation33_spill] sm:$0xff] }
 0x4a8   : > { %v1843_v60 = vpop.permute.xlu1 %1842  ;;  %2621 = vadd.xlane.f32.xlu0 %v7717_v63  ;;  %v1600_v63 = vsub.f32 %v7736_v40, %v7746_v41  ;;  %v2121_v45 = vsub.f32 %v10549_v25, %v7900_v47 }
 0x4a9   : > { %v5903_v26 = vpop.eup %5902  ;;  %v2118_v42 = vsub.f32 %v10544_v24, %v1843_v60  ;;  %v2119_v3 = vsub.f32 %v10545_v49, %v1843_v60  ;;  %v3447_v5 = vpop.f32.mrf.mxu2  ;;  %v2278_v60 = vmul.f32 1.442695, %v2120_v12  ;;  %v10552_v12 = vld [vmem:[#allocation56_spill] sm:$0xff] }
 0x4aa   : > { %v5905_v9 = vpop.eup %5904  ;;  %v3656_v51 = vpop.f32.mrf.mxu3  ;;  %v1686_v19 = vmul.f32 1.442695, %v1600_v63 }
 0x4ab   : > { %v2274_v20 = vmul.f32 1.442695, %v2118_v42  ;;  %v2276_v15 = vmul.f32 1.442695, %v2119_v3  ;;  %v3657_v53 = vadd.f32 %v3656_v51, %v3447_v5  ;;  %2606 = vadd.xlane.f32.xlu1 %v10546_v59  ;;  %v7957_v29 = vadd.f32 %v5905_v9, %v5903_v26  ;;  %v7968_v59 = vpop.permute.xlu0 %3069 }
 0x4ac   : > { %v1424_v51 = vmax.f32 %v7916_v34, %v7918_v37  ;;  %v2280_v42 = vmul.f32 1.442695, %v2121_v45  ;;  %v3317_v5 = vmul.f32 %v7809_v22, %v2933_v6  ;;  %v2476_v45 = vld [vmem:[#allocation4 + $0x10] sm:$0xff]  ;;  %v10567_v37 = vld [vmem:[#allocation44_spill] sm:$0xff] }
 0x4ad   : > { %10547 = vst [vmem:[#allocation35_spill] sm:$0xff] %v7957_v29  ;;  %5906 = vpow2.f32 %v2274_v20  ;;  %v3830_v49 = vadd.f32 %v3657_v53, %v3316_v52  ;;  %v1427_v53 = vmax.f32 %v7933_v21, %v7935_v30 }
 0x4ae   : > { %5908 = vpow2.f32 %v2276_v15 }
 0x4af   : > { %3894 = vst [vmem:[#allocation5 + $0x50] sm:$0xff] %v3830_v49  ;;  %5910 = vpow2.f32 %v1686_v19 }
 0x4b0   : > { %5912 = vpow2.f32 %v2278_v60  ;;  %v10554_v60 = vld [vmem:[#allocation61_spill] sm:$0xff] }
 0x4b1   : > { %v3450_v24 = vpop.f32.mrf.mxu2  ;;  %5914 = vpow2.f32 %v2280_v42  ;;  %v7994_v42 = vld [vmem:[#allocation3 + $0x108] sm:$0xff] }
 0x4b2   : > { %v3659_v3 = vpop.f32.mrf.mxu3  ;;  %10556 = vst [vmem:[#allocation50_spill] sm:$0xff] %v7994_v42 }
 0x4b3   : > { %v5907_v40 = vpop.eup %5906  ;;  %v3660_v52 = vadd.f32 %v3659_v3, %v3450_v24  ;;  %1425 = vmax.xlane.f32.xlu1 %v1424_v51  ;;  %v7985_v49 = vpop.permute.xlu0 %1862  ;;  %v10553_v51 = vld [vmem:[#allocation42_spill] sm:$0xff] }
 0x4b4   : > { %v5909_v20 = vpop.eup %5908  ;;  %3461 = vmatmul.f32.gmra.mxu2 %v5907_v40  ;;  %v2540_v19 = vmul.f32 %v10553_v51, %v2476_v45  ;;  %v10559_v45 = vld [vmem:[#allocation40_spill] sm:$0xff] }
 0x4b5   : > { %v3831_v47 = vadd.f32 %v3660_v52, %v3317_v5  ;;  %3670 = vmatmul.f32.gmra.mxu3 %v5909_v20  ;;  %2612 = vadd.xlane.f32.xlu2 %v7631_v18  ;;  %v7971_v15 = vadd.f32 %v5909_v20, %v5907_v40  ;;  %v7975_v22 = vpop.eup %5910  ;;  %v1596_v18 = vsub.f32 %v10552_v12, %v7605_v57  ;;  %v10558_v40 = vld [vmem:[#allocation67_spill] sm:$0xff]  ;;  %v2474_v12 = vld [vmem:[#allocation4] sm:$0xff] }
 0x4b6   : > { %10551 = vst [vmem:[#allocation30_spill] sm:$0xff] %v7975_v22  ;;  %v7977_v63 = vpop.eup %5912  ;;  %v2538_v51 = vmul.f32 %v10559_v45, %v2474_v12 }
 0x4b7   : > { %10550 = vst [vmem:[#allocation34_spill] sm:$0xff] %v7971_v15  ;;  %v7979_v10 = vpop.eup %5914  ;;  %v1678_v25 = vmul.f32 1.442695, %v1596_v18  ;;  %v8008_v18 = vpop.f32.mrf.mxu1 }
 0x4b8   : > { %3895 = vst [vmem:[#allocation5 + $0x1f0] sm:$0xff] %v3831_v47  ;;  %v8006_v47 = vpop.f32.mrf.mxu0 }
 0x4b9   : > { %5916 = vpow2.f32 %v1678_v25 }
 0x4bc   : > { %3464 = vmatmul.f32.gmra.mxu2 %v7977_v63  ;;  %3099 = vperm.xlu0 %5807, %v7975_v22  }
 0x4bd   : > { %3673 = vmatmul.f32.gmra.mxu3 %v7979_v10  ;;  %1428 = vmax.xlane.f32.xlu2 %v1427_v53 }
 0x4bf   : > { %v7992_v57 = vpop.eup %5916 }
 0x4c0   : > { %10555 = vst [vmem:[#allocation31_spill] sm:$0xff] %v7992_v57 }
 0x4c4   : > { %3467 = vmatmul.f32.gmra.mxu2 %v5903_v26  ;;  %1892 = vperm.xlu0 %5807, %v7749_v13   ;;  %v10557_v26 = vld [vmem:[#allocation68_spill] sm:$0xff] }
 0x4c5   : > { %3676 = vmatmul.f32.gmra.mxu3 %v5905_v9  ;;  %v2610_v6 = vpop.xlane.xlu0 %2609  ;;  %2618 = vadd.xlane.f32.xlu2 %v10554_v60  ;;  %v1598_v5 = vsub.f32 %v10558_v40, %v10557_v26  ;;  %v8004_v9 = vld [vmem:[#allocation3 + $0xf8] sm:$0xff]  ;;  %v8025_v40 = vpop.f32.mrf.mxu1 }
 0x4c6   : > { %v2796_v24 = vadd.f32 %v2610_v6, %v2540_v19  ;;  %v787_v60 = vld [vmem:[#allocation2 + $0x78] sm:$0xff]  ;;  %10563 = vst [vmem:[#allocation42_spill] sm:$0xff] %v8025_v40 }
 0x4c7   : > { %v1682_v20 = vmul.f32 1.442695, %v1598_v5  ;;  %985 = vmatmul.f32.gmra.mxu0 %v787_v60  ;;  %1194 = vmatmul.f32.gmra.mxu1 %v787_v60  ;;  %v2934_v60 = vld [vmem:[#allocation5 + $0x130] sm:$0xff] }
 0x4c8   : > { %2861 = vst.msk [vmem:[#allocation4 + $0x10] sm:$0xff] %vm2858_vm5, %v2796_v24 }
 0x4c9   : > { %5918 = vpow2.f32 %v1682_v20 }
 0x4cc   : > { %3079 = vperm.xlu1 %5805, %v7992_v57  }
 0x4cd   : > { %v1423_v3 = vpop.xlane.xlu0 %1422 }
 0x4ce   : > { %v8000_v52 = vmax.f32 %v7994_v42, %v1423_v3  ;;  %v8020_v3 = vpop.f32.mrf.mxu0  ;;  %v10568_v42 = vld [vmem:[#allocation45_spill] sm:$0xff] }
 0x4cf   : > { %v8018_v24 = vpop.eup %5918  ;;  %10561 = vst [vmem:[#allocation33_spill] sm:$0xff] %v8020_v3 }
 0x4d0   : > { %3982 = vst.msk [vmem:[#allocation3 + $0x108] sm:$0xff] %vm2858_vm5, %v8000_v52 }
 0x4d1   : > { %10560 = vst [vmem:[#allocation32_spill] sm:$0xff] %v8018_v24 }
 0x4d3   : > { %v1417_v53 = vpop.xlane.xlu1 %1416 }
 0x4d4   : > { %v8011_v25 = vmax.f32 %v8004_v9, %v1417_v53  ;;  %1872 = vperm.xlu1 %5805, %v10557_v26   ;;  %v8023_v26 = vld [vmem:[#allocation3 + $0x100] sm:$0xff]  ;;  %v788_v53 = vld [vmem:[#allocation2 + $0x70] sm:$0xff] }
 0x4d5   : > { %10562 = vst [vmem:[#allocation56_spill] sm:$0xff] %v8023_v26  ;;  %988 = vmatmul.f32.gmra.mxu0 %v788_v53  ;;  %1197 = vmatmul.f32.gmra.mxu1 %v788_v53  ;;  %v3318_v53 = vmul.f32 %v7852_v39, %v2934_v60  ;;  %v2629_v39 = vadd.f32 %v7806_v33, %v7804_v1 }
 0x4d6   : > { %3980 = vst.msk [vmem:[#allocation3 + $0xf8] sm:$0xff] %vm2858_vm5, %v8011_v25  ;;  %v8033_v12 = vpop.f32.mrf.mxu0  ;;  %v1603_v33 = vsub.f32 %v7828_v61, %v7833_v62 }
 0x4d7   : > { %v2604_v19 = vpop.xlane.xlu2 %2603  ;;  %10565 = vst [vmem:[#allocation68_spill] sm:$0xff] %v8033_v12 }
 0x4d8   : > { %v2794_v6 = vadd.f32 %v2604_v19, %v2538_v51  ;;  %v8037_v51 = vpop.f32.mrf.mxu1  ;;  %v789_v19 = vld [vmem:[#allocation2 + $0x90] sm:$0xff] }
 0x4d9   : > { %10566 = vst [vmem:[#allocation67_spill] sm:$0xff] %v8037_v51 }
 0x4da   : > { %2859 = vst.msk [vmem:[#allocation4] sm:$0xff] %vm2858_vm5, %v2794_v6  ;;  %v1439_v6 = vmax.f32 %v8033_v12, %v8037_v51  ;;  %v2935_v12 = vld [vmem:[#allocation5 + $0x190] sm:$0xff] }
 0x4dd   : > { %3089 = vperm.xlu2 %5806, %v8018_v24   ;;  %991 = vmatmul.f32.gmra.mxu0 %v789_v19 }
 0x4de   : > { %1200 = vmatmul.f32.gmra.mxu1 %v789_v19 }
 0x4df   : > { %v1420_v5 = vpop.xlane.xlu2 %1419 }
 0x4e0   : > { %v8028_v20 = vmax.f32 %v8023_v26, %v1420_v5 }
 0x4e2   : > { %10564 = vst [vmem:[#allocation61_spill] sm:$0xff] %v8028_v20 }
 0x4e3   : > { %3981 = vst.msk [vmem:[#allocation3 + $0x100] sm:$0xff] %vm2858_vm5, %v8028_v20  ;;  %v10569_v20 = vld [vmem:[#allocation37_spill] sm:$0xff] }
 0x4e5   : > { %1882 = vperm.xlu2 %5806, %v7746_v41  }
 0x4e7   : > { %v8035_v45 = vpop.permute.xlu2 %3074 }
 0x4eb   : > { %v8041_v5 = vpop.permute.xlu1 %3064 }
 0x4ec   : > { %v3453_v22 = vpop.f32.mrf.mxu2 }
 0x4ed   : > { %v3662_v30 = vpop.f32.mrf.mxu3 }
 0x4ee   : > { %v3663_v41 = vadd.f32 %v3662_v30, %v3453_v22  ;;  %1440 = vmax.xlane.f32.xlu0 %v1439_v6 }
 0x4ef   : > { %v1868_v21 = vpop.permute.xlu2 %1867 }
 0x4f0   : > { %v3832_v24 = vadd.f32 %v3663_v41, %v3318_v53  ;;  %v2128_v34 = vsub.f32 %v10567_v37, %v1868_v21  ;;  %v2129_v57 = vsub.f32 %v10568_v42, %v1868_v21  ;;  %v3319_v37 = vmul.f32 %v7949_v28, %v2935_v12  ;;  %v2936_v28 = vld [vmem:[#allocation5 + $0x8] sm:$0xff]  ;;  %v10573_v41 = vld [vmem:[#allocation62_spill] sm:$0xff] }
 0x4f1   : > { %v3320_v60 = vmul.f32 %v7888_v2, %v2936_v28 }
 0x4f2   : > { %3896 = vst [vmem:[#allocation5 + $0x130] sm:$0xff] %v3832_v24  ;;  %v2294_v29 = vmul.f32 1.442695, %v2128_v34  ;;  %v2296_v51 = vmul.f32 1.442695, %v2129_v57  ;;  %v10571_v34 = vld [vmem:[#allocation39_spill] sm:$0xff] }
 0x4f3   : > { %v1858_v26 = vpop.permute.xlu1 %1857  ;;  %v2126_v57 = vsub.f32 %v10571_v34, %v7985_v49  ;;  %v10572_v24 = vld [vmem:[#allocation38_spill] sm:$0xff] }
 0x4f4   : > { %5920 = vpow2.f32 %v2294_v29  ;;  %v2124_v19 = vsub.f32 %v10569_v20, %v1858_v26  ;;  %v2125_v50 = vsub.f32 %v10570_v0, %v1858_v26  ;;  %v3456_v15 = vpop.f32.mrf.mxu2  ;;  %v2127_v0 = vsub.f32 %v10572_v24, %v7985_v49  ;;  %v8082_v24 = vld [vmem:[#allocation3 + $0x120] sm:$0xff] }
 0x4f5   : > { %5922 = vpow2.f32 %v2296_v51  ;;  %v3665_v30 = vpop.f32.mrf.mxu3  ;;  %v2290_v20 = vmul.f32 1.442695, %v2126_v57  ;;  %v10575_v57 = vld [vmem:[#allocation66_spill] sm:$0xff] }
 0x4f6   : > { %v2286_v22 = vmul.f32 1.442695, %v2124_v19  ;;  %v2288_v21 = vmul.f32 1.442695, %v2125_v50  ;;  %v3666_v42 = vadd.f32 %v3665_v30, %v3456_v15  ;;  %2630 = vadd.xlane.f32.xlu0 %v2629_v39  ;;  %v2292_v12 = vmul.f32 1.442695, %v2127_v0  ;;  %v8063_v30 = vpop.permute.xlu0 %3084 }
 0x4f7   : > { %v1692_v19 = vmul.f32 1.442695, %v1603_v33 }
 0x4f8   : > { %5924 = vpow2.f32 %v2286_v22  ;;  %v3833_v29 = vadd.f32 %v3666_v42, %v3319_v37  ;;  %v1433_v37 = vmax.f32 %v8006_v47, %v8008_v18  ;;  %v1436_v42 = vmax.f32 %v8020_v3, %v8025_v40 }
 0x4f9   : > { %5926 = vpow2.f32 %v2288_v21 }
 0x4fa   : > { %v5921_v26 = vpop.eup %5920  ;;  %3897 = vst [vmem:[#allocation5 + $0x190] sm:$0xff] %v3833_v29  ;;  %5928 = vpow2.f32 %v2290_v20  ;;  %v1599_v29 = vsub.f32 %v10575_v57, %v7675_v54  ;;  %v2480_v20 = vld [vmem:[#allocation4 + $0x30] sm:$0xff]  ;;  %v2475_v54 = vld [vmem:[#allocation4 + $0x8] sm:$0xff] }
 0x4fb   : > { %v5923_v1 = vpop.eup %5922  ;;  %5930 = vpow2.f32 %v2292_v12 }
 0x4fc   : > { %v3459_v50 = vpop.f32.mrf.mxu2  ;;  %v8057_v15 = vadd.f32 %v5923_v1, %v5921_v26  ;;  %5932 = vpow2.f32 %v1692_v19  ;;  %v1684_v33 = vmul.f32 1.442695, %v1599_v29  ;;  %v8102_v19 = vpop.f32.mrf.mxu1 }
 0x4fd   : > { %v3668_v51 = vpop.f32.mrf.mxu3  ;;  %10578 = vst [vmem:[#allocation44_spill] sm:$0xff] %v8102_v19 }
 0x4fe   : > { %v5925_v6 = vpop.eup %5924  ;;  %v3669_v53 = vadd.f32 %v3668_v51, %v3459_v50  ;;  %2615 = vadd.xlane.f32.xlu1 %v10573_v41  ;;  %v8078_v34 = vpop.permute.xlu0 %1877  ;;  %5934 = vpow2.f32 %v1684_v33  ;;  %v10577_v51 = vld [vmem:[#allocation41_spill] sm:$0xff]  ;;  %v1601_v41 = vsub.f32 %v7755_v11, %v7762_v17  ;;  %v10579_v11 = vld [vmem:[#allocation51_spill] sm:$0xff] }
 0x4ff   : > { %v5927_v49 = vpop.eup %5926  ;;  %3470 = vmatmul.f32.gmra.mxu2 %v5925_v6 }
 0x500   : > { %v3834_v39 = vadd.f32 %v3669_v53, %v3320_v60  ;;  %3679 = vmatmul.f32.gmra.mxu3 %v5927_v49  ;;  %v8061_v61 = vadd.f32 %v5927_v49, %v5925_v6  ;;  %v8067_v2 = vpop.eup %5928  ;;  %v2539_v6 = vmul.f32 %v10577_v51, %v2475_v54 }
 0x501   : > { %v8069_v22 = vpop.eup %5930 }
 0x502   : > { %3898 = vst [vmem:[#allocation5 + $0x8] sm:$0xff] %v3834_v39  ;;  %v8073_v21 = vpop.eup %5932  ;;  %v1688_v39 = vmul.f32 1.442695, %v1601_v41 }
 0x503   : > { %10574 = vst [vmem:[#allocation40_spill] sm:$0xff] %v8073_v21 }
 0x504   : > { %v8093_v60 = vpop.eup %5934  ;;  %5936 = vpow2.f32 %v1688_v39  ;;  %v8116_v54 = vpop.f32.mrf.mxu1  ;;  %v2937_v39 = vld [vmem:[#allocation5 + $0x88] sm:$0xff] }
 0x505   : > { %10581 = vst [vmem:[#allocation37_spill] sm:$0xff] %v8116_v54 }
 0x506   : > { %1434 = vmax.xlane.f32.xlu1 %v1433_v37  ;;  %v8104_v37 = vld [vmem:[#allocation3 + $0x110] sm:$0xff] }
 0x507   : > { %3473 = vmatmul.f32.gmra.mxu2 %v8067_v2 }
 0x508   : > { %3682 = vmatmul.f32.gmra.mxu3 %v8069_v22 }
 0x50a   : > { %3114 = vperm.xlu0 %5807, %v8073_v21  }
 0x50e   : > { %1437 = vmax.xlane.f32.xlu2 %v1436_v42  ;;  %v2477_v42 = vld [vmem:[#allocation4 + $0x18] sm:$0xff] }
 0x50f   : > { %3476 = vmatmul.f32.gmra.mxu2 %v5921_v26  ;;  %v10576_v26 = vld [vmem:[#allocation64_spill] sm:$0xff] }
 0x510   : > { %3685 = vmatmul.f32.gmra.mxu3 %v5923_v1  ;;  %v2544_v50 = vmul.f32 %v10576_v26, %v2480_v20  ;;  %v790_v26 = vld [vmem:[#allocation2 + $0x1d8] sm:$0xff] }
 0x511   : > { %994 = vmatmul.f32.gmra.mxu0 %v790_v26  ;;  %1203 = vmatmul.f32.gmra.mxu1 %v790_v26 }
 0x512   : > { %1907 = vperm.xlu0 %5807, %v7825_v23  }
 0x513   : > { %v1432_v0 = vpop.xlane.xlu0 %1431 }
 0x514   : > { %v8086_v28 = vmax.f32 %v8082_v24, %v1432_v0  ;;  %v2541_v0 = vmul.f32 %v10579_v11, %v2477_v42 }
 0x516   : > { %3985 = vst.msk [vmem:[#allocation3 + $0x120] sm:$0xff] %vm2858_vm5, %v8086_v28  ;;  %2627 = vadd.xlane.f32.xlu2 %v7799_v43  ;;  %v8100_v43 = vpop.f32.mrf.mxu0 }
 0x51b   : > { %v2622_v1 = vpop.xlane.xlu0 %2621 }
 0x51c   : > { %v2800_v12 = vadd.f32 %v2622_v1, %v2544_v50  ;;  %v8118_v1 = vpop.eup %5936 }
 0x51d   : > { %10582 = vst [vmem:[#allocation36_spill] sm:$0xff] %v8118_v1 }
 0x51e   : > { %2865 = vst.msk [vmem:[#allocation4 + $0x30] sm:$0xff] %vm2858_vm5, %v2800_v12  ;;  %v2607_v53 = vpop.xlane.xlu1 %2606  ;;  %v8114_v50 = vpop.f32.mrf.mxu0  ;;  %v791_v12 = vld [vmem:[#allocation2 + $0xd0] sm:$0xff] }
 0x51f   : > { %v2795_v49 = vadd.f32 %v2607_v53, %v2539_v6  ;;  %3094 = vperm.xlu1 %5805, %v8093_v60   ;;  %10580 = vst [vmem:[#allocation45_spill] sm:$0xff] %v8114_v50  ;;  %997 = vmatmul.f32.gmra.mxu0 %v791_v12  ;;  %v2479_v53 = vld [vmem:[#allocation4 + $0x28] sm:$0xff] }
 0x520   : > { %1206 = vmatmul.f32.gmra.mxu1 %v791_v12  ;;  %v3321_v12 = vmul.f32 %v7939_v46, %v2937_v39  ;;  %v2638_v46 = vadd.f32 %v7893_v8, %v7891_v32  ;;  %v10588_v8 = vld [vmem:[#allocation54_spill] sm:$0xff] }
 0x521   : > { %2860 = vst.msk [vmem:[#allocation4 + $0x8] sm:$0xff] %vm2858_vm5, %v2795_v49  ;;  %v8130_v49 = vpop.f32.mrf.mxu1 }
 0x522   : > { %10584 = vst [vmem:[#allocation38_spill] sm:$0xff] %v8130_v49 }
 0x526   : > { %v1426_v57 = vpop.xlane.xlu1 %1425  ;;  %v8128_v41 = vpop.f32.mrf.mxu0 }
 0x527   : > { %v8107_v29 = vmax.f32 %v8104_v37, %v1426_v57  ;;  %1887 = vperm.xlu1 %5805, %v7762_v17   ;;  %v8121_v17 = vld [vmem:[#allocation3 + $0x118] sm:$0xff]  ;;  %10583 = vst [vmem:[#allocation39_spill] sm:$0xff] %v8128_v41  ;;  %v10585_v57 = vld [vmem:[#allocation53_spill] sm:$0xff]  ;;  %v1448_v26 = vmax.f32 %v8128_v41, %v8130_v49 }
 0x528   : > { %v2613_v33 = vpop.xlane.xlu2 %2612  ;;  %v2543_v11 = vmul.f32 %v10585_v57, %v2479_v53 }
 0x529   : > { %3983 = vst.msk [vmem:[#allocation3 + $0x110] sm:$0xff] %vm2858_vm5, %v8107_v29  ;;  %v2797_v20 = vadd.f32 %v2613_v33, %v2541_v0  ;;  %v792_v0 = vld [vmem:[#allocation2 + $0xb8] sm:$0xff] }
 0x52a   : > { %1000 = vmatmul.f32.gmra.mxu0 %v792_v0  ;;  %1209 = vmatmul.f32.gmra.mxu1 %v792_v0  ;;  %v10587_v0 = vld [vmem:[#allocation47_spill] sm:$0xff] }
 0x52b   : > { %2862 = vst.msk [vmem:[#allocation4 + $0x18] sm:$0xff] %vm2858_vm5, %v2797_v20 }
 0x52e   : > { %3104 = vperm.xlu2 %5806, %v8118_v1  }
 0x530   : > { %v1429_v51 = vpop.xlane.xlu2 %1428 }
 0x531   : > { %v8124_v6 = vmax.f32 %v8121_v17, %v1429_v51 }
 0x533   : > { %3984 = vst.msk [vmem:[#allocation3 + $0x118] sm:$0xff] %vm2858_vm5, %v8124_v6 }
 0x536   : > { %1897 = vperm.xlu2 %5806, %v7833_v62   ;;  %v2938_v62 = vld [vmem:[#allocation5 + $0x38] sm:$0xff] }
 0x537   : > { %v3462_v42 = vpop.f32.mrf.mxu2  ;;  %v3322_v49 = vmul.f32 %v8041_v5, %v2938_v62 }
 0x538   : > { %v3671_v33 = vpop.f32.mrf.mxu3  ;;  %v2619_v20 = vpop.xlane.xlu2 %2618 }
 0x539   : > { %v3672_v51 = vadd.f32 %v3671_v33, %v3462_v42  ;;  %v2799_v21 = vadd.f32 %v2619_v20, %v2543_v11  ;;  %v2939_v42 = vld [vmem:[#allocation5 + $0xe0] sm:$0xff]  ;;  %v10586_v11 = vld [vmem:[#allocation46_spill] sm:$0xff] }
 0x53b   : > { %v3835_v40 = vadd.f32 %v3672_v51, %v3321_v12  ;;  %2864 = vst.msk [vmem:[#allocation4 + $0x28] sm:$0xff] %vm2858_vm5, %v2799_v21  ;;  %v3323_v12 = vmul.f32 %v7968_v59, %v2939_v42 }
 0x53c   : > { %1449 = vmax.xlane.f32.xlu0 %v1448_v26  ;;  %v1606_v26 = vsub.f32 %v7920_v55, %v7923_v38 }
 0x53d   : > { %3899 = vst [vmem:[#allocation5 + $0x88] sm:$0xff] %v3835_v40 }
 0x53e   : > { %v8138_v3 = vpop.permute.xlu1 %3079  ;;  %v1698_v42 = vmul.f32 1.442695, %v1606_v26  ;;  %v1442_v26 = vmax.f32 %v8100_v43, %v8102_v19 }
 0x53f   : > { %v3465_v53 = vpop.f32.mrf.mxu2 }
 0x540   : > { %v3674_v57 = vpop.f32.mrf.mxu3  ;;  %v8140_v1 = vpop.permute.xlu2 %3089 }
 0x541   : > { %v3675_v41 = vadd.f32 %v3674_v57, %v3465_v53 }
 0x543   : > { %v3836_v39 = vadd.f32 %v3675_v41, %v3322_v49  ;;  %v10589_v49 = vld [vmem:[#allocation55_spill] sm:$0xff] }
 0x544   : > { %2639 = vadd.xlane.f32.xlu0 %v2638_v46  ;;  %v10590_v46 = vld [vmem:[#allocation48_spill] sm:$0xff] }
 0x545   : > { %3900 = vst [vmem:[#allocation5 + $0x38] sm:$0xff] %v3836_v39  ;;  %v2132_v39 = vsub.f32 %v10590_v46, %v8078_v34 }
 0x546   : > { %v1873_v21 = vpop.permute.xlu1 %1872 }
 0x547   : > { %v2130_v40 = vsub.f32 %v10586_v11, %v1873_v21  ;;  %v2131_v33 = vsub.f32 %v10587_v0, %v1873_v21  ;;  %v3468_v20 = vpop.f32.mrf.mxu2  ;;  %v10591_v0 = vld [vmem:[#allocation49_spill] sm:$0xff] }
 0x548   : > { %v3677_v5 = vpop.f32.mrf.mxu3  ;;  %v1883_v51 = vpop.permute.xlu2 %1882  ;;  %v2133_v55 = vsub.f32 %v10591_v0, %v8078_v34 }
 0x549   : > { %v2298_v62 = vmul.f32 1.442695, %v2130_v40  ;;  %v2300_v53 = vmul.f32 1.442695, %v2131_v33  ;;  %v3678_v32 = vadd.f32 %v3677_v5, %v3468_v20  ;;  %v2134_v41 = vsub.f32 %v10588_v8, %v1883_v51  ;;  %v8156_v33 = vpop.permute.xlu0 %3099 }
 0x54a   : > { %v2135_v57 = vsub.f32 %v10589_v49, %v1883_v51  ;;  %v2302_v40 = vmul.f32 1.442695, %v2132_v39  ;;  %v2304_v20 = vmul.f32 1.442695, %v2133_v55  ;;  %v1445_v49 = vmax.f32 %v8114_v50, %v8116_v54  ;;  %v2941_v50 = vld [vmem:[#allocation5 + $0x1a8] sm:$0xff] }
 0x54b   : > { %5938 = vpow2.f32 %v2298_v62  ;;  %v3837_v21 = vadd.f32 %v3678_v32, %v3323_v12  ;;  %v2306_v11 = vmul.f32 1.442695, %v2134_v41 }
 0x54c   : > { %5940 = vpow2.f32 %v2300_v53  ;;  %v2308_v59 = vmul.f32 1.442695, %v2135_v57  ;;  %v8178_v57 = vld [vmem:[#allocation3 + $0x138] sm:$0xff] }
 0x54d   : > { %3901 = vst [vmem:[#allocation5 + $0xe0] sm:$0xff] %v3837_v21  ;;  %5942 = vpow2.f32 %v2306_v11  ;;  %v1602_v21 = vsub.f32 %v7742_v44, %v7749_v13  ;;  %v2483_v11 = vld [vmem:[#allocation4 + $0x48] sm:$0xff]  ;;  %v1604_v44 = vsub.f32 %v7841_v35, %v7844_v27  ;;  %v10595_v13 = vld [vmem:[#allocation43_spill] sm:$0xff] }
 0x54e   : > { %5944 = vpow2.f32 %v2308_v59  ;;  %v2547_v55 = vmul.f32 %v7726_v31, %v2483_v11 }
 0x54f   : > { %5946 = vpow2.f32 %v1698_v42  ;;  %v1690_v0 = vmul.f32 1.442695, %v1602_v21  ;;  %v1694_v31 = vmul.f32 1.442695, %v1604_v44 }
 0x550   : > { %5948 = vpow2.f32 %v2302_v40  ;;  %v2478_v40 = vld [vmem:[#allocation4 + $0x20] sm:$0xff] }
 0x551   : > { %v5939_v5 = vpop.eup %5938  ;;  %2624 = vadd.xlane.f32.xlu1 %v7712_v48  ;;  %5950 = vpow2.f32 %v2304_v20  ;;  %v8170_v48 = vpop.permute.xlu0 %1892 }
 0x552   : > { %v5941_v51 = vpop.eup %5940  ;;  %3479 = vmatmul.f32.gmra.mxu2 %v5939_v5  ;;  %5952 = vpow2.f32 %v1690_v0  ;;  %v8191_v20 = vpop.f32.mrf.mxu1 }
 0x553   : > { %v5943_v12 = vpop.eup %5942  ;;  %3688 = vmatmul.f32.gmra.mxu3 %v5941_v51  ;;  %v8159_v34 = vadd.f32 %v5941_v51, %v5939_v5  ;;  %10593 = vst [vmem:[#allocation66_spill] sm:$0xff] %v8191_v20  ;;  %v8193_v5 = vpop.f32.mrf.mxu0  ;;  %v2542_v51 = vmul.f32 %v10595_v13, %v2478_v40  ;;  %5954 = vpow2.f32 %v1694_v31 }
 0x554   : > { %v5945_v62 = vpop.eup %5944  ;;  %10594 = vst [vmem:[#allocation64_spill] sm:$0xff] %v8193_v5 }
 0x555   : > { %v8163_v53 = vadd.f32 %v5945_v62, %v5943_v12  ;;  %v8165_v32 = vpop.eup %5946 }
 0x556   : > { %10592 = vst [vmem:[#allocation62_spill] sm:$0xff] %v8165_v32  ;;  %v8168_v8 = vpop.eup %5948 }
 0x557   : > { %v8172_v41 = vpop.eup %5950 }
 0x558   : > { %3129 = vperm.xlu0 %5807, %v8165_v32   ;;  %v795_v32 = vld [vmem:[#allocation2 + $0x1c8] sm:$0xff] }
 0x559   : > { %1443 = vmax.xlane.f32.xlu1 %v1442_v26  ;;  %v8202_v26 = vld [vmem:[#allocation3 + $0x128] sm:$0xff] }
 0x55a   : > { %3482 = vmatmul.f32.gmra.mxu2 %v8168_v8 }
 0x55b   : > { %3691 = vmatmul.f32.gmra.mxu3 %v8172_v41  ;;  %v8206_v21 = vpop.f32.mrf.mxu0 }
 0x55c   : > { %10597 = vst [vmem:[#allocation51_spill] sm:$0xff] %v8206_v21 }
 0x55f   : > { %1446 = vmax.xlane.f32.xlu2 %v1445_v49  ;;  %v793_v49 = vld [vmem:[#allocation2 + $0x88] sm:$0xff] }
 0x560   : > { %1922 = vperm.xlu0 %5807, %v7908_v7   ;;  %1003 = vmatmul.f32.gmra.mxu0 %v793_v49 }
 0x561   : > { %v1441_v46 = vpop.xlane.xlu0 %1440  ;;  %1212 = vmatmul.f32.gmra.mxu1 %v793_v49  ;;  %v2482_v49 = vld [vmem:[#allocation4 + $0x40] sm:$0xff] }
 0x562   : > { %v8182_v39 = vmax.f32 %v8178_v57, %v1441_v46  ;;  %3485 = vmatmul.f32.gmra.mxu2 %v5943_v12  ;;  %v8198_v12 = vpop.eup %5952  ;;  %v8204_v46 = vpop.f32.mrf.mxu1 }
 0x563   : > { %3694 = vmatmul.f32.gmra.mxu3 %v5945_v62  ;;  %10596 = vst [vmem:[#allocation41_spill] sm:$0xff] %v8204_v46  ;;  %v8214_v0 = vpop.eup %5954 }
 0x564   : > { %3988 = vst.msk [vmem:[#allocation3 + $0x138] sm:$0xff] %vm2858_vm5, %v8182_v39 }
 0x565   : > { %10598 = vst [vmem:[#allocation53_spill] sm:$0xff] %v8214_v0 }
 0x567   : > { %2636 = vadd.xlane.f32.xlu2 %v7884_v4 }
 0x569   : > { %v2631_v59 = vpop.xlane.xlu0 %2630 }
 0x56a   : > { %v2803_v42 = vadd.f32 %v2631_v59, %v2547_v55  ;;  %v8217_v55 = vld [vmem:[#allocation3 + $0x130] sm:$0xff]  ;;  %v794_v59 = vld [vmem:[#allocation2 + $0xa8] sm:$0xff] }
 0x56b   : > { %1006 = vmatmul.f32.gmra.mxu0 %v794_v59  ;;  %1215 = vmatmul.f32.gmra.mxu1 %v794_v59 }
 0x56c   : > { %2868 = vst.msk [vmem:[#allocation4 + $0x48] sm:$0xff] %vm2858_vm5, %v2803_v42  ;;  %v2940_v42 = vld [vmem:[#allocation5 + $0x10] sm:$0xff] }
 0x571   : > { %v2616_v4 = vpop.xlane.xlu1 %2615 }
 0x572   : > { %v2798_v62 = vadd.f32 %v2616_v4, %v2542_v51  ;;  %3109 = vperm.xlu1 %5805, %v8198_v12   ;;  %v8222_v51 = vpop.f32.mrf.mxu1  ;;  %v8224_v4 = vpop.f32.mrf.mxu0 }
 0x573   : > { %10599 = vst [vmem:[#allocation46_spill] sm:$0xff] %v8222_v51  ;;  %v1457_v59 = vmax.f32 %v8224_v4, %v8222_v51  ;;  %1009 = vmatmul.f32.gmra.mxu0 %v795_v32  ;;  %1218 = vmatmul.f32.gmra.mxu1 %v795_v32 }
 0x574   : > { %2863 = vst.msk [vmem:[#allocation4 + $0x20] sm:$0xff] %vm2858_vm5, %v2798_v62  ;;  %v3324_v62 = vmul.f32 %v8035_v45, %v2940_v42 }
 0x575   : > { %10600 = vst [vmem:[#allocation47_spill] sm:$0xff] %v8224_v4 }
 0x579   : > { %v1435_v35 = vpop.xlane.xlu1 %1434 }
 0x57a   : > { %v8209_v11 = vmax.f32 %v8202_v26, %v1435_v35  ;;  %1902 = vperm.xlu1 %5805, %v7844_v27  }
 0x57c   : > { %3986 = vst.msk [vmem:[#allocation3 + $0x128] sm:$0xff] %vm2858_vm5, %v8209_v11 }
 0x57f   : > { %3119 = vperm.xlu2 %5806, %v8214_v0  }
 0x581   : > { %v1438_v40 = vpop.xlane.xlu2 %1437 }
 0x582   : > { %v8220_v44 = vmax.f32 %v8217_v55, %v1438_v40  ;;  %v3471_v13 = vpop.f32.mrf.mxu2  ;;  %v10601_v40 = vld [vmem:[#allocation65_spill] sm:$0xff] }
 0x583   : > { %v3680_v27 = vpop.f32.mrf.mxu3  ;;  %v2546_v54 = vmul.f32 %v10601_v40, %v2482_v49 }
 0x584   : > { %3987 = vst.msk [vmem:[#allocation3 + $0x130] sm:$0xff] %vm2858_vm5, %v8220_v44  ;;  %v3681_v31 = vadd.f32 %v3680_v27, %v3471_v13  ;;  %v3325_v13 = vmul.f32 %v8138_v3, %v2941_v50  ;;  %v1609_v3 = vsub.f32 %v8004_v9, %v8011_v25 }
 0x586   : > { %v3838_v35 = vadd.f32 %v3681_v31, %v3324_v62  ;;  %v2942_v31 = vld [vmem:[#allocation5 + $0xa0] sm:$0xff]  ;;  %v1704_v50 = vmul.f32 1.442695, %v1609_v3 }
 0x587   : > { %1912 = vperm.xlu2 %5806, %v7923_v38   ;;  %v2647_v38 = vadd.f32 %v7979_v10, %v7977_v63  ;;  %v10602_v63 = vld [vmem:[#allocation57_spill] sm:$0xff] }
 0x588   : > { %3902 = vst [vmem:[#allocation5 + $0x10] sm:$0xff] %v3838_v35  ;;  %5956 = vpow2.f32 %v1704_v50 }
 0x589   : > { %v2628_v0 = vpop.xlane.xlu2 %2627 }
 0x58a   : > { %v2802_v45 = vadd.f32 %v2628_v0, %v2546_v54  ;;  %v3474_v42 = vpop.f32.mrf.mxu2  ;;  %1458 = vmax.xlane.f32.xlu0 %v1457_v59  ;;  %v3326_v0 = vmul.f32 %v8063_v30, %v2942_v31  ;;  %v8248_v31 = vpop.permute.xlu0 %3114 }
 0x58b   : > { %v3683_v19 = vpop.f32.mrf.mxu3 }
 0x58c   : > { %2867 = vst.msk [vmem:[#allocation4 + $0x40] sm:$0xff] %vm2858_vm5, %v2802_v45  ;;  %v3684_v27 = vadd.f32 %v3683_v19, %v3474_v42  ;;  %v10603_v42 = vld [vmem:[#allocation58_spill] sm:$0xff] }
 0x58e   : > { %v3839_v62 = vadd.f32 %v3684_v27, %v3325_v13  ;;  %v8254_v3 = vpop.eup %5956 }
 0x58f   : > { %10606 = vst [vmem:[#allocation54_spill] sm:$0xff] %v8254_v3 }
 0x590   : > { %3903 = vst [vmem:[#allocation5 + $0x1a8] sm:$0xff] %v3839_v62 }
 0x591   : > { %v8237_v49 = vpop.permute.xlu1 %3094  ;;  %v8239_v35 = vpop.permute.xlu2 %3104 }
 0x592   : > { %v3477_v32 = vpop.f32.mrf.mxu2  ;;  %2648 = vadd.xlane.f32.xlu0 %v2647_v38 }
 0x593   : > { %v3686_v54 = vpop.f32.mrf.mxu3 }
 0x594   : > { %v3687_v59 = vadd.f32 %v3686_v54, %v3477_v32  ;;  %v10604_v32 = vld [vmem:[#allocation59_spill] sm:$0xff] }
 0x595   : > { %v2138_v54 = vsub.f32 %v10604_v32, %v8170_v48 }
 0x596   : > { %v3840_v19 = vadd.f32 %v3687_v59, %v3326_v0  ;;  %v10605_v0 = vld [vmem:[#allocation60_spill] sm:$0xff] }
 0x597   : > { %v2139_v59 = vsub.f32 %v10605_v0, %v8170_v48 }
 0x598   : > { %3904 = vst [vmem:[#allocation5 + $0xa0] sm:$0xff] %v3840_v19 }
 0x599   : > { %v1888_v40 = vpop.permute.xlu1 %1887  ;;  %v1898_v45 = vpop.permute.xlu2 %1897 }
 0x59a   : > { %v2136_v10 = vsub.f32 %v10602_v63, %v1888_v40  ;;  %v2137_v13 = vsub.f32 %v10603_v42, %v1888_v40  ;;  %v2140_v27 = vsub.f32 %v7668_v58, %v1898_v45  ;;  %v2141_v62 = vsub.f32 %v7670_v16, %v1898_v45 }
 0x59b   : > { %v2314_v58 = vmul.f32 1.442695, %v2138_v54  ;;  %v2316_v16 = vmul.f32 1.442695, %v2139_v59  ;;  %v1451_v63 = vmax.f32 %v8193_v5, %v8191_v20  ;;  %v10609_v59 = vld [vmem:[#allocation34_spill] sm:$0xff] }
 0x59c   : > { %v2310_v38 = vmul.f32 1.442695, %v2136_v10  ;;  %v2312_v51 = vmul.f32 1.442695, %v2137_v13  ;;  %v2318_v30 = vmul.f32 1.442695, %v2140_v27 }
 0x59d   : > { %v2320_v9 = vmul.f32 1.442695, %v2141_v62  ;;  %v8273_v27 = vld [vmem:[#allocation3 + $0x150] sm:$0xff] }
 0x59e   : > { %5958 = vpow2.f32 %v2310_v38  ;;  %10607 = vst [vmem:[#allocation55_spill] sm:$0xff] %v8273_v27 }
 0x59f   : > { %5960 = vpow2.f32 %v2312_v51  ;;  %v8260_v51 = vpop.permute.xlu0 %1907 }
 0x5a0   : > { %5962 = vpow2.f32 %v2318_v30  ;;  %v2486_v30 = vld [vmem:[#allocation4 + $0x60] sm:$0xff] }
 0x5a1   : > { %5964 = vpow2.f32 %v2320_v9  ;;  %v1605_v9 = vsub.f32 %v7822_v56, %v7825_v23  ;;  %v2550_v32 = vmul.f32 %v7813_v36, %v2486_v30  ;;  %v10614_v56 = vld [vmem:[#allocation52_spill] sm:$0xff] }
 0x5a2   : > { %5966 = vpow2.f32 %v2314_v58 }
 0x5a3   : > { %5968 = vpow2.f32 %v2316_v16  ;;  %v1696_v58 = vmul.f32 1.442695, %v1605_v9  ;;  %v8287_v16 = vpop.f32.mrf.mxu1 }
 0x5a4   : > { %v5959_v19 = vpop.eup %5958  ;;  %2633 = vadd.xlane.f32.xlu1 %v7793_v14  ;;  %v1454_v14 = vmax.f32 %v8206_v21, %v8204_v46  ;;  %10610 = vst [vmem:[#allocation49_spill] sm:$0xff] %v8287_v16 }
 0x5a5   : > { %v5961_v50 = vpop.eup %5960  ;;  %3488 = vmatmul.f32.gmra.mxu2 %v5959_v19  ;;  %5970 = vpow2.f32 %v1696_v58 }
 0x5a6   : > { %v5963_v40 = vpop.eup %5962  ;;  %3697 = vmatmul.f32.gmra.mxu3 %v5961_v50  ;;  %3144 = vperm.xlu0 %5807, %v8254_v3   ;;  %v8258_v45 = vadd.f32 %v5961_v50, %v5959_v19  ;;  %v8289_v19 = vpop.f32.mrf.mxu0  ;;  %v2481_v50 = vld [vmem:[#allocation4 + $0x38] sm:$0xff] }
 0x5a7   : > { %v5965_v48 = vpop.eup %5964  ;;  %10611 = vst [vmem:[#allocation43_spill] sm:$0xff] %v8289_v19  ;;  %v2545_v23 = vmul.f32 %v10614_v56, %v2481_v50  ;;  %v797_v50 = vld [vmem:[#allocation2 + $0x178] sm:$0xff] }
 0x5a8   : > { %v8264_v10 = vadd.f32 %v5965_v48, %v5963_v40  ;;  %v8266_v42 = vpop.eup %5966 }
 0x5a9   : > { %v8270_v13 = vpop.eup %5968 }
 0x5ab   : > { %v8294_v36 = vpop.eup %5970 }
 0x5ac   : > { %1452 = vmax.xlane.f32.xlu1 %v1451_v63  ;;  %v10613_v63 = vld [vmem:[#allocation94_spill] sm:$0xff] }
 0x5ad   : > { %3491 = vmatmul.f32.gmra.mxu2 %v8266_v42 }
 0x5ae   : > { %3700 = vmatmul.f32.gmra.mxu3 %v8270_v13  ;;  %1937 = vperm.xlu0 %5807, %v8000_v52  }
 0x5af   : > { %v1450_v62 = vpop.xlane.xlu0 %1449 }
 0x5b0   : > { %v8278_v38 = vmax.f32 %v8273_v27, %v1450_v62  ;;  %1455 = vmax.xlane.f32.xlu2 %v1454_v14  ;;  %v2485_v27 = vld [vmem:[#allocation4 + $0x58] sm:$0xff] }
 0x5b2   : > { %10608 = vst [vmem:[#allocation48_spill] sm:$0xff] %v8278_v38 }
 0x5b3   : > { %3991 = vst.msk [vmem:[#allocation3 + $0x150] sm:$0xff] %vm2858_vm5, %v8278_v38 }
 0x5b5   : > { %3494 = vmatmul.f32.gmra.mxu2 %v5963_v40  ;;  %v10612_v40 = vld [vmem:[#allocation95_spill] sm:$0xff] }
 0x5b6   : > { %3703 = vmatmul.f32.gmra.mxu3 %v5965_v48  ;;  %v1607_v14 = vsub.f32 %v10613_v63, %v10612_v40  ;;  %v796_v48 = vld [vmem:[#allocation2 + $0x170] sm:$0xff] }
 0x5b7   : > { %v2640_v54 = vpop.xlane.xlu0 %2639  ;;  %1012 = vmatmul.f32.gmra.mxu0 %v796_v48  ;;  %1221 = vmatmul.f32.gmra.mxu1 %v796_v48 }
 0x5b8   : > { %v2806_v0 = vadd.f32 %v2640_v54, %v2550_v32  ;;  %2645 = vadd.xlane.f32.xlu2 %v10609_v59  ;;  %v1700_v30 = vmul.f32 1.442695, %v1607_v14  ;;  %v8298_v32 = vpop.f32.mrf.mxu1  ;;  %v8300_v54 = vpop.f32.mrf.mxu0  ;;  %v8313_v14 = vld [vmem:[#allocation3 + $0x148] sm:$0xff] }
 0x5b9   : > { %10615 = vst [vmem:[#allocation65_spill] sm:$0xff] %v8298_v32 }
 0x5ba   : > { %2871 = vst.msk [vmem:[#allocation4 + $0x60] sm:$0xff] %vm2858_vm5, %v2806_v0  ;;  %5972 = vpow2.f32 %v1700_v30  ;;  %v8302_v0 = vld [vmem:[#allocation3 + $0x140] sm:$0xff] }
 0x5bb   : > { %10616 = vst [vmem:[#allocation57_spill] sm:$0xff] %v8300_v54 }
 0x5bc   : > { %10618 = vst [vmem:[#allocation59_spill] sm:$0xff] %v8313_v14 }
 0x5bf   : > { %1015 = vmatmul.f32.gmra.mxu0 %v797_v50  ;;  %1224 = vmatmul.f32.gmra.mxu1 %v797_v50 }
 0x5c0   : > { %v8308_v63 = vpop.eup %5972  ;;  %v8315_v56 = vpop.f32.mrf.mxu0 }
 0x5c1   : > { %10617 = vst [vmem:[#allocation58_spill] sm:$0xff] %v8308_v63 }
 0x5c2   : > { %10619 = vst [vmem:[#allocation60_spill] sm:$0xff] %v8315_v56 }
 0x5c4   : > { %v2625_v62 = vpop.xlane.xlu1 %2624 }
 0x5c5   : > { %v2801_v9 = vadd.f32 %v2625_v62, %v2545_v23  ;;  %3124 = vperm.xlu1 %5805, %v8294_v36   ;;  %v8317_v23 = vpop.f32.mrf.mxu1 }
 0x5c6   : > { %10620 = vst [vmem:[#allocation34_spill] sm:$0xff] %v8317_v23  ;;  %v1466_v30 = vmax.f32 %v8315_v56, %v8317_v23  ;;  %v2944_v56 = vld [vmem:[#allocation5 + $0x78] sm:$0xff] }
 0x5c7   : > { %2866 = vst.msk [vmem:[#allocation4 + $0x38] sm:$0xff] %vm2858_vm5, %v2801_v9  ;;  %v798_v9 = vld [vmem:[#allocation2 + $0x68] sm:$0xff] }
 0x5c8   : > { %1018 = vmatmul.f32.gmra.mxu0 %v798_v9  ;;  %1227 = vmatmul.f32.gmra.mxu1 %v798_v9 }
 0x5cc   : > { %v1444_v59 = vpop.xlane.xlu1 %1443 }
 0x5cd   : > { %v8305_v58 = vmax.f32 %v8302_v0, %v1444_v59  ;;  %1917 = vperm.xlu1 %5805, %v10612_v40   ;;  %v2943_v40 = vld [vmem:[#allocation5 + $0x1c0] sm:$0xff] }
 0x5ce   : > { %v3327_v3 = vmul.f32 %v8140_v1, %v2943_v40  ;;  %v2656_v1 = vadd.f32 %v8069_v22, %v8067_v2  ;;  %v3328_v40 = vmul.f32 %v8237_v49, %v2944_v56 }
 0x5cf   : > { %3989 = vst.msk [vmem:[#allocation3 + $0x140] sm:$0xff] %vm2858_vm5, %v8305_v58 }
 0x5d0   : > { %3134 = vperm.xlu2 %5806, %v8308_v63  }
 0x5d2   : > { %v1447_v48 = vpop.xlane.xlu2 %1446 }
 0x5d3   : > { %v8320_v62 = vmax.f32 %v8313_v14, %v1447_v48  ;;  %v10622_v14 = vld [vmem:[#allocation74_spill] sm:$0xff] }
 0x5d4   : > { %v2549_v46 = vmul.f32 %v10622_v14, %v2485_v27 }
 0x5d5   : > { %10621 = vst [vmem:[#allocation95_spill] sm:$0xff] %v8320_v62  ;;  %v3480_v59 = vpop.f32.mrf.mxu2 }
 0x5d6   : > { %3990 = vst.msk [vmem:[#allocation3 + $0x148] sm:$0xff] %vm2858_vm5, %v8320_v62  ;;  %v3689_v50 = vpop.f32.mrf.mxu3 }
 0x5d7   : > { %v3690_v4 = vadd.f32 %v3689_v50, %v3480_v59  ;;  %v10624_v59 = vld [vmem:[#allocation76_spill] sm:$0xff] }
 0x5d8   : > { %1927 = vperm.xlu2 %5806, %v8011_v25   ;;  %1467 = vmax.xlane.f32.xlu0 %v1466_v30 }
 0x5d9   : > { %v3841_v48 = vadd.f32 %v3690_v4, %v3327_v3  ;;  %v1612_v4 = vsub.f32 %v8104_v37, %v8107_v29 }
 0x5da   : > { %v2637_v21 = vpop.xlane.xlu2 %2636 }
 0x5db   : > { %3905 = vst [vmem:[#allocation5 + $0x1c0] sm:$0xff] %v3841_v48  ;;  %v2805_v23 = vadd.f32 %v2637_v21, %v2549_v46  ;;  %v2945_v46 = vld [vmem:[#allocation5 + $0x108] sm:$0xff]  ;;  %v1710_v2 = vmul.f32 1.442695, %v1612_v4 }
 0x5dc   : > { %v3329_v14 = vmul.f32 %v8156_v33, %v2945_v46  ;;  %v10627_v46 = vld [vmem:[#allocation71_spill] sm:$0xff] }
 0x5dd   : > { %2870 = vst.msk [vmem:[#allocation4 + $0x58] sm:$0xff] %vm2858_vm5, %v2805_v23  ;;  %v3483_v63 = vpop.f32.mrf.mxu2  ;;  %5974 = vpow2.f32 %v1710_v2 }
 0x5de   : > { %v3692_v20 = vpop.f32.mrf.mxu3 }
 0x5df   : > { %v3693_v9 = vadd.f32 %v3692_v20, %v3483_v63  ;;  %v8340_v20 = vpop.permute.xlu0 %3129  ;;  %v10623_v63 = vld [vmem:[#allocation75_spill] sm:$0xff] }
 0x5e0   : > { %2657 = vadd.xlane.f32.xlu0 %v2656_v1 }
 0x5e1   : > { %v3842_v25 = vadd.f32 %v3693_v9, %v3328_v40  ;;  %v10625_v40 = vld [vmem:[#allocation69_spill] sm:$0xff] }
 0x5e2   : > { %v8333_v30 = vpop.permute.xlu2 %3119 }
 0x5e3   : > { %3906 = vst [vmem:[#allocation5 + $0x78] sm:$0xff] %v3842_v25  ;;  %v10626_v25 = vld [vmem:[#allocation70_spill] sm:$0xff] }
 0x5e4   : > { %v8337_v21 = vpop.permute.xlu1 %3109 }
 0x5e5   : > { %v3486_v3 = vpop.f32.mrf.mxu2 }
 0x5e6   : > { %v3695_v27 = vpop.f32.mrf.mxu3 }
 0x5e7   : > { %v3696_v23 = vadd.f32 %v3695_v27, %v3486_v3  ;;  %v2144_v3 = vsub.f32 %v10627_v46, %v8260_v51  ;;  %v8348_v27 = vpop.eup %5974  ;;  %v2489_v46 = vld [vmem:[#allocation4 + $0x78] sm:$0xff] }
 0x5e8   : > { %10628 = vst [vmem:[#allocation94_spill] sm:$0xff] %v8348_v27 }
 0x5e9   : > { %v3843_v22 = vadd.f32 %v3696_v23, %v3329_v14  ;;  %v10629_v14 = vld [vmem:[#allocation72_spill] sm:$0xff] }
 0x5ea   : > { %v1913_v49 = vpop.permute.xlu2 %1912  ;;  %v2145_v23 = vsub.f32 %v10629_v14, %v8260_v51  ;;  %v8360_v51 = vld [vmem:[#allocation3 + $0x168] sm:$0xff] }
 0x5eb   : > { %3907 = vst [vmem:[#allocation5 + $0x108] sm:$0xff] %v3843_v22  ;;  %v2146_v56 = vsub.f32 %v10623_v63, %v1913_v49  ;;  %v2147_v50 = vsub.f32 %v10624_v59, %v1913_v49  ;;  %v2326_v22 = vmul.f32 1.442695, %v2144_v3  ;;  %v8353_v49 = vpop.permute.xlu0 %1922  ;;  %v10630_v59 = vld [vmem:[#allocation28_spill] sm:$0xff]  ;;  %v10634_v3 = vld [vmem:[#allocation89_spill] sm:$0xff] }
 0x5ec   : > { %v1903_v37 = vpop.permute.xlu1 %1902  ;;  %10632 = vst [vmem:[#allocation74_spill] sm:$0xff] %v8360_v51  ;;  %v2553_v14 = vmul.f32 %v10634_v3, %v2489_v46  ;;  %v2484_v3 = vld [vmem:[#allocation4 + $0x50] sm:$0xff] }
 0x5ed   : > { %v2330_v48 = vmul.f32 1.442695, %v2146_v56  ;;  %v2332_v1 = vmul.f32 1.442695, %v2147_v50  ;;  %v2142_v9 = vsub.f32 %v10625_v40, %v1903_v37  ;;  %v2143_v5 = vsub.f32 %v10626_v25, %v1903_v37 }
 0x5ee   : > { %v2328_v56 = vmul.f32 1.442695, %v2145_v23 }
 0x5ef   : > { %5976 = vpow2.f32 %v2330_v48  ;;  %v2322_v33 = vmul.f32 1.442695, %v2142_v9  ;;  %v2324_v4 = vmul.f32 1.442695, %v2143_v5  ;;  %v1463_v9 = vmax.f32 %v8300_v54, %v8298_v32 }
 0x5f0   : > { %5978 = vpow2.f32 %v2332_v1  ;;  %v1460_v1 = vmax.f32 %v8289_v19, %v8287_v16 }
 0x5f1   : > { %5980 = vpow2.f32 %v2322_v33 }
 0x5f2   : > { %5982 = vpow2.f32 %v2324_v4 }
 0x5f3   : > { %5984 = vpow2.f32 %v2326_v22 }
 0x5f4   : > { %3159 = vperm.xlu0 %5807, %v8348_v27   ;;  %5986 = vpow2.f32 %v2328_v56  ;;  %v10635_v56 = vld [vmem:[#allocation90_spill] sm:$0xff] }
 0x5f5   : > { %v5977_v2 = vpop.eup %5976 }
 0x5f6   : > { %v5979_v63 = vpop.eup %5978 }
 0x5f7   : > { %v5981_v5 = vpop.eup %5980  ;;  %2642 = vadd.xlane.f32.xlu1 %v10630_v59  ;;  %v8356_v50 = vadd.f32 %v5979_v63, %v5977_v2  ;;  %v8383_v59 = vpop.f32.mrf.mxu1 }
 0x5f8   : > { %v5983_v37 = vpop.eup %5982  ;;  %3497 = vmatmul.f32.gmra.mxu2 %v5981_v5 }
 0x5f9   : > { %10631 = vst [vmem:[#allocation52_spill] sm:$0xff] %v8356_v50  ;;  %3706 = vmatmul.f32.gmra.mxu3 %v5983_v37  ;;  %v8358_v48 = vadd.f32 %v5983_v37, %v5981_v5  ;;  %v8370_v33 = vpop.eup %5984  ;;  %v1608_v5 = vsub.f32 %v10635_v56, %v7908_v7  ;;  %v8385_v37 = vpop.f32.mrf.mxu0 }
 0x5fa   : > { %v8372_v4 = vpop.eup %5986 }
 0x5fc   : > { %1952 = vperm.xlu0 %5807, %v8086_v28  }
 0x5fd   : > { %v1459_v40 = vpop.xlane.xlu0 %1458 }
 0x5fe   : > { %v8368_v25 = vmax.f32 %v8360_v51, %v1459_v40  ;;  %v10636_v40 = vld [vmem:[#allocation61_spill] sm:$0xff] }
 0x5ff   : > { %1461 = vmax.xlane.f32.xlu1 %v1460_v1  ;;  %v1702_v1 = vmul.f32 1.442695, %v1608_v5  ;;  %v800_v5 = vld [vmem:[#allocation2 + $0x198] sm:$0xff] }
 0x600   : > { %10633 = vst [vmem:[#allocation75_spill] sm:$0xff] %v8368_v25  ;;  %3500 = vmatmul.f32.gmra.mxu2 %v8370_v33 }
 0x601   : > { %3994 = vst.msk [vmem:[#allocation3 + $0x168] sm:$0xff] %vm2858_vm5, %v8368_v25  ;;  %3709 = vmatmul.f32.gmra.mxu3 %v8372_v4  ;;  %1464 = vmax.xlane.f32.xlu2 %v1463_v9  ;;  %5988 = vpow2.f32 %v1702_v1  ;;  %v10637_v9 = vld [vmem:[#allocation56_spill] sm:$0xff]  ;;  %v8398_v1 = vld [vmem:[#allocation3 + $0x158] sm:$0xff] }
 0x602   : > { %v1610_v46 = vsub.f32 %v10637_v9, %v10636_v40  ;;  %10642 = vst [vmem:[#allocation71_spill] sm:$0xff] %v8398_v1 }
 0x604   : > { %v1706_v7 = vmul.f32 1.442695, %v1610_v46 }
 0x605   : > { %v2649_v23 = vpop.xlane.xlu0 %2648 }
 0x606   : > { %v2809_v22 = vadd.f32 %v2649_v23, %v2553_v14  ;;  %v8389_v14 = vpop.f32.mrf.mxu1  ;;  %v799_v23 = vld [vmem:[#allocation2 + $0x190] sm:$0xff]  ;;  %5990 = vpow2.f32 %v1706_v7 }
 0x607   : > { %10638 = vst [vmem:[#allocation76_spill] sm:$0xff] %v8389_v14  ;;  %1021 = vmatmul.f32.gmra.mxu0 %v799_v23  ;;  %1230 = vmatmul.f32.gmra.mxu1 %v799_v23 }
 0x608   : > { %2874 = vst.msk [vmem:[#allocation4 + $0x78] sm:$0xff] %vm2858_vm5, %v2809_v22  ;;  %3503 = vmatmul.f32.gmra.mxu2 %v5977_v2  ;;  %v8391_v2 = vpop.f32.mrf.mxu0  ;;  %v8394_v22 = vpop.eup %5988 }
 0x609   : > { %3712 = vmatmul.f32.gmra.mxu3 %v5979_v63  ;;  %2654 = vadd.xlane.f32.xlu2 %v8061_v61  ;;  %10639 = vst [vmem:[#allocation69_spill] sm:$0xff] %v8391_v2  ;;  %v10640_v63 = vld [vmem:[#allocation63_spill] sm:$0xff] }
 0x60a   : > { %v2548_v61 = vmul.f32 %v10640_v63, %v2484_v3  ;;  %10641 = vst [vmem:[#allocation70_spill] sm:$0xff] %v8394_v22 }
 0x60c   : > { %v8404_v3 = vpop.eup %5990 }
 0x60d   : > { %10645 = vst [vmem:[#allocation89_spill] sm:$0xff] %v8404_v3 }
 0x60e   : > { %v8400_v9 = vpop.f32.mrf.mxu1 }
 0x60f   : > { %1024 = vmatmul.f32.gmra.mxu0 %v800_v5  ;;  %1233 = vmatmul.f32.gmra.mxu1 %v800_v5  ;;  %10643 = vst [vmem:[#allocation72_spill] sm:$0xff] %v8400_v9  ;;  %v801_v5 = vld [vmem:[#allocation2 + $0x38] sm:$0xff] }
 0x610   : > { %v8402_v46 = vpop.f32.mrf.mxu0 }
 0x611   : > { %10644 = vst [vmem:[#allocation28_spill] sm:$0xff] %v8402_v46  ;;  %v1475_v7 = vmax.f32 %v8402_v46, %v8400_v9  ;;  %v10647_v46 = vld [vmem:[#allocation82_spill] sm:$0xff] }
 0x617   : > { %v2634_v56 = vpop.xlane.xlu1 %2633  ;;  %1027 = vmatmul.f32.gmra.mxu0 %v801_v5  ;;  %1236 = vmatmul.f32.gmra.mxu1 %v801_v5  ;;  %v2665_v5 = vadd.f32 %v8172_v41, %v8168_v8 }
 0x618   : > { %v2804_v51 = vadd.f32 %v2634_v56, %v2548_v61  ;;  %3139 = vperm.xlu1 %5805, %v8394_v22  }
 0x61a   : > { %2869 = vst.msk [vmem:[#allocation4 + $0x50] sm:$0xff] %vm2858_vm5, %v2804_v51  ;;  %v8411_v51 = vld [vmem:[#allocation3 + $0x160] sm:$0xff] }
 0x61b   : > { %10646 = vst [vmem:[#allocation90_spill] sm:$0xff] %v8411_v51 }
 0x61f   : > { %v1453_v23 = vpop.xlane.xlu1 %1452 }
 0x620   : > { %v8407_v63 = vmax.f32 %v8398_v1, %v1453_v23  ;;  %1932 = vperm.xlu1 %5805, %v10636_v40   ;;  %v2946_v40 = vld [vmem:[#allocation5 + $0x80] sm:$0xff]  ;;  %v2488_v23 = vld [vmem:[#allocation4 + $0x70] sm:$0xff] }
 0x621   : > { %3149 = vperm.xlu2 %5806, %v8404_v3   ;;  %v3330_v32 = vmul.f32 %v8239_v35, %v2946_v40  ;;  %v2552_v54 = vmul.f32 %v10647_v46, %v2488_v23  ;;  %v1615_v35 = vsub.f32 %v8202_v26, %v8209_v11  ;;  %v10649_v40 = vld [vmem:[#allocation84_spill] sm:$0xff] }
 0x622   : > { %3992 = vst.msk [vmem:[#allocation3 + $0x158] sm:$0xff] %vm2858_vm5, %v8407_v63 }
 0x623   : > { %v1456_v61 = vpop.xlane.xlu2 %1455 }
 0x624   : > { %v8418_v56 = vmax.f32 %v8411_v51, %v1456_v61 }
 0x626   : > { %3993 = vst.msk [vmem:[#allocation3 + $0x160] sm:$0xff] %vm2858_vm5, %v8418_v56  ;;  %1476 = vmax.xlane.f32.xlu0 %v1475_v7  ;;  %v2947_v7 = vld [vmem:[#allocation5 + $0x58] sm:$0xff] }
 0x628   : > { %v3489_v27 = vpop.f32.mrf.mxu2 }
 0x629   : > { %v3698_v1 = vpop.f32.mrf.mxu3  ;;  %1942 = vperm.xlu2 %5806, %v8107_v29   ;;  %v3331_v29 = vmul.f32 %v8337_v21, %v2947_v7  ;;  %v10648_v21 = vld [vmem:[#allocation83_spill] sm:$0xff]  ;;  %v10650_v7 = vld [vmem:[#allocation77_spill] sm:$0xff] }
 0x62a   : > { %v3699_v9 = vadd.f32 %v3698_v1, %v3489_v27  ;;  %v2948_v1 = vld [vmem:[#allocation5 + $0x48] sm:$0xff] }
 0x62b   : > { %v2646_v61 = vpop.xlane.xlu2 %2645 }
 0x62c   : > { %v3844_v51 = vadd.f32 %v3699_v9, %v3330_v32  ;;  %v2808_v3 = vadd.f32 %v2646_v61, %v2552_v54  ;;  %v1716_v54 = vmul.f32 1.442695, %v1615_v35  ;;  %v8435_v9 = vpop.permute.xlu0 %3144  ;;  %v10651_v35 = vld [vmem:[#allocation78_spill] sm:$0xff] }
 0x62e   : > { %3908 = vst [vmem:[#allocation5 + $0x80] sm:$0xff] %v3844_v51  ;;  %2666 = vadd.xlane.f32.xlu0 %v2665_v5  ;;  %5992 = vpow2.f32 %v1716_v54 }
 0x62f   : > { %2873 = vst.msk [vmem:[#allocation4 + $0x70] sm:$0xff] %vm2858_vm5, %v2808_v3  ;;  %v3332_v3 = vmul.f32 %v8248_v31, %v2948_v1 }
 0x630   : > { %v3492_v16 = vpop.f32.mrf.mxu2 }
 0x631   : > { %v3701_v19 = vpop.f32.mrf.mxu3 }
 0x632   : > { %v3702_v50 = vadd.f32 %v3701_v19, %v3492_v16 }
 0x633   : > { %v8431_v27 = vpop.permute.xlu2 %3134 }
 0x634   : > { %v3845_v32 = vadd.f32 %v3702_v50, %v3331_v29  ;;  %v8442_v22 = vpop.eup %5992  ;;  %v8445_v1 = vpop.permute.xlu0 %1937 }
 0x635   : > { %10652 = vst [vmem:[#allocation61_spill] sm:$0xff] %v8442_v22 }
 0x636   : > { %3909 = vst [vmem:[#allocation5 + $0x58] sm:$0xff] %v3845_v32 }
 0x637   : > { %v8433_v8 = vpop.permute.xlu1 %3124 }
 0x638   : > { %v3495_v41 = vpop.f32.mrf.mxu2 }
 0x639   : > { %v3704_v46 = vpop.f32.mrf.mxu3 }
 0x63a   : > { %v3705_v51 = vadd.f32 %v3704_v46, %v3495_v41  ;;  %v10653_v41 = vld [vmem:[#allocation79_spill] sm:$0xff] }
 0x63b   : > { %v1928_v16 = vpop.permute.xlu2 %1927  ;;  %v2150_v46 = vsub.f32 %v10653_v41, %v8353_v49  ;;  %v10658_v41 = vld [vmem:[#allocation31_spill] sm:$0xff] }
 0x63c   : > { %v3846_v19 = vadd.f32 %v3705_v51, %v3332_v3  ;;  %v2152_v26 = vsub.f32 %v10648_v21, %v1928_v16  ;;  %v2153_v23 = vsub.f32 %v10649_v40, %v1928_v16  ;;  %v10654_v3 = vld [vmem:[#allocation80_spill] sm:$0xff] }
 0x63d   : > { %v2151_v51 = vsub.f32 %v10654_v3, %v8353_v49  ;;  %v2338_v21 = vmul.f32 1.442695, %v2150_v46 }
 0x63e   : > { %3910 = vst [vmem:[#allocation5 + $0x48] sm:$0xff] %v3846_v19  ;;  %v2342_v50 = vmul.f32 1.442695, %v2152_v26  ;;  %v2344_v61 = vmul.f32 1.442695, %v2153_v23  ;;  %v8453_v23 = vld [vmem:[#allocation3 + $0x180] sm:$0xff] }
 0x63f   : > { %v1918_v5 = vpop.permute.xlu1 %1917  ;;  %v2340_v40 = vmul.f32 1.442695, %v2151_v51  ;;  %10655 = vst [vmem:[#allocation56_spill] sm:$0xff] %v8453_v23 }
 0x640   : > { %5994 = vpow2.f32 %v2342_v50  ;;  %v2148_v29 = vsub.f32 %v10650_v7, %v1918_v5  ;;  %v2149_v32 = vsub.f32 %v10651_v35, %v1918_v5  ;;  %v1469_v35 = vmax.f32 %v8385_v37, %v8383_v59 }
 0x641   : > { %5996 = vpow2.f32 %v2344_v61  ;;  %v10656_v61 = vld [vmem:[#allocation35_spill] sm:$0xff] }
 0x642   : > { %v2334_v31 = vmul.f32 1.442695, %v2148_v29  ;;  %v2336_v54 = vmul.f32 1.442695, %v2149_v32  ;;  %3174 = vperm.xlu0 %5807, %v8442_v22   ;;  %v1472_v32 = vmax.f32 %v8391_v2, %v8389_v14  ;;  %v1618_v2 = vsub.f32 %v8302_v0, %v8305_v58 }
 0x644   : > { %5998 = vpow2.f32 %v2334_v31  ;;  %v2492_v31 = vld [vmem:[#allocation4 + $0x90] sm:$0xff] }
 0x645   : > { %6000 = vpow2.f32 %v2336_v54  ;;  %v2556_v46 = vmul.f32 %v10658_v41, %v2492_v31  ;;  %v1613_v31 = vsub.f32 %v8121_v17, %v8124_v6 }
 0x646   : > { %v5995_v16 = vpop.eup %5994  ;;  %6002 = vpow2.f32 %v2338_v21 }
 0x647   : > { %v5997_v19 = vpop.eup %5996  ;;  %6004 = vpow2.f32 %v2340_v40  ;;  %v8476_v40 = vpop.f32.mrf.mxu0 }
 0x648   : > { %v8451_v26 = vadd.f32 %v5997_v19, %v5995_v16 }
 0x64a   : > { %v5999_v50 = vpop.eup %5998  ;;  %2651 = vadd.xlane.f32.xlu1 %v10656_v61  ;;  %1967 = vperm.xlu0 %5807, %v8182_v39   ;;  %v802_v61 = vld [vmem:[#allocation2 + $0xc0] sm:$0xff] }
 0x64b   : > { %v6001_v5 = vpop.eup %6000  ;;  %3506 = vmatmul.f32.gmra.mxu2 %v5999_v50  ;;  %v1468_v7 = vpop.xlane.xlu0 %1467  ;;  %1030 = vmatmul.f32.gmra.mxu0 %v802_v61 }
 0x64c   : > { %3715 = vmatmul.f32.gmra.mxu3 %v6001_v5  ;;  %v8458_v49 = vmax.f32 %v8453_v23, %v1468_v7  ;;  %v8460_v29 = vadd.f32 %v6001_v5, %v5999_v50  ;;  %v8468_v54 = vpop.eup %6002  ;;  %v8478_v50 = vpop.f32.mrf.mxu1  ;;  %v10659_v5 = vld [vmem:[#allocation50_spill] sm:$0xff]  ;;  %1239 = vmatmul.f32.gmra.mxu1 %v802_v61  ;;  %v804_v23 = vld [vmem:[#allocation2 + $0x158] sm:$0xff] }
 0x64d   : > { %v8471_v3 = vpop.eup %6004  ;;  %v1611_v7 = vsub.f32 %v10659_v5, %v8000_v52 }
 0x64e   : > { %10657 = vst [vmem:[#allocation63_spill] sm:$0xff] %v8458_v49 }
 0x64f   : > { %3997 = vst.msk [vmem:[#allocation3 + $0x180] sm:$0xff] %vm2858_vm5, %v8458_v49  ;;  %v8485_v41 = vpop.f32.mrf.mxu0 }
 0x650   : > { %10660 = vst [vmem:[#allocation82_spill] sm:$0xff] %v8485_v41 }
 0x652   : > { %1470 = vmax.xlane.f32.xlu1 %v1469_v35  ;;  %1473 = vmax.xlane.f32.xlu2 %v1472_v32  ;;  %v1708_v35 = vmul.f32 1.442695, %v1611_v7  ;;  %v803_v32 = vld [vmem:[#allocation2 + $0x1c0] sm:$0xff] }
 0x653   : > { %3509 = vmatmul.f32.gmra.mxu2 %v8468_v54  ;;  %v2658_v51 = vpop.xlane.xlu0 %2657  ;;  %1033 = vmatmul.f32.gmra.mxu0 %v803_v32 }
 0x654   : > { %3718 = vmatmul.f32.gmra.mxu3 %v8471_v3  ;;  %v2812_v21 = vadd.f32 %v2658_v51, %v2556_v46  ;;  %v8487_v46 = vpop.f32.mrf.mxu1  ;;  %6006 = vpow2.f32 %v1708_v35  ;;  %1242 = vmatmul.f32.gmra.mxu1 %v803_v32  ;;  %v10662_v51 = vld [vmem:[#allocation73_spill] sm:$0xff]  ;;  %v8500_v35 = vld [vmem:[#allocation3 + $0x170] sm:$0xff] }
 0x655   : > { %10661 = vst [vmem:[#allocation83_spill] sm:$0xff] %v8487_v46 }
 0x656   : > { %2877 = vst.msk [vmem:[#allocation4 + $0x90] sm:$0xff] %vm2858_vm5, %v2812_v21 }
 0x657   : > { %v8494_v17 = vpop.f32.mrf.mxu0  ;;  %10665 = vst [vmem:[#allocation78_spill] sm:$0xff] %v8500_v35 }
 0x658   : > { %10663 = vst [vmem:[#allocation84_spill] sm:$0xff] %v8494_v17 }
 0x65a   : > { %2663 = vadd.xlane.f32.xlu2 %v8159_v34  ;;  %v2487_v34 = vld [vmem:[#allocation4 + $0x68] sm:$0xff]  ;;  %v8490_v52 = vpop.eup %6006 }
 0x65b   : > { %3512 = vmatmul.f32.gmra.mxu2 %v5995_v16  ;;  %v1712_v16 = vmul.f32 1.442695, %v1613_v31  ;;  %v2551_v21 = vmul.f32 %v10662_v51, %v2487_v34  ;;  %1036 = vmatmul.f32.gmra.mxu0 %v804_v23  ;;  %v8505_v34 = vld [vmem:[#allocation3 + $0x178] sm:$0xff] }
 0x65c   : > { %3721 = vmatmul.f32.gmra.mxu3 %v5997_v19  ;;  %1245 = vmatmul.f32.gmra.mxu1 %v804_v23  ;;  %v8496_v5 = vpop.f32.mrf.mxu1  ;;  %10667 = vst [vmem:[#allocation80_spill] sm:$0xff] %v8505_v34 }
 0x65d   : > { %6008 = vpow2.f32 %v1712_v16  ;;  %10664 = vst [vmem:[#allocation77_spill] sm:$0xff] %v8496_v5  ;;  %v1484_v7 = vmax.f32 %v8494_v17, %v8496_v5 }
 0x663   : > { %v8502_v32 = vpop.eup %6008 }
 0x664   : > { %10666 = vst [vmem:[#allocation79_spill] sm:$0xff] %v8502_v32 }
 0x66a   : > { %v2643_v19 = vpop.xlane.xlu1 %2642 }
 0x66b   : > { %v2807_v61 = vadd.f32 %v2643_v19, %v2551_v21  ;;  %3154 = vperm.xlu1 %5805, %v8490_v52   ;;  %v2491_v21 = vld [vmem:[#allocation4 + $0x88] sm:$0xff]  ;;  %v2949_v19 = vld [vmem:[#allocation5 + $0x40] sm:$0xff] }
 0x66c   : > { %v3333_v17 = vmul.f32 %v8333_v30, %v2949_v19 }
 0x66d   : > { %2872 = vst.msk [vmem:[#allocation4 + $0x68] sm:$0xff] %vm2858_vm5, %v2807_v61  ;;  %v2674_v61 = vadd.f32 %v8270_v13, %v8266_v42 }
 0x672   : > { %v1462_v31 = vpop.xlane.xlu1 %1461  ;;  %3164 = vperm.xlu2 %5806, %v8502_v32   ;;  %v8529_v32 = vpop.permute.xlu0 %3159 }
 0x673   : > { %v8508_v23 = vmax.f32 %v8500_v35, %v1462_v31  ;;  %1947 = vperm.xlu1 %5805, %v8124_v6   ;;  %v10668_v6 = vld [vmem:[#allocation91_spill] sm:$0xff] }
 0x674   : > { %v1465_v16 = vpop.xlane.xlu2 %1464  ;;  %1485 = vmax.xlane.f32.xlu0 %v1484_v7  ;;  %v2555_v22 = vmul.f32 %v10668_v6, %v2491_v21  ;;  %v1722_v21 = vmul.f32 1.442695, %v1618_v2  ;;  %v10670_v2 = vld [vmem:[#allocation93_spill] sm:$0xff] }
 0x675   : > { %3995 = vst.msk [vmem:[#allocation3 + $0x170] sm:$0xff] %vm2858_vm5, %v8508_v23  ;;  %v8514_v51 = vmax.f32 %v8505_v34, %v1465_v16 }
 0x676   : > { %6010 = vpow2.f32 %v1722_v21 }
 0x677   : > { %3996 = vst.msk [vmem:[#allocation3 + $0x178] sm:$0xff] %vm2858_vm5, %v8514_v51 }
 0x67a   : > { %1957 = vperm.xlu2 %5806, %v8209_v11   ;;  %v2950_v11 = vld [vmem:[#allocation5 + $0x1a0] sm:$0xff]  ;;  %v8539_v21 = vpop.permute.xlu0 %1952 }
 0x67b   : > { %v3498_v31 = vpop.f32.mrf.mxu2  ;;  %v3334_v6 = vmul.f32 %v8433_v8, %v2950_v11 }
 0x67c   : > { %v3707_v7 = vpop.f32.mrf.mxu3  ;;  %v2655_v5 = vpop.xlane.xlu2 %2654  ;;  %2675 = vadd.xlane.f32.xlu0 %v2674_v61 }
 0x67d   : > { %v3708_v16 = vadd.f32 %v3707_v7, %v3498_v31  ;;  %v2811_v34 = vadd.f32 %v2655_v5, %v2555_v22  ;;  %v2951_v22 = vld [vmem:[#allocation5 + $0x198] sm:$0xff]  ;;  %v10669_v31 = vld [vmem:[#allocation92_spill] sm:$0xff]  ;;  %v8536_v8 = vpop.eup %6010 }
 0x67e   : > { %10671 = vst [vmem:[#allocation35_spill] sm:$0xff] %v8536_v8 }
 0x67f   : > { %v3847_v14 = vadd.f32 %v3708_v16, %v3333_v17  ;;  %2876 = vst.msk [vmem:[#allocation4 + $0x88] sm:$0xff] %vm2858_vm5, %v2811_v34  ;;  %v3335_v34 = vmul.f32 %v8340_v20, %v2951_v22 }
 0x681   : > { %3911 = vst [vmem:[#allocation5 + $0x40] sm:$0xff] %v3847_v14 }
 0x683   : > { %v3501_v35 = vpop.f32.mrf.mxu2 }
 0x684   : > { %v3710_v42 = vpop.f32.mrf.mxu3  ;;  %v8526_v13 = vpop.permute.xlu2 %3149 }
 0x685   : > { %v3711_v61 = vadd.f32 %v3710_v42, %v3501_v35 }
 0x687   : > { %v3848_v30 = vadd.f32 %v3711_v61, %v3334_v6  ;;  %v10672_v61 = vld [vmem:[#allocation85_spill] sm:$0xff] }
 0x689   : > { %3912 = vst [vmem:[#allocation5 + $0x1a0] sm:$0xff] %v3848_v30  ;;  %v10673_v30 = vld [vmem:[#allocation86_spill] sm:$0xff] }
 0x68a   : > { %v8531_v17 = vpop.permute.xlu1 %3139 }
 0x68b   : > { %v3504_v5 = vpop.f32.mrf.mxu2 }
 0x68c   : > { %v3713_v0 = vpop.f32.mrf.mxu3  ;;  %v1943_v14 = vpop.permute.xlu2 %1942 }
 0x68d   : > { %v3714_v19 = vadd.f32 %v3713_v0, %v3504_v5  ;;  %v2158_v7 = vsub.f32 %v10669_v31, %v1943_v14  ;;  %v2159_v16 = vsub.f32 %v10670_v2, %v1943_v14  ;;  %v10674_v31 = vld [vmem:[#allocation87_spill] sm:$0xff]  ;;  %v10676_v2 = vld [vmem:[#allocation88_spill] sm:$0xff] }
 0x68f   : > { %v3849_v35 = vadd.f32 %v3714_v19, %v3335_v34  ;;  %v2354_v11 = vmul.f32 1.442695, %v2158_v7  ;;  %v2356_v42 = vmul.f32 1.442695, %v2159_v16  ;;  %v2156_v34 = vsub.f32 %v10674_v31, %v8445_v1  ;;  %v8545_v19 = vld [vmem:[#allocation3 + $0x198] sm:$0xff]  ;;  %v805_v31 = vld [vmem:[#allocation2 + $0x10] sm:$0xff] }
 0x690   : > { %3189 = vperm.xlu0 %5807, %v8536_v8   ;;  %10675 = vst [vmem:[#allocation31_spill] sm:$0xff] %v8545_v19  ;;  %v2157_v16 = vsub.f32 %v10676_v2, %v8445_v1  ;;  %v1481_v1 = vmax.f32 %v8485_v41, %v8487_v46  ;;  %1039 = vmatmul.f32.gmra.mxu0 %v805_v31 }
 0x691   : > { %3913 = vst [vmem:[#allocation5 + $0x198] sm:$0xff] %v3849_v35  ;;  %6012 = vpow2.f32 %v2354_v11  ;;  %1248 = vmatmul.f32.gmra.mxu1 %v805_v31  ;;  %v1616_v31 = vsub.f32 %v8217_v55, %v8220_v44 }
 0x692   : > { %6014 = vpow2.f32 %v2356_v42  ;;  %v1933_v6 = vpop.permute.xlu1 %1932 }
 0x693   : > { %v2154_v20 = vsub.f32 %v10672_v61, %v1933_v6  ;;  %v2155_v22 = vsub.f32 %v10673_v30, %v1933_v6  ;;  %v2350_v6 = vmul.f32 1.442695, %v2156_v34  ;;  %v2352_v61 = vmul.f32 1.442695, %v2157_v16  ;;  %v2495_v30 = vld [vmem:[#allocation4 + $0xa8] sm:$0xff] }
 0x694   : > { %v1478_v34 = vmax.f32 %v8476_v40, %v8478_v50 }
 0x695   : > { %v2346_v5 = vmul.f32 1.442695, %v2154_v20  ;;  %v2348_v0 = vmul.f32 1.442695, %v2155_v22 }
 0x697   : > { %v6013_v14 = vpop.eup %6012  ;;  %6016 = vpow2.f32 %v2346_v5 }
 0x698   : > { %v6015_v7 = vpop.eup %6014  ;;  %6018 = vpow2.f32 %v2348_v0  ;;  %1982 = vperm.xlu0 %5807, %v8278_v38   ;;  %v2559_v0 = vmul.f32 %v8093_v60, %v2495_v30  ;;  %v8572_v60 = vpop.f32.mrf.mxu0  ;;  %v807_v30 = vld [vmem:[#allocation2 + $0xa0] sm:$0xff] }
 0x699   : > { %v1477_v35 = vpop.xlane.xlu0 %1476  ;;  %v8550_v11 = vadd.f32 %v6015_v7, %v6013_v14  ;;  %6020 = vpow2.f32 %v2350_v6  ;;  %v8574_v6 = vpop.f32.mrf.mxu1 }
 0x69a   : > { %v8553_v42 = vmax.f32 %v8545_v19, %v1477_v35  ;;  %6022 = vpow2.f32 %v2352_v61  ;;  %v806_v61 = vld [vmem:[#allocation2 + $0x58] sm:$0xff] }
 0x69b   : > { %1042 = vmatmul.f32.gmra.mxu0 %v806_v61  ;;  %1251 = vmatmul.f32.gmra.mxu1 %v806_v61 }
 0x69c   : > { %10677 = vst [vmem:[#allocation50_spill] sm:$0xff] %v8553_v42 }
 0x69d   : > { %4000 = vst.msk [vmem:[#allocation3 + $0x198] sm:$0xff] %vm2858_vm5, %v8553_v42  ;;  %v6017_v20 = vpop.eup %6016  ;;  %2660 = vadd.xlane.f32.xlu1 %v8057_v15 }
 0x69e   : > { %v6019_v22 = vpop.eup %6018  ;;  %3515 = vmatmul.f32.gmra.mxu2 %v6017_v20 }
 0x69f   : > { %3724 = vmatmul.f32.gmra.mxu3 %v6019_v22  ;;  %v8560_v5 = vadd.f32 %v6019_v22, %v6017_v20  ;;  %v8566_v16 = vpop.eup %6020  ;;  %v1614_v20 = vsub.f32 %v8082_v24, %v8086_v28  ;;  %v10682_v24 = vld [vmem:[#allocation81_spill] sm:$0xff] }
 0x6a0   : > { %v8568_v35 = vpop.eup %6022  ;;  %v8579_v22 = vpop.f32.mrf.mxu0 }
 0x6a1   : > { %v2667_v2 = vpop.xlane.xlu0 %2666  ;;  %10678 = vst [vmem:[#allocation73_spill] sm:$0xff] %v8579_v22 }
 0x6a2   : > { %v2815_v15 = vadd.f32 %v2667_v2, %v2559_v0  ;;  %v1714_v0 = vmul.f32 1.442695, %v1614_v20  ;;  %v2490_v2 = vld [vmem:[#allocation4 + $0x80] sm:$0xff] }
 0x6a3   : > { %1482 = vmax.xlane.f32.xlu2 %v1481_v1  ;;  %v8581_v1 = vpop.f32.mrf.mxu1  ;;  %1045 = vmatmul.f32.gmra.mxu0 %v807_v30  ;;  %v2554_v28 = vmul.f32 %v10682_v24, %v2490_v2 }
 0x6a4   : > { %2880 = vst.msk [vmem:[#allocation4 + $0xa8] sm:$0xff] %vm2858_vm5, %v2815_v15  ;;  %1254 = vmatmul.f32.gmra.mxu1 %v807_v30  ;;  %6024 = vpow2.f32 %v1714_v0  ;;  %v8599_v30 = vld [vmem:[#allocation3 + $0x188] sm:$0xff]  ;;  %v8601_v0 = vld [vmem:[#allocation3 + $0x190] sm:$0xff] }
 0x6a5   : > { %1479 = vmax.xlane.f32.xlu1 %v1478_v34  ;;  %10679 = vst [vmem:[#allocation91_spill] sm:$0xff] %v8581_v1  ;;  %v1718_v34 = vmul.f32 1.442695, %v1616_v31 }
 0x6a6   : > { %3518 = vmatmul.f32.gmra.mxu2 %v8566_v16  ;;  %10684 = vst [vmem:[#allocation86_spill] sm:$0xff] %v8601_v0 }
 0x6a7   : > { %3727 = vmatmul.f32.gmra.mxu3 %v8568_v35  ;;  %6026 = vpow2.f32 %v1718_v34 }
 0x6ab   : > { %2672 = vadd.xlane.f32.xlu2 %v8258_v45  ;;  %v8585_v45 = vpop.f32.mrf.mxu0 }
 0x6ac   : > { %10680 = vst [vmem:[#allocation92_spill] sm:$0xff] %v8585_v45 }
 0x6ae   : > { %3521 = vmatmul.f32.gmra.mxu2 %v6013_v14  ;;  %v8587_v14 = vpop.f32.mrf.mxu1 }
 0x6af   : > { %3730 = vmatmul.f32.gmra.mxu3 %v6015_v7  ;;  %10681 = vst [vmem:[#allocation93_spill] sm:$0xff] %v8587_v14  ;;  %v8590_v7 = vpop.eup %6024  ;;  %v1493_v20 = vmax.f32 %v8585_v45, %v8587_v14 }
 0x6b0   : > { %v8596_v55 = vpop.eup %6026 }
 0x6b1   : > { %10683 = vst [vmem:[#allocation85_spill] sm:$0xff] %v8596_v55 }
 0x6bd   : > { %v2652_v15 = vpop.xlane.xlu1 %2651 }
 0x6be   : > { %v2810_v61 = vadd.f32 %v2652_v15, %v2554_v28  ;;  %3169 = vperm.xlu1 %5805, %v8590_v7   ;;  %v2683_v28 = vadd.f32 %v8372_v4, %v8370_v33  ;;  %v2494_v15 = vld [vmem:[#allocation4 + $0xa0] sm:$0xff]  ;;  %v2953_v4 = vld [vmem:[#allocation5 + $0x168] sm:$0xff] }
 0x6c0   : > { %2875 = vst.msk [vmem:[#allocation4 + $0x80] sm:$0xff] %vm2858_vm5, %v2810_v61  ;;  %v10685_v61 = vld [vmem:[#allocation32_spill] sm:$0xff] }
 0x6c2   : > { %1494 = vmax.xlane.f32.xlu0 %v1493_v20  ;;  %v2558_v20 = vmul.f32 %v10685_v61, %v2494_v15  ;;  %v3337_v15 = vmul.f32 %v8531_v17, %v2953_v4 }
 0x6c3   : > { %3179 = vperm.xlu2 %5806, %v8596_v55  }
 0x6c5   : > { %v1471_v31 = vpop.xlane.xlu1 %1470  ;;  %v1474_v34 = vpop.xlane.xlu2 %1473 }
 0x6c6   : > { %v8604_v2 = vmax.f32 %v8599_v30, %v1471_v31  ;;  %v8607_v24 = vmax.f32 %v8601_v0, %v1474_v34  ;;  %1962 = vperm.xlu1 %5805, %v8220_v44   ;;  %v2952_v31 = vld [vmem:[#allocation5 + $0xe8] sm:$0xff]  ;;  %v8620_v0 = vpop.permute.xlu0 %3174 }
 0x6c7   : > { %v3336_v14 = vmul.f32 %v8431_v27, %v2952_v31 }
 0x6c8   : > { %3998 = vst.msk [vmem:[#allocation3 + $0x188] sm:$0xff] %vm2858_vm5, %v8604_v2 }
 0x6c9   : > { %3999 = vst.msk [vmem:[#allocation3 + $0x190] sm:$0xff] %vm2858_vm5, %v8607_v24 }
 0x6ca   : > { %2684 = vadd.xlane.f32.xlu0 %v2683_v28 }
 0x6cb   : > { %1972 = vperm.xlu2 %5806, %v8305_v58  }
 0x6cd   : > { %v2664_v34 = vpop.xlane.xlu2 %2663 }
 0x6ce   : > { %v2814_v19 = vadd.f32 %v2664_v34, %v2558_v20  ;;  %v3507_v8 = vpop.f32.mrf.mxu2  ;;  %v2954_v34 = vld [vmem:[#allocation5 + $0x158] sm:$0xff] }
 0x6cf   : > { %v3716_v44 = vpop.f32.mrf.mxu3 }
 0x6d0   : > { %2879 = vst.msk [vmem:[#allocation4 + $0xa0] sm:$0xff] %vm2858_vm5, %v2814_v19  ;;  %v3717_v45 = vadd.f32 %v3716_v44, %v3507_v8  ;;  %v3338_v44 = vmul.f32 %v8435_v9, %v2954_v34 }
 0x6d2   : > { %v3850_v33 = vadd.f32 %v3717_v45, %v3336_v14  ;;  %v8630_v14 = vpop.permute.xlu0 %1967 }
 0x6d4   : > { %3914 = vst [vmem:[#allocation5 + $0xe8] sm:$0xff] %v3850_v33 }
 0x6d5   : > { %v8622_v28 = vpop.permute.xlu2 %3164 }
 0x6d6   : > { %v3510_v58 = vpop.f32.mrf.mxu2 }
 0x6d7   : > { %v3719_v46 = vpop.f32.mrf.mxu3 }
 0x6d8   : > { %v3720_v61 = vadd.f32 %v3719_v46, %v3510_v58 }
 0x6da   : > { %v3851_v20 = vadd.f32 %v3720_v61, %v3337_v15  ;;  %v8633_v15 = vld [vmem:[#allocation3 + $0x1b0] sm:$0xff]  ;;  %v10688_v61 = vld [vmem:[#allocation97_spill] sm:$0xff] }
 0x6db   : > { %10686 = vst [vmem:[#allocation87_spill] sm:$0xff] %v8633_v15 }
 0x6dc   : > { %3915 = vst [vmem:[#allocation5 + $0x168] sm:$0xff] %v3851_v20 }
 0x6dd   : > { %v8625_v41 = vpop.permute.xlu1 %3154  ;;  %v1958_v27 = vpop.permute.xlu2 %1957 }
 0x6de   : > { %v2164_v8 = vsub.f32 %v8006_v47, %v1958_v27  ;;  %v2165_v19 = vsub.f32 %v8008_v18, %v1958_v27  ;;  %v3513_v45 = vpop.f32.mrf.mxu2  ;;  %1997 = vperm.xlu0 %5807, %v8368_v25   ;;  %v10687_v47 = vld [vmem:[#allocation96_spill] sm:$0xff] }
 0x6df   : > { %v3722_v31 = vpop.f32.mrf.mxu3 }
 0x6e0   : > { %v2366_v17 = vmul.f32 1.442695, %v2164_v8  ;;  %v2368_v46 = vmul.f32 1.442695, %v2165_v19  ;;  %v3723_v33 = vadd.f32 %v3722_v31, %v3513_v45  ;;  %v10690_v8 = vld [vmem:[#allocation98_spill] sm:$0xff]  ;;  %v10691_v31 = vld [vmem:[#allocation99_spill] sm:$0xff] }
 0x6e1   : > { %v2162_v19 = vsub.f32 %v10690_v8, %v8539_v21 }
 0x6e2   : > { %6028 = vpow2.f32 %v2366_v17  ;;  %v3852_v4 = vadd.f32 %v3723_v33, %v3338_v44  ;;  %v2163_v44 = vsub.f32 %v10691_v31, %v8539_v21  ;;  %v2498_v17 = vld [vmem:[#allocation4 + $0xc0] sm:$0xff]  ;;  %v8650_v33 = vpop.f32.mrf.mxu1 }
 0x6e3   : > { %6030 = vpow2.f32 %v2368_v46  ;;  %v8648_v46 = vpop.f32.mrf.mxu0  ;;  %10693 = vst [vmem:[#allocation32_spill] sm:$0xff] %v8650_v33 }
 0x6e4   : > { %3916 = vst [vmem:[#allocation5 + $0x158] sm:$0xff] %v3852_v4  ;;  %v2362_v4 = vmul.f32 1.442695, %v2162_v19 }
 0x6e5   : > { %v1948_v58 = vpop.permute.xlu1 %1947  ;;  %10692 = vst [vmem:[#allocation81_spill] sm:$0xff] %v8648_v46 }
 0x6e6   : > { %v2160_v18 = vsub.f32 %v10687_v47, %v1948_v58  ;;  %v2161_v20 = vsub.f32 %v10688_v61, %v1948_v58  ;;  %v2562_v58 = vmul.f32 %v8198_v12, %v2498_v17  ;;  %v2364_v47 = vmul.f32 1.442695, %v2163_v44 }
 0x6e7   : > { %v1486_v27 = vpop.xlane.xlu0 %1485  ;;  %v1490_v61 = vmax.f32 %v8579_v22, %v8581_v1  ;;  %v1487_v12 = vmax.f32 %v8572_v60, %v8574_v6  ;;  %v1617_v17 = vsub.f32 %v8178_v57, %v8182_v39  ;;  %v8688_v57 = vld [vmem:[#allocation3 + $0x1a8] sm:$0xff] }
 0x6e8   : > { %v6029_v25 = vpop.eup %6028  ;;  %v2358_v55 = vmul.f32 1.442695, %v2160_v18  ;;  %v2360_v38 = vmul.f32 1.442695, %v2161_v20  ;;  %v8638_v9 = vmax.f32 %v8633_v15, %v1486_v27  ;;  %v2956_v1 = vld [vmem:[#allocation5 + $0x28] sm:$0xff] }
 0x6e9   : > { %v6031_v34 = vpop.eup %6030 }
 0x6ea   : > { %10689 = vst [vmem:[#allocation88_spill] sm:$0xff] %v8638_v9  ;;  %6032 = vpow2.f32 %v2358_v55  ;;  %v8644_v45 = vadd.f32 %v6031_v34, %v6029_v25  ;;  %v8663_v8 = vpop.f32.mrf.mxu1 }
 0x6eb   : > { %4003 = vst.msk [vmem:[#allocation3 + $0x1b0] sm:$0xff] %vm2858_vm5, %v8638_v9  ;;  %6034 = vpow2.f32 %v2360_v38  ;;  %v8661_v21 = vpop.f32.mrf.mxu0 }
 0x6ec   : > { %6036 = vpow2.f32 %v2362_v4  ;;  %10694 = vst [vmem:[#allocation96_spill] sm:$0xff] %v8661_v21 }
 0x6ed   : > { %6038 = vpow2.f32 %v2364_v47  ;;  %10695 = vst [vmem:[#allocation97_spill] sm:$0xff] %v8663_v8  ;;  %v2493_v47 = vld [vmem:[#allocation4 + $0x98] sm:$0xff] }
 0x6ef   : > { %v2676_v18 = vpop.xlane.xlu0 %2675 }
 0x6f0   : > { %v6033_v55 = vpop.eup %6032  ;;  %v2818_v20 = vadd.f32 %v2676_v18, %v2562_v58  ;;  %2669 = vadd.xlane.f32.xlu1 %v8163_v53  ;;  %v1720_v58 = vmul.f32 1.442695, %v1617_v17  ;;  %v2692_v18 = vadd.f32 %v8471_v3, %v8468_v54  ;;  %v10700_v17 = vld [vmem:[#allocation36_spill] sm:$0xff] }
 0x6f1   : > { %v6035_v27 = vpop.eup %6034  ;;  %3524 = vmatmul.f32.gmra.mxu2 %v6033_v55 }
 0x6f2   : > { %2883 = vst.msk [vmem:[#allocation4 + $0xc0] sm:$0xff] %vm2858_vm5, %v2818_v20  ;;  %3733 = vmatmul.f32.gmra.mxu3 %v6035_v27  ;;  %v8657_v38 = vadd.f32 %v6035_v27, %v6033_v55  ;;  %v8665_v19 = vpop.eup %6036  ;;  %v8674_v44 = vpop.f32.mrf.mxu1  ;;  %6040 = vpow2.f32 %v1720_v58 }
 0x6f3   : > { %v8667_v53 = vpop.eup %6038  ;;  %v8672_v31 = vpop.f32.mrf.mxu0  ;;  %10697 = vst [vmem:[#allocation99_spill] sm:$0xff] %v8674_v44 }
 0x6f4   : > { %1491 = vmax.xlane.f32.xlu2 %v1490_v61  ;;  %10696 = vst [vmem:[#allocation98_spill] sm:$0xff] %v8672_v31  ;;  %v1502_v4 = vmax.f32 %v8672_v31, %v8674_v44 }
 0x6f8   : > { %1488 = vmax.xlane.f32.xlu1 %v1487_v12  ;;  %v8683_v55 = vpop.eup %6040  ;;  %v2497_v12 = vld [vmem:[#allocation4 + $0xb8] sm:$0xff] }
 0x6f9   : > { %3527 = vmatmul.f32.gmra.mxu2 %v8665_v19 }
 0x6fa   : > { %3736 = vmatmul.f32.gmra.mxu3 %v8667_v53 }
 0x6fc   : > { %2681 = vadd.xlane.f32.xlu2 %v8358_v48  ;;  %v10698_v48 = vld [vmem:[#allocation29_spill] sm:$0xff] }
 0x6fd   : > { %10699 = vst [vmem:[#allocation29_spill] sm:$0xff] %v8688_v57 }
 0x701   : > { %3530 = vmatmul.f32.gmra.mxu2 %v6029_v25  ;;  %v2557_v25 = vmul.f32 %v10698_v48, %v2493_v47 }
 0x702   : > { %3739 = vmatmul.f32.gmra.mxu3 %v6031_v34  ;;  %v8690_v34 = vld [vmem:[#allocation3 + $0x1a0] sm:$0xff] }
 0x708   : > { %1503 = vmax.xlane.f32.xlu0 %v1502_v4  ;;  %v2561_v4 = vmul.f32 %v10700_v17, %v2497_v12 }
 0x710   : > { %v2661_v61 = vpop.xlane.xlu1 %2660  ;;  %2693 = vadd.xlane.f32.xlu0 %v2692_v18  ;;  %v2955_v18 = vld [vmem:[#allocation5 + $0x1d8] sm:$0xff] }
 0x711   : > { %v2813_v20 = vadd.f32 %v2661_v61, %v2557_v25  ;;  %3184 = vperm.xlu1 %5805, %v8683_v55   ;;  %v3339_v61 = vmul.f32 %v8526_v13, %v2955_v18  ;;  %v10701_v18 = vld [vmem:[#allocation44_spill] sm:$0xff] }
 0x713   : > { %2878 = vst.msk [vmem:[#allocation4 + $0x98] sm:$0xff] %vm2858_vm5, %v2813_v20  ;;  %v8706_v20 = vpop.permute.xlu0 %3189 }
 0x714   : > { %1987 = vperm.xlu2 %5806, %v8407_v63  }
 0x716   : > { %v1483_v39 = vpop.xlane.xlu2 %1482 }
 0x717   : > { %v8693_v54 = vmax.f32 %v8688_v57, %v1483_v39  ;;  %v8718_v57 = vpop.f32.mrf.mxu0 }
 0x718   : > { %v1480_v3 = vpop.xlane.xlu1 %1479  ;;  %10702 = vst [vmem:[#allocation36_spill] sm:$0xff] %v8718_v57 }
 0x719   : > { %4002 = vst.msk [vmem:[#allocation3 + $0x1a8] sm:$0xff] %vm2858_vm5, %v8693_v54  ;;  %v8698_v27 = vmax.f32 %v8690_v34, %v1480_v3  ;;  %1977 = vperm.xlu1 %5805, %v8320_v62  }
 0x71b   : > { %4001 = vst.msk [vmem:[#allocation3 + $0x1a0] sm:$0xff] %vm2858_vm5, %v8698_v27 }
 0x71e   : > { %v2673_v58 = vpop.xlane.xlu2 %2672 }
 0x71f   : > { %v2817_v47 = vadd.f32 %v2673_v58, %v2561_v4  ;;  %v3340_v4 = vmul.f32 %v8625_v41, %v2956_v1 }
 0x721   : > { %2882 = vst.msk [vmem:[#allocation4 + $0xb8] sm:$0xff] %vm2858_vm5, %v2817_v47  ;;  %v3516_v48 = vpop.f32.mrf.mxu2  ;;  %v8712_v47 = vpop.permute.xlu0 %1982 }
 0x722   : > { %v3725_v25 = vpop.f32.mrf.mxu3 }
 0x723   : > { %v3726_v39 = vadd.f32 %v3725_v25, %v3516_v48  ;;  %v2957_v25 = vld [vmem:[#allocation5] sm:$0xff] }
 0x724   : > { %2012 = vperm.xlu0 %5807, %v8458_v49   ;;  %v3341_v41 = vmul.f32 %v8529_v32, %v2957_v25  ;;  %v1499_v32 = vmax.f32 %v8661_v21, %v8663_v8 }
 0x725   : > { %v3853_v3 = vadd.f32 %v3726_v39, %v3339_v61 }
 0x726   : > { %v8709_v15 = vpop.permute.xlu2 %3179 }
 0x727   : > { %3917 = vst [vmem:[#allocation5 + $0x1d8] sm:$0xff] %v3853_v3 }
 0x729   : > { %v3519_v12 = vpop.f32.mrf.mxu2 }
 0x72a   : > { %v3728_v17 = vpop.f32.mrf.mxu3 }
 0x72b   : > { %v3729_v58 = vadd.f32 %v3728_v17, %v3519_v12  ;;  %v8721_v12 = vld [vmem:[#allocation3 + $0x1c8] sm:$0xff] }
 0x72c   : > { %10703 = vst [vmem:[#allocation44_spill] sm:$0xff] %v8721_v12 }
 0x72d   : > { %v3854_v22 = vadd.f32 %v3729_v58, %v3340_v4 }
 0x72e   : > { %v1973_v44 = vpop.permute.xlu2 %1972 }
 0x72f   : > { %3918 = vst [vmem:[#allocation5 + $0x28] sm:$0xff] %v3854_v22  ;;  %v2170_v13 = vsub.f32 %v8100_v43, %v1973_v44  ;;  %v2171_v48 = vsub.f32 %v10701_v18, %v1973_v44  ;;  %v8723_v22 = vpop.f32.mrf.mxu1 }
 0x730   : > { %v8716_v61 = vpop.permute.xlu1 %3169  ;;  %10704 = vst [vmem:[#allocation100_spill] sm:$0xff] %v8723_v22 }
 0x731   : > { %v2378_v39 = vmul.f32 1.442695, %v2170_v13  ;;  %v2380_v3 = vmul.f32 1.442695, %v2171_v48  ;;  %v3522_v49 = vpop.f32.mrf.mxu2  ;;  %v10706_v13 = vld [vmem:[#allocation42_spill] sm:$0xff]  ;;  %v2501_v48 = vld [vmem:[#allocation4 + $0xd8] sm:$0xff] }
 0x732   : > { %v3731_v31 = vpop.f32.mrf.mxu3 }
 0x733   : > { %6042 = vpow2.f32 %v2378_v39  ;;  %v3732_v1 = vadd.f32 %v3731_v31, %v3522_v49  ;;  %v10705_v49 = vld [vmem:[#allocation33_spill] sm:$0xff] }
 0x734   : > { %6044 = vpow2.f32 %v2380_v3 }
 0x735   : > { %v3855_v43 = vadd.f32 %v3732_v1, %v3341_v41  ;;  %v1495_v44 = vpop.xlane.xlu0 %1494  ;;  %v2565_v1 = vmul.f32 %v8294_v36, %v2501_v48 }
 0x736   : > { %v8726_v17 = vmax.f32 %v8721_v12, %v1495_v44  ;;  %v10708_v44 = vld [vmem:[#allocation68_spill] sm:$0xff] }
 0x737   : > { %3919 = vst [vmem:[#allocation5] sm:$0xff] %v3855_v43  ;;  %v8737_v43 = vpop.f32.mrf.mxu0  ;;  %v2168_v12 = vsub.f32 %v10708_v44, %v8630_v14  ;;  %v8741_v8 = vpop.f32.mrf.mxu1  ;;  %v10713_v44 = vld [vmem:[#allocation30_spill] sm:$0xff] }
 0x738   : > { %4006 = vst.msk [vmem:[#allocation3 + $0x1c8] sm:$0xff] %vm2858_vm5, %v8726_v17  ;;  %v1963_v4 = vpop.permute.xlu1 %1962 }
 0x739   : > { %v6043_v58 = vpop.eup %6042  ;;  %v2166_v31 = vsub.f32 %v10705_v49, %v1963_v4  ;;  %v2167_v18 = vsub.f32 %v10706_v13, %v1963_v4  ;;  %10707 = vst [vmem:[#allocation33_spill] sm:$0xff] %v8737_v43  ;;  %v10710_v4 = vld [vmem:[#allocation67_spill] sm:$0xff]  ;;  %v2374_v13 = vmul.f32 1.442695, %v2168_v12 }
 0x73a   : > { %v6045_v25 = vpop.eup %6044  ;;  %10709 = vst [vmem:[#allocation42_spill] sm:$0xff] %v8741_v8  ;;  %v2169_v49 = vsub.f32 %v10710_v4, %v8630_v14  ;;  %v1496_v14 = vmax.f32 %v8648_v46, %v8650_v33  ;;  %v8792_v46 = vld [vmem:[#allocation3 + $0x1e0] sm:$0xff] }
 0x73b   : > { %v2370_v39 = vmul.f32 1.442695, %v2166_v31  ;;  %v2372_v3 = vmul.f32 1.442695, %v2167_v18  ;;  %v8734_v41 = vadd.f32 %v6045_v25, %v6043_v58 }
 0x73c   : > { %v2376_v18 = vmul.f32 1.442695, %v2169_v49 }
 0x73d   : > { %6046 = vpow2.f32 %v2370_v39  ;;  %v2685_v62 = vpop.xlane.xlu0 %2684  ;;  %1500 = vmax.xlane.f32.xlu2 %v1499_v32 }
 0x73e   : > { %6048 = vpow2.f32 %v2372_v3  ;;  %v2821_v31 = vadd.f32 %v2685_v62, %v2565_v1  ;;  %v2496_v1 = vld [vmem:[#allocation4 + $0xb0] sm:$0xff] }
 0x73f   : > { %6050 = vpow2.f32 %v2374_v13  ;;  %v8752_v62 = vpop.f32.mrf.mxu1  ;;  %v8754_v39 = vpop.f32.mrf.mxu0  ;;  %v2560_v4 = vmul.f32 %v10713_v44, %v2496_v1  ;;  %v8769_v13 = vld [vmem:[#allocation3 + $0x1c0] sm:$0xff]  ;;  %v2958_v1 = vld [vmem:[#allocation5 + $0x1c8] sm:$0xff] }
 0x740   : > { %2886 = vst.msk [vmem:[#allocation4 + $0xd8] sm:$0xff] %vm2858_vm5, %v2821_v31  ;;  %6052 = vpow2.f32 %v2376_v18  ;;  %v1511_v12 = vmax.f32 %v8754_v39, %v8752_v62 }
 0x741   : > { %10711 = vst [vmem:[#allocation68_spill] sm:$0xff] %v8752_v62 }
 0x742   : > { %10712 = vst [vmem:[#allocation67_spill] sm:$0xff] %v8754_v39  ;;  %v10717_v39 = vld [vmem:[#allocation66_spill] sm:$0xff] }
 0x743   : > { %v6047_v36 = vpop.eup %6046  ;;  %2678 = vadd.xlane.f32.xlu1 %v8264_v10  ;;  %10714 = vst [vmem:[#allocation30_spill] sm:$0xff] %v8769_v13 }
 0x744   : > { %v6049_v48 = vpop.eup %6048  ;;  %3533 = vmatmul.f32.gmra.mxu2 %v6047_v36 }
 0x745   : > { %3742 = vmatmul.f32.gmra.mxu3 %v6049_v48  ;;  %2690 = vadd.xlane.f32.xlu2 %v8460_v29  ;;  %v8748_v32 = vadd.f32 %v6049_v48, %v6047_v36  ;;  %v8758_v10 = vpop.eup %6050  ;;  %v2701_v29 = vadd.f32 %v8568_v35, %v8566_v16  ;;  %v8775_v16 = vld [vmem:[#allocation3 + $0x1b8] sm:$0xff]  ;;  %v10715_v48 = vld [vmem:[#allocation53_spill] sm:$0xff] }
 0x746   : > { %v8760_v3 = vpop.eup %6052  ;;  %10718 = vst [vmem:[#allocation53_spill] sm:$0xff] %v8792_v46 }
 0x74b   : > { %1497 = vmax.xlane.f32.xlu1 %v1496_v14 }
 0x74c   : > { %3536 = vmatmul.f32.gmra.mxu2 %v8758_v10 }
 0x74d   : > { %3745 = vmatmul.f32.gmra.mxu3 %v8760_v3 }
 0x74e   : > { %1512 = vmax.xlane.f32.xlu0 %v1511_v12 }
 0x750   : > { %v8787_v44 = vpop.permute.xlu0 %1997 }
 0x754   : > { %3539 = vmatmul.f32.gmra.mxu2 %v6043_v58 }
 0x755   : > { %3748 = vmatmul.f32.gmra.mxu3 %v6045_v25  ;;  %v2500_v25 = vld [vmem:[#allocation4 + $0xd0] sm:$0xff] }
 0x756   : > { %2702 = vadd.xlane.f32.xlu0 %v2701_v29  ;;  %v2564_v14 = vmul.f32 %v10715_v48, %v2500_v25 }
 0x75d   : > { %2002 = vperm.xlu2 %5806, %v8508_v23  }
 0x763   : > { %v2670_v49 = vpop.xlane.xlu1 %2669 }
 0x764   : > { %v2816_v31 = vadd.f32 %v2670_v49, %v2560_v4  ;;  %1992 = vperm.xlu1 %5805, %v8418_v56  }
 0x766   : > { %2881 = vst.msk [vmem:[#allocation4 + $0xb0] sm:$0xff] %vm2858_vm5, %v2816_v31  ;;  %v3342_v31 = vmul.f32 %v8622_v28, %v2958_v1 }
 0x767   : > { %v1492_v18 = vpop.xlane.xlu2 %1491 }
 0x768   : > { %v8773_v58 = vmax.f32 %v8769_v13, %v1492_v18 }
 0x76a   : > { %4005 = vst.msk [vmem:[#allocation3 + $0x1c0] sm:$0xff] %vm2858_vm5, %v8773_v58  ;;  %2027 = vperm.xlu0 %5807, %v8553_v42   ;;  %v10716_v42 = vld [vmem:[#allocation64_spill] sm:$0xff] }
 0x76b   : > { %v1489_v35 = vpop.xlane.xlu1 %1488 }
 0x76c   : > { %v8781_v36 = vmax.f32 %v8775_v16, %v1489_v35 }
 0x76e   : > { %4004 = vst.msk [vmem:[#allocation3 + $0x1b8] sm:$0xff] %vm2858_vm5, %v8781_v36 }
 0x76f   : > { %v2682_v12 = vpop.xlane.xlu2 %2681 }
 0x770   : > { %v2820_v29 = vadd.f32 %v2682_v12, %v2564_v14  ;;  %v2959_v14 = vld [vmem:[#allocation5 + $0x1e8] sm:$0xff] }
 0x771   : > { %v3343_v1 = vmul.f32 %v8716_v61, %v2959_v14 }
 0x772   : > { %2885 = vst.msk [vmem:[#allocation4 + $0xd0] sm:$0xff] %vm2858_vm5, %v2820_v29 }
 0x774   : > { %v3525_v4 = vpop.f32.mrf.mxu2 }
 0x775   : > { %v3734_v49 = vpop.f32.mrf.mxu3 }
 0x776   : > { %v3735_v18 = vadd.f32 %v3734_v49, %v3525_v4 }
 0x777   : > { %v1988_v21 = vpop.permute.xlu2 %1987 }
 0x778   : > { %v3856_v35 = vadd.f32 %v3735_v18, %v3342_v31  ;;  %v2176_v62 = vsub.f32 %v10716_v42, %v1988_v21  ;;  %v2177_v33 = vsub.f32 %v10717_v39, %v1988_v21  ;;  %v2504_v21 = vld [vmem:[#allocation4 + $0xf0] sm:$0xff]  ;;  %v2960_v18 = vld [vmem:[#allocation5 + $0x140] sm:$0xff] }
 0x77a   : > { %3920 = vst [vmem:[#allocation5 + $0x1c8] sm:$0xff] %v3856_v35  ;;  %v2390_v25 = vmul.f32 1.442695, %v2176_v62  ;;  %v2392_v48 = vmul.f32 1.442695, %v2177_v33  ;;  %v1508_v33 = vmax.f32 %v8737_v43, %v8741_v8  ;;  %v10719_v62 = vld [vmem:[#allocation70_spill] sm:$0xff] }
 0x77b   : > { %v1504_v12 = vpop.xlane.xlu0 %1503  ;;  %v2568_v49 = vmul.f32 %v10719_v62, %v2504_v21  ;;  %v10720_v21 = vld [vmem:[#allocation45_spill] sm:$0xff] }
 0x77c   : > { %6054 = vpow2.f32 %v2390_v25  ;;  %v8795_v29 = vmax.f32 %v8792_v46, %v1504_v12  ;;  %v3528_v13 = vpop.f32.mrf.mxu2  ;;  %v10721_v62 = vld [vmem:[#allocation37_spill] sm:$0xff] }
 0x77d   : > { %6056 = vpow2.f32 %v2392_v48  ;;  %v3737_v28 = vpop.f32.mrf.mxu3 }
 0x77e   : > { %4009 = vst.msk [vmem:[#allocation3 + $0x1e0] sm:$0xff] %vm2858_vm5, %v8795_v29  ;;  %v3738_v42 = vadd.f32 %v3737_v28, %v3528_v13  ;;  %v3344_v13 = vmul.f32 %v8620_v0, %v2960_v18  ;;  %v10724_v18 = vld [vmem:[#allocation38_spill] sm:$0xff] }
 0x780   : > { %v3857_v39 = vadd.f32 %v3738_v42, %v3343_v1 }
 0x782   : > { %v6055_v4 = vpop.eup %6054  ;;  %3921 = vst [vmem:[#allocation5 + $0x1e8] sm:$0xff] %v3857_v39 }
 0x783   : > { %v6057_v31 = vpop.eup %6056  ;;  %v8803_v35 = vpop.permute.xlu1 %3184 }
 0x784   : > { %v2694_v25 = vpop.xlane.xlu0 %2693  ;;  %v3531_v61 = vpop.f32.mrf.mxu2  ;;  %v8805_v14 = vadd.f32 %v6057_v31, %v6055_v4 }
 0x785   : > { %v2824_v48 = vadd.f32 %v2694_v25, %v2568_v49  ;;  %v3740_v12 = vpop.f32.mrf.mxu3  ;;  %v10722_v49 = vld [vmem:[#allocation52_spill] sm:$0xff]  ;;  %v10723_v25 = vld [vmem:[#allocation39_spill] sm:$0xff] }
 0x786   : > { %v3741_v28 = vadd.f32 %v3740_v12, %v3531_v61  ;;  %1509 = vmax.xlane.f32.xlu2 %v1508_v33  ;;  %v2174_v0 = vsub.f32 %v10723_v25, %v8712_v47  ;;  %v2175_v33 = vsub.f32 %v10724_v18, %v8712_v47  ;;  %v2710_v61 = vadd.f32 %v8667_v53, %v8665_v19  ;;  %v8831_v19 = vld [vmem:[#allocation3 + $0x1d8] sm:$0xff] }
 0x787   : > { %2889 = vst.msk [vmem:[#allocation4 + $0xf0] sm:$0xff] %vm2858_vm5, %v2824_v48  ;;  %v1505_v48 = vmax.f32 %v8718_v57, %v8723_v22 }
 0x788   : > { %v3858_v1 = vadd.f32 %v3741_v28, %v3344_v13  ;;  %v2386_v12 = vmul.f32 1.442695, %v2174_v0 }
 0x78a   : > { %3922 = vst [vmem:[#allocation5 + $0x140] sm:$0xff] %v3858_v1  ;;  %v2499_v1 = vld [vmem:[#allocation4 + $0xc8] sm:$0xff] }
 0x78b   : > { %v1978_v42 = vpop.permute.xlu1 %1977 }
 0x78c   : > { %v2172_v39 = vsub.f32 %v10720_v21, %v1978_v42  ;;  %v2173_v8 = vsub.f32 %v10721_v62, %v1978_v42  ;;  %v2503_v42 = vld [vmem:[#allocation4 + $0xe8] sm:$0xff]  ;;  %v10725_v21 = vld [vmem:[#allocation40_spill] sm:$0xff] }
 0x78e   : > { %v2382_v43 = vmul.f32 1.442695, %v2172_v39  ;;  %v2384_v46 = vmul.f32 1.442695, %v2173_v8  ;;  %2687 = vadd.xlane.f32.xlu1 %v10722_v49  ;;  %2699 = vadd.xlane.f32.xlu2 %v8560_v5  ;;  %v2388_v8 = vmul.f32 1.442695, %v2175_v33  ;;  %v2563_v39 = vmul.f32 %v10725_v21, %v2499_v1 }
 0x78f   : > { %v8845_v33 = vld [vmem:[#allocation3 + $0x1d0] sm:$0xff] }
 0x790   : > { %6058 = vpow2.f32 %v2382_v43 }
 0x791   : > { %6060 = vpow2.f32 %v2384_v46 }
 0x792   : > { %6062 = vpow2.f32 %v2386_v12  ;;  %v8850_v12 = vld [vmem:[#allocation3 + $0x1f8] sm:$0xff] }
 0x793   : > { %6064 = vpow2.f32 %v2388_v8  ;;  %10727 = vst [vmem:[#allocation64_spill] sm:$0xff] %v8850_v12 }
 0x794   : > { %2711 = vadd.xlane.f32.xlu0 %v2710_v61 }
 0x796   : > { %v6059_v13 = vpop.eup %6058  ;;  %1506 = vmax.xlane.f32.xlu1 %v1505_v48  ;;  %v8841_v0 = vpop.permute.xlu0 %2012 }
 0x797   : > { %v6061_v5 = vpop.eup %6060  ;;  %3542 = vmatmul.f32.gmra.mxu2 %v6059_v13 }
 0x798   : > { %3751 = vmatmul.f32.gmra.mxu3 %v6061_v5  ;;  %v8821_v43 = vadd.f32 %v6061_v5, %v6059_v13  ;;  %v8823_v47 = vpop.eup %6062  ;;  %v10728_v13 = vld [vmem:[#allocation43_spill] sm:$0xff] }
 0x799   : > { %v8825_v46 = vpop.eup %6064 }
 0x79f   : > { %3545 = vmatmul.f32.gmra.mxu2 %v8823_v47 }
 0x7a0   : > { %3754 = vmatmul.f32.gmra.mxu3 %v8825_v46 }
 0x7a6   : > { %2017 = vperm.xlu2 %5806, %v8604_v2  }
 0x7a7   : > { %3548 = vmatmul.f32.gmra.mxu2 %v6055_v4 }
 0x7a8   : > { %3757 = vmatmul.f32.gmra.mxu3 %v6057_v31  ;;  %2042 = vperm.xlu0 %5807, %v8638_v9   ;;  %v10726_v31 = vld [vmem:[#allocation58_spill] sm:$0xff] }
 0x7a9   : > { %v2567_v49 = vmul.f32 %v10726_v31, %v2503_v42  ;;  %v2961_v31 = vld [vmem:[#allocation5 + $0x60] sm:$0xff] }
 0x7af   : > { %2007 = vperm.xlu1 %5805, %v8514_v51  }
 0x7b0   : > { %v1501_v53 = vpop.xlane.xlu2 %1500 }
 0x7b1   : > { %v8835_v28 = vmax.f32 %v8831_v19, %v1501_v53  ;;  %v10729_v53 = vld [vmem:[#allocation49_spill] sm:$0xff] }
 0x7b3   : > { %4008 = vst.msk [vmem:[#allocation3 + $0x1d8] sm:$0xff] %vm2858_vm5, %v8835_v28 }
 0x7b6   : > { %v2679_v62 = vpop.xlane.xlu1 %2678 }
 0x7b7   : > { %v2819_v4 = vadd.f32 %v2679_v62, %v2563_v39 }
 0x7b8   : > { %v2691_v25 = vpop.xlane.xlu2 %2690 }
 0x7b9   : > { %2884 = vst.msk [vmem:[#allocation4 + $0xc8] sm:$0xff] %vm2858_vm5, %v2819_v4  ;;  %v2823_v18 = vadd.f32 %v2691_v25, %v2567_v49  ;;  %v2507_v4 = vld [vmem:[#allocation4 + $0x108] sm:$0xff] }
 0x7bb   : > { %2888 = vst.msk [vmem:[#allocation4 + $0xe8] sm:$0xff] %vm2858_vm5, %v2823_v18  ;;  %v2571_v18 = vmul.f32 %v8490_v52, %v2507_v4  ;;  %v2719_v52 = vadd.f32 %v8760_v3, %v8758_v10  ;;  %v10733_v10 = vld [vmem:[#allocation47_spill] sm:$0xff] }
 0x7bc   : > { %v2180_v3 = vsub.f32 %v10733_v10, %v8787_v44 }
 0x7be   : > { %v1498_v48 = vpop.xlane.xlu1 %1497 }
 0x7bf   : > { %v8848_v61 = vmax.f32 %v8845_v33, %v1498_v48  ;;  %v3345_v48 = vmul.f32 %v8709_v15, %v2961_v31 }
 0x7c0   : > { %v2003_v8 = vpop.permute.xlu2 %2002 }
 0x7c1   : > { %4007 = vst.msk [vmem:[#allocation3 + $0x1d0] sm:$0xff] %vm2858_vm5, %v8848_v61  ;;  %v2182_v5 = vsub.f32 %v10728_v13, %v2003_v8  ;;  %v2183_v1 = vsub.f32 %v10729_v53, %v2003_v8  ;;  %v1513_v42 = vpop.xlane.xlu0 %1512 }
 0x7c2   : > { %v8857_v21 = vmax.f32 %v8850_v12, %v1513_v42 }
 0x7c3   : > { %v2402_v39 = vmul.f32 1.442695, %v2182_v5  ;;  %v2404_v62 = vmul.f32 1.442695, %v2183_v1  ;;  %v2962_v1 = vld [vmem:[#allocation5 + $0x98] sm:$0xff] }
 0x7c4   : > { %4012 = vst.msk [vmem:[#allocation3 + $0x1f8] sm:$0xff] %vm2858_vm5, %v8857_v21  ;;  %v3346_v15 = vmul.f32 %v8803_v35, %v2962_v1  ;;  %v10734_v1 = vld [vmem:[#allocation46_spill] sm:$0xff] }
 0x7c5   : > { %6066 = vpow2.f32 %v2402_v39 }
 0x7c6   : > { %6068 = vpow2.f32 %v2404_v62 }
 0x7c7   : > { %v3534_v49 = vpop.f32.mrf.mxu2 }
 0x7c8   : > { %v3743_v25 = vpop.f32.mrf.mxu3 }
 0x7c9   : > { %v3744_v8 = vadd.f32 %v3743_v25, %v3534_v49  ;;  %v2703_v13 = vpop.xlane.xlu0 %2702  ;;  %v2963_v49 = vld [vmem:[#allocation5 + $0x1b8] sm:$0xff] }
 0x7ca   : > { %v2827_v53 = vadd.f32 %v2703_v13, %v2571_v18  ;;  %v10731_v18 = vld [vmem:[#allocation51_spill] sm:$0xff] }
 0x7cb   : > { %v3859_v42 = vadd.f32 %v3744_v8, %v3345_v48  ;;  %v6067_v12 = vpop.eup %6066  ;;  %v10732_v8 = vld [vmem:[#allocation41_spill] sm:$0xff] }
 0x7cc   : > { %2892 = vst.msk [vmem:[#allocation4 + $0x108] sm:$0xff] %vm2858_vm5, %v2827_v53  ;;  %v6069_v5 = vpop.eup %6068 }
 0x7cd   : > { %3923 = vst [vmem:[#allocation5 + $0x60] sm:$0xff] %v3859_v42  ;;  %v8864_v9 = vadd.f32 %v6069_v5, %v6067_v12 }
 0x7cf   : > { %10730 = vst [vmem:[#allocation66_spill] sm:$0xff] %v8864_v9  ;;  %v3537_v39 = vpop.f32.mrf.mxu2  ;;  %2708 = vadd.xlane.f32.xlu2 %v8657_v38  ;;  %v3347_v38 = vmul.f32 %v8706_v20, %v2963_v49  ;;  %v2506_v49 = vld [vmem:[#allocation4 + $0x100] sm:$0xff] }
 0x7d0   : > { %v3746_v62 = vpop.f32.mrf.mxu3 }
 0x7d1   : > { %v3747_v4 = vadd.f32 %v3746_v62, %v3537_v39  ;;  %v2181_v39 = vsub.f32 %v10734_v1, %v8787_v44  ;;  %v2398_v62 = vmul.f32 1.442695, %v2180_v3 }
 0x7d2   : > { %2720 = vadd.xlane.f32.xlu0 %v2719_v52 }
 0x7d3   : > { %v3860_v31 = vadd.f32 %v3747_v4, %v3346_v15  ;;  %v2400_v52 = vmul.f32 1.442695, %v2181_v39 }
 0x7d5   : > { %3924 = vst [vmem:[#allocation5 + $0x98] sm:$0xff] %v3860_v31  ;;  %v2502_v31 = vld [vmem:[#allocation4 + $0xe0] sm:$0xff] }
 0x7d6   : > { %v1993_v25 = vpop.permute.xlu1 %1992 }
 0x7d7   : > { %v2178_v48 = vsub.f32 %v10731_v18, %v1993_v25  ;;  %v2179_v13 = vsub.f32 %v10732_v8, %v1993_v25  ;;  %v3540_v53 = vpop.f32.mrf.mxu2  ;;  %v10735_v18 = vld [vmem:[#allocation62_spill] sm:$0xff]  ;;  %v10736_v8 = vld [vmem:[#allocation89_spill] sm:$0xff] }
 0x7d8   : > { %v3749_v42 = vpop.f32.mrf.mxu3 }
 0x7d9   : > { %v2394_v9 = vmul.f32 1.442695, %v2178_v48  ;;  %v2396_v22 = vmul.f32 1.442695, %v2179_v13  ;;  %v3750_v57 = vadd.f32 %v3749_v42, %v3540_v53  ;;  %2696 = vadd.xlane.f32.xlu1 %v8451_v26  ;;  %v2566_v48 = vmul.f32 %v10735_v18, %v2502_v31 }
 0x7da   : > { %v2728_v31 = vadd.f32 %v8825_v46, %v8823_v47 }
 0x7db   : > { %6070 = vpow2.f32 %v2394_v9  ;;  %v3861_v35 = vadd.f32 %v3750_v57, %v3347_v38  ;;  %v8889_v57 = vld [vmem:[#allocation3 + $0x1f0] sm:$0xff]  ;;  %v2510_v38 = vld [vmem:[#allocation4 + $0x120] sm:$0xff] }
 0x7dc   : > { %6072 = vpow2.f32 %v2396_v22  ;;  %v8896_v25 = vpop.permute.xlu0 %2027  ;;  %v2574_v10 = vmul.f32 %v8590_v7, %v2510_v38 }
 0x7dd   : > { %3925 = vst [vmem:[#allocation5 + $0x1b8] sm:$0xff] %v3861_v35  ;;  %6074 = vpow2.f32 %v2398_v62  ;;  %v8903_v35 = vld [vmem:[#allocation3 + $0x1e8] sm:$0xff] }
 0x7de   : > { %6076 = vpow2.f32 %v2400_v52 }
 0x7e1   : > { %v6071_v15 = vpop.eup %6070 }
 0x7e2   : > { %v6073_v4 = vpop.eup %6072  ;;  %3551 = vmatmul.f32.gmra.mxu2 %v6071_v15 }
 0x7e3   : > { %3760 = vmatmul.f32.gmra.mxu3 %v6073_v4  ;;  %v8878_v20 = vadd.f32 %v6073_v4, %v6071_v15  ;;  %v8882_v26 = vpop.eup %6074 }
 0x7e4   : > { %v8884_v9 = vpop.eup %6076 }
 0x7e6   : > { %2057 = vperm.xlu0 %5807, %v8726_v17  }
 0x7e7   : > { %2032 = vperm.xlu2 %5806, %v8698_v27  }
 0x7ea   : > { %3554 = vmatmul.f32.gmra.mxu2 %v8882_v26 }
 0x7eb   : > { %3763 = vmatmul.f32.gmra.mxu3 %v8884_v9 }
 0x7f2   : > { %3557 = vmatmul.f32.gmra.mxu2 %v6067_v12  ;;  %2022 = vperm.xlu1 %5805, %v8607_v24   ;;  %v2570_v12 = vmul.f32 %v10736_v8, %v2506_v49 }
 0x7f3   : > { %3766 = vmatmul.f32.gmra.mxu3 %v6069_v5 }
 0x7f9   : > { %v1510_v22 = vpop.xlane.xlu2 %1509 }
 0x7fa   : > { %v8892_v44 = vmax.f32 %v8889_v57, %v1510_v22 }
 0x7fc   : > { %4011 = vst.msk [vmem:[#allocation3 + $0x1f0] sm:$0xff] %vm2858_vm5, %v8892_v44 }
 0x801   : > { %v2688_v13 = vpop.xlane.xlu1 %2687  ;;  %v2700_v53 = vpop.xlane.xlu2 %2699 }
 0x802   : > { %v2822_v5 = vadd.f32 %v2688_v13, %v2566_v48  ;;  %v2826_v42 = vadd.f32 %v2700_v53, %v2570_v12  ;;  %v10737_v13 = vld [vmem:[#allocation57_spill] sm:$0xff] }
 0x804   : > { %2887 = vst.msk [vmem:[#allocation4 + $0xe0] sm:$0xff] %vm2858_vm5, %v2822_v5  ;;  %v10738_v5 = vld [vmem:[#allocation65_spill] sm:$0xff] }
 0x805   : > { %2891 = vst.msk [vmem:[#allocation4 + $0x100] sm:$0xff] %vm2858_vm5, %v2826_v42 }
 0x807   : > { %v2712_v3 = vpop.xlane.xlu0 %2711 }
 0x808   : > { %v2830_v1 = vadd.f32 %v2712_v3, %v2574_v10  ;;  %v10739_v3 = vld [vmem:[#allocation60_spill] sm:$0xff] }
 0x809   : > { %v1507_v39 = vpop.xlane.xlu1 %1506  ;;  %v2018_v62 = vpop.permute.xlu2 %2017 }
 0x80a   : > { %2895 = vst.msk [vmem:[#allocation4 + $0x120] sm:$0xff] %vm2858_vm5, %v2830_v1  ;;  %v8907_v52 = vmax.f32 %v8903_v35, %v1507_v39  ;;  %v2188_v15 = vsub.f32 %v8385_v37, %v2018_v62  ;;  %v2189_v4 = vsub.f32 %v8383_v59, %v2018_v62  ;;  %v2186_v1 = vsub.f32 %v10739_v3, %v8841_v0  ;;  %v10740_v39 = vld [vmem:[#allocation34_spill] sm:$0xff] }
 0x80c   : > { %4010 = vst.msk [vmem:[#allocation3 + $0x1e8] sm:$0xff] %vm2858_vm5, %v8907_v52  ;;  %v2414_v22 = vmul.f32 1.442695, %v2188_v15  ;;  %v2416_v7 = vmul.f32 1.442695, %v2189_v4 }
 0x80d   : > { %v2410_v62 = vmul.f32 1.442695, %v2186_v1 }
 0x80e   : > { %6078 = vpow2.f32 %v2414_v22 }
 0x80f   : > { %6080 = vpow2.f32 %v2416_v7 }
 0x810   : > { %2717 = vadd.xlane.f32.xlu2 %v8748_v32  ;;  %2729 = vadd.xlane.f32.xlu0 %v2728_v31 }
 0x814   : > { %v6079_v49 = vpop.eup %6078 }
 0x815   : > { %v6081_v18 = vpop.eup %6080 }
 0x816   : > { %v8916_v48 = vadd.f32 %v6081_v18, %v6079_v49 }
 0x81a   : > { %v3543_v37 = vpop.f32.mrf.mxu2 }
 0x81b   : > { %v3752_v8 = vpop.f32.mrf.mxu3 }
 0x81c   : > { %v8918_v59 = vadd.f32 %v3752_v8, %v3543_v37  ;;  %2705 = vadd.xlane.f32.xlu1 %v8550_v11  ;;  %v2187_v11 = vsub.f32 %v10740_v39, %v8841_v0  ;;  %v8940_v0 = vpop.permute.xlu0 %2042  ;;  %v2509_v8 = vld [vmem:[#allocation4 + $0x118] sm:$0xff] }
 0x81e   : > { %v2412_v15 = vmul.f32 1.442695, %v2187_v11 }
 0x821   : > { %v2008_v12 = vpop.permute.xlu1 %2007 }
 0x822   : > { %v2184_v53 = vsub.f32 %v10737_v13, %v2008_v12  ;;  %v2185_v42 = vsub.f32 %v10738_v5, %v2008_v12  ;;  %v3546_v47 = vpop.f32.mrf.mxu2  ;;  %v10741_v12 = vld [vmem:[#allocation79_spill] sm:$0xff] }
 0x823   : > { %v3755_v46 = vpop.f32.mrf.mxu3  ;;  %v2573_v13 = vmul.f32 %v10741_v12, %v2509_v8 }
 0x824   : > { %v2406_v38 = vmul.f32 1.442695, %v2184_v53  ;;  %v2408_v32 = vmul.f32 1.442695, %v2185_v42  ;;  %v8923_v10 = vadd.f32 %v3755_v46, %v3546_v47  ;;  %2072 = vperm.xlu0 %5807, %v8795_v29   ;;  %v2513_v53 = vld [vmem:[#allocation4 + $0x138] sm:$0xff] }
 0x825   : > { %v2577_v47 = vmul.f32 %v8683_v55, %v2513_v53 }
 0x826   : > { %6082 = vpow2.f32 %v2406_v38 }
 0x827   : > { %6084 = vpow2.f32 %v2408_v32  ;;  %v2505_v32 = vld [vmem:[#allocation4 + $0xf8] sm:$0xff] }
 0x828   : > { %2047 = vperm.xlu2 %5806, %v8781_v36   ;;  %6086 = vpow2.f32 %v2410_v62  ;;  %v2737_v62 = vadd.f32 %v8884_v9, %v8882_v26  ;;  %v10743_v26 = vld [vmem:[#allocation71_spill] sm:$0xff] }
 0x829   : > { %6088 = vpow2.f32 %v2412_v15  ;;  %v1621_v9 = vsub.f32 %v10743_v26, %v8407_v63 }
 0x82a   : > { %v8963_v8 = vpop.f32.mrf.mxu2 }
 0x82b   : > { %v8965_v12 = vpop.f32.mrf.mxu3 }
 0x82c   : > { %v6083_v4 = vpop.eup %6082 }
 0x82d   : > { %v6085_v22 = vpop.eup %6084  ;;  %3560 = vmatmul.f32.gmra.mxu2 %v6083_v4 }
 0x82e   : > { %3769 = vmatmul.f32.gmra.mxu3 %v6085_v22  ;;  %v8931_v7 = vadd.f32 %v6085_v22, %v6083_v4  ;;  %v8933_v31 = vpop.eup %6086 }
 0x82f   : > { %v8935_v37 = vpop.eup %6088 }
 0x835   : > { %2037 = vperm.xlu1 %5805, %v8693_v54   ;;  %3563 = vmatmul.f32.gmra.mxu2 %v8933_v31 }
 0x836   : > { %3772 = vmatmul.f32.gmra.mxu3 %v8935_v37 }
 0x83d   : > { %3566 = vmatmul.f32.gmra.mxu2 %v6079_v49 }
 0x83e   : > { %3775 = vmatmul.f32.gmra.mxu3 %v6081_v18  ;;  %v10742_v18 = vld [vmem:[#allocation54_spill] sm:$0xff] }
 0x83f   : > { %v2569_v39 = vmul.f32 %v10742_v18, %v2505_v32 }
 0x842   : > { %v2709_v5 = vpop.xlane.xlu2 %2708 }
 0x843   : > { %v2829_v42 = vadd.f32 %v2709_v5, %v2573_v13  ;;  %v1728_v13 = vmul.f32 1.442695, %v1621_v9 }
 0x845   : > { %2894 = vst.msk [vmem:[#allocation4 + $0x118] sm:$0xff] %vm2858_vm5, %v2829_v42  ;;  %v2721_v46 = vpop.xlane.xlu0 %2720  ;;  %v10745_v42 = vld [vmem:[#allocation69_spill] sm:$0xff] }
 0x846   : > { %v2833_v38 = vadd.f32 %v2721_v46, %v2577_v47  ;;  %v10746_v46 = vld [vmem:[#allocation76_spill] sm:$0xff] }
 0x848   : > { %2898 = vst.msk [vmem:[#allocation4 + $0x138] sm:$0xff] %vm2858_vm5, %v2833_v38 }
 0x84a   : > { %v2033_v3 = vpop.permute.xlu2 %2032 }
 0x84b   : > { %v2194_v1 = vsub.f32 %v8476_v40, %v2033_v3  ;;  %v2195_v49 = vsub.f32 %v8478_v50, %v2033_v3 }
 0x84c   : > { %v2697_v11 = vpop.xlane.xlu1 %2696 }
 0x84d   : > { %v2426_v15 = vmul.f32 1.442695, %v2194_v1  ;;  %v2428_v55 = vmul.f32 1.442695, %v2195_v49  ;;  %v2825_v4 = vadd.f32 %v2697_v11, %v2569_v39 }
 0x84e   : > { %2738 = vadd.xlane.f32.xlu0 %v2737_v62 }
 0x84f   : > { %6090 = vpow2.f32 %v2426_v15  ;;  %2890 = vst.msk [vmem:[#allocation4 + $0xf8] sm:$0xff] %vm2858_vm5, %v2825_v4  ;;  %v1627_v15 = vsub.f32 %v8599_v30, %v8604_v2  ;;  %v1630_v30 = vsub.f32 %v8690_v34, %v8698_v27  ;;  %v1633_v34 = vsub.f32 %v8775_v16, %v8781_v36 }
 0x850   : > { %6092 = vpow2.f32 %v2428_v55  ;;  %v1636_v16 = vsub.f32 %v8845_v33, %v8848_v61 }
 0x851   : > { %2726 = vadd.xlane.f32.xlu2 %v8821_v43  ;;  %6094 = vpow2.f32 %v1728_v13  ;;  %v10744_v43 = vld [vmem:[#allocation78_spill] sm:$0xff] }
 0x852   : > { %v1624_v53 = vsub.f32 %v10744_v43, %v8508_v23  ;;  %v10748_v23 = vld [vmem:[#allocation72_spill] sm:$0xff]  ;;  %v1740_v43 = vmul.f32 1.442695, %v1627_v15  ;;  %v10751_v15 = vld [vmem:[#allocation85_spill] sm:$0xff] }
 0x853   : > { %v2193_v62 = vsub.f32 %v10748_v23, %v8896_v25  ;;  %v2516_v23 = vld [vmem:[#allocation4 + $0x150] sm:$0xff] }
 0x854   : > { %v1734_v3 = vmul.f32 1.442695, %v1624_v53 }
 0x855   : > { %v8953_v22 = vpop.eup %6090  ;;  %v2424_v26 = vmul.f32 1.442695, %v2193_v62 }
 0x856   : > { %v8955_v40 = vpop.eup %6092 }
 0x857   : > { %v8959_v50 = vadd.f32 %v8955_v40, %v8953_v22  ;;  %v8975_v39 = vpop.eup %6094 }
 0x858   : > { %v9008_v27 = vpop.permute.xlu0 %2057 }
 0x85f   : > { %2714 = vadd.xlane.f32.xlu1 %v8644_v45  ;;  %v10747_v45 = vld [vmem:[#allocation28_spill] sm:$0xff] }
 0x860   : > { %v2192_v11 = vsub.f32 %v10747_v45, %v8896_v25  ;;  %v10749_v25 = vld [vmem:[#allocation48_spill] sm:$0xff]  ;;  %v1752_v45 = vmul.f32 1.442695, %v1633_v34 }
 0x862   : > { %2087 = vperm.xlu0 %5807, %v8857_v21   ;;  %v2422_v55 = vmul.f32 1.442695, %v2192_v11  ;;  %v2512_v11 = vld [vmem:[#allocation4 + $0x130] sm:$0xff] }
 0x864   : > { %v2023_v5 = vpop.permute.xlu1 %2022 }
 0x865   : > { %v2190_v47 = vsub.f32 %v10745_v42, %v2023_v5  ;;  %v2191_v38 = vsub.f32 %v10746_v46, %v2023_v5  ;;  %v3552_v32 = vpop.f32.mrf.mxu2 }
 0x866   : > { %v3761_v63 = vpop.f32.mrf.mxu3 }
 0x867   : > { %v2418_v1 = vmul.f32 1.442695, %v2190_v47  ;;  %v2420_v49 = vmul.f32 1.442695, %v2191_v38  ;;  %v8973_v18 = vadd.f32 %v3761_v63, %v3552_v32  ;;  %v10750_v47 = vld [vmem:[#allocation55_spill] sm:$0xff] }
 0x868   : > { %v1620_v46 = vsub.f32 %v10750_v47, %v10749_v25  ;;  %v1746_v63 = vmul.f32 1.442695, %v1630_v30 }
 0x869   : > { %6096 = vpow2.f32 %v2418_v1  ;;  %2062 = vperm.xlu2 %5806, %v8848_v61  }
 0x86a   : > { %6098 = vpow2.f32 %v2420_v49  ;;  %3204 = vperm.xlu0 %5807, %v8975_v39   ;;  %v1726_v2 = vmul.f32 1.442695, %v1620_v46  ;;  %v10752_v46 = vld [vmem:[#allocation94_spill] sm:$0xff] }
 0x86b   : > { %6100 = vpow2.f32 %v1734_v3 }
 0x86c   : > { %6102 = vpow2.f32 %v2422_v55  ;;  %v2576_v55 = vmul.f32 %v10751_v15, %v2512_v11  ;;  %v10753_v11 = vld [vmem:[#allocation95_spill] sm:$0xff] }
 0x86d   : > { %v3555_v4 = vpop.f32.mrf.mxu2  ;;  %6104 = vpow2.f32 %v2424_v26 }
 0x86e   : > { %v3764_v9 = vpop.f32.mrf.mxu3  ;;  %6106 = vpow2.f32 %v1740_v43 }
 0x86f   : > { %v6097_v13 = vpop.eup %6096  ;;  %v8985_v53 = vadd.f32 %v3764_v9, %v3555_v4  ;;  %6108 = vpow2.f32 %v1726_v2 }
 0x870   : > { %v6099_v5 = vpop.eup %6098  ;;  %3569 = vmatmul.f32.gmra.mxu2 %v6097_v13  ;;  %6110 = vpow2.f32 %v1746_v63 }
 0x871   : > { %v8987_v42 = vpop.eup %6100  ;;  %3778 = vmatmul.f32.gmra.mxu3 %v6099_v5  ;;  %v8991_v38 = vadd.f32 %v6099_v5, %v6097_v13  ;;  %6112 = vpow2.f32 %v1752_v45  ;;  %v2508_v5 = vld [vmem:[#allocation4 + $0x110] sm:$0xff] }
 0x872   : > { %3219 = vperm.xlu0 %5807, %v8987_v42   ;;  %v8996_v32 = vpop.eup %6102  ;;  %v2572_v30 = vmul.f32 %v10752_v46, %v2508_v5  ;;  %v10760_v46 = vld [vmem:[#allocation75_spill] sm:$0xff] }
 0x873   : > { %v8998_v3 = vpop.eup %6104 }
 0x874   : > { %v9002_v1 = vpop.eup %6106 }
 0x875   : > { %v9010_v49 = vpop.eup %6108 }
 0x876   : > { %v9013_v62 = vpop.eup %6110  ;;  %v2580_v4 = vmul.f32 %v9010_v49, %v2516_v23  ;;  %v10754_v23 = vld [vmem:[#allocation59_spill] sm:$0xff] }
 0x877   : > { %v1619_v15 = vsub.f32 %v10754_v23, %v10753_v11 }
 0x878   : > { %2052 = vperm.xlu1 %5805, %v8773_v58   ;;  %3572 = vmatmul.f32.gmra.mxu2 %v8996_v32 }
 0x879   : > { %3781 = vmatmul.f32.gmra.mxu3 %v8998_v3 }
 0x87a   : > { %3234 = vperm.xlu0 %5807, %v9002_v1  }
 0x880   : > { %3575 = vmatmul.f32.gmra.mxu2 %v8953_v22  ;;  %v1758_v22 = vmul.f32 1.442695, %v1636_v16  ;;  %v9045_v16 = vpop.f32.mrf.mxu2 }
 0x881   : > { %3784 = vmatmul.f32.gmra.mxu3 %v8955_v40  ;;  %v9023_v40 = vpop.eup %6112 }
 0x882   : > { %3249 = vperm.xlu0 %5807, %v9013_v62   ;;  %6114 = vpow2.f32 %v1758_v22 }
 0x883   : > { %v2718_v36 = vpop.xlane.xlu2 %2717  ;;  %v2730_v26 = vpop.xlane.xlu0 %2729 }
 0x884   : > { %v2832_v9 = vadd.f32 %v2718_v36, %v2576_v55  ;;  %v2836_v13 = vadd.f32 %v2730_v26, %v2580_v4  ;;  %v1724_v55 = vmul.f32 1.442695, %v1619_v15  ;;  %v10756_v26 = vld [vmem:[#allocation83_spill] sm:$0xff] }
 0x886   : > { %2897 = vst.msk [vmem:[#allocation4 + $0x130] sm:$0xff] %vm2858_vm5, %v2832_v9 }
 0x887   : > { %2901 = vst.msk [vmem:[#allocation4 + $0x150] sm:$0xff] %vm2858_vm5, %v2836_v13  ;;  %v9049_v13 = vpop.f32.mrf.mxu3 }
 0x888   : > { %v9029_v34 = vpop.eup %6114 }
 0x88a   : > { %3264 = vperm.xlu0 %5807, %v9023_v40  }
 0x88b   : > { %v2048_v43 = vpop.permute.xlu2 %2047 }
 0x88c   : > { %v2200_v25 = vsub.f32 %v8572_v60, %v2048_v43  ;;  %v2201_v33 = vsub.f32 %v8574_v6, %v2048_v43 }
 0x88e   : > { %v2438_v61 = vmul.f32 1.442695, %v2200_v25  ;;  %v2440_v47 = vmul.f32 1.442695, %v2201_v33  ;;  %v10758_v25 = vld [vmem:[#allocation84_spill] sm:$0xff] }
 0x88f   : > { %v2706_v2 = vpop.xlane.xlu1 %2705  ;;  %v2198_v33 = vsub.f32 %v10758_v25, %v8940_v0 }
 0x890   : > { %6116 = vpow2.f32 %v2438_v61  ;;  %v2828_v63 = vadd.f32 %v2706_v2, %v2572_v30  ;;  %v10759_v61 = vld [vmem:[#allocation77_spill] sm:$0xff]  ;;  %v10761_v30 = vld [vmem:[#allocation74_spill] sm:$0xff] }
 0x891   : > { %6118 = vpow2.f32 %v2440_v47  ;;  %v2199_v47 = vsub.f32 %v10759_v61, %v8940_v0  ;;  %v1623_v2 = vsub.f32 %v10761_v30, %v10760_v46  ;;  %v2434_v11 = vmul.f32 1.442695, %v2198_v33  ;;  %v10763_v30 = vld [vmem:[#allocation86_spill] sm:$0xff] }
 0x892   : > { %2893 = vst.msk [vmem:[#allocation4 + $0x110] sm:$0xff] %vm2858_vm5, %v2828_v63  ;;  %2735 = vadd.xlane.f32.xlu2 %v8878_v20  ;;  %3279 = vperm.xlu0 %5807, %v9029_v34   ;;  %v10755_v20 = vld [vmem:[#allocation82_spill] sm:$0xff]  ;;  %6120 = vpow2.f32 %v1724_v55 }
 0x896   : > { %v9034_v45 = vpop.eup %6116  ;;  %v2073_v25 = vpop.permute.xlu0 %2072 }
 0x897   : > { %v9036_v60 = vpop.eup %6118 }
 0x898   : > { %v9040_v6 = vadd.f32 %v9036_v60, %v9034_v45  ;;  %v6121_v15 = vpop.eup %6120 }
 0x8a2   : > { %2723 = vadd.xlane.f32.xlu1 %v8734_v41  ;;  %v10757_v41 = vld [vmem:[#allocation90_spill] sm:$0xff] }
 0x8a3   : > { %v1622_v5 = vsub.f32 %v10757_v41, %v8418_v56 }
 0x8a5   : > { %v1730_v63 = vmul.f32 1.442695, %v1622_v5 }
 0x8a7   : > { %v2038_v4 = vpop.permute.xlu1 %2037 }
 0x8a8   : > { %v2196_v36 = vsub.f32 %v10755_v20, %v2038_v4  ;;  %v2197_v9 = vsub.f32 %v10756_v26, %v2038_v4  ;;  %v2436_v4 = vmul.f32 1.442695, %v2199_v47  ;;  %v1732_v26 = vmul.f32 1.442695, %v1623_v2 }
 0x8a9   : > { %v1628_v2 = vsub.f32 %v10763_v30, %v8607_v24 }
 0x8aa   : > { %v2430_v22 = vmul.f32 1.442695, %v2196_v36  ;;  %v2432_v43 = vmul.f32 1.442695, %v2197_v9  ;;  %2077 = vperm.xlu2 %5806, %v8907_v52   ;;  %v10762_v9 = vld [vmem:[#allocation80_spill] sm:$0xff] }
 0x8ab   : > { %v1625_v0 = vsub.f32 %v10762_v9, %v8514_v51  ;;  %v2746_v51 = vadd.f32 %v8935_v37, %v8933_v31  ;;  %v2515_v31 = vld [vmem:[#allocation4 + $0x148] sm:$0xff] }
 0x8ac   : > { %6122 = vpow2.f32 %v2430_v22 }
 0x8ad   : > { %6124 = vpow2.f32 %v2432_v43  ;;  %v1736_v43 = vmul.f32 1.442695, %v1625_v0  ;;  %v2755_v0 = vadd.f32 %v8998_v3, %v8996_v32  ;;  %v10768_v32 = vld [vmem:[#allocation99_spill] sm:$0xff] }
 0x8ae   : > { %6126 = vpow2.f32 %v1730_v63 }
 0x8af   : > { %6128 = vpow2.f32 %v2434_v11  ;;  %v2519_v11 = vld [vmem:[#allocation4 + $0x168] sm:$0xff] }
 0x8b0   : > { %v3561_v23 = vpop.f32.mrf.mxu2  ;;  %6130 = vpow2.f32 %v2436_v4  ;;  %v10764_v4 = vld [vmem:[#allocation92_spill] sm:$0xff] }
 0x8b1   : > { %v3770_v55 = vpop.f32.mrf.mxu3  ;;  %6132 = vpow2.f32 %v1732_v26 }
 0x8b2   : > { %v6123_v20 = vpop.eup %6122  ;;  %v9060_v36 = vadd.f32 %v3770_v55, %v3561_v23  ;;  %3194 = vperm.xlu2 %5806, %v6121_v15   ;;  %6134 = vpow2.f32 %v1736_v43  ;;  %v1742_v23 = vmul.f32 1.442695, %v1628_v2  ;;  %v2204_v55 = vsub.f32 %v10764_v4, %v9008_v27  ;;  %v10766_v43 = vld [vmem:[#allocation29_spill] sm:$0xff]  ;;  %v10767_v4 = vld [vmem:[#allocation98_spill] sm:$0xff] }
 0x8b3   : > { %v6125_v56 = vpop.eup %6124  ;;  %3578 = vmatmul.f32.gmra.mxu2 %v6123_v20 }
 0x8b4   : > { %3787 = vmatmul.f32.gmra.mxu3 %v6125_v56  ;;  %v9064_v22 = vadd.f32 %v6125_v56, %v6123_v20  ;;  %v9066_v5 = vpop.eup %6126  ;;  %v10765_v56 = vld [vmem:[#allocation93_spill] sm:$0xff]  ;;  %6136 = vpow2.f32 %v1742_v23 }
 0x8b5   : > { %v6129_v61 = vpop.eup %6128  ;;  %v2205_v24 = vsub.f32 %v10765_v56, %v9008_v27  ;;  %v10770_v56 = vld [vmem:[#allocation81_spill] sm:$0xff] }
 0x8b6   : > { %v6131_v46 = vpop.eup %6130 }
 0x8b7   : > { %v9076_v63 = vpop.eup %6132  ;;  %v2448_v30 = vmul.f32 1.442695, %v2205_v24 }
 0x8b8   : > { %v3564_v41 = vpop.f32.mrf.mxu2  ;;  %v2583_v20 = vmul.f32 %v9076_v63, %v2519_v11  ;;  %v9081_v37 = vpop.eup %6134 }
 0x8b9   : > { %v3773_v33 = vpop.f32.mrf.mxu3 }
 0x8ba   : > { %v9068_v47 = vadd.f32 %v3773_v33, %v3564_v41  ;;  %3209 = vperm.xlu2 %5806, %v9066_v5   ;;  %v1631_v41 = vsub.f32 %v10766_v43, %v8693_v54  ;;  %v2579_v33 = vmul.f32 %v6121_v15, %v2515_v31  ;;  %v2211_v54 = vsub.f32 %v10768_v32, %v2073_v25  ;;  %v9096_v3 = vpop.eup %6136  ;;  %v10773_v32 = vld [vmem:[#allocation67_spill] sm:$0xff] }
 0x8bb   : > { %2067 = vperm.xlu1 %5805, %v8835_v28   ;;  %3581 = vmatmul.f32.gmra.mxu2 %v6129_v61 }
 0x8bc   : > { %3790 = vmatmul.f32.gmra.mxu3 %v6131_v46  ;;  %2747 = vadd.xlane.f32.xlu0 %v2746_v51  ;;  %v2446_v51 = vmul.f32 1.442695, %v2204_v55  ;;  %v1748_v11 = vmul.f32 1.442695, %v1631_v41  ;;  %v2460_v55 = vmul.f32 1.442695, %v2211_v54 }
 0x8be   : > { %6138 = vpow2.f32 %v2446_v51 }
 0x8bf   : > { %6140 = vpow2.f32 %v2448_v30 }
 0x8c0   : > { %6142 = vpow2.f32 %v1748_v11 }
 0x8c1   : > { %v2739_v26 = vpop.xlane.xlu0 %2738 }
 0x8c2   : > { %v2839_v9 = vadd.f32 %v2739_v26, %v2583_v20  ;;  %3224 = vperm.xlu2 %5806, %v9081_v37   ;;  %v2210_v20 = vsub.f32 %v10767_v4, %v2073_v25  ;;  %v10771_v26 = vld [vmem:[#allocation32_spill] sm:$0xff]  ;;  %v2511_v25 = vld [vmem:[#allocation4 + $0x128] sm:$0xff] }
 0x8c3   : > { %3584 = vmatmul.f32.gmra.mxu2 %v9034_v45  ;;  %v2764_v45 = vadd.f32 %v6131_v46, %v6129_v61 }
 0x8c4   : > { %2904 = vst.msk [vmem:[#allocation4 + $0x168] sm:$0xff] %vm2858_vm5, %v2839_v9  ;;  %3793 = vmatmul.f32.gmra.mxu3 %v9036_v60  ;;  %v2727_v27 = vpop.xlane.xlu2 %2726  ;;  %2756 = vadd.xlane.f32.xlu0 %v2755_v0  ;;  %v10769_v60 = vld [vmem:[#allocation30_spill] sm:$0xff]  ;;  %v2458_v23 = vmul.f32 1.442695, %v2210_v20  ;;  %v9103_v0 = vpop.eup %6138 }
 0x8c5   : > { %v2835_v2 = vadd.f32 %v2727_v27, %v2579_v33  ;;  %v1634_v15 = vsub.f32 %v10769_v60, %v8773_v58  ;;  %v9105_v43 = vpop.eup %6140  ;;  %v10772_v58 = vld [vmem:[#allocation61_spill] sm:$0xff] }
 0x8c6   : > { %6144 = vpow2.f32 %v2458_v23  ;;  %v9107_v33 = vpop.eup %6142  ;;  %v2575_v51 = vmul.f32 %v10772_v58, %v2511_v25  ;;  %v2773_v30 = vadd.f32 %v9105_v43, %v9103_v0 }
 0x8c7   : > { %2900 = vst.msk [vmem:[#allocation4 + $0x148] sm:$0xff] %vm2858_vm5, %v2835_v2  ;;  %v1754_v41 = vmul.f32 1.442695, %v1634_v15  ;;  %6146 = vpow2.f32 %v2460_v55  ;;  %v1637_v2 = vsub.f32 %v8831_v19, %v8835_v28 }
 0x8c9   : > { %v1760_v55 = vmul.f32 1.442695, %v1637_v2  ;;  %v2969_v2 = vld [vmem:[#allocation5 + $0xb0] sm:$0xff] }
 0x8ca   : > { %3239 = vperm.xlu2 %5806, %v9096_v3  }
 0x8cc   : > { %v2063_v31 = vpop.permute.xlu2 %2062  ;;  %2765 = vadd.xlane.f32.xlu0 %v2764_v45  ;;  %v9115_v20 = vpop.eup %6144  ;;  %v10774_v45 = vld [vmem:[#allocation68_spill] sm:$0xff] }
 0x8cd   : > { %v2206_v24 = vsub.f32 %v10770_v56, %v2063_v31  ;;  %v2207_v9 = vsub.f32 %v10771_v26, %v2063_v31  ;;  %v9120_v15 = vpop.eup %6146 }
 0x8ce   : > { %v2782_v26 = vadd.f32 %v9120_v15, %v9115_v20 }
 0x8cf   : > { %v2450_v61 = vmul.f32 1.442695, %v2206_v24  ;;  %v2452_v46 = vmul.f32 1.442695, %v2207_v9  ;;  %v2966_v9 = vld [vmem:[#allocation5 + $0xf8] sm:$0xff] }
 0x8d1   : > { %6148 = vpow2.f32 %v2450_v61 }
 0x8d2   : > { %6150 = vpow2.f32 %v2452_v46  ;;  %v2715_v27 = vpop.xlane.xlu1 %2714  ;;  %3254 = vperm.xlu2 %5806, %v9107_v33  }
 0x8d3   : > { %6152 = vpow2.f32 %v1754_v41  ;;  %v2831_v11 = vadd.f32 %v2715_v27, %v2575_v51  ;;  %v3759_v41 = vadd.f32 %v8965_v12, %v8963_v8  ;;  %v3768_v8 = vadd.f32 %v9049_v13, %v9045_v16 }
 0x8d4   : > { %2774 = vadd.xlane.f32.xlu0 %v2773_v30  ;;  %v2088_v4 = vpop.permute.xlu0 %2087 }
 0x8d5   : > { %2896 = vst.msk [vmem:[#allocation4 + $0x128] sm:$0xff] %vm2858_vm5, %v2831_v11  ;;  %v2216_v54 = vsub.f32 %v10773_v32, %v2088_v4  ;;  %v2217_v60 = vsub.f32 %v10774_v45, %v2088_v4  ;;  %v1639_v32 = vsub.f32 %v8903_v35, %v8907_v52  ;;  %v3776_v45 = vpop.f32.mrf.mxu3 }
 0x8d7   : > { %v9122_v23 = vpop.eup %6148  ;;  %v2470_v31 = vmul.f32 1.442695, %v2216_v54  ;;  %v2472_v56 = vmul.f32 1.442695, %v2217_v60  ;;  %v3567_v54 = vpop.f32.mrf.mxu2 }
 0x8d8   : > { %v9124_v24 = vpop.eup %6150 }
 0x8d9   : > { %v9126_v19 = vpop.eup %6152  ;;  %6154 = vpow2.f32 %v2470_v31  ;;  %v9130_v28 = vadd.f32 %v9124_v24, %v9122_v23  ;;  %v10775_v31 = vld [vmem:[#allocation73_spill] sm:$0xff] }
 0x8da   : > { %6156 = vpow2.f32 %v2472_v56  ;;  %3269 = vperm.xlu2 %5806, %v9126_v19  }
 0x8db   : > { %6158 = vpow2.f32 %v1760_v55  ;;  %v2972_v55 = vld [vmem:[#allocation5 + $0xb8] sm:$0xff] }
 0x8dc   : > { %2783 = vadd.xlane.f32.xlu0 %v2782_v26  ;;  %v3205_v25 = vpop.permute.xlu0 %3204  ;;  %v10776_v26 = vld [vmem:[#allocation91_spill] sm:$0xff] }
 0x8dd   : > { %v3350_v61 = vmul.f32 %v3205_v25, %v2966_v9  ;;  %v1764_v25 = vmul.f32 1.442695, %v1639_v32  ;;  %v2518_v32 = vld [vmem:[#allocation4 + $0x160] sm:$0xff] }
 0x8df   : > { %v9137_v46 = vpop.eup %6154  ;;  %v3864_v58 = vadd.f32 %v3759_v41, %v3350_v61  ;;  %v3777_v61 = vadd.f32 %v3776_v45, %v3567_v54  ;;  %v2975_v54 = vld [vmem:[#allocation5 + $0xa8] sm:$0xff] }
 0x8e0   : > { %v9139_v51 = vpop.eup %6156 }
 0x8e1   : > { %v9141_v27 = vpop.eup %6158  ;;  %3928 = vst [vmem:[#allocation5 + $0xf8] sm:$0xff] %v3864_v58  ;;  %v2791_v30 = vadd.f32 %v9139_v51, %v9137_v46 }
 0x8e2   : > { %3284 = vperm.xlu2 %5806, %v9141_v27  }
 0x8e4   : > { %2792 = vadd.xlane.f32.xlu0 %v2791_v30  ;;  %v3220_v11 = vpop.permute.xlu0 %3219 }
 0x8e5   : > { %v3353_v12 = vmul.f32 %v3220_v11, %v2969_v2  ;;  %2732 = vadd.xlane.f32.xlu1 %v8805_v14 }
 0x8e7   : > { %v3867_v4 = vadd.f32 %v3768_v8, %v3353_v12 }
 0x8e9   : > { %3931 = vst [vmem:[#allocation5 + $0xb0] sm:$0xff] %v3867_v4 }
 0x8ea   : > { %v2053_v60 = vpop.permute.xlu1 %2052 }
 0x8eb   : > { %v2202_v56 = vsub.f32 %v10775_v31, %v2053_v60  ;;  %v2203_v9 = vsub.f32 %v10776_v26, %v2053_v60  ;;  %v2582_v31 = vmul.f32 %v9066_v5, %v2518_v32  ;;  %v10778_v5 = vld [vmem:[#allocation100_spill] sm:$0xff] }
 0x8ec   : > { %v3235_v41 = vpop.permute.xlu0 %3234 }
 0x8ed   : > { %v2442_v16 = vmul.f32 1.442695, %v2202_v56  ;;  %v2444_v13 = vmul.f32 1.442695, %v2203_v9  ;;  %v3356_v58 = vmul.f32 %v3235_v41, %v2972_v55 }
 0x8ef   : > { %6160 = vpow2.f32 %v2442_v16  ;;  %v3870_v14 = vadd.f32 %v3777_v61, %v3356_v58  ;;  %v2514_v58 = vld [vmem:[#allocation4 + $0x140] sm:$0xff] }
 0x8f0   : > { %6162 = vpow2.f32 %v2444_v13 }
 0x8f1   : > { %6164 = vpow2.f32 %v1764_v25  ;;  %3934 = vst [vmem:[#allocation5 + $0xb8] sm:$0xff] %v3870_v14  ;;  %v10779_v14 = vld [vmem:[#allocation35_spill] sm:$0xff] }
 0x8f3   : > { %v9153_v35 = vpop.f32.mrf.mxu2 }
 0x8f4   : > { %v9155_v52 = vpop.f32.mrf.mxu3  ;;  %v3250_v45 = vpop.permute.xlu0 %3249 }
 0x8f5   : > { %v6161_v30 = vpop.eup %6160  ;;  %v3359_v56 = vmul.f32 %v3250_v45, %v2975_v54 }
 0x8f6   : > { %v6163_v2 = vpop.eup %6162  ;;  %3587 = vmatmul.f32.gmra.mxu2 %v6161_v30 }
 0x8f7   : > { %v9157_v11 = vpop.eup %6164  ;;  %3796 = vmatmul.f32.gmra.mxu3 %v6163_v2 }
 0x8f8   : > { %3294 = vperm.xlu0 %5807, %v9157_v11  }
 0x8fb   : > { %v3573_v8 = vpop.f32.mrf.mxu2 }
 0x8fc   : > { %v3782_v12 = vpop.f32.mrf.mxu3 }
 0x8fd   : > { %v9160_v4 = vadd.f32 %v3782_v12, %v3573_v8 }
 0x8fe   : > { %3199 = vperm.xlu1 %5805, %v9010_v49   ;;  %3590 = vmatmul.f32.gmra.mxu2 %v9103_v0 }
 0x8ff   : > { %3799 = vmatmul.f32.gmra.mxu3 %v9105_v43  ;;  %v10777_v43 = vld [vmem:[#allocation36_spill] sm:$0xff] }
 0x903   : > { %v3576_v60 = vpop.f32.mrf.mxu2 }
 0x904   : > { %v3785_v55 = vpop.f32.mrf.mxu3 }
 0x905   : > { %v3786_v26 = vadd.f32 %v3785_v55, %v3576_v60  ;;  %v2736_v9 = vpop.xlane.xlu2 %2735 }
 0x906   : > { %v2838_v25 = vadd.f32 %v2736_v9, %v2582_v31  ;;  %2082 = vperm.xlu1 %5805, %v8892_v44   ;;  %3593 = vmatmul.f32.gmra.mxu2 %v9122_v23  ;;  %v2964_v23 = vld [vmem:[#allocation5 + $0x100] sm:$0xff]  ;;  %v10780_v31 = vld [vmem:[#allocation63_spill] sm:$0xff]  ;;  %v9188_v9 = vpop.permute.xlu0 %3264 }
 0x907   : > { %v3873_v49 = vadd.f32 %v3786_v26, %v3359_v56  ;;  %3802 = vmatmul.f32.gmra.mxu3 %v9124_v24  ;;  %v2578_v24 = vmul.f32 %v10779_v14, %v2514_v58  ;;  %v10781_v56 = vld [vmem:[#allocation56_spill] sm:$0xff] }
 0x908   : > { %2903 = vst.msk [vmem:[#allocation4 + $0x160] sm:$0xff] %vm2858_vm5, %v2838_v25  ;;  %v1626_v26 = vsub.f32 %v10781_v56, %v10780_v31  ;;  %v10786_v31 = vld [vmem:[#allocation96_spill] sm:$0xff] }
 0x909   : > { %3937 = vst [vmem:[#allocation5 + $0xa8] sm:$0xff] %v3873_v49 }
 0x90b   : > { %2744 = vadd.xlane.f32.xlu2 %v8931_v7 }
 0x90d   : > { %v2078_v0 = vpop.permute.xlu2 %2077 }
 0x90e   : > { %v2212_v41 = vsub.f32 %v10777_v43, %v2078_v0  ;;  %v2213_v61 = vsub.f32 %v10778_v5, %v2078_v0  ;;  %v1738_v0 = vmul.f32 1.442695, %v1626_v26  ;;  %v2770_v43 = vadd.f32 %v6163_v2, %v6161_v30  ;;  %v10782_v5 = vld [vmem:[#allocation50_spill] sm:$0xff]  ;;  %v9193_v58 = vpop.permute.xlu0 %3279  ;;  %v10784_v30 = vld [vmem:[#allocation88_spill] sm:$0xff]  ;;  %v10785_v2 = vld [vmem:[#allocation87_spill] sm:$0xff] }
 0x910   : > { %v2462_v16 = vmul.f32 1.442695, %v2212_v41  ;;  %v2464_v13 = vmul.f32 1.442695, %v2213_v61  ;;  %v2970_v41 = vld [vmem:[#allocation5 + $0x110] sm:$0xff]  ;;  %v10783_v61 = vld [vmem:[#allocation31_spill] sm:$0xff] }
 0x912   : > { %6166 = vpow2.f32 %v2462_v16  ;;  %v1629_v16 = vsub.f32 %v10783_v61, %v10782_v5  ;;  %v10788_v5 = vld [vmem:[#allocation66_spill] sm:$0xff] }
 0x913   : > { %6168 = vpow2.f32 %v2464_v13  ;;  %2753 = vadd.xlane.f32.xlu2 %v8991_v38  ;;  %v2967_v38 = vld [vmem:[#allocation5 + $0x178] sm:$0xff] }
 0x914   : > { %6170 = vpow2.f32 %v1738_v0  ;;  %v1744_v14 = vmul.f32 1.442695, %v1629_v16 }
 0x915   : > { %v2724_v8 = vpop.xlane.xlu1 %2723  ;;  %v3195_v12 = vpop.permute.xlu2 %3194 }
 0x916   : > { %v2834_v32 = vadd.f32 %v2724_v8, %v2578_v24  ;;  %v3348_v54 = vmul.f32 %v3195_v12, %v2964_v23  ;;  %v2522_v8 = vld [vmem:[#allocation4 + $0x180] sm:$0xff]  ;;  %6172 = vpow2.f32 %v1744_v14  ;;  %v1632_v12 = vsub.f32 %v10785_v2, %v10784_v30 }
 0x918   : > { %v9175_v7 = vpop.eup %6166  ;;  %2899 = vst.msk [vmem:[#allocation4 + $0x140] sm:$0xff] %vm2858_vm5, %v2834_v32  ;;  %v3862_v45 = vadd.f32 %v8918_v59, %v3348_v54  ;;  %v1750_v61 = vmul.f32 1.442695, %v1632_v12 }
 0x919   : > { %v9179_v60 = vpop.eup %6168 }
 0x91a   : > { %3926 = vst [vmem:[#allocation5 + $0x100] sm:$0xff] %v3862_v45  ;;  %v9183_v55 = vadd.f32 %v9179_v60, %v9175_v7  ;;  %v9196_v24 = vpop.eup %6170 }
 0x91b   : > { %2762 = vadd.xlane.f32.xlu2 %v9064_v22  ;;  %v2586_v45 = vmul.f32 %v9196_v24, %v2522_v8 }
 0x91c   : > { %v9206_v16 = vpop.eup %6172 }
 0x91d   : > { %v3210_v25 = vpop.permute.xlu2 %3209 }
 0x91e   : > { %v3351_v49 = vmul.f32 %v3210_v25, %v2967_v38  ;;  %v3780_v38 = vadd.f32 %v9155_v52, %v9153_v35  ;;  %v2976_v35 = vld [vmem:[#allocation5 + $0xc0] sm:$0xff]  ;;  %v2525_v52 = vld [vmem:[#allocation4 + $0x198] sm:$0xff] }
 0x920   : > { %v3865_v59 = vadd.f32 %v8973_v18, %v3351_v49  ;;  %v2973_v18 = vld [vmem:[#allocation5 + $0x120] sm:$0xff] }
 0x922   : > { %3929 = vst [vmem:[#allocation5 + $0x178] sm:$0xff] %v3865_v59 }
 0x923   : > { %2771 = vadd.xlane.f32.xlu2 %v2770_v43 }
 0x925   : > { %v3225_v22 = vpop.permute.xlu2 %3224 }
 0x926   : > { %v3354_v13 = vmul.f32 %v3225_v22, %v2970_v41  ;;  %v10789_v22 = vld [vmem:[#allocation44_spill] sm:$0xff] }
 0x928   : > { %v3868_v23 = vadd.f32 %v9060_v36, %v3354_v13  ;;  %v10787_v36 = vld [vmem:[#allocation97_spill] sm:$0xff]  ;;  %v1635_v13 = vsub.f32 %v10789_v22, %v8726_v17  ;;  %v2528_v17 = vld [vmem:[#allocation4 + $0x1b0] sm:$0xff]  ;;  %v10791_v22 = vld [vmem:[#allocation64_spill] sm:$0xff] }
 0x92a   : > { %3932 = vst [vmem:[#allocation5 + $0x110] sm:$0xff] %v3868_v23 }
 0x92d   : > { %v2068_v32 = vpop.permute.xlu1 %2067  ;;  %v3240_v54 = vpop.permute.xlu2 %3239 }
 0x92e   : > { %v2208_v56 = vsub.f32 %v10786_v31, %v2068_v32  ;;  %v2209_v26 = vsub.f32 %v10787_v36, %v2068_v32  ;;  %v3357_v25 = vmul.f32 %v3240_v54, %v2973_v18  ;;  %v2589_v18 = vmul.f32 %v9206_v16, %v2525_v52  ;;  %v2531_v52 = vld [vmem:[#allocation4 + $0x1c8] sm:$0xff] }
 0x92f   : > { %v2748_v49 = vpop.xlane.xlu0 %2747 }
 0x930   : > { %v2454_v0 = vmul.f32 1.442695, %v2208_v56  ;;  %v2456_v59 = vmul.f32 1.442695, %v2209_v26  ;;  %v3871_v43 = vadd.f32 %v3780_v38, %v3357_v25  ;;  %v2842_v41 = vadd.f32 %v2748_v49, %v2586_v45  ;;  %2741 = vadd.xlane.f32.xlu1 %v10788_v5  ;;  %v10790_v26 = vld [vmem:[#allocation53_spill] sm:$0xff] }
 0x931   : > { %v1756_v38 = vmul.f32 1.442695, %v1635_v13  ;;  %v1638_v25 = vsub.f32 %v10790_v26, %v8795_v29  ;;  %v1641_v29 = vsub.f32 %v10791_v22, %v8857_v21  ;;  %v2978_v13 = vld [vmem:[#allocation5 + $0x188] sm:$0xff]  ;;  %v10793_v22 = vld [vmem:[#allocation42_spill] sm:$0xff] }
 0x932   : > { %6174 = vpow2.f32 %v2454_v0  ;;  %3935 = vst [vmem:[#allocation5 + $0x120] sm:$0xff] %v3871_v43 }
 0x933   : > { %6176 = vpow2.f32 %v2456_v59  ;;  %2907 = vst.msk [vmem:[#allocation4 + $0x180] sm:$0xff] %vm2858_vm5, %v2842_v41 }
 0x934   : > { %6178 = vpow2.f32 %v1750_v61  ;;  %v1762_v61 = vmul.f32 1.442695, %v1638_v25 }
 0x935   : > { %v3255_v23 = vpop.permute.xlu2 %3254  ;;  %6180 = vpow2.f32 %v1756_v38 }
 0x936   : > { %v3360_v14 = vmul.f32 %v3255_v23, %v2976_v35  ;;  %v3579_v8 = vpop.f32.mrf.mxu2  ;;  %6182 = vpow2.f32 %v1762_v61 }
 0x937   : > { %v3788_v30 = vpop.f32.mrf.mxu3  ;;  %v2757_v2 = vpop.xlane.xlu0 %2756 }
 0x938   : > { %v6175_v12 = vpop.eup %6174  ;;  %v3789_v32 = vadd.f32 %v3788_v30, %v3579_v8  ;;  %v2845_v54 = vadd.f32 %v2757_v2, %v2589_v18  ;;  %v3362_v30 = vmul.f32 %v9188_v9, %v2978_v13 }
 0x939   : > { %v6177_v45 = vpop.eup %6176  ;;  %3596 = vmatmul.f32.gmra.mxu2 %v6175_v12 }
 0x93a   : > { %v3874_v31 = vadd.f32 %v3789_v32, %v3360_v14  ;;  %2910 = vst.msk [vmem:[#allocation4 + $0x198] sm:$0xff] %vm2858_vm5, %v2845_v54  ;;  %3805 = vmatmul.f32.gmra.mxu3 %v6177_v45  ;;  %v2779_v56 = vadd.f32 %v6177_v45, %v6175_v12  ;;  %v6179_v36 = vpop.eup %6178  ;;  %v2534_v32 = vld [vmem:[#allocation4 + $0x1e0] sm:$0xff] }
 0x93b   : > { %v2592_v0 = vmul.f32 %v6179_v36, %v2528_v17  ;;  %v6181_v35 = vpop.eup %6180 }
 0x93c   : > { %3938 = vst [vmem:[#allocation5 + $0xc0] sm:$0xff] %v3874_v31  ;;  %2780 = vadd.xlane.f32.xlu2 %v2779_v56  ;;  %v2595_v14 = vmul.f32 %v6181_v35, %v2531_v52  ;;  %v6183_v21 = vpop.eup %6182  ;;  %v10792_v52 = vld [vmem:[#allocation33_spill] sm:$0xff] }
 0x93d   : > { %v2598_v54 = vmul.f32 %v6183_v21, %v2534_v32 }
 0x93e   : > { %v3582_v49 = vpop.f32.mrf.mxu2 }
 0x93f   : > { %v3791_v59 = vpop.f32.mrf.mxu3  ;;  %v2766_v43 = vpop.xlane.xlu0 %2765 }
 0x940   : > { %v9215_v41 = vadd.f32 %v3791_v59, %v3582_v49  ;;  %v2848_v5 = vadd.f32 %v2766_v43, %v2592_v0  ;;  %v2965_v49 = vld [vmem:[#allocation5 + $0xc8] sm:$0xff] }
 0x941   : > { %3599 = vmatmul.f32.gmra.mxu2 %v9115_v20  ;;  %v1768_v20 = vmul.f32 1.442695, %v1641_v29 }
 0x942   : > { %2913 = vst.msk [vmem:[#allocation4 + $0x1b0] sm:$0xff] %vm2858_vm5, %v2848_v5  ;;  %3808 = vmatmul.f32.gmra.mxu3 %v9120_v15  ;;  %v2979_v5 = vld [vmem:[#allocation5 + $0x1b0] sm:$0xff] }
 0x943   : > { %6184 = vpow2.f32 %v1768_v20 }
 0x946   : > { %v3585_v23 = vpop.f32.mrf.mxu2 }
 0x947   : > { %v3794_v8 = vpop.f32.mrf.mxu3  ;;  %v2775_v18 = vpop.xlane.xlu0 %2774 }
 0x948   : > { %v3795_v2 = vadd.f32 %v3794_v8, %v3585_v23  ;;  %v2851_v12 = vadd.f32 %v2775_v18, %v2595_v14 }
 0x949   : > { %3214 = vperm.xlu1 %5805, %v9076_v63   ;;  %3602 = vmatmul.f32.gmra.mxu2 %v9175_v7  ;;  %v9229_v9 = vpop.eup %6184  ;;  %v2537_v63 = vld [vmem:[#allocation4 + $0x1f8] sm:$0xff] }
 0x94a   : > { %v3876_v15 = vadd.f32 %v3795_v2, %v3362_v30  ;;  %2916 = vst.msk [vmem:[#allocation4 + $0x1c8] sm:$0xff] %vm2858_vm5, %v2851_v12  ;;  %3811 = vmatmul.f32.gmra.mxu3 %v9179_v60  ;;  %v2517_v7 = vld [vmem:[#allocation4 + $0x158] sm:$0xff]  ;;  %v2601_v31 = vmul.f32 %v9229_v9, %v2537_v63 }
 0x94b   : > { %v2581_v60 = vmul.f32 %v8975_v39, %v2517_v7 }
 0x94c   : > { %3940 = vst [vmem:[#allocation5 + $0x188] sm:$0xff] %v3876_v15 }
 0x94f   : > { %v2784_v45 = vpop.xlane.xlu0 %2783 }
 0x950   : > { %v2854_v38 = vadd.f32 %v2784_v45, %v2598_v54 }
 0x951   : > { %3229 = vperm.xlu1 %5805, %v9196_v24   ;;  %v3270_v24 = vpop.permute.xlu2 %3269 }
 0x952   : > { %2919 = vst.msk [vmem:[#allocation4 + $0x1e0] sm:$0xff] %vm2858_vm5, %v2854_v38 }
 0x957   : > { %v2793_v56 = vpop.xlane.xlu0 %2792 }
 0x958   : > { %v2857_v17 = vadd.f32 %v2793_v56, %v2601_v31  ;;  %v2733_v26 = vpop.xlane.xlu1 %2732  ;;  %v2981_v31 = vld [vmem:[#allocation5 + $0xf0] sm:$0xff] }
 0x959   : > { %v2837_v25 = vadd.f32 %v2733_v26, %v2581_v60  ;;  %3244 = vperm.xlu1 %5805, %v9206_v16   ;;  %v9237_v39 = vpop.permute.xlu2 %3284  ;;  %v3365_v26 = vmul.f32 %v9193_v58, %v2981_v31 }
 0x95a   : > { %2922 = vst.msk [vmem:[#allocation4 + $0x1f8] sm:$0xff] %vm2858_vm5, %v2857_v17  ;;  %v2527_v17 = vld [vmem:[#allocation4 + $0x1a8] sm:$0xff] }
 0x95b   : > { %2902 = vst.msk [vmem:[#allocation4 + $0x158] sm:$0xff] %vm2858_vm5, %v2837_v25 }
 0x961   : > { %3259 = vperm.xlu1 %5805, %v6179_v36   ;;  %v2521_v36 = vld [vmem:[#allocation4 + $0x178] sm:$0xff] }
 0x969   : > { %3274 = vperm.xlu1 %5805, %v6181_v35   ;;  %v3363_v35 = vmul.f32 %v3270_v24, %v2979_v5 }
 0x970   : > { %v3200_v0 = vpop.permute.xlu1 %3199 }
 0x971   : > { %v3349_v59 = vmul.f32 %v3200_v0, %v2965_v49  ;;  %3289 = vperm.xlu1 %5805, %v6183_v21   ;;  %v2524_v21 = vld [vmem:[#allocation4 + $0x190] sm:$0xff]  ;;  %v2591_v49 = vmul.f32 %v9107_v33, %v2527_v17 }
 0x972   : > { %v2588_v63 = vmul.f32 %v9096_v3, %v2524_v21 }
 0x973   : > { %v3863_v43 = vadd.f32 %v8923_v10, %v3349_v59  ;;  %v2585_v10 = vmul.f32 %v9081_v37, %v2521_v36  ;;  %v1640_v59 = vsub.f32 %v8889_v57, %v8892_v44 }
 0x975   : > { %3927 = vst [vmem:[#allocation5 + $0xc8] sm:$0xff] %v3863_v43  ;;  %v2530_v43 = vld [vmem:[#allocation4 + $0x1c0] sm:$0xff]  ;;  %v1766_v5 = vmul.f32 1.442695, %v1640_v59 }
 0x976   : > { %v2594_v58 = vmul.f32 %v9126_v19, %v2530_v43  ;;  %v2533_v19 = vld [vmem:[#allocation4 + $0x1d8] sm:$0xff] }
 0x978   : > { %v2083_v61 = vpop.permute.xlu1 %2082 }
 0x979   : > { %v2214_v16 = vsub.f32 %v10792_v52, %v2083_v61  ;;  %v2215_v29 = vsub.f32 %v10793_v22, %v2083_v61  ;;  %v3588_v13 = vpop.f32.mrf.mxu2 }
 0x97a   : > { %v3797_v23 = vpop.f32.mrf.mxu3 }
 0x97b   : > { %v2466_v14 = vmul.f32 1.442695, %v2214_v16  ;;  %v2468_v8 = vmul.f32 1.442695, %v2215_v29  ;;  %v3798_v18 = vadd.f32 %v3797_v23, %v3588_v13  ;;  %v2597_v16 = vmul.f32 %v9141_v27, %v2533_v19  ;;  %v2968_v29 = vld [vmem:[#allocation5 + $0x180] sm:$0xff]  ;;  %v2982_v13 = vld [vmem:[#allocation5 + $0x128] sm:$0xff] }
 0x97d   : > { %6186 = vpow2.f32 %v2466_v14  ;;  %v3877_v30 = vadd.f32 %v3798_v18, %v3363_v35  ;;  %v3366_v35 = vmul.f32 %v9237_v39, %v2982_v13 }
 0x97e   : > { %6188 = vpow2.f32 %v2468_v8  ;;  %v2745_v2 = vpop.xlane.xlu2 %2744  ;;  %v2971_v8 = vld [vmem:[#allocation5 + $0x20] sm:$0xff] }
 0x97f   : > { %3941 = vst [vmem:[#allocation5 + $0x1b0] sm:$0xff] %v3877_v30  ;;  %v2841_v12 = vadd.f32 %v2745_v2, %v2585_v10  ;;  %6190 = vpow2.f32 %v1766_v5 }
 0x981   : > { %2906 = vst.msk [vmem:[#allocation4 + $0x178] sm:$0xff] %vm2858_vm5, %v2841_v12  ;;  %v3591_v20 = vpop.f32.mrf.mxu2  ;;  %v2984_v12 = vld [vmem:[#allocation5 + $0x170] sm:$0xff] }
 0x982   : > { %v3800_v15 = vpop.f32.mrf.mxu3 }
 0x983   : > { %v6187_v32 = vpop.eup %6186  ;;  %v9243_v54 = vadd.f32 %v3800_v15, %v3591_v20  ;;  %v3295_v20 = vpop.permute.xlu0 %3294 }
 0x984   : > { %v6189_v45 = vpop.eup %6188  ;;  %3605 = vmatmul.f32.gmra.mxu2 %v6187_v32 }
 0x985   : > { %3814 = vmatmul.f32.gmra.mxu3 %v6189_v45  ;;  %v2788_v38 = vadd.f32 %v6189_v45, %v6187_v32  ;;  %v9257_v33 = vpop.eup %6190 }
 0x986   : > { %v2754_v7 = vpop.xlane.xlu2 %2753 }
 0x987   : > { %2789 = vadd.xlane.f32.xlu2 %v2788_v38  ;;  %v2844_v37 = vadd.f32 %v2754_v7, %v2588_v63  ;;  %v2977_v7 = vld [vmem:[#allocation5 + $0x138] sm:$0xff] }
 0x989   : > { %2909 = vst.msk [vmem:[#allocation4 + $0x190] sm:$0xff] %vm2858_vm5, %v2844_v37  ;;  %v3594_v56 = vpop.f32.mrf.mxu2 }
 0x98a   : > { %v3803_v60 = vpop.f32.mrf.mxu3 }
 0x98b   : > { %v3804_v25 = vadd.f32 %v3803_v60, %v3594_v56  ;;  %v2980_v56 = vld [vmem:[#allocation5 + $0x18] sm:$0xff] }
 0x98c   : > { %3608 = vmatmul.f32.gmra.mxu2 %v9137_v46  ;;  %v2520_v46 = vld [vmem:[#allocation4 + $0x170] sm:$0xff] }
 0x98d   : > { %v3879_v24 = vadd.f32 %v3804_v25, %v3365_v26  ;;  %3817 = vmatmul.f32.gmra.mxu3 %v9139_v51  ;;  %v2584_v57 = vmul.f32 %v8987_v42, %v2520_v46  ;;  %v2983_v25 = vld [vmem:[#allocation5 + $0x1f8] sm:$0xff]  ;;  %v2523_v46 = vld [vmem:[#allocation4 + $0x188] sm:$0xff] }
 0x98e   : > { %v2763_v3 = vpop.xlane.xlu2 %2762 }
 0x98f   : > { %3943 = vst [vmem:[#allocation5 + $0xf0] sm:$0xff] %v3879_v24  ;;  %v2847_v0 = vadd.f32 %v2763_v3, %v2591_v49 }
 0x991   : > { %2912 = vst.msk [vmem:[#allocation4 + $0x1a8] sm:$0xff] %vm2858_vm5, %v2847_v0  ;;  %v2536_v0 = vld [vmem:[#allocation4 + $0x1f0] sm:$0xff] }
 0x992   : > { %v2600_v59 = vmul.f32 %v9257_v33, %v2536_v0 }
 0x996   : > { %v2772_v61 = vpop.xlane.xlu2 %2771 }
 0x997   : > { %v2850_v52 = vadd.f32 %v2772_v61, %v2594_v58 }
 0x999   : > { %2915 = vst.msk [vmem:[#allocation4 + $0x1c0] sm:$0xff] %vm2858_vm5, %v2850_v52 }
 0x99b   : > { %2750 = vadd.xlane.f32.xlu1 %v8916_v48 }
 0x99f   : > { %3299 = vperm.xlu2 %5806, %v9257_v33   ;;  %v2526_v33 = vld [vmem:[#allocation4 + $0x1a0] sm:$0xff] }
 0x9a3   : > { %v2742_v44 = vpop.xlane.xlu1 %2741  ;;  %2759 = vadd.xlane.f32.xlu1 %v8959_v50 }
 0x9a4   : > { %v2840_v51 = vadd.f32 %v2742_v44, %v2584_v57  ;;  %v2587_v44 = vmul.f32 %v9002_v1, %v2523_v46 }
 0x9a6   : > { %2905 = vst.msk [vmem:[#allocation4 + $0x170] sm:$0xff] %vm2858_vm5, %v2840_v51 }
 0x9ab   : > { %2768 = vadd.xlane.f32.xlu1 %v9040_v6 }
 0x9af   : > { %v2781_v22 = vpop.xlane.xlu2 %2780 }
 0x9b0   : > { %v2853_v48 = vadd.f32 %v2781_v22, %v2597_v16  ;;  %v2590_v16 = vmul.f32 %v9013_v62, %v2526_v33 }
 0x9b2   : > { %2918 = vst.msk [vmem:[#allocation4 + $0x1d8] sm:$0xff] %vm2858_vm5, %v2853_v48 }
 0x9b3   : > { %2777 = vadd.xlane.f32.xlu1 %v9130_v28 }
 0x9bb   : > { %v3215_v42 = vpop.permute.xlu1 %3214  ;;  %2786 = vadd.xlane.f32.xlu1 %v9183_v55  ;;  %v2974_v55 = vld [vmem:[#allocation5 + $0x90] sm:$0xff] }
 0x9bc   : > { %v3352_v50 = vmul.f32 %v3215_v42, %v2968_v29  ;;  %v3597_v23 = vpop.f32.mrf.mxu2  ;;  %v2529_v29 = vld [vmem:[#allocation4 + $0x1b8] sm:$0xff] }
 0x9bd   : > { %v3806_v36 = vpop.f32.mrf.mxu3  ;;  %v2593_v13 = vmul.f32 %v9023_v40, %v2529_v29 }
 0x9be   : > { %v3866_v6 = vadd.f32 %v8985_v53, %v3352_v50  ;;  %v3807_v14 = vadd.f32 %v3806_v36, %v3597_v23  ;;  %v3368_v53 = vmul.f32 %v3295_v20, %v2984_v12  ;;  %v2532_v23 = vld [vmem:[#allocation4 + $0x1d0] sm:$0xff] }
 0x9bf   : > { %v2596_v1 = vmul.f32 %v9029_v34, %v2532_v23 }
 0x9c0   : > { %3930 = vst [vmem:[#allocation5 + $0x180] sm:$0xff] %v3866_v6  ;;  %v3880_v27 = vadd.f32 %v3807_v14, %v3366_v35  ;;  %v2535_v6 = vld [vmem:[#allocation4 + $0x1e8] sm:$0xff] }
 0x9c1   : > { %v2599_v62 = vmul.f32 %v9157_v11, %v2535_v6 }
 0x9c2   : > { %3944 = vst [vmem:[#allocation5 + $0x128] sm:$0xff] %v3880_v27 }
 0x9c3   : > { %v3230_v18 = vpop.permute.xlu1 %3229 }
 0x9c4   : > { %v3355_v30 = vmul.f32 %v3230_v18, %v2971_v8  ;;  %v3600_v28 = vpop.f32.mrf.mxu2  ;;  %v2986_v18 = vld [vmem:[#allocation5 + $0x118] sm:$0xff] }
 0x9c5   : > { %v3809_v10 = vpop.f32.mrf.mxu3 }
 0x9c6   : > { %v3869_v2 = vadd.f32 %v9068_v47, %v3355_v30  ;;  %v3810_v24 = vadd.f32 %v3809_v10, %v3600_v28 }
 0x9c8   : > { %3933 = vst [vmem:[#allocation5 + $0x20] sm:$0xff] %v3869_v2 }
 0x9cb   : > { %v3245_v15 = vpop.permute.xlu1 %3244 }
 0x9cc   : > { %v3358_v21 = vmul.f32 %v3245_v15, %v2974_v55  ;;  %v3603_v39 = vpop.f32.mrf.mxu2 }
 0x9cd   : > { %v3812_v32 = vpop.f32.mrf.mxu3 }
 0x9ce   : > { %v3872_v45 = vadd.f32 %v9160_v4, %v3358_v21  ;;  %v3813_v38 = vadd.f32 %v3812_v32, %v3603_v39 }
 0x9d0   : > { %3936 = vst [vmem:[#allocation5 + $0x90] sm:$0xff] %v3872_v45  ;;  %v3882_v63 = vadd.f32 %v3813_v38, %v3368_v53 }
 0x9d2   : > { %3946 = vst [vmem:[#allocation5 + $0x170] sm:$0xff] %v3882_v63 }
 0x9d3   : > { %v3260_v37 = vpop.permute.xlu1 %3259 }
 0x9d4   : > { %v3361_v31 = vmul.f32 %v3260_v37, %v2977_v7  ;;  %3304 = vperm.xlu1 %5805, %v9229_v9  }
 0x9d6   : > { %v3875_v47 = vadd.f32 %v9215_v41, %v3361_v31  ;;  %v2985_v41 = vld [vmem:[#allocation5 + $0x1d0] sm:$0xff] }
 0x9d8   : > { %3939 = vst [vmem:[#allocation5 + $0x138] sm:$0xff] %v3875_v47 }
 0x9db   : > { %v3275_v60 = vpop.permute.xlu1 %3274 }
 0x9dc   : > { %v3364_v17 = vmul.f32 %v3275_v60, %v2980_v56 }
 0x9de   : > { %v3878_v26 = vadd.f32 %v9243_v54, %v3364_v17 }
 0x9e0   : > { %3942 = vst [vmem:[#allocation5 + $0x18] sm:$0xff] %v3878_v26 }
 0x9e3   : > { %v3290_v4 = vpop.permute.xlu1 %3289 }
 0x9e4   : > { %v3367_v49 = vmul.f32 %v3290_v4, %v2983_v25 }
 0x9e6   : > { %v3881_v3 = vadd.f32 %v3810_v24, %v3367_v49 }
 0x9e8   : > { %3945 = vst [vmem:[#allocation5 + $0x1f8] sm:$0xff] %v3881_v3 }
 0x9fa   : > { %v2790_v43 = vpop.xlane.xlu2 %2789 }
 0x9fb   : > { %v2856_v9 = vadd.f32 %v2790_v43, %v2600_v59 }
 0x9fd   : > { %2921 = vst.msk [vmem:[#allocation4 + $0x1f0] sm:$0xff] %vm2858_vm5, %v2856_v9 }
 0xa02   : > { %v3300_v5 = vpop.permute.xlu2 %3299 }
 0xa03   : > { %v3369_v52 = vmul.f32 %v3300_v5, %v2985_v41 }
 0xa07   : > { %v3606_v58 = vpop.f32.mrf.mxu2 }
 0xa08   : > { %v3815_v61 = vpop.f32.mrf.mxu3 }
 0xa09   : > { %v3816_v54 = vadd.f32 %v3815_v61, %v3606_v58 }
 0xa0b   : > { %v3883_v57 = vadd.f32 %v3816_v54, %v3369_v52 }
 0xa0d   : > { %3947 = vst [vmem:[#allocation5 + $0x1d0] sm:$0xff] %v3883_v57 }
 0xa0e   : > { %v2751_v51 = vpop.xlane.xlu1 %2750 }
 0xa0f   : > { %v2843_v19 = vadd.f32 %v2751_v51, %v2587_v44  ;;  %v3609_v8 = vpop.f32.mrf.mxu2 }
 0xa10   : > { %v3818_v40 = vpop.f32.mrf.mxu3 }
 0xa11   : > { %2908 = vst.msk [vmem:[#allocation4 + $0x188] sm:$0xff] %vm2858_vm5, %v2843_v19  ;;  %v3819_v28 = vadd.f32 %v3818_v40, %v3609_v8 }
 0xa16   : > { %v2760_v22 = vpop.xlane.xlu1 %2759 }
 0xa17   : > { %v2846_v48 = vadd.f32 %v2760_v22, %v2590_v16 }
 0xa19   : > { %2911 = vst.msk [vmem:[#allocation4 + $0x1a0] sm:$0xff] %vm2858_vm5, %v2846_v48 }
 0xa1e   : > { %v2769_v42 = vpop.xlane.xlu1 %2768 }
 0xa1f   : > { %v2849_v50 = vadd.f32 %v2769_v42, %v2593_v13 }
 0xa21   : > { %2914 = vst.msk [vmem:[#allocation4 + $0x1b8] sm:$0xff] %vm2858_vm5, %v2849_v50 }
 0xa26   : > { %v2778_v36 = vpop.xlane.xlu1 %2777 }
 0xa27   : > { %v2852_v35 = vadd.f32 %v2778_v36, %v2596_v1 }
 0xa29   : > { %2917 = vst.msk [vmem:[#allocation4 + $0x1d0] sm:$0xff] %vm2858_vm5, %v2852_v35 }
 0xa2e   : > { %v2787_v14 = vpop.xlane.xlu1 %2786 }
 0xa2f   : > { %v2855_v27 = vadd.f32 %v2787_v14, %v2599_v62 }
 0xa31   : > { %2920 = vst.msk [vmem:[#allocation4 + $0x1e8] sm:$0xff] %vm2858_vm5, %v2855_v27 }
 0xa46   : > { %v3305_v30 = vpop.permute.xlu1 %3304 }
 0xa47   : > { %v3370_v10 = vmul.f32 %v3305_v30, %v2986_v18  ;;  %4016 = sbr.rel (%p5670_p8) target bundleno = 2978 (0xba2), region = 56 }
 0xa49   : > { %v3884_v2 = vadd.f32 %v3819_v28, %v3370_v10 }
 0xa4b   : > { %3948 = vst [vmem:[#allocation5 + $0x118] sm:$0xff] %v3884_v2 }
 0xa4c   : > { %v4085_v34 = vld [vmem:[#allocation4 + $0x20] sm:$0xff]  ;;  %v4083_v55 = vld [vmem:[#allocation4 + $0x10] sm:$0xff]  ;;  %v6549_v20 = vmov 0   ;;  %v4086_v11 = vld [vmem:[#allocation4 + $0x28] sm:$0xff] }
 0xa4d   : > { %v4081_v12 = vld [vmem:[#allocation4] sm:$0xff]  ;;  %6194 = vset.pattern.permute.xlu2 %v6549_v20  ;;  %6193 = vset.pattern.permute.xlu1 %v6549_v20  ;;  %v4084_v15 = vld [vmem:[#allocation4 + $0x18] sm:$0xff]  ;;  %v4082_v21 = vld [vmem:[#allocation4 + $0x8] sm:$0xff] }
 0xa4e   : > { %6192 = vset.pattern.permute.xlu0 %v6549_v20  ;;  %4167 = vperm.xlu2 %6194, %v4085_v34   ;;  %v4089_v39 = vld [vmem:[#allocation4 + $0x40] sm:$0xff]  ;;  %v4088_v32 = vld [vmem:[#allocation4 + $0x38] sm:$0xff]  ;;  %v4087_v53 = vld [vmem:[#allocation4 + $0x30] sm:$0xff] }
 0xa4f   : > { %4157 = vperm.xlu1 %6193, %v4083_v55   ;;  %4147 = vperm.xlu0 %6192, %v4081_v12   ;;  %v4092_v45 = vld [vmem:[#allocation4 + $0x58] sm:$0xff]  ;;  %v4091_v38 = vld [vmem:[#allocation4 + $0x50] sm:$0xff]  ;;  %v4090_v63 = vld [vmem:[#allocation4 + $0x48] sm:$0xff] }
 0xa50   : > { %v4095_v7 = vld [vmem:[#allocation4 + $0x70] sm:$0xff]  ;;  %v4094_v37 = vld [vmem:[#allocation4 + $0x68] sm:$0xff]  ;;  %v4093_v31 = vld [vmem:[#allocation4 + $0x60] sm:$0xff] }
 0xa51   : > { %v4098_v47 = vld [vmem:[#allocation4 + $0x88] sm:$0xff]  ;;  %v4097_v56 = vld [vmem:[#allocation4 + $0x80] sm:$0xff]  ;;  %v4096_v60 = vld [vmem:[#allocation4 + $0x78] sm:$0xff] }
 0xa52   : > { %v4101_v17 = vld [vmem:[#allocation4 + $0xa0] sm:$0xff]  ;;  %v4100_v26 = vld [vmem:[#allocation4 + $0x98] sm:$0xff]  ;;  %v4099_v25 = vld [vmem:[#allocation4 + $0x90] sm:$0xff] }
 0xa53   : > { %v4104_v4 = vld [vmem:[#allocation4 + $0xb8] sm:$0xff]  ;;  %v4103_v24 = vld [vmem:[#allocation4 + $0xb0] sm:$0xff]  ;;  %v4102_v49 = vld [vmem:[#allocation4 + $0xa8] sm:$0xff] }
 0xa54   : > { %v4107_v3 = vld [vmem:[#allocation4 + $0xd0] sm:$0xff]  ;;  %v4106_v0 = vld [vmem:[#allocation4 + $0xc8] sm:$0xff]  ;;  %v4105_v59 = vld [vmem:[#allocation4 + $0xc0] sm:$0xff] }
 0xa55   : > { %v4110_v43 = vld [vmem:[#allocation4 + $0xe8] sm:$0xff]  ;;  %v4109_v9 = vld [vmem:[#allocation4 + $0xe0] sm:$0xff]  ;;  %v4108_v41 = vld [vmem:[#allocation4 + $0xd8] sm:$0xff] }
 0xa56   : > { %4172 = vperm.xlu2 %6194, %v4086_v11   ;;  %v4113_v5 = vld [vmem:[#allocation4 + $0x100] sm:$0xff]  ;;  %v4112_v58 = vld [vmem:[#allocation4 + $0xf8] sm:$0xff]  ;;  %v4111_v61 = vld [vmem:[#allocation4 + $0xf0] sm:$0xff] }
 0xa57   : > { %4162 = vperm.xlu1 %6193, %v4084_v15   ;;  %4152 = vperm.xlu0 %6192, %v4082_v21   ;;  %v4116_v52 = vld [vmem:[#allocation4 + $0x118] sm:$0xff]  ;;  %v4115_v54 = vld [vmem:[#allocation4 + $0x110] sm:$0xff]  ;;  %v4114_v46 = vld [vmem:[#allocation4 + $0x108] sm:$0xff] }
 0xa58   : > { %v4119_v44 = vld [vmem:[#allocation4 + $0x130] sm:$0xff]  ;;  %v4118_v51 = vld [vmem:[#allocation4 + $0x128] sm:$0xff]  ;;  %v4117_v19 = vld [vmem:[#allocation4 + $0x120] sm:$0xff] }
 0xa59   : > { %v4122_v42 = vld [vmem:[#allocation4 + $0x148] sm:$0xff]  ;;  %v4121_v23 = vld [vmem:[#allocation4 + $0x140] sm:$0xff]  ;;  %v4120_v1 = vld [vmem:[#allocation4 + $0x138] sm:$0xff] }
 0xa5a   : > { %v4021_v62 = vld [vmem:[#allocation5 + $0xd0] sm:$0xff]  ;;  %v4125_v2 = vld [vmem:[#allocation4 + $0x160] sm:$0xff]  ;;  %v4124_v55 = vld [vmem:[#allocation4 + $0x158] sm:$0xff] }
 0xa5b   : > { %v4123_v12 = vld [vmem:[#allocation4 + $0x150] sm:$0xff]  ;;  %v4022_v21 = vld [vmem:[#allocation5 + $0xd8] sm:$0xff] }
 0xa5e   : > { %4187 = vperm.xlu2 %6194, %v4089_v39  }
 0xa5f   : > { %4182 = vperm.xlu1 %6193, %v4088_v32   ;;  %4177 = vperm.xlu0 %6192, %v4087_v53  }
 0xa66   : > { %4202 = vperm.xlu2 %6194, %v4092_v45  }
 0xa67   : > { %4197 = vperm.xlu1 %6193, %v4091_v38   ;;  %4192 = vperm.xlu0 %6192, %v4090_v63  }
 0xa6e   : > { %4217 = vperm.xlu2 %6194, %v4095_v7  }
 0xa6f   : > { %4212 = vperm.xlu1 %6193, %v4094_v37   ;;  %4207 = vperm.xlu0 %6192, %v4093_v31  }
 0xa76   : > { %4232 = vperm.xlu2 %6194, %v4098_v47  }
 0xa77   : > { %4227 = vperm.xlu1 %6193, %v4097_v56   ;;  %4222 = vperm.xlu0 %6192, %v4096_v60   ;;  %v4128_v56 = vld [vmem:[#allocation4 + $0x178] sm:$0xff] }
 0xa7e   : > { %4247 = vperm.xlu2 %6194, %v4101_v17  }
 0xa7f   : > { %4242 = vperm.xlu1 %6193, %v4100_v26   ;;  %4237 = vperm.xlu0 %6192, %v4099_v25   ;;  %v4127_v26 = vld [vmem:[#allocation4 + $0x170] sm:$0xff]  ;;  %v4126_v25 = vld [vmem:[#allocation4 + $0x168] sm:$0xff] }
 0xa86   : > { %4262 = vperm.xlu2 %6194, %v4104_v4  }
 0xa87   : > { %4257 = vperm.xlu1 %6193, %v4103_v24   ;;  %4252 = vperm.xlu0 %6192, %v4102_v49  }
 0xa8e   : > { %4277 = vperm.xlu2 %6194, %v4107_v3  }
 0xa8f   : > { %4272 = vperm.xlu1 %6193, %v4106_v0   ;;  %4267 = vperm.xlu0 %6192, %v4105_v59   ;;  %v4025_v59 = vld [vmem:[#allocation5 + $0x148] sm:$0xff] }
 0xa96   : > { %4292 = vperm.xlu2 %6194, %v4110_v43  }
 0xa97   : > { %4287 = vperm.xlu1 %6193, %v4109_v9   ;;  %4282 = vperm.xlu0 %6192, %v4108_v41  }
 0xa9e   : > { %4307 = vperm.xlu2 %6194, %v4113_v5  }
 0xa9f   : > { %4302 = vperm.xlu1 %6193, %v4112_v58   ;;  %4297 = vperm.xlu0 %6192, %v4111_v61  }
 0xaa6   : > { %4322 = vperm.xlu2 %6194, %v4116_v52  }
 0xaa7   : > { %4317 = vperm.xlu1 %6193, %v4115_v54   ;;  %4312 = vperm.xlu0 %6192, %v4114_v46  }
 0xaa8   : > { %v4168_v57 = vpop.permute.xlu2 %4167 }
 0xaa9   : > { %6195 = vrcp.f32 %v4168_v57  ;;  %v4536_v48 = vand.u32 2147483648, %v4168_v57  ;;  %vm4530_vm6 = vweird.f32 %v4168_v57  ;;  %v4534_v13 = vand.u32 2147483647, %v4168_v57 }
 0xaab   : > { %v4537_v36 = vor.u32 1.1754944e-38, %v4536_v48  ;;  %vm4535_vm9 = vcmp.eq.f32.partialorder %v4534_v13, 8.507059e+37  ;;  %v4131_v13 = vld [vmem:[#allocation4 + $0x190] sm:$0xff] }
 0xaae   : > { %4337 = vperm.xlu2 %6194, %v4119_v44  }
 0xaaf   : > { %v6196_v33 = vpop.eup %6195  ;;  %4332 = vperm.xlu1 %6193, %v4118_v51   ;;  %4327 = vperm.xlu0 %6192, %v4117_v19  }
 0xab0   : > { %v4526_v16 = vmul.f32 %v6196_v33, %v4168_v57  ;;  %v4173_v22 = vpop.permute.xlu2 %4172  ;;  %vm4531_vm7 = vweird.f32 %v6196_v33 }
 0xab1   : > { %6197 = vrcp.f32 %v4173_v22  ;;  %vm4532_vm8 = vmor %vm4530_vm6, %vm4531_vm7  ;;  %vm4545_vm10 = vweird.f32 %v4173_v22  ;;  %v4551_v18 = vand.u32 2147483648, %v4173_v22  ;;  %v4549_v10 = vand.u32 2147483647, %v4173_v22 }
 0xab2   : > { %v4527_v29 = vsub.f32 1.0, %v4526_v16 }
 0xab3   : > { %v4552_v20 = vor.u32 1.1754944e-38, %v4551_v18  ;;  %vm4550_vm13 = vcmp.eq.f32.partialorder %v4549_v10, 8.507059e+37 }
 0xab4   : > { %v4528_v50 = vmul.f32 %v6196_v33, %v4527_v29 }
 0xab6   : > { %v4529_v35 = vadd.f32 %v6196_v33, %v4528_v50  ;;  %4352 = vperm.xlu2 %6194, %v4122_v42  }
 0xab7   : > { %v6198_v6 = vpop.eup %6197  ;;  %4347 = vperm.xlu1 %6193, %v4121_v23   ;;  %4342 = vperm.xlu0 %6192, %v4120_v1   ;;  %v4130_v23 = vld [vmem:[#allocation4 + $0x188] sm:$0xff]  ;;  %v4129_v1 = vld [vmem:[#allocation4 + $0x180] sm:$0xff] }
 0xab8   : > { %v4533_v14 = vsel %vm4532_vm8, %v6196_v33, %v4529_v35  ;;  %v4541_v27 = vmul.f32 %v6198_v6, %v4173_v22  ;;  %v4188_v8 = vpop.permute.xlu2 %4187  ;;  %vm4546_vm11 = vweird.f32 %v6198_v6 }
 0xab9   : > { %v4538_v40 = vsel %vm4535_vm9, %v4537_v36, %v4533_v14  ;;  %6199 = vrcp.f32 %v4188_v8  ;;  %vm4547_vm12 = vmor %vm4545_vm10, %vm4546_vm11  ;;  %vm4590_vm14 = vweird.f32 %v4188_v8  ;;  %v4594_v38 = vand.u32 2147483647, %v4188_v8 }
 0xaba   : > { %v4539_v30 = vmul.f32 %v4538_v40, %v4021_v62  ;;  %v4542_v28 = vsub.f32 1.0, %v4541_v27  ;;  %v4596_v63 = vand.u32 2147483648, %v4188_v8  ;;  %v4028_v40 = vld [vmem:[#allocation5 + $0x130] sm:$0xff] }
 0xabb   : > { %vm4595_vm1 = vcmp.eq.f32.partialorder %v4594_v38, 8.507059e+37 }
 0xabc   : > { %5429 = vst [vmem:[%s6778_s30 + $0x20] sm:$0xff] %v4539_v30  ;;  %v4543_v34 = vmul.f32 %v6198_v6, %v4542_v28  ;;  %v4597_v24 = vor.u32 1.1754944e-38, %v4596_v63  ;;  %v4017_v63 = vld [vmem:[#allocation5 + $0x68] sm:$0xff] }
 0xabe   : > { %v4544_v11 = vadd.f32 %v6198_v6, %v4543_v34  ;;  %4367 = vperm.xlu2 %6194, %v4125_v2   ;;  %v4019_v2 = vld [vmem:[#allocation5 + $0x70] sm:$0xff] }
 0xabf   : > { %v6200_v15 = vpop.eup %6199  ;;  %4362 = vperm.xlu1 %6193, %v4124_v55   ;;  %4357 = vperm.xlu0 %6192, %v4123_v12  }
 0xac0   : > { %v4548_v39 = vsel %vm4547_vm12, %v6198_v6, %v4544_v11  ;;  %v4586_v32 = vmul.f32 %v6200_v15, %v4188_v8  ;;  %v9289_v53 = vpop.permute.xlu2 %4202  ;;  %vm4591_vm15 = vweird.f32 %v6200_v15 }
 0xac1   : > { %v4553_v45 = vsel %vm4550_vm13, %v4552_v20, %v4548_v39  ;;  %6201 = vrcp.f32 %v9289_v53  ;;  %v9292_v7 = vpop.permute.xlu1 %4157  ;;  %v9294_v37 = vpop.permute.xlu0 %4147  ;;  %v4639_v17 = vand.u32 2147483647, %v9289_v53  ;;  %vm9301_vm0 = vmor %vm4590_vm14, %vm4591_vm15  ;;  %v4641_v3 = vand.u32 2147483648, %v9289_v53 }
 0xac2   : > { %v4554_v31 = vmul.f32 %v4553_v45, %v4022_v21  ;;  %v4587_v47 = vsub.f32 1.0, %v4586_v32  ;;  %6203 = vrcp.f32 %v9292_v7  ;;  %vm4635_vm2 = vweird.f32 %v9289_v53 }
 0xac3   : > { %6205 = vrcp.f32 %v9294_v37  ;;  %vm9312_vm3 = vcmp.eq.f32.partialorder %v4639_v17, 8.507059e+37  ;;  %vm4500_vm4 = vweird.f32 %v9292_v7  ;;  %v4504_v54 = vand.u32 2147483647, %v9292_v7 }
 0xac4   : > { %5430 = vst [vmem:[%s6778_s30 + $0x28] sm:$0xff] %v4554_v31  ;;  %v4588_v60 = vmul.f32 %v6200_v15, %v4587_v47  ;;  %v4642_v33 = vor.u32 1.1754944e-38, %v4641_v3  ;;  %v4506_v16 = vand.u32 2147483648, %v9292_v7  ;;  %vm4470_vm5 = vweird.f32 %v9294_v37 }
 0xac5   : > { %v4474_v29 = vand.u32 2147483647, %v9294_v37  ;;  %v4476_v50 = vand.u32 2147483648, %v9294_v37  ;;  %vm9339_vm8 = vcmp.eq.f32.partialorder %v4504_v54, 8.507059e+37 }
 0xac6   : > { %v4589_v49 = vadd.f32 %v6200_v15, %v4588_v60  ;;  %4382 = vperm.xlu2 %6194, %v4128_v56   ;;  %v4507_v14 = vor.u32 1.1754944e-38, %v4506_v16 }
 0xac7   : > { %v6202_v0 = vpop.eup %6201  ;;  %4377 = vperm.xlu1 %6193, %v4127_v26   ;;  %4372 = vperm.xlu0 %6192, %v4126_v25   ;;  %vm9353_vm11 = vcmp.eq.f32.partialorder %v4474_v29, 8.507059e+37  ;;  %v4477_v34 = vor.u32 1.1754944e-38, %v4476_v50  ;;  %v4134_v26 = vld [vmem:[#allocation4 + $0x1a8] sm:$0xff]  ;;  %v4020_v29 = vld [vmem:[#allocation5 + $0x160] sm:$0xff] }
 0xac8   : > { %v9307_v43 = vpop.eup %6203  ;;  %v4593_v9 = vsel %vm9301_vm0, %v6200_v15, %v4589_v49  ;;  %v4631_v41 = vmul.f32 %v6202_v0, %v9289_v53  ;;  %v9317_v58 = vpop.permute.xlu2 %4217  ;;  %vm4636_vm6 = vweird.f32 %v6202_v0  ;;  %v4132_v49 = vld [vmem:[#allocation4 + $0x198] sm:$0xff] }
 0xac9   : > { %v4598_v61 = vsel %vm4595_vm1, %v4597_v24, %v4593_v9  ;;  %v4496_v52 = vmul.f32 %v9307_v43, %v9292_v7  ;;  %6207 = vrcp.f32 %v9317_v58  ;;  %v9323_v46 = vpop.permute.xlu1 %4162  ;;  %v9325_v57 = vpop.permute.xlu0 %4152  ;;  %vm4501_vm7 = vweird.f32 %v9307_v43  ;;  %vm4637_vm9 = vmor %vm4635_vm2, %vm4636_vm6  ;;  %v4133_v24 = vld [vmem:[#allocation4 + $0x1a0] sm:$0xff] }
 0xaca   : > { %v9327_v44 = vpop.eup %6205  ;;  %v4599_v51 = vmul.f32 %v4598_v61, %v4025_v59  ;;  %v4632_v19 = vsub.f32 1.0, %v4631_v41  ;;  %6209 = vrcp.f32 %v9323_v46  ;;  %v4684_v27 = vand.u32 2147483647, %v9317_v58  ;;  %vm4502_vm12 = vmor %vm4500_vm4, %vm4501_vm7 }
 0xacb   : > { %v4497_v22 = vsub.f32 1.0, %v4496_v52  ;;  %v4466_v48 = vmul.f32 %v9327_v44, %v9294_v37  ;;  %6211 = vrcp.f32 %v9325_v57  ;;  %vm4471_vm10 = vweird.f32 %v9327_v44  ;;  %v4031_v52 = vld [vmem:[#allocation5 + $0x88] sm:$0xff] }
 0xacc   : > { %5433 = vst [vmem:[%s6778_s30 + $0x40] sm:$0xff] %v4599_v51  ;;  %v4633_v42 = vmul.f32 %v6202_v0, %v4632_v19  ;;  %vm4680_vm13 = vweird.f32 %v9317_v58  ;;  %v4686_v21 = vand.u32 2147483648, %v9317_v58  ;;  %vm4472_vm14 = vmor %vm4470_vm5, %vm4471_vm10  ;;  %vm9383_vm15 = vcmp.eq.f32.partialorder %v4684_v27, 8.507059e+37  ;;  %v4137_v27 = vld [vmem:[#allocation4 + $0x1c0] sm:$0xff]  ;;  %v4138_v19 = vld [vmem:[#allocation4 + $0x1c8] sm:$0xff] }
 0xacd   : > { %v4498_v36 = vmul.f32 %v9307_v43, %v4497_v22  ;;  %v4467_v6 = vsub.f32 1.0, %v4466_v48  ;;  %v4519_v17 = vand.u32 2147483647, %v9323_v46  ;;  %v4521_v41 = vand.u32 2147483648, %v9323_v46 }
 0xace   : > { %v4634_v62 = vadd.f32 %v6202_v0, %v4633_v42  ;;  %4397 = vperm.xlu2 %6194, %v4131_v13   ;;  %v4489_v5 = vand.u32 2147483647, %v9325_v57  ;;  %v4491_v61 = vand.u32 2147483648, %v9325_v57  ;;  %vm4485_vm5 = vweird.f32 %v9325_v57  ;;  %v4018_v42 = vld [vmem:[#allocation5 + $0x150] sm:$0xff] }
 0xacf   : > { %v9345_v8 = vpop.eup %6207  ;;  %v4499_v18 = vadd.f32 %v9307_v43, %v4498_v36  ;;  %v4468_v30 = vmul.f32 %v9327_v44, %v4467_v6  ;;  %4392 = vperm.xlu1 %6193, %v4130_v23   ;;  %4387 = vperm.xlu0 %6192, %v4129_v1   ;;  %vm9416_vm4 = vcmp.eq.f32.partialorder %v4519_v17, 8.507059e+37  ;;  %v4522_v13 = vor.u32 1.1754944e-38, %v4521_v41  ;;  %v4034_v17 = vld [vmem:[#allocation5 + $0x10] sm:$0xff] }
 0xad0   : > { %v4638_v10 = vsel %vm4637_vm9, %v6202_v0, %v4634_v62  ;;  %v4676_v55 = vmul.f32 %v9345_v8, %v9317_v58  ;;  %v9364_v12 = vpop.permute.xlu2 %4232  ;;  %v9375_v53 = vpop.eup %6209  ;;  %vm4681_vm0 = vweird.f32 %v9345_v8  ;;  %v4687_v0 = vor.u32 1.1754944e-38, %v4686_v21  ;;  %v4139_v41 = vld [vmem:[#allocation4 + $0x1d0] sm:$0xff] }
 0xad1   : > { %v4643_v20 = vsel %vm9312_vm3, %v4642_v33, %v4638_v10  ;;  %v4503_v11 = vsel %vm4502_vm12, %v9307_v43, %v4499_v18  ;;  %v4469_v15 = vadd.f32 %v9327_v44, %v4468_v30  ;;  %v9371_v39 = vpop.permute.xlu1 %4182  ;;  %v9373_v32 = vpop.permute.xlu0 %4177  ;;  %v4511_v60 = vmul.f32 %v9375_v53, %v9323_v46  ;;  %vm4682_vm1 = vmor %vm4680_vm13, %vm4681_vm0 }
 0xad2   : > { %v4644_v45 = vmul.f32 %v4643_v20, %v4028_v40  ;;  %v4508_v38 = vsel %vm9339_vm8, %v4507_v14, %v4503_v11  ;;  %v4677_v7 = vsub.f32 1.0, %v4676_v55  ;;  %v9391_v25 = vpop.eup %6211  ;;  %6213 = vrcp.f32 %v9364_v12  ;;  %v4135_v40 = vld [vmem:[#allocation4 + $0x1b0] sm:$0xff] }
 0xad3   : > { %v4509_v47 = vmul.f32 %v4508_v38, %v4019_v2  ;;  %v4473_v56 = vsel %vm4472_vm14, %v9327_v44, %v4469_v15  ;;  %v4512_v59 = vsub.f32 1.0, %v4511_v60  ;;  %v4481_v43 = vmul.f32 %v9391_v25, %v9325_v57 }
 0xad4   : > { %5436 = vst [vmem:[%s6778_s30 + $0x58] sm:$0xff] %v4644_v45  ;;  %v4478_v37 = vsel %vm9353_vm11, %v4477_v34, %v4473_v56  ;;  %v4678_v4 = vmul.f32 %v9345_v8, %v4677_v7  ;;  %vm4516_vm2 = vweird.f32 %v9375_v53  ;;  %6215 = vrcp.f32 %v9371_v39 }
 0xad5   : > { %5427 = vst [vmem:[%s6778_s30 + $0x10] sm:$0xff] %v4509_v47  ;;  %v4479_v3 = vmul.f32 %v4478_v37, %v4017_v63  ;;  %v4513_v54 = vmul.f32 %v9375_v53, %v4512_v59  ;;  %v4482_v44 = vsub.f32 1.0, %v4481_v43  ;;  %vm4515_vm3 = vweird.f32 %v9323_v46 }
 0xad6   : > { %v4679_v9 = vadd.f32 %v9345_v8, %v4678_v4  ;;  %4412 = vperm.xlu2 %6194, %v4134_v26   ;;  %vm4486_vm6 = vweird.f32 %v9391_v25  ;;  %vm9430_vm7 = vmor %vm4515_vm3, %vm4516_vm2  ;;  %vm9434_vm8 = vcmp.eq.f32.partialorder %v4489_v5, 8.507059e+37  ;;  %6217 = vrcp.f32 %v9373_v32 }
 0xad7   : > { %5425 = vst [vmem:[%s6778_s30] sm:$0xff] %v4479_v3  ;;  %4407 = vperm.xlu1 %6193, %v4133_v24   ;;  %4402 = vperm.xlu0 %6192, %v4132_v49   ;;  %v4514_v33 = vadd.f32 %v9375_v53, %v4513_v54  ;;  %v4483_v16 = vmul.f32 %v9391_v25, %v4482_v44  ;;  %v4492_v6 = vor.u32 1.1754944e-38, %v4491_v61  ;;  %vm4487_vm9 = vmor %vm4485_vm5, %vm4486_vm6  ;;  %v4729_v30 = vand.u32 2147483647, %v9364_v12  ;;  %v4140_v3 = vld [vmem:[#allocation4 + $0x1d8] sm:$0xff]  ;;  %v4024_v61 = vld [vmem:[#allocation5 + $0x30] sm:$0xff] }
 0xad8   : > { %v4683_v51 = vsel %vm4682_vm1, %v9345_v8, %v4679_v9  ;;  %v9426_v22 = vpop.eup %6213  ;;  %v9439_v23 = vpop.permute.xlu2 %4247  ;;  %v4136_v8 = vld [vmem:[#allocation4 + $0x1b8] sm:$0xff]  ;;  %v4731_v28 = vand.u32 2147483648, %v9364_v12  ;;  %v4579_v10 = vand.u32 2147483647, %v9371_v39  ;;  %vm4725_vm10 = vweird.f32 %v9364_v12 }
 0xad9   : > { %v4688_v58 = vsel %vm9383_vm15, %v4687_v0, %v4683_v51  ;;  %v9441_v1 = vpop.permute.xlu0 %4192  ;;  %v4518_v36 = vsel %vm9430_vm7, %v9375_v53, %v4514_v33  ;;  %v4484_v35 = vadd.f32 %v9391_v25, %v4483_v16  ;;  %v4721_v62 = vmul.f32 %v9426_v22, %v9364_v12  ;;  %v9449_v14 = vpop.permute.xlu1 %4197 }
 0xada   : > { %v4689_v48 = vmul.f32 %v4688_v58, %v4031_v52  ;;  %v4523_v18 = vsel %vm9416_vm4, %v4522_v13, %v4518_v36  ;;  %v9461_v2 = vpop.eup %6215  ;;  %6219 = vrcp.f32 %v9439_v23  ;;  %vm4575_vm11 = vweird.f32 %v9371_v39 }
 0xadb   : > { %v4524_v34 = vmul.f32 %v4523_v18, %v4020_v29  ;;  %v4488_v55 = vsel %vm4487_vm9, %v9391_v25, %v4484_v35  ;;  %v4722_v20 = vsub.f32 1.0, %v4721_v62  ;;  %v4571_v57 = vmul.f32 %v9461_v2, %v9371_v39 }
 0xadc   : > { %5439 = vst [vmem:[%s6778_s30 + $0x70] sm:$0xff] %v4689_v48  ;;  %v4493_v11 = vsel %vm9434_vm8, %v4492_v6, %v4488_v55  ;;  %vm4726_vm12 = vweird.f32 %v9426_v22  ;;  %v4581_v53 = vand.u32 2147483648, %v9371_v39  ;;  %v9475_v45 = vpop.eup %6217  ;;  %vm9477_vm13 = vcmp.eq.f32.partialorder %v4729_v30, 8.507059e+37  ;;  %v4037_v30 = vld [vmem:[#allocation5 + $0x1c0] sm:$0xff] }
 0xadd   : > { %5428 = vst [vmem:[%s6778_s30 + $0x18] sm:$0xff] %v4524_v34  ;;  %v4494_v15 = vmul.f32 %v4493_v11, %v4018_v42  ;;  %v4723_v21 = vmul.f32 %v9426_v22, %v4722_v20  ;;  %v4572_v63 = vsub.f32 1.0, %v4571_v57  ;;  %v4564_v7 = vand.u32 2147483647, %v9373_v32  ;;  %vm4727_vm15 = vmor %vm4725_vm10, %vm4726_vm12  ;;  %v4023_v42 = vld [vmem:[#allocation5 + $0x1e0] sm:$0xff]  ;;  %v4142_v20 = vld [vmem:[#allocation4 + $0x1e8] sm:$0xff] }
 0xade   : > { %4427 = vperm.xlu2 %6194, %v4137_v27   ;;  %6221 = vrcp.f32 %v9449_v14  ;;  %v4732_v47 = vor.u32 1.1754944e-38, %v4731_v28  ;;  %vm9485_vm14 = vcmp.eq.f32.partialorder %v4579_v10, 8.507059e+37  ;;  %v4556_v60 = vmul.f32 %v9475_v45, %v9373_v32 }
 0xadf   : > { %4422 = vperm.xlu1 %6193, %v4136_v8   ;;  %4417 = vperm.xlu0 %6192, %v4135_v40   ;;  %5426 = vst [vmem:[%s6778_s30 + $0x8] sm:$0xff] %v4494_v15  ;;  %v4724_v31 = vadd.f32 %v9426_v22, %v4723_v21  ;;  %v4573_v26 = vmul.f32 %v9461_v2, %v4572_v63  ;;  %vm4576_vm0 = vweird.f32 %v9461_v2  ;;  %vm4560_vm1 = vweird.f32 %v9373_v32  ;;  %v4141_v21 = vld [vmem:[#allocation4 + $0x1e0] sm:$0xff] }
 0xae0   : > { %v4566_v25 = vand.u32 2147483648, %v9373_v32  ;;  %v9499_v37 = vpop.eup %6219  ;;  %v4582_v24 = vor.u32 1.1754944e-38, %v4581_v53  ;;  %v4557_v49 = vsub.f32 1.0, %v4556_v60  ;;  %6223 = vrcp.f32 %v9441_v1  ;;  %vm4577_vm3 = vmor %vm4575_vm11, %vm4576_vm0  ;;  %v9521_v44 = vpop.permute.xlu2 %4262 }
 0xae1   : > { %v4728_v4 = vsel %vm4727_vm15, %v9426_v22, %v4724_v31  ;;  %v4574_v0 = vadd.f32 %v9461_v2, %v4573_v26  ;;  %vm9506_vm2 = vcmp.eq.f32.partialorder %v4564_v7, 8.507059e+37  ;;  %v4766_v43 = vmul.f32 %v9499_v37, %v9439_v23  ;;  %v9512_v9 = vpop.permute.xlu0 %4207  ;;  %v9523_v51 = vpop.permute.xlu1 %4212 }
 0xae2   : > { %v4733_v12 = vsel %vm9477_vm13, %v4732_v47, %v4728_v4  ;;  %v4558_v52 = vmul.f32 %v9475_v45, %v4557_v49  ;;  %vm4561_vm4 = vweird.f32 %v9475_v45  ;;  %v4776_v54 = vand.u32 2147483648, %v9439_v23 }
 0xae3   : > { %v4734_v5 = vmul.f32 %v4733_v12, %v4034_v17  ;;  %v4578_v33 = vsel %vm4577_vm3, %v9461_v2, %v4574_v0  ;;  %v4567_v16 = vor.u32 1.1754944e-38, %v4566_v25  ;;  %v4767_v22 = vsub.f32 1.0, %v4766_v43  ;;  %vm4562_vm6 = vmor %vm4560_vm1, %vm4561_vm4  ;;  %v4143_v2 = vld [vmem:[#allocation4 + $0x1f0] sm:$0xff] }
 0xae4   : > { %v9525_v58 = vpop.eup %6221  ;;  %vm4770_vm5 = vweird.f32 %v9439_v23  ;;  %v4583_v39 = vsel %vm9485_vm14, %v4582_v24, %v4578_v33  ;;  %v4559_v48 = vadd.f32 %v9475_v45, %v4558_v52  ;;  %v4774_v29 = vand.u32 2147483647, %v9439_v23  ;;  %v4026_v24 = vld [vmem:[#allocation5 + $0x50] sm:$0xff] }
 0xae5   : > { %5442 = vst [vmem:[%s6778_s30 + $0x88] sm:$0xff] %v4734_v5  ;;  %v4616_v46 = vmul.f32 %v9525_v58, %v9449_v14  ;;  %v4584_v13 = vmul.f32 %v4583_v39, %v4024_v61  ;;  %v4768_v50 = vmul.f32 %v9499_v37, %v4767_v22  ;;  %vm4771_vm7 = vweird.f32 %v9499_v37 }
 0xae6   : > { %4442 = vperm.xlu2 %6194, %v4140_v3   ;;  %vm4620_vm8 = vweird.f32 %v9449_v14  ;;  %v9543_v36 = vpop.eup %6223  ;;  %v4563_v35 = vsel %vm4562_vm6, %v9475_v45, %v4559_v48  ;;  %v4777_v6 = vor.u32 1.1754944e-38, %v4776_v54  ;;  %6225 = vrcp.f32 %v9521_v44  ;;  %vm4772_vm9 = vmor %vm4770_vm5, %vm4771_vm7  ;;  %v4027_v45 = vld [vmem:[#allocation5 + $0x1f0] sm:$0xff] }
 0xae7   : > { %4437 = vperm.xlu1 %6193, %v4139_v41   ;;  %4432 = vperm.xlu0 %6192, %v4138_v19   ;;  %v4617_v62 = vsub.f32 1.0, %v4616_v46  ;;  %5432 = vst [vmem:[%s6778_s30 + $0x38] sm:$0xff] %v4584_v13  ;;  %v4568_v32 = vsel %vm9506_vm2, %v4567_v16, %v4563_v35  ;;  %v4769_v27 = vadd.f32 %v9499_v37, %v4768_v50  ;;  %v4626_v8 = vand.u32 2147483648, %v9449_v14  ;;  %v4144_v16 = vld [vmem:[#allocation4 + $0x1f8] sm:$0xff] }
 0xae8   : > { %v4601_v40 = vmul.f32 %v9543_v36, %v9441_v1  ;;  %v4569_v18 = vmul.f32 %v4568_v32, %v4023_v42  ;;  %vm4621_vm10 = vweird.f32 %v9525_v58  ;;  %v4624_v10 = vand.u32 2147483647, %v9449_v14  ;;  %v9584_v60 = vpop.permute.xlu2 %4277 }
 0xae9   : > { %v4618_v28 = vmul.f32 %v9525_v58, %v4617_v62  ;;  %v4773_v34 = vsel %vm4772_vm9, %v9499_v37, %v4769_v27  ;;  %vm4775_vm11 = vcmp.eq.f32.partialorder %v4774_v29, 8.507059e+37  ;;  %6227 = vrcp.f32 %v9523_v51  ;;  %vm9571_vm12 = vmor %vm4620_vm8, %vm4621_vm10  ;;  %v9577_v31 = vpop.permute.xlu0 %4222  ;;  %v9586_v17 = vpop.permute.xlu1 %4227  ;;  %v4040_v29 = vld [vmem:[#allocation5 + $0x80] sm:$0xff] }
 0xaea   : > { %v4602_v55 = vsub.f32 1.0, %v4601_v40  ;;  %5431 = vst [vmem:[%s6778_s30 + $0x30] sm:$0xff] %v4569_v18  ;;  %v4778_v11 = vsel %vm4775_vm11, %v4777_v6, %v4773_v34  ;;  %v4609_v23 = vand.u32 2147483647, %v9441_v1  ;;  %v4611_v15 = vand.u32 2147483648, %v9441_v1 }
 0xaeb   : > { %v4619_v57 = vadd.f32 %v9525_v58, %v4618_v28  ;;  %v4779_v53 = vmul.f32 %v4778_v11, %v4037_v30  ;;  %v4627_v63 = vor.u32 1.1754944e-38, %v4626_v8  ;;  %vm4606_vm13 = vweird.f32 %v9543_v36  ;;  %v4030_v30 = vld [vmem:[#allocation5 + $0x8] sm:$0xff] }
 0xaec   : > { %v4603_v7 = vmul.f32 %v9543_v36, %v4602_v55  ;;  %v6226_v47 = vpop.eup %6225  ;;  %vm4625_vm14 = vcmp.eq.f32.partialorder %v4624_v10, 8.507059e+37  ;;  %v4819_v14 = vand.u32 2147483647, %v9521_v44  ;;  %6229 = vrcp.f32 %v9512_v9 }
 0xaed   : > { %v4623_v56 = vsel %vm9571_vm12, %v9525_v58, %v4619_v57  ;;  %5445 = vst [vmem:[%s6778_s30 + $0xa0] sm:$0xff] %v4779_v53  ;;  %vm4605_vm15 = vweird.f32 %v9441_v1  ;;  %v4811_v37 = vmul.f32 %v6226_v47, %v9521_v44  ;;  %vm4610_vm1 = vcmp.eq.f32.partialorder %v4609_v23, 8.507059e+37  ;;  %v4029_v53 = vld [vmem:[#allocation5 + $0x190] sm:$0xff] }
 0xaee   : > { %4457 = vperm.xlu2 %6194, %v4143_v2   ;;  %v4628_v26 = vsel %vm4625_vm14, %v4627_v63, %v4623_v56  ;;  %v4604_v25 = vadd.f32 %v9543_v36, %v4603_v7  ;;  %vm4607_vm0 = vmor %vm4605_vm15, %vm4606_vm13  ;;  %v4612_v49 = vor.u32 1.1754944e-38, %v4611_v15  ;;  %vm4815_vm2 = vweird.f32 %v9521_v44 }
 0xaef   : > { %4452 = vperm.xlu1 %6193, %v4142_v20   ;;  %4447 = vperm.xlu0 %6192, %v4141_v21   ;;  %v4629_v4 = vmul.f32 %v4628_v26, %v4027_v45  ;;  %v6228_v3 = vpop.eup %6227  ;;  %v4812_v0 = vsub.f32 1.0, %v4811_v37  ;;  %v4821_v59 = vand.u32 2147483648, %v9521_v44  ;;  %6231 = vrcp.f32 %v9584_v60  ;;  %v4043_v37 = vld [vmem:[#allocation5 + $0x40] sm:$0xff] }
 0xaf0   : > { %v4608_v12 = vsel %vm4607_vm0, %v9543_v36, %v4604_v25  ;;  %vm9599_vm3 = vcmp.eq.f32.partialorder %v4819_v14, 8.507059e+37  ;;  %v4661_v41 = vmul.f32 %v6228_v3, %v9523_v51  ;;  %v4669_v5 = vand.u32 2147483647, %v9523_v51  ;;  %v9635_v2 = vpop.permute.xlu2 %4292 }
 0xaf1   : > { %5435 = vst [vmem:[%s6778_s30 + $0x50] sm:$0xff] %v4629_v4  ;;  %v4613_v1 = vsel %vm4610_vm1, %v4612_v49, %v4608_v12  ;;  %v4813_v52 = vmul.f32 %v6226_v47, %v4812_v0  ;;  %vm4816_vm4 = vweird.f32 %v6226_v47  ;;  %v4671_v54 = vand.u32 2147483648, %v9523_v51  ;;  %v9620_v62 = vpop.permute.xlu0 %4237  ;;  %v9629_v40 = vpop.permute.xlu1 %4242 }
 0xaf2   : > { %v4614_v61 = vmul.f32 %v4613_v1, %v4026_v24  ;;  %v6230_v19 = vpop.eup %6229  ;;  %v4662_v58 = vsub.f32 1.0, %v4661_v41  ;;  %vm4665_vm5 = vweird.f32 %v9523_v51  ;;  %v4654_v33 = vand.u32 2147483647, %v9512_v9  ;;  %vm4817_vm7 = vmor %vm4815_vm2, %vm4816_vm4  ;;  %v4033_v41 = vld [vmem:[#allocation5 + $0xe0] sm:$0xff] }
 0xaf3   : > { %6233 = vrcp.f32 %v9586_v17  ;;  %v4814_v22 = vadd.f32 %v6226_v47, %v4813_v52  ;;  %v4822_v39 = vor.u32 1.1754944e-38, %v4821_v59  ;;  %v4646_v48 = vmul.f32 %v6230_v19, %v9512_v9 }
 0xaf4   : > { %5434 = vst [vmem:[%s6778_s30 + $0x48] sm:$0xff] %v4614_v61  ;;  %vm4650_vm6 = vweird.f32 %v9512_v9  ;;  %v4663_v46 = vmul.f32 %v6228_v3, %v4662_v58  ;;  %vm4666_vm8 = vweird.f32 %v6228_v3  ;;  %vm9614_vm9 = vcmp.eq.f32.partialorder %v4669_v5, 8.507059e+37 }
 0xaf5   : > { %v4656_v42 = vand.u32 2147483648, %v9512_v9  ;;  %v6232_v50 = vpop.eup %6231  ;;  %v4818_v36 = vsel %vm4817_vm7, %v6226_v47, %v4814_v22  ;;  %v4672_v35 = vor.u32 1.1754944e-38, %v4671_v54  ;;  %v4647_v6 = vsub.f32 1.0, %v4646_v48  ;;  %vm4667_vm11 = vmor %vm4665_vm5, %vm4666_vm8  ;;  %v4032_v48 = vld [vmem:[#allocation5 + $0x38] sm:$0xff] }
 0xaf6   : > { %6235 = vrcp.f32 %v9577_v31  ;;  %v4823_v44 = vsel %vm9599_vm3, %v4822_v39, %v4818_v36  ;;  %v4664_v32 = vadd.f32 %v6228_v3, %v4663_v46  ;;  %vm9624_vm10 = vcmp.eq.f32.partialorder %v4654_v33, 8.507059e+37 }
 0xaf7   : > { %4462 = vperm.xlu0 %6192, %v4144_v16   ;;  %v4856_v8 = vmul.f32 %v6232_v50, %v9584_v60  ;;  %v4824_v18 = vmul.f32 %v4823_v44, %v4040_v29  ;;  %v4648_v28 = vmul.f32 %v6230_v19, %v4647_v6  ;;  %vm4651_vm12 = vweird.f32 %v6230_v19 }
 0xaf8   : > { %v4866_v10 = vand.u32 2147483648, %v9584_v60  ;;  %v4668_v55 = vsel %vm4667_vm11, %v6228_v3, %v4664_v32  ;;  %v4657_v20 = vor.u32 1.1754944e-38, %v4656_v42  ;;  %vm4860_vm13 = vweird.f32 %v9584_v60  ;;  %vm4652_vm14 = vmor %vm4650_vm6, %vm4651_vm12  ;;  %v9668_v33 = vpop.permute.xlu2 %4307 }
 0xaf9   : > { %v6234_v34 = vpop.eup %6233  ;;  %v4857_v11 = vsub.f32 1.0, %v4856_v8  ;;  %5448 = vst [vmem:[%s6778_s30 + $0xb8] sm:$0xff] %v4824_v18  ;;  %v4673_v57 = vsel %vm9614_vm9, %v4672_v35, %v4668_v55  ;;  %v4649_v23 = vadd.f32 %v6230_v19, %v4648_v28  ;;  %v4864_v51 = vand.u32 2147483647, %v9584_v60  ;;  %v9660_v43 = vpop.permute.xlu0 %4252  ;;  %v4046_v55 = vld [vmem:[#allocation5 + $0xe8] sm:$0xff] }
 0xafa   : > { %v4706_v15 = vmul.f32 %v6234_v34, %v9586_v17  ;;  %v4674_v21 = vmul.f32 %v4673_v57, %v4030_v30  ;;  %vm4861_vm15 = vweird.f32 %v6232_v50  ;;  %vm4710_vm0 = vweird.f32 %v9586_v17  ;;  %v9664_v52 = vpop.permute.xlu1 %4257 }
 0xafb   : > { %v4858_v45 = vmul.f32 %v6232_v50, %v4857_v11  ;;  %v4653_v63 = vsel %vm4652_vm14, %v6230_v19, %v4649_v23  ;;  %v4867_v7 = vor.u32 1.1754944e-38, %v4866_v10  ;;  %6237 = vrcp.f32 %v9635_v2  ;;  %vm4862_vm1 = vmor %vm4860_vm13, %vm4861_vm15 }
 0xafc   : > { %v6236_v38 = vpop.eup %6235  ;;  %v4707_v47 = vsub.f32 1.0, %v4706_v15  ;;  %5438 = vst [vmem:[%s6778_s30 + $0x68] sm:$0xff] %v4674_v21  ;;  %v4658_v56 = vsel %vm9624_vm10, %v4657_v20, %v4653_v63  ;;  %v4716_v26 = vand.u32 2147483648, %v9586_v17  ;;  %vm4711_vm2 = vweird.f32 %v6234_v34 }
 0xafd   : > { %v4859_v14 = vadd.f32 %v6232_v50, %v4858_v45  ;;  %v4691_v9 = vmul.f32 %v6236_v38, %v9577_v31  ;;  %v4659_v25 = vmul.f32 %v4658_v56, %v4029_v53  ;;  %v4714_v24 = vand.u32 2147483647, %v9586_v17  ;;  %vm4712_vm4 = vmor %vm4710_vm0, %vm4711_vm2  ;;  %v4036_v56 = vld [vmem:[#allocation5 + $0xa0] sm:$0xff] }
 0xafe   : > { %v4708_v4 = vmul.f32 %v6234_v34, %v4707_v47  ;;  %vm4865_vm3 = vcmp.eq.f32.partialorder %v4864_v51, 8.507059e+37  ;;  %6239 = vrcp.f32 %v9629_v40  ;;  %v4699_v59 = vand.u32 2147483647, %v9577_v31 }
 0xaff   : > { %v4863_v49 = vsel %vm4862_vm1, %v6232_v50, %v4859_v14  ;;  %v4692_v3 = vsub.f32 1.0, %v4691_v9  ;;  %5437 = vst [vmem:[%s6778_s30 + $0x60] sm:$0xff] %v4659_v25  ;;  %v4701_v1 = vand.u32 2147483648, %v9577_v31  ;;  %v4717_v5 = vor.u32 1.1754944e-38, %v4716_v26 }
 0xb00   : > { %v4868_v12 = vsel %vm4865_vm3, %v4867_v7, %v4863_v49  ;;  %v4709_v0 = vadd.f32 %v6234_v34, %v4708_v4  ;;  %vm4696_vm5 = vweird.f32 %v6236_v38  ;;  %vm4715_vm6 = vcmp.eq.f32.partialorder %v4714_v24, 8.507059e+37  ;;  %v9714_v9 = vpop.permute.xlu2 %4322 }
 0xb01   : > { %v4869_v60 = vmul.f32 %v4868_v12, %v4043_v37  ;;  %v4693_v61 = vmul.f32 %v6236_v38, %v4692_v3  ;;  %v6238_v54 = vpop.eup %6237  ;;  %v4909_v58 = vand.u32 2147483647, %v9635_v2  ;;  %6241 = vrcp.f32 %v9620_v62  ;;  %v9698_v23 = vpop.permute.xlu0 %4267 }
 0xb02   : > { %v4713_v19 = vsel %vm4712_vm4, %v6234_v34, %v4709_v0  ;;  %vm4695_vm7 = vweird.f32 %v9577_v31  ;;  %v4901_v17 = vmul.f32 %v6238_v54, %v9635_v2  ;;  %vm4700_vm9 = vcmp.eq.f32.partialorder %v4699_v59, 8.507059e+37  ;;  %v9701_v45 = vpop.permute.xlu1 %4272  ;;  %v4035_v59 = vld [vmem:[#allocation5 + $0x1a8] sm:$0xff] }
 0xb03   : > { %5451 = vst [vmem:[%s6778_s30 + $0xd0] sm:$0xff] %v4869_v60  ;;  %v4718_v16 = vsel %vm4715_vm6, %v4717_v5, %v4713_v19  ;;  %v4694_v22 = vadd.f32 %v6236_v38, %v4693_v61  ;;  %vm4697_vm8 = vmor %vm4695_vm7, %vm4696_vm5  ;;  %v4702_v29 = vor.u32 1.1754944e-38, %v4701_v1  ;;  %vm4905_vm10 = vweird.f32 %v9635_v2 }
 0xb04   : > { %v4719_v39 = vmul.f32 %v4718_v16, %v4033_v41  ;;  %v6240_v46 = vpop.eup %6239  ;;  %v4902_v42 = vsub.f32 1.0, %v4901_v17  ;;  %v4911_v50 = vand.u32 2147483648, %v9635_v2  ;;  %6243 = vrcp.f32 %v9668_v33 }
 0xb05   : > { %v4698_v13 = vsel %vm4697_vm8, %v6236_v38, %v4694_v22  ;;  %vm9678_vm11 = vcmp.eq.f32.partialorder %v4909_v58, 8.507059e+37  ;;  %v4751_v35 = vmul.f32 %v6240_v46, %v9629_v40  ;;  %v4759_v6 = vand.u32 2147483647, %v9629_v40  ;;  %v4049_v22 = vld [vmem:[#allocation5 + $0x1d8] sm:$0xff] }
 0xb06   : > { %5441 = vst [vmem:[%s6778_s30 + $0x80] sm:$0xff] %v4719_v39  ;;  %v4703_v31 = vsel %vm4700_vm9, %v4702_v29, %v4698_v13  ;;  %v4903_v32 = vmul.f32 %v6238_v54, %v4902_v42  ;;  %vm4906_vm12 = vweird.f32 %v6238_v54  ;;  %v4761_v27 = vand.u32 2147483648, %v9629_v40 }
 0xb07   : > { %v4704_v44 = vmul.f32 %v4703_v31, %v4032_v48  ;;  %v6242_v8 = vpop.eup %6241  ;;  %v4752_v18 = vsub.f32 1.0, %v4751_v35  ;;  %vm4755_vm13 = vweird.f32 %v9629_v40  ;;  %v4744_v30 = vand.u32 2147483647, %v9620_v62  ;;  %vm4907_vm15 = vmor %vm4905_vm10, %vm4906_vm12  ;;  %v4039_v35 = vld [vmem:[#allocation5 + $0x108] sm:$0xff] }
 0xb08   : > { %6245 = vrcp.f32 %v9664_v52  ;;  %v4904_v28 = vadd.f32 %v6238_v54, %v4903_v32  ;;  %v4912_v10 = vor.u32 1.1754944e-38, %v4911_v50  ;;  %v4736_v34 = vmul.f32 %v6242_v8, %v9620_v62 }
 0xb09   : > { %5440 = vst [vmem:[%s6778_s30 + $0x78] sm:$0xff] %v4704_v44  ;;  %vm4740_vm14 = vweird.f32 %v9620_v62  ;;  %v4753_v20 = vmul.f32 %v6240_v46, %v4752_v18  ;;  %vm4756_vm0 = vweird.f32 %v6240_v46  ;;  %vm9693_vm1 = vcmp.eq.f32.partialorder %v4759_v6, 8.507059e+37  ;;  %v9748_v18 = vpop.permute.xlu2 %4337 }
 0xb0a   : > { %v4746_v57 = vand.u32 2147483648, %v9620_v62  ;;  %v6244_v51 = vpop.eup %6243  ;;  %v4908_v15 = vsel %vm4907_vm15, %v6238_v54, %v4904_v28  ;;  %v4762_v21 = vor.u32 1.1754944e-38, %v4761_v27  ;;  %v4737_v53 = vsub.f32 1.0, %v4736_v34  ;;  %vm4757_vm3 = vmor %vm4755_vm13, %vm4756_vm0  ;;  %v9741_v31 = vpop.permute.xlu1 %4287  ;;  %v4038_v34 = vld [vmem:[#allocation5 + $0x78] sm:$0xff] }
 0xb0b   : > { %6247 = vrcp.f32 %v9660_v43  ;;  %v4913_v2 = vsel %vm9678_vm11, %v4912_v10, %v4908_v15  ;;  %v4754_v38 = vadd.f32 %v6240_v46, %v4753_v20  ;;  %vm9705_vm2 = vcmp.eq.f32.partialorder %v4744_v30, 8.507059e+37 }
 0xb0c   : > { %v4946_v7 = vmul.f32 %v6244_v51, %v9668_v33  ;;  %v4914_v47 = vmul.f32 %v4913_v2, %v4046_v55  ;;  %v4738_v14 = vmul.f32 %v6242_v8, %v4737_v53  ;;  %vm4741_vm4 = vweird.f32 %v6242_v8 }
 0xb0d   : > { %v4956_v26 = vand.u32 2147483648, %v9668_v33  ;;  %v4758_v37 = vsel %vm4757_vm3, %v6240_v46, %v4754_v38  ;;  %v4747_v4 = vor.u32 1.1754944e-38, %v4746_v57  ;;  %vm4950_vm5 = vweird.f32 %v9668_v33  ;;  %vm4742_vm6 = vmor %vm4740_vm14, %vm4741_vm4  ;;  %v9736_v46 = vpop.permute.xlu0 %4282 }
 0xb0e   : > { %v6246_v25 = vpop.eup %6245  ;;  %v4947_v24 = vsub.f32 1.0, %v4946_v7  ;;  %5454 = vst [vmem:[%s6778_s30 + $0xe8] sm:$0xff] %v4914_v47  ;;  %v4763_v49 = vsel %vm9693_vm1, %v4762_v21, %v4758_v37  ;;  %v4739_v3 = vadd.f32 %v6242_v8, %v4738_v14  ;;  %v4954_v40 = vand.u32 2147483647, %v9668_v33 }
 0xb0f   : > { %v4796_v12 = vmul.f32 %v6246_v25, %v9664_v52  ;;  %v4764_v0 = vmul.f32 %v4763_v49, %v4036_v56  ;;  %vm4951_vm7 = vweird.f32 %v6244_v51  ;;  %vm4800_vm8 = vweird.f32 %v9664_v52 }
 0xb10   : > { %v4948_v1 = vmul.f32 %v6244_v51, %v4947_v24  ;;  %v4743_v41 = vsel %vm4742_vm6, %v6242_v8, %v4739_v3  ;;  %v4957_v5 = vor.u32 1.1754944e-38, %v4956_v26  ;;  %6249 = vrcp.f32 %v9714_v9  ;;  %vm4952_vm9 = vmor %vm4950_vm5, %vm4951_vm7 }
 0xb11   : > { %v6248_v60 = vpop.eup %6247  ;;  %v4797_v61 = vsub.f32 1.0, %v4796_v12  ;;  %5444 = vst [vmem:[%s6778_s30 + $0x98] sm:$0xff] %v4764_v0  ;;  %v4748_v54 = vsel %vm9705_vm2, %v4747_v4, %v4743_v41  ;;  %v4806_v58 = vand.u32 2147483648, %v9664_v52  ;;  %vm4801_vm10 = vweird.f32 %v6246_v25  ;;  %v4052_v4 = vld [vmem:[#allocation5 + $0x1c8] sm:$0xff] }
 0xb12   : > { %v4949_v19 = vadd.f32 %v6244_v51, %v4948_v1  ;;  %v4781_v62 = vmul.f32 %v6248_v60, %v9660_v43  ;;  %v4749_v16 = vmul.f32 %v4748_v54, %v4035_v59  ;;  %v4804_v39 = vand.u32 2147483647, %v9664_v52  ;;  %vm4802_vm12 = vmor %vm4800_vm8, %vm4801_vm10  ;;  %v4042_v54 = vld [vmem:[#allocation5 + $0x48] sm:$0xff] }
 0xb13   : > { %v4798_v17 = vmul.f32 %v6246_v25, %v4797_v61  ;;  %vm4955_vm11 = vcmp.eq.f32.partialorder %v4954_v40, 8.507059e+37  ;;  %6251 = vrcp.f32 %v9701_v45  ;;  %v4789_v50 = vand.u32 2147483647, %v9660_v43  ;;  %v9779_v40 = vpop.permute.xlu1 %4302 }
 0xb14   : > { %v4953_v48 = vsel %vm4952_vm9, %v6244_v51, %v4949_v19  ;;  %v4782_v29 = vsub.f32 1.0, %v4781_v62  ;;  %5443 = vst [vmem:[%s6778_s30 + $0x90] sm:$0xff] %v4749_v16  ;;  %v4791_v33 = vand.u32 2147483648, %v9660_v43  ;;  %v4807_v6 = vor.u32 1.1754944e-38, %v4806_v58  ;;  %v9793_v62 = vpop.permute.xlu2 %4352 }
 0xb15   : > { %v4958_v13 = vsel %vm4955_vm11, %v4957_v5, %v4953_v48  ;;  %v4799_v42 = vadd.f32 %v6246_v25, %v4798_v17  ;;  %vm4786_vm13 = vweird.f32 %v6248_v60  ;;  %vm4805_vm14 = vcmp.eq.f32.partialorder %v4804_v39, 8.507059e+37  ;;  %v9770_v37 = vpop.permute.xlu0 %4297 }
 0xb16   : > { %v4959_v36 = vmul.f32 %v4958_v13, %v4049_v22  ;;  %v4783_v44 = vmul.f32 %v6248_v60, %v4782_v29  ;;  %v6250_v32 = vpop.eup %6249  ;;  %v4999_v8 = vand.u32 2147483647, %v9714_v9  ;;  %6253 = vrcp.f32 %v9698_v23 }
 0xb17   : > { %v4803_v27 = vsel %vm4802_vm12, %v6246_v25, %v4799_v42  ;;  %vm4785_vm15 = vweird.f32 %v9660_v43  ;;  %v4991_v52 = vmul.f32 %v6250_v32, %v9714_v9  ;;  %vm4790_vm1 = vcmp.eq.f32.partialorder %v4789_v50, 8.507059e+37  ;;  %v4041_v50 = vld [vmem:[#allocation5 + $0x58] sm:$0xff] }
 0xb18   : > { %5457 = vst [vmem:[%s6778_s30 + $0x100] sm:$0xff] %v4959_v36  ;;  %v4808_v30 = vsel %vm4805_vm14, %v4807_v6, %v4803_v27  ;;  %v4784_v28 = vadd.f32 %v6248_v60, %v4783_v44  ;;  %vm4787_vm0 = vmor %vm4785_vm15, %vm4786_vm13  ;;  %v4792_v55 = vor.u32 1.1754944e-38, %v4791_v33  ;;  %vm4995_vm2 = vweird.f32 %v9714_v9 }
 0xb19   : > { %v4809_v10 = vmul.f32 %v4808_v30, %v4039_v35  ;;  %v6252_v20 = vpop.eup %6251  ;;  %v4992_v57 = vsub.f32 1.0, %v4991_v52  ;;  %v5001_v51 = vand.u32 2147483648, %v9714_v9  ;;  %6255 = vrcp.f32 %v9748_v18 }
 0xb1a   : > { %v4788_v11 = vsel %vm4787_vm0, %v6248_v60, %v4784_v28  ;;  %vm9757_vm3 = vcmp.eq.f32.partialorder %v4999_v8, 8.507059e+37  ;;  %v4841_v21 = vmul.f32 %v6252_v20, %v9701_v45  ;;  %v4849_v53 = vand.u32 2147483647, %v9701_v45  ;;  %v4055_v28 = vld [vmem:[#allocation5 + $0x60] sm:$0xff] }
 0xb1b   : > { %5447 = vst [vmem:[%s6778_s30 + $0xb0] sm:$0xff] %v4809_v10  ;;  %v4793_v15 = vsel %vm4790_vm1, %v4792_v55, %v4788_v11  ;;  %v4993_v38 = vmul.f32 %v6250_v32, %v4992_v57  ;;  %vm4996_vm4 = vweird.f32 %v6250_v32  ;;  %v4851_v63 = vand.u32 2147483648, %v9701_v45  ;;  %v9817_v11 = vpop.permute.xlu1 %4317 }
 0xb1c   : > { %v4794_v2 = vmul.f32 %v4793_v15, %v4038_v34  ;;  %v6254_v7 = vpop.eup %6253  ;;  %v4842_v47 = vsub.f32 1.0, %v4841_v21  ;;  %vm4845_vm5 = vweird.f32 %v9701_v45  ;;  %v4834_v56 = vand.u32 2147483647, %v9698_v23  ;;  %vm4997_vm7 = vmor %vm4995_vm2, %vm4996_vm4  ;;  %v4045_v21 = vld [vmem:[#allocation5 + $0x198] sm:$0xff] }
 0xb1d   : > { %6257 = vrcp.f32 %v9741_v31  ;;  %v4994_v14 = vadd.f32 %v6250_v32, %v4993_v38  ;;  %v5002_v26 = vor.u32 1.1754944e-38, %v5001_v51  ;;  %v4826_v25 = vmul.f32 %v6254_v7, %v9698_v23  ;;  %v9814_v34 = vpop.permute.xlu0 %4312 }
 0xb1e   : > { %5446 = vst [vmem:[%s6778_s30 + $0xa8] sm:$0xff] %v4794_v2  ;;  %vm4830_vm6 = vweird.f32 %v9698_v23  ;;  %v4843_v24 = vmul.f32 %v6252_v20, %v4842_v47  ;;  %vm4846_vm8 = vweird.f32 %v6252_v20  ;;  %vm9774_vm9 = vcmp.eq.f32.partialorder %v4849_v53, 8.507059e+37  ;;  %v9827_v47 = vpop.permute.xlu2 %4367 }
 0xb1f   : > { %v4836_v3 = vand.u32 2147483648, %v9698_v23  ;;  %v6256_v12 = vpop.eup %6255  ;;  %v4998_v0 = vsel %vm4997_vm7, %v6250_v32, %v4994_v14  ;;  %v4852_v59 = vor.u32 1.1754944e-38, %v4851_v63  ;;  %v4827_v1 = vsub.f32 1.0, %v4826_v25  ;;  %vm4847_vm11 = vmor %vm4845_vm5, %vm4846_vm8  ;;  %v4044_v25 = vld [vmem:[#allocation5 + $0x1a0] sm:$0xff] }
 0xb20   : > { %6259 = vrcp.f32 %v9736_v46  ;;  %v5003_v9 = vsel %vm9757_vm3, %v5002_v26, %v4998_v0  ;;  %v4844_v60 = vadd.f32 %v6252_v20, %v4843_v24  ;;  %vm9784_vm10 = vcmp.eq.f32.partialorder %v4834_v56, 8.507059e+37 }
 0xb21   : > { %v5036_v5 = vmul.f32 %v6256_v12, %v9748_v18  ;;  %v5004_v61 = vmul.f32 %v5003_v9, %v4052_v4  ;;  %v4828_v19 = vmul.f32 %v6254_v7, %v4827_v1  ;;  %vm4831_vm12 = vweird.f32 %v6254_v7 }
 0xb22   : > { %v5046_v58 = vand.u32 2147483648, %v9748_v18  ;;  %v4848_v22 = vsel %vm4847_vm11, %v6252_v20, %v4844_v60  ;;  %v4837_v17 = vor.u32 1.1754944e-38, %v4836_v3  ;;  %vm5040_vm13 = vweird.f32 %v9748_v18  ;;  %vm4832_vm14 = vmor %vm4830_vm6, %vm4831_vm12 }
 0xb23   : > { %v6258_v16 = vpop.eup %6257  ;;  %v5037_v39 = vsub.f32 1.0, %v5036_v5  ;;  %5460 = vst [vmem:[%s6778_s30 + $0x118] sm:$0xff] %v5004_v61  ;;  %v4853_v48 = vsel %vm9774_vm9, %v4852_v59, %v4848_v22  ;;  %v4829_v29 = vadd.f32 %v6254_v7, %v4828_v19  ;;  %v5044_v45 = vand.u32 2147483647, %v9748_v18 }
 0xb24   : > { %v4886_v13 = vmul.f32 %v6258_v16, %v9741_v31  ;;  %v4854_v42 = vmul.f32 %v4853_v48, %v4042_v54  ;;  %vm5041_vm15 = vweird.f32 %v6256_v12  ;;  %vm4890_vm0 = vweird.f32 %v9741_v31 }
 0xb25   : > { %v5038_v33 = vmul.f32 %v6256_v12, %v5037_v39  ;;  %v4833_v35 = vsel %vm4832_vm14, %v6254_v7, %v4829_v29  ;;  %v5047_v6 = vor.u32 1.1754944e-38, %v5046_v58  ;;  %6261 = vrcp.f32 %v9793_v62  ;;  %vm5042_vm1 = vmor %vm5040_vm13, %vm5041_vm15  ;;  %v9846_v19 = vpop.permute.xlu0 %4327  ;;  %v4058_v39 = vld [vmem:[#allocation5 + $0x100] sm:$0xff] }
 0xb26   : > { %v6260_v36 = vpop.eup %6259  ;;  %v4887_v44 = vsub.f32 1.0, %v4886_v13  ;;  %5450 = vst [vmem:[%s6778_s30 + $0xc8] sm:$0xff] %v4854_v42  ;;  %v4838_v32 = vsel %vm9784_vm10, %v4837_v17, %v4833_v35  ;;  %v4896_v8 = vand.u32 2147483648, %v9741_v31  ;;  %vm4891_vm2 = vweird.f32 %v6258_v16  ;;  %v9851_v17 = vpop.permute.xlu1 %4332 }
 0xb27   : > { %v5039_v27 = vadd.f32 %v6256_v12, %v5038_v33  ;;  %v4871_v23 = vmul.f32 %v6260_v36, %v9736_v46  ;;  %v4839_v30 = vmul.f32 %v4838_v32, %v4041_v50  ;;  %v4894_v10 = vand.u32 2147483647, %v9741_v31  ;;  %vm4892_vm4 = vmor %vm4890_vm0, %vm4891_vm2  ;;  %v4048_v32 = vld [vmem:[#allocation5 + $0x158] sm:$0xff] }
 0xb28   : > { %v4888_v52 = vmul.f32 %v6258_v16, %v4887_v44  ;;  %vm5045_vm3 = vcmp.eq.f32.partialorder %v5044_v45, 8.507059e+37  ;;  %6263 = vrcp.f32 %v9779_v40  ;;  %v4879_v18 = vand.u32 2147483647, %v9736_v46 }
 0xb29   : > { %v5043_v55 = vsel %vm5042_vm1, %v6256_v12, %v5039_v27  ;;  %v4872_v20 = vsub.f32 1.0, %v4871_v23  ;;  %5449 = vst [vmem:[%s6778_s30 + $0xc0] sm:$0xff] %v4839_v30  ;;  %v4881_v15 = vand.u32 2147483648, %v9736_v46  ;;  %v4897_v53 = vor.u32 1.1754944e-38, %v4896_v8  ;;  %v9872_v23 = vpop.permute.xlu2 %4382 }
 0xb2a   : > { %v5048_v57 = vsel %vm5045_vm3, %v5047_v6, %v5043_v55  ;;  %v4889_v51 = vadd.f32 %v6258_v16, %v4888_v52  ;;  %vm4876_vm5 = vweird.f32 %v6260_v36  ;;  %vm4895_vm6 = vcmp.eq.f32.partialorder %v4894_v10, 8.507059e+37 }
 0xb2b   : > { %v5049_v43 = vmul.f32 %v5048_v57, %v4055_v28  ;;  %v4873_v2 = vmul.f32 %v6260_v36, %v4872_v20  ;;  %v6262_v38 = vpop.eup %6261  ;;  %v5089_v7 = vand.u32 2147483647, %v9793_v62  ;;  %6265 = vrcp.f32 %v9770_v37 }
 0xb2c   : > { %v4893_v63 = vsel %vm4892_vm4, %v6258_v16, %v4889_v51  ;;  %vm4875_vm7 = vweird.f32 %v9736_v46  ;;  %v5081_v31 = vmul.f32 %v6262_v38, %v9793_v62  ;;  %vm4880_vm9 = vcmp.eq.f32.partialorder %v4879_v18, 8.507059e+37  ;;  %v4047_v18 = vld [vmem:[#allocation5 + $0x168] sm:$0xff] }
 0xb2d   : > { %5463 = vst [vmem:[%s6778_s30 + $0x130] sm:$0xff] %v5049_v43  ;;  %v4898_v56 = vsel %vm4895_vm6, %v4897_v53, %v4893_v63  ;;  %v4874_v14 = vadd.f32 %v6260_v36, %v4873_v2  ;;  %vm4877_vm8 = vmor %vm4875_vm7, %vm4876_vm5  ;;  %v4882_v4 = vor.u32 1.1754944e-38, %v4881_v15  ;;  %vm5085_vm10 = vweird.f32 %v9793_v62 }
 0xb2e   : > { %v4899_v26 = vmul.f32 %v4898_v56, %v4045_v21  ;;  %v6264_v24 = vpop.eup %6263  ;;  %v5082_v3 = vsub.f32 1.0, %v5081_v31  ;;  %v5091_v12 = vand.u32 2147483648, %v9793_v62  ;;  %6267 = vrcp.f32 %v9827_v47  ;;  %v9890_v56 = vpop.permute.xlu0 %4342  ;;  %v4061_v31 = vld [vmem:[#allocation5 + $0x178] sm:$0xff] }
 0xb2f   : > { %v4878_v49 = vsel %vm4877_vm8, %v6260_v36, %v4874_v14  ;;  %vm9836_vm11 = vcmp.eq.f32.partialorder %v5089_v7, 8.507059e+37  ;;  %v4931_v59 = vmul.f32 %v6264_v24, %v9779_v40  ;;  %v4939_v1 = vand.u32 2147483647, %v9779_v40 }
 0xb30   : > { %5453 = vst [vmem:[%s6778_s30 + $0xe0] sm:$0xff] %v4899_v26  ;;  %v4883_v0 = vsel %vm4880_vm9, %v4882_v4, %v4878_v49  ;;  %v5083_v60 = vmul.f32 %v6262_v38, %v5082_v3  ;;  %vm5086_vm12 = vweird.f32 %v6262_v38  ;;  %v4941_v41 = vand.u32 2147483648, %v9779_v40  ;;  %v9896_v4 = vpop.permute.xlu1 %4347 }
 0xb31   : > { %v4884_v9 = vmul.f32 %v4883_v0, %v4044_v25  ;;  %v6266_v5 = vpop.eup %6265  ;;  %v4932_v61 = vsub.f32 1.0, %v4931_v59  ;;  %vm4935_vm13 = vweird.f32 %v9779_v40  ;;  %v4924_v54 = vand.u32 2147483647, %v9770_v37  ;;  %vm5087_vm15 = vmor %vm5085_vm10, %vm5086_vm12  ;;  %v4051_v59 = vld [vmem:[#allocation5] sm:$0xff] }
 0xb32   : > { %6269 = vrcp.f32 %v9817_v11  ;;  %v5084_v58 = vadd.f32 %v6262_v38, %v5083_v60  ;;  %v5092_v16 = vor.u32 1.1754944e-38, %v5091_v12  ;;  %v4916_v22 = vmul.f32 %v6266_v5, %v9770_v37 }
 0xb33   : > { %5452 = vst [vmem:[%s6778_s30 + $0xd8] sm:$0xff] %v4884_v9  ;;  %vm4920_vm14 = vweird.f32 %v9770_v37  ;;  %v4933_v48 = vmul.f32 %v6264_v24, %v4932_v61  ;;  %vm4936_vm0 = vweird.f32 %v6264_v24  ;;  %vm9856_vm1 = vcmp.eq.f32.partialorder %v4939_v1, 8.507059e+37  ;;  %v9906_v61 = vpop.permute.xlu2 %4397 }
 0xb34   : > { %v4926_v45 = vand.u32 2147483648, %v9770_v37  ;;  %v6268_v13 = vpop.eup %6267  ;;  %v5088_v42 = vsel %vm5087_vm15, %v6262_v38, %v5084_v58  ;;  %v4942_v50 = vor.u32 1.1754944e-38, %v4941_v41  ;;  %v4917_v33 = vsub.f32 1.0, %v4916_v22  ;;  %vm4937_vm3 = vmor %vm4935_vm13, %vm4936_vm0  ;;  %v4050_v22 = vld [vmem:[#allocation5 + $0x28] sm:$0xff] }
 0xb35   : > { %6271 = vrcp.f32 %v9814_v34  ;;  %v5093_v36 = vsel %vm9836_vm11, %v5092_v16, %v5088_v42  ;;  %v4934_v62 = vadd.f32 %v6264_v24, %v4933_v48  ;;  %vm9864_vm2 = vcmp.eq.f32.partialorder %v4924_v54, 8.507059e+37 }
 0xb36   : > { %v5126_v6 = vmul.f32 %v6268_v13, %v9827_v47  ;;  %v5094_v44 = vmul.f32 %v5093_v36, %v4058_v39  ;;  %v4918_v27 = vmul.f32 %v6266_v5, %v4917_v33  ;;  %vm4921_vm4 = vweird.f32 %v6266_v5 }
 0xb37   : > { %v5136_v8 = vand.u32 2147483648, %v9827_v47  ;;  %v4938_v28 = vsel %vm4937_vm3, %v6264_v24, %v4934_v62  ;;  %v4927_v52 = vor.u32 1.1754944e-38, %v4926_v45  ;;  %vm5130_vm5 = vweird.f32 %v9827_v47  ;;  %vm4922_vm6 = vmor %vm4920_vm14, %vm4921_vm4 }
 0xb38   : > { %v6270_v30 = vpop.eup %6269  ;;  %v5127_v10 = vsub.f32 1.0, %v5126_v6  ;;  %5466 = vst [vmem:[%s6778_s30 + $0x148] sm:$0xff] %v5094_v44  ;;  %v4943_v55 = vsel %vm9856_vm1, %v4942_v50, %v4938_v28  ;;  %v4919_v20 = vadd.f32 %v6266_v5, %v4918_v27  ;;  %v5134_v40 = vand.u32 2147483647, %v9827_v47  ;;  %v9922_v6 = vpop.permute.xlu0 %4357 }
 0xb39   : > { %v4976_v57 = vmul.f32 %v6270_v30, %v9817_v11  ;;  %v4944_v51 = vmul.f32 %v4943_v55, %v4048_v32  ;;  %vm5131_vm7 = vweird.f32 %v6268_v13  ;;  %vm4980_vm8 = vweird.f32 %v9817_v11 }
 0xb3a   : > { %v5128_v15 = vmul.f32 %v6268_v13, %v5127_v10  ;;  %v4923_v21 = vsel %vm4922_vm6, %v6266_v5, %v4919_v20  ;;  %v5137_v53 = vor.u32 1.1754944e-38, %v5136_v8  ;;  %6273 = vrcp.f32 %v9872_v23  ;;  %vm5132_vm9 = vmor %vm5130_vm5, %vm5131_vm7  ;;  %v9927_v8 = vpop.permute.xlu1 %4362  ;;  %v4064_v10 = vld [vmem:[#allocation5 + $0x110] sm:$0xff] }
 0xb3b   : > { %v6272_v43 = vpop.eup %6271  ;;  %v4977_v2 = vsub.f32 1.0, %v4976_v57  ;;  %5456 = vst [vmem:[%s6778_s30 + $0xf8] sm:$0xff] %v4944_v51  ;;  %v4928_v38 = vsel %vm9864_vm2, %v4927_v52, %v4923_v21  ;;  %v4986_v7 = vand.u32 2147483648, %v9817_v11  ;;  %vm4981_vm10 = vweird.f32 %v6270_v30 }
 0xb3c   : > { %v5129_v63 = vadd.f32 %v6268_v13, %v5128_v15  ;;  %v4961_v37 = vmul.f32 %v6272_v43, %v9814_v34  ;;  %v4929_v14 = vmul.f32 %v4928_v38, %v4047_v18  ;;  %v4984_v25 = vand.u32 2147483647, %v9817_v11  ;;  %vm4982_vm12 = vmor %vm4980_vm8, %vm4981_vm10  ;;  %v4054_v38 = vld [vmem:[#allocation5 + $0x140] sm:$0xff] }
 0xb3d   : > { %v4978_v26 = vmul.f32 %v6270_v30, %v4977_v2  ;;  %vm5135_vm11 = vcmp.eq.f32.partialorder %v5134_v40, 8.507059e+37  ;;  %6275 = vrcp.f32 %v9851_v17  ;;  %v4969_v0 = vand.u32 2147483647, %v9814_v34 }
 0xb3e   : > { %v5133_v24 = vsel %vm5132_vm9, %v6268_v13, %v5129_v63  ;;  %v4962_v49 = vsub.f32 1.0, %v4961_v37  ;;  %5455 = vst [vmem:[%s6778_s30 + $0xf0] sm:$0xff] %v4929_v14  ;;  %v4971_v47 = vand.u32 2147483648, %v9814_v34  ;;  %v4987_v1 = vor.u32 1.1754944e-38, %v4986_v7  ;;  %v9951_v37 = vpop.permute.xlu2 %4412 }
 0xb3f   : > { %v5138_v3 = vsel %vm5135_vm11, %v5137_v53, %v5133_v24  ;;  %v4979_v12 = vadd.f32 %v6270_v30, %v4978_v26  ;;  %vm4966_vm13 = vweird.f32 %v6272_v43  ;;  %vm4985_vm14 = vcmp.eq.f32.partialorder %v4984_v25, 8.507059e+37 }
 0xb40   : > { %v5139_v46 = vmul.f32 %v5138_v3, %v4061_v31  ;;  %v4963_v9 = vmul.f32 %v6272_v43, %v4962_v49  ;;  %v6274_v60 = vpop.eup %6273  ;;  %v5179_v5 = vand.u32 2147483647, %v9872_v23  ;;  %6277 = vrcp.f32 %v9846_v19 }
 0xb41   : > { %v4983_v41 = vsel %vm4982_vm12, %v6270_v30, %v4979_v12  ;;  %vm4965_vm15 = vweird.f32 %v9814_v34  ;;  %v5171_v11 = vmul.f32 %v6274_v60, %v9872_v23  ;;  %vm4970_vm1 = vcmp.eq.f32.partialorder %v4969_v0, 8.507059e+37  ;;  %v4053_v0 = vld [vmem:[#allocation5 + $0x1e8] sm:$0xff] }
 0xb42   : > { %5469 = vst [vmem:[%s6778_s30 + $0x160] sm:$0xff] %v5139_v46  ;;  %v4988_v54 = vsel %vm4985_vm14, %v4987_v1, %v4983_v41  ;;  %v4964_v58 = vadd.f32 %v6272_v43, %v4963_v9  ;;  %vm4967_vm0 = vmor %vm4965_vm15, %vm4966_vm13  ;;  %v4972_v39 = vor.u32 1.1754944e-38, %v4971_v47  ;;  %vm5175_vm2 = vweird.f32 %v9872_v23 }
 0xb43   : > { %v4989_v16 = vmul.f32 %v4988_v54, %v4051_v59  ;;  %v6276_v48 = vpop.eup %6275  ;;  %v5172_v45 = vsub.f32 1.0, %v5171_v11  ;;  %v5181_v13 = vand.u32 2147483648, %v9872_v23  ;;  %6279 = vrcp.f32 %v9906_v61 }
 0xb44   : > { %v4968_v29 = vsel %vm4967_vm0, %v6272_v43, %v4964_v58  ;;  %vm9915_vm3 = vcmp.eq.f32.partialorder %v5179_v5, 8.507059e+37  ;;  %v5021_v50 = vmul.f32 %v6276_v48, %v9851_v17  ;;  %v5029_v33 = vand.u32 2147483647, %v9851_v17  ;;  %v9971_v58 = vpop.permute.xlu1 %4377 }
 0xb45   : > { %5459 = vst [vmem:[%s6778_s30 + $0x110] sm:$0xff] %v4989_v16  ;;  %v4973_v42 = vsel %vm4970_vm1, %v4972_v39, %v4968_v29  ;;  %v5173_v62 = vmul.f32 %v6274_v60, %v5172_v45  ;;  %vm5176_vm4 = vweird.f32 %v6274_v60  ;;  %v5031_v35 = vand.u32 2147483648, %v9851_v17  ;;  %v4067_v16 = vld [vmem:[#allocation5 + $0x120] sm:$0xff] }
 0xb46   : > { %v4974_v36 = vmul.f32 %v4973_v42, %v4050_v22  ;;  %v6278_v44 = vpop.eup %6277  ;;  %v5022_v32 = vsub.f32 1.0, %v5021_v50  ;;  %vm5025_vm5 = vweird.f32 %v9851_v17  ;;  %v5014_v27 = vand.u32 2147483647, %v9846_v19  ;;  %vm5177_vm7 = vmor %vm5175_vm2, %vm5176_vm4 }
 0xb47   : > { %6281 = vrcp.f32 %v9896_v4  ;;  %v5174_v30 = vadd.f32 %v6274_v60, %v5173_v62  ;;  %v5182_v28 = vor.u32 1.1754944e-38, %v5181_v13  ;;  %v5006_v52 = vmul.f32 %v6278_v44, %v9846_v19 }
 0xb48   : > { %5458 = vst [vmem:[%s6778_s30 + $0x108] sm:$0xff] %v4974_v36  ;;  %vm5010_vm6 = vweird.f32 %v9846_v19  ;;  %v5023_v55 = vmul.f32 %v6276_v48, %v5022_v32  ;;  %vm5026_vm8 = vweird.f32 %v6276_v48  ;;  %vm9935_vm9 = vcmp.eq.f32.partialorder %v5029_v33, 8.507059e+37  ;;  %v9985_v32 = vpop.permute.xlu2 %4427 }
 0xb49   : > { %v5016_v40 = vand.u32 2147483648, %v9846_v19  ;;  %v6280_v57 = vpop.eup %6279  ;;  %v5178_v51 = vsel %vm5177_vm7, %v6274_v60, %v5174_v30  ;;  %v5032_v18 = vor.u32 1.1754944e-38, %v5031_v35  ;;  %v5007_v15 = vsub.f32 1.0, %v5006_v52  ;;  %vm5027_vm11 = vmor %vm5025_vm5, %vm5026_vm8  ;;  %v9964_v60 = vpop.permute.xlu0 %4372  ;;  %v4056_v52 = vld [vmem:[#allocation5 + $0x98] sm:$0xff] }
 0xb4a   : > { %6283 = vrcp.f32 %v9890_v56  ;;  %v5183_v43 = vsel %vm9915_vm3, %v5182_v28, %v5178_v51  ;;  %v5024_v23 = vadd.f32 %v6276_v48, %v5023_v55  ;;  %vm9943_vm10 = vcmp.eq.f32.partialorder %v5014_v27, 8.507059e+37 }
 0xb4b   : > { %v5216_v53 = vmul.f32 %v6280_v57, %v9906_v61  ;;  %v5184_v2 = vmul.f32 %v5183_v43, %v4064_v10  ;;  %v5008_v63 = vmul.f32 %v6278_v44, %v5007_v15  ;;  %vm5011_vm12 = vweird.f32 %v6278_v44 }
 0xb4c   : > { %v5226_v7 = vand.u32 2147483648, %v9906_v61  ;;  %v5028_v31 = vsel %vm5027_vm11, %v6276_v48, %v5024_v23  ;;  %v5017_v26 = vor.u32 1.1754944e-38, %v5016_v40  ;;  %vm5220_vm13 = vweird.f32 %v9906_v61  ;;  %vm5012_vm14 = vmor %vm5010_vm6, %vm5011_vm12 }
 0xb4d   : > { %v6282_v14 = vpop.eup %6281  ;;  %v5217_v25 = vsub.f32 1.0, %v5216_v53  ;;  %5472 = vst [vmem:[%s6778_s30 + $0x178] sm:$0xff] %v5184_v2  ;;  %v5033_v24 = vsel %vm9935_vm9, %v5032_v18, %v5028_v31  ;;  %v5009_v49 = vadd.f32 %v6278_v44, %v5008_v63  ;;  %v5224_v17 = vand.u32 2147483647, %v9906_v61  ;;  %v4057_v61 = vld [vmem:[#allocation5 + $0x1b8] sm:$0xff]  ;;  %v10003_v2 = vpop.permute.xlu1 %4392 }
 0xb4e   : > { %v5066_v3 = vmul.f32 %v6282_v14, %v9896_v4  ;;  %v5034_v12 = vmul.f32 %v5033_v24, %v4054_v38  ;;  %vm5221_vm15 = vweird.f32 %v6280_v57  ;;  %vm5070_vm0 = vweird.f32 %v9896_v4 }
 0xb4f   : > { %v5218_v47 = vmul.f32 %v6280_v57, %v5217_v25  ;;  %v5013_v59 = vsel %vm5012_vm14, %v6278_v44, %v5009_v49  ;;  %v5227_v1 = vor.u32 1.1754944e-38, %v5226_v7  ;;  %6285 = vrcp.f32 %v9951_v37  ;;  %vm5222_vm1 = vmor %vm5220_vm13, %vm5221_vm15  ;;  %v4070_v25 = vld [vmem:[#allocation5 + $0xc0] sm:$0xff] }
 0xb50   : > { %v6284_v46 = vpop.eup %6283  ;;  %v5067_v9 = vsub.f32 1.0, %v5066_v3  ;;  %5462 = vst [vmem:[%s6778_s30 + $0x128] sm:$0xff] %v5034_v12  ;;  %v5018_v41 = vsel %vm9943_vm10, %v5017_v26, %v5013_v59  ;;  %v5076_v19 = vand.u32 2147483648, %v9896_v4  ;;  %vm5071_vm2 = vweird.f32 %v6282_v14 }
 0xb51   : > { %v5219_v5 = vadd.f32 %v6280_v57, %v5218_v47  ;;  %v5051_v54 = vmul.f32 %v6284_v46, %v9890_v56  ;;  %v5019_v11 = vmul.f32 %v5018_v41, %v4053_v0  ;;  %v5074_v39 = vand.u32 2147483647, %v9896_v4  ;;  %vm5072_vm4 = vmor %vm5070_vm0, %vm5071_vm2  ;;  %v10000_v43 = vpop.permute.xlu0 %4387  ;;  %v4060_v41 = vld [vmem:[#allocation5 + $0xf8] sm:$0xff] }
 0xb52   : > { %v5068_v22 = vmul.f32 %v6282_v14, %v5067_v9  ;;  %vm5225_vm3 = vcmp.eq.f32.partialorder %v5224_v17, 8.507059e+37  ;;  %6287 = vrcp.f32 %v9927_v8  ;;  %v5059_v42 = vand.u32 2147483647, %v9890_v56 }
 0xb53   : > { %v5223_v48 = vsel %vm5222_vm1, %v6280_v57, %v5219_v5  ;;  %v5052_v29 = vsub.f32 1.0, %v5051_v54  ;;  %5461 = vst [vmem:[%s6778_s30 + $0x120] sm:$0xff] %v5019_v11  ;;  %v5061_v34 = vand.u32 2147483648, %v9890_v56  ;;  %v5077_v33 = vor.u32 1.1754944e-38, %v5076_v19  ;;  %v10029_v54 = vpop.permute.xlu2 %4442 }
 0xb54   : > { %v5228_v45 = vsel %vm5225_vm3, %v5227_v1, %v5223_v48  ;;  %v5069_v13 = vadd.f32 %v6282_v14, %v5068_v22  ;;  %vm5056_vm5 = vweird.f32 %v6284_v46  ;;  %vm5075_vm6 = vcmp.eq.f32.partialorder %v5074_v39, 8.507059e+37 }
 0xb55   : > { %v5229_v50 = vmul.f32 %v5228_v45, %v4067_v16  ;;  %v5053_v36 = vmul.f32 %v6284_v46, %v5052_v29  ;;  %v6286_v62 = vpop.eup %6285  ;;  %v5269_v44 = vand.u32 2147483647, %v9951_v37  ;;  %6289 = vrcp.f32 %v9922_v6 }
 0xb56   : > { %v5073_v35 = vsel %vm5072_vm4, %v6282_v14, %v5069_v13  ;;  %vm5055_vm7 = vweird.f32 %v9890_v56  ;;  %v5261_v4 = vmul.f32 %v6286_v62, %v9951_v37  ;;  %vm5060_vm9 = vcmp.eq.f32.partialorder %v5059_v42, 8.507059e+37  ;;  %v4059_v42 = vld [vmem:[#allocation5 + $0xc8] sm:$0xff] }
 0xb57   : > { %5475 = vst [vmem:[%s6778_s30 + $0x190] sm:$0xff] %v5229_v50  ;;  %v5078_v27 = vsel %vm5075_vm6, %v5077_v33, %v5073_v35  ;;  %v5054_v30 = vadd.f32 %v6284_v46, %v5053_v36  ;;  %vm5057_vm8 = vmor %vm5055_vm7, %vm5056_vm5  ;;  %v5062_v10 = vor.u32 1.1754944e-38, %v5061_v34  ;;  %vm5265_vm10 = vweird.f32 %v9951_v37  ;;  %v10044_v35 = vpop.permute.xlu1 %4407 }
 0xb58   : > { %v5079_v28 = vmul.f32 %v5078_v27, %v4057_v61  ;;  %v6288_v55 = vpop.eup %6287  ;;  %v5262_v40 = vsub.f32 1.0, %v5261_v4  ;;  %v5271_v57 = vand.u32 2147483648, %v9951_v37  ;;  %6291 = vrcp.f32 %v9985_v32 }
 0xb59   : > { %v5058_v20 = vsel %vm5057_vm8, %v6284_v46, %v5054_v30  ;;  %vm9994_vm11 = vcmp.eq.f32.partialorder %v5269_v44, 8.507059e+37  ;;  %v5111_v18 = vmul.f32 %v6288_v55, %v9927_v8  ;;  %v5119_v15 = vand.u32 2147483647, %v9927_v8  ;;  %v10041_v50 = vpop.permute.xlu0 %4402 }
 0xb5a   : > { %5465 = vst [vmem:[%s6778_s30 + $0x140] sm:$0xff] %v5079_v28  ;;  %v5063_v51 = vsel %vm5060_vm9, %v5062_v10, %v5058_v20  ;;  %v5263_v21 = vmul.f32 %v6286_v62, %v5262_v40  ;;  %vm5266_vm12 = vweird.f32 %v6286_v62  ;;  %v5121_v53 = vand.u32 2147483648, %v9927_v8  ;;  %v4073_v28 = vld [vmem:[#allocation5 + $0x1b0] sm:$0xff] }
 0xb5b   : > { %v5064_v23 = vmul.f32 %v5063_v51, %v4056_v52  ;;  %v6290_v38 = vpop.eup %6289  ;;  %v5112_v63 = vsub.f32 1.0, %v5111_v18  ;;  %vm5115_vm13 = vweird.f32 %v9927_v8  ;;  %v5104_v7 = vand.u32 2147483647, %v9922_v6  ;;  %vm5267_vm15 = vmor %vm5265_vm10, %vm5266_vm12 }
 0xb5c   : > { %6293 = vrcp.f32 %v9971_v58  ;;  %v5264_v14 = vadd.f32 %v6286_v62, %v5263_v21  ;;  %v5272_v31 = vor.u32 1.1754944e-38, %v5271_v57  ;;  %v5096_v26 = vmul.f32 %v6290_v38, %v9922_v6 }
 0xb5d   : > { %5464 = vst [vmem:[%s6778_s30 + $0x138] sm:$0xff] %v5064_v23  ;;  %vm5100_vm14 = vweird.f32 %v9922_v6  ;;  %v5113_v24 = vmul.f32 %v6288_v55, %v5112_v63  ;;  %vm5116_vm0 = vweird.f32 %v6288_v55  ;;  %vm10013_vm1 = vcmp.eq.f32.partialorder %v5119_v15, 8.507059e+37  ;;  %v10063_v63 = vpop.permute.xlu2 %4457 }
 0xb5e   : > { %v5106_v17 = vand.u32 2147483648, %v9922_v6  ;;  %v6292_v3 = vpop.eup %6291  ;;  %v5268_v12 = vsel %vm5267_vm15, %v6286_v62, %v5264_v14  ;;  %v5122_v0 = vor.u32 1.1754944e-38, %v5121_v53  ;;  %v5097_v47 = vsub.f32 1.0, %v5096_v26  ;;  %vm5117_vm3 = vmor %vm5115_vm13, %vm5116_vm0  ;;  %v4062_v26 = vld [vmem:[#allocation5 + $0x180] sm:$0xff] }
 0xb5f   : > { %6295 = vrcp.f32 %v9964_v60  ;;  %v5273_v46 = vsel %vm9994_vm11, %v5272_v31, %v5268_v12  ;;  %v5114_v37 = vadd.f32 %v6288_v55, %v5113_v24  ;;  %vm10021_vm2 = vcmp.eq.f32.partialorder %v5104_v7, 8.507059e+37 }
 0xb60   : > { %v5306_v1 = vmul.f32 %v6292_v3, %v9985_v32  ;;  %v5274_v9 = vmul.f32 %v5273_v46, %v4070_v25  ;;  %v5098_v5 = vmul.f32 %v6290_v38, %v5097_v47  ;;  %vm5101_vm4 = vweird.f32 %v6290_v38 }
 0xb61   : > { %v5316_v19 = vand.u32 2147483648, %v9985_v32  ;;  %v5118_v16 = vsel %vm5117_vm3, %v6288_v55, %v5114_v37  ;;  %v5107_v22 = vor.u32 1.1754944e-38, %v5106_v17  ;;  %vm5310_vm5 = vweird.f32 %v9985_v32  ;;  %vm5102_vm6 = vmor %vm5100_vm14, %vm5101_vm4  ;;  %v10071_v12 = vpop.permute.xlu0 %4417  ;;  %v10080_v37 = vpop.permute.xlu1 %4422 }
 0xb62   : > { %v6294_v11 = vpop.eup %6293  ;;  %v5307_v39 = vsub.f32 1.0, %v5306_v1  ;;  %5478 = vst [vmem:[%s6778_s30 + $0x1a8] sm:$0xff] %v5274_v9  ;;  %v5123_v48 = vsel %vm10013_vm1, %v5122_v0, %v5118_v16  ;;  %v5099_v29 = vadd.f32 %v6290_v38, %v5098_v5  ;;  %v5314_v8 = vand.u32 2147483647, %v9985_v32  ;;  %v4063_v32 = vld [vmem:[#allocation5 + $0xb0] sm:$0xff] }
 0xb63   : > { %v5156_v45 = vmul.f32 %v6294_v11, %v9971_v58  ;;  %v5124_v13 = vmul.f32 %v5123_v48, %v4060_v41  ;;  %vm5311_vm7 = vweird.f32 %v6292_v3  ;;  %vm5160_vm8 = vweird.f32 %v9971_v58 }
 0xb64   : > { %v5308_v34 = vmul.f32 %v6292_v3, %v5307_v39  ;;  %v5103_v33 = vsel %vm5102_vm6, %v6290_v38, %v5099_v29  ;;  %v5317_v36 = vor.u32 1.1754944e-38, %v5316_v19  ;;  %6297 = vrcp.f32 %v10029_v54  ;;  %vm5312_vm9 = vmor %vm5310_vm5, %vm5311_vm7  ;;  %v4076_v39 = vld [vmem:[#allocation5 + $0x128] sm:$0xff] }
 0xb65   : > { %v6296_v61 = vpop.eup %6295  ;;  %v5157_v62 = vsub.f32 1.0, %v5156_v45  ;;  %5468 = vst [vmem:[%s6778_s30 + $0x158] sm:$0xff] %v5124_v13  ;;  %v5108_v6 = vsel %vm10021_vm2, %v5107_v22, %v5103_v33  ;;  %v5166_v27 = vand.u32 2147483648, %v9971_v58  ;;  %vm5161_vm10 = vweird.f32 %v6294_v11 }
 0xb66   : > { %v5309_v44 = vadd.f32 %v6292_v3, %v5308_v34  ;;  %v5141_v30 = vmul.f32 %v6296_v61, %v9964_v60  ;;  %v5109_v4 = vmul.f32 %v5108_v6, %v4059_v42  ;;  %v5164_v10 = vand.u32 2147483647, %v9971_v58  ;;  %vm5162_vm12 = vmor %vm5160_vm8, %vm5161_vm10  ;;  %v4066_v6 = vld [vmem:[#allocation5 + $0xb8] sm:$0xff] }
 0xb67   : > { %v5158_v52 = vmul.f32 %v6294_v11, %v5157_v62  ;;  %vm5315_vm11 = vcmp.eq.f32.partialorder %v5314_v8, 8.507059e+37  ;;  %6299 = vrcp.f32 %v10003_v2  ;;  %v5149_v51 = vand.u32 2147483647, %v9964_v60 }
 0xb68   : > { %v5313_v55 = vsel %vm5312_vm9, %v6292_v3, %v5309_v44  ;;  %v5142_v20 = vsub.f32 1.0, %v5141_v30  ;;  %5467 = vst [vmem:[%s6778_s30 + $0x150] sm:$0xff] %v5109_v4  ;;  %v5151_v56 = vand.u32 2147483648, %v9964_v60  ;;  %v5167_v15 = vor.u32 1.1754944e-38, %v5166_v27 }
 0xb69   : > { %v5318_v40 = vsel %vm5315_vm11, %v5317_v36, %v5313_v55  ;;  %v5159_v57 = vadd.f32 %v6294_v11, %v5158_v52  ;;  %vm5146_vm13 = vweird.f32 %v6296_v61  ;;  %vm5165_vm14 = vcmp.eq.f32.partialorder %v5164_v10, 8.507059e+37 }
 0xb6a   : > { %v5319_v18 = vmul.f32 %v5318_v40, %v4073_v28  ;;  %v5143_v23 = vmul.f32 %v6296_v61, %v5142_v20  ;;  %v6298_v21 = vpop.eup %6297  ;;  %v5359_v38 = vand.u32 2147483647, %v10029_v54  ;;  %6301 = vrcp.f32 %v10000_v43  ;;  %v10113_v40 = vpop.permute.xlu0 %4432 }
 0xb6b   : > { %v5163_v53 = vsel %vm5162_vm12, %v6294_v11, %v5159_v57  ;;  %vm5145_vm15 = vweird.f32 %v9964_v60  ;;  %v5351_v58 = vmul.f32 %v6298_v21, %v10029_v54  ;;  %vm5150_vm1 = vcmp.eq.f32.partialorder %v5149_v51, 8.507059e+37  ;;  %v4065_v51 = vld [vmem:[#allocation5 + $0x20] sm:$0xff] }
 0xb6c   : > { %5481 = vst [vmem:[%s6778_s30 + $0x1c0] sm:$0xff] %v5319_v18  ;;  %v5168_v7 = vsel %vm5165_vm14, %v5167_v15, %v5163_v53  ;;  %v5144_v14 = vadd.f32 %v6296_v61, %v5143_v23  ;;  %vm5147_vm0 = vmor %vm5145_vm15, %vm5146_vm13  ;;  %v5152_v25 = vor.u32 1.1754944e-38, %v5151_v56  ;;  %vm5355_vm2 = vweird.f32 %v10029_v54  ;;  %v10119_v18 = vpop.permute.xlu1 %4437 }
 0xb6d   : > { %v5169_v31 = vmul.f32 %v5168_v7, %v4063_v32  ;;  %v6300_v24 = vpop.eup %6299  ;;  %v5352_v17 = vsub.f32 1.0, %v5351_v58  ;;  %v5361_v3 = vand.u32 2147483648, %v10029_v54  ;;  %6303 = vrcp.f32 %v10063_v63  ;;  %v4079_v58 = vld [vmem:[#allocation5 + $0x1d0] sm:$0xff] }
 0xb6e   : > { %v5148_v49 = vsel %vm5147_vm0, %v6296_v61, %v5144_v14  ;;  %vm10074_vm3 = vcmp.eq.f32.partialorder %v5359_v38, 8.507059e+37  ;;  %v5201_v47 = vmul.f32 %v6300_v24, %v10003_v2  ;;  %v5209_v46 = vand.u32 2147483647, %v10003_v2 }
 0xb6f   : > { %5471 = vst [vmem:[%s6778_s30 + $0x170] sm:$0xff] %v5169_v31  ;;  %v5153_v60 = vsel %vm5150_vm1, %v5152_v25, %v5148_v49  ;;  %v5353_v1 = vmul.f32 %v6298_v21, %v5352_v17  ;;  %vm5356_vm4 = vweird.f32 %v6298_v21  ;;  %v5211_v9 = vand.u32 2147483648, %v10003_v2 }
 0xb70   : > { %v5154_v59 = vmul.f32 %v5153_v60, %v4062_v26  ;;  %v6302_v41 = vpop.eup %6301  ;;  %v5202_v5 = vsub.f32 1.0, %v5201_v47  ;;  %vm5205_vm5 = vweird.f32 %v10003_v2  ;;  %v5194_v19 = vand.u32 2147483647, %v10000_v43  ;;  %vm5357_vm7 = vmor %vm5355_vm2, %vm5356_vm4 }
 0xb71   : > { %6305 = vrcp.f32 %v10044_v35  ;;  %v5354_v11 = vadd.f32 %v6298_v21, %v5353_v1  ;;  %v5362_v16 = vor.u32 1.1754944e-38, %v5361_v3  ;;  %v5186_v22 = vmul.f32 %v6302_v41, %v10000_v43 }
 0xb72   : > { %5470 = vst [vmem:[%s6778_s30 + $0x168] sm:$0xff] %v5154_v59  ;;  %vm5190_vm6 = vweird.f32 %v10000_v43  ;;  %v5203_v48 = vmul.f32 %v6300_v24, %v5202_v5  ;;  %vm5206_vm8 = vweird.f32 %v6300_v24  ;;  %vm10091_vm9 = vcmp.eq.f32.partialorder %v5209_v46, 8.507059e+37 }
 0xb73   : > { %v5196_v8 = vand.u32 2147483648, %v10000_v43  ;;  %v6304_v45 = vpop.eup %6303  ;;  %v5358_v13 = vsel %vm5357_vm7, %v6298_v21, %v5354_v11  ;;  %v5212_v42 = vor.u32 1.1754944e-38, %v5211_v9  ;;  %v5187_v34 = vsub.f32 1.0, %v5186_v22  ;;  %vm5207_vm11 = vmor %vm5205_vm5, %vm5206_vm8  ;;  %v4068_v11 = vld [vmem:[#allocation5 + $0x90] sm:$0xff]  ;;  %v10142_v22 = vpop.permute.xlu0 %4447 }
 0xb74   : > { %6307 = vrcp.f32 %v10041_v50  ;;  %v5363_v61 = vsel %vm10074_vm3, %v5362_v16, %v5358_v13  ;;  %v5204_v54 = vadd.f32 %v6300_v24, %v5203_v48  ;;  %vm10099_vm10 = vcmp.eq.f32.partialorder %v5194_v19, 8.507059e+37 }
 0xb75   : > { %v5396_v36 = vmul.f32 %v6304_v45, %v10063_v63  ;;  %v5364_v62 = vmul.f32 %v5363_v61, %v4076_v39  ;;  %v5188_v44 = vmul.f32 %v6302_v41, %v5187_v34  ;;  %vm5191_vm12 = vweird.f32 %v6302_v41 }
 0xb76   : > { %v5406_v27 = vand.u32 2147483648, %v10063_v63  ;;  %v5208_v4 = vsel %vm5207_vm11, %v6300_v24, %v5204_v54  ;;  %v5197_v28 = vor.u32 1.1754944e-38, %v5196_v8  ;;  %vm5400_vm13 = vweird.f32 %v10063_v63  ;;  %vm5192_vm14 = vmor %vm5190_vm6, %vm5191_vm12 }
 0xb77   : > { %v6306_v30 = vpop.eup %6305  ;;  %v5397_v52 = vsub.f32 1.0, %v5396_v36  ;;  %5484 = vst [vmem:[%s6778_s30 + $0x1d8] sm:$0xff] %v5364_v62  ;;  %v5213_v10 = vsel %vm10091_vm9, %v5212_v42, %v5208_v4  ;;  %v5189_v55 = vadd.f32 %v6302_v41, %v5188_v44  ;;  %v5404_v20 = vand.u32 2147483647, %v10063_v63  ;;  %v4069_v63 = vld [vmem:[#allocation5 + $0xa8] sm:$0xff] }
 0xb78   : > { %v5246_v2 = vmul.f32 %v6306_v30, %v10044_v35  ;;  %v5214_v57 = vmul.f32 %v5213_v10, %v4066_v6  ;;  %vm5401_vm15 = vweird.f32 %v6304_v45  ;;  %vm5250_vm0 = vweird.f32 %v10044_v35  ;;  %v4072_v4 = vld [vmem:[#allocation5 + $0x188] sm:$0xff] }
 0xb79   : > { %v5398_v56 = vmul.f32 %v6304_v45, %v5397_v52  ;;  %v5193_v15 = vsel %vm5192_vm14, %v6302_v41, %v5189_v55  ;;  %v5407_v23 = vor.u32 1.1754944e-38, %v5406_v27  ;;  %6309 = vrcp.f32 %v10080_v37  ;;  %vm5402_vm1 = vmor %vm5400_vm13, %vm5401_vm15 }
 0xb7a   : > { %v6308_v32 = vpop.eup %6307  ;;  %v5247_v21 = vsub.f32 1.0, %v5246_v2  ;;  %5474 = vst [vmem:[%s6778_s30 + $0x188] sm:$0xff] %v5214_v57  ;;  %v5198_v53 = vsel %vm10099_vm10, %v5197_v28, %v5193_v15  ;;  %v5256_v43 = vand.u32 2147483648, %v10044_v35  ;;  %vm5251_vm2 = vweird.f32 %v6306_v30  ;;  %v4071_v15 = vld [vmem:[#allocation5 + $0x138] sm:$0xff] }
 0xb7b   : > { %v5399_v38 = vadd.f32 %v6304_v45, %v5398_v56  ;;  %v5231_v7 = vmul.f32 %v6308_v32, %v10041_v50  ;;  %v5199_v14 = vmul.f32 %v5198_v53, %v4065_v51  ;;  %v5254_v26 = vand.u32 2147483647, %v10044_v35  ;;  %vm5252_vm4 = vmor %vm5250_vm0, %vm5251_vm2 }
 0xb7c   : > { %v5248_v31 = vmul.f32 %v6306_v30, %v5247_v21  ;;  %vm5405_vm3 = vcmp.eq.f32.partialorder %v5404_v20, 8.507059e+37  ;;  %6311 = vrcp.f32 %v10071_v12  ;;  %v5239_v3 = vand.u32 2147483647, %v10041_v50 }
 0xb7d   : > { %v5403_v25 = vsel %vm5402_vm1, %v6304_v45, %v5399_v38  ;;  %v5232_v24 = vsub.f32 1.0, %v5231_v7  ;;  %5473 = vst [vmem:[%s6778_s30 + $0x180] sm:$0xff] %v5199_v14  ;;  %v5241_v60 = vand.u32 2147483648, %v10041_v50  ;;  %v5257_v47 = vor.u32 1.1754944e-38, %v5256_v43  ;;  %v10146_v45 = vpop.permute.xlu1 %4452 }
 0xb7e   : > { %v5408_v49 = vsel %vm5405_vm3, %v5407_v23, %v5403_v25  ;;  %v5249_v17 = vadd.f32 %v6306_v30, %v5248_v31  ;;  %vm5236_vm5 = vweird.f32 %v6308_v32  ;;  %vm5255_vm6 = vcmp.eq.f32.partialorder %v5254_v26, 8.507059e+37 }
 0xb7f   : > { %v5409_v0 = vmul.f32 %v5408_v49, %v4079_v58  ;;  %v5233_v46 = vmul.f32 %v6308_v32, %v5232_v24  ;;  %v6310_v59 = vpop.eup %6309  ;;  %v5299_v9 = vand.u32 2147483647, %v10080_v37  ;;  %6313 = vrcp.f32 %v10119_v18  ;;  %v10181_v58 = vpop.permute.xlu0 %4462  ;;  %v4075_v24 = vld [vmem:[#allocation5 + $0xf0] sm:$0xff] }
 0xb80   : > { %v5253_v1 = vsel %vm5252_vm4, %v6306_v30, %v5249_v17  ;;  %vm5235_vm7 = vweird.f32 %v10041_v50  ;;  %v5291_v19 = vmul.f32 %v6310_v59, %v10080_v37  ;;  %vm5240_vm9 = vcmp.eq.f32.partialorder %v5239_v3, 8.507059e+37 }
 0xb81   : > { %5487 = vst [vmem:[%s6778_s30 + $0x1f0] sm:$0xff] %v5409_v0  ;;  %v5258_v41 = vsel %vm5255_vm6, %v5257_v47, %v5253_v1  ;;  %v5234_v5 = vadd.f32 %v6308_v32, %v5233_v46  ;;  %vm5237_vm8 = vmor %vm5235_vm7, %vm5236_vm5  ;;  %v5242_v16 = vor.u32 1.1754944e-38, %v5241_v60  ;;  %v5301_v8 = vand.u32 2147483648, %v10080_v37 }
 0xb82   : > { %v5259_v35 = vmul.f32 %v5258_v41, %v4069_v63  ;;  %v6312_v39 = vpop.eup %6311  ;;  %v5292_v29 = vsub.f32 1.0, %v5291_v19  ;;  %6315 = vrcp.f32 %v10113_v40  ;;  %vm5295_vm10 = vweird.f32 %v10080_v37 }
 0xb83   : > { %v5238_v48 = vsel %vm5237_vm8, %v6308_v32, %v5234_v5  ;;  %vm10150_vm11 = vcmp.eq.f32.partialorder %v5299_v9, 8.507059e+37  ;;  %v5276_v42 = vmul.f32 %v6312_v39, %v10071_v12  ;;  %vm5296_vm12 = vweird.f32 %v6310_v59  ;;  %v4074_v9 = vld [vmem:[#allocation5 + $0x18] sm:$0xff] }
 0xb84   : > { %5477 = vst [vmem:[%s6778_s30 + $0x1a0] sm:$0xff] %v5259_v35  ;;  %v5243_v50 = vsel %vm5240_vm9, %v5242_v16, %v5238_v48  ;;  %v5293_v61 = vmul.f32 %v6310_v59, %v5292_v29  ;;  %v5284_v54 = vand.u32 2147483647, %v10071_v12  ;;  %vm5280_vm13 = vweird.f32 %v10071_v12  ;;  %vm5297_vm14 = vmor %vm5295_vm10, %vm5296_vm12 }
 0xb85   : > { %v5244_v34 = vmul.f32 %v5243_v50, %v4068_v11  ;;  %v6314_v33 = vpop.eup %6313  ;;  %v5277_v36 = vsub.f32 1.0, %v5276_v42  ;;  %v5286_v62 = vand.u32 2147483648, %v10071_v12  ;;  %6317 = vrcp.f32 %v10146_v45 }
 0xb86   : > { %v5294_v6 = vadd.f32 %v6310_v59, %v5293_v61  ;;  %v5302_v44 = vor.u32 1.1754944e-38, %v5301_v8  ;;  %v5336_v27 = vmul.f32 %v6314_v33, %v10119_v18  ;;  %v5344_v30 = vand.u32 2147483647, %v10119_v18  ;;  %v4078_v8 = vld [vmem:[#allocation5 + $0x170] sm:$0xff] }
 0xb87   : > { %5476 = vst [vmem:[%s6778_s30 + $0x198] sm:$0xff] %v5244_v34  ;;  %v5278_v28 = vmul.f32 %v6312_v39, %v5277_v36  ;;  %vm5281_vm15 = vweird.f32 %v6312_v39  ;;  %vm5340_vm0 = vweird.f32 %v10119_v18  ;;  %v5346_v52 = vand.u32 2147483648, %v10119_v18 }
 0xb88   : > { %v6316_v10 = vpop.eup %6315  ;;  %v5298_v55 = vsel %vm5297_vm14, %v6310_v59, %v5294_v6  ;;  %vm10166_vm1 = vcmp.eq.f32.partialorder %v5284_v54, 8.507059e+37  ;;  %v5337_v2 = vsub.f32 1.0, %v5336_v27  ;;  %6319 = vrcp.f32 %v10142_v22  ;;  %vm5282_vm2 = vmor %vm5280_vm13, %vm5281_vm15 }
 0xb89   : > { %v5303_v57 = vsel %vm10150_vm11, %v5302_v44, %v5298_v55  ;;  %v5279_v37 = vadd.f32 %v6312_v39, %v5278_v28  ;;  %v5287_v51 = vor.u32 1.1754944e-38, %v5286_v62  ;;  %v5321_v56 = vmul.f32 %v6316_v10, %v10113_v40 }
 0xb8a   : > { %v5304_v32 = vmul.f32 %v5303_v57, %v4072_v4  ;;  %v5338_v23 = vmul.f32 %v6314_v33, %v5337_v2  ;;  %vm5341_vm3 = vweird.f32 %v6314_v33  ;;  %vm10176_vm4 = vcmp.eq.f32.partialorder %v5344_v30, 8.507059e+37 }
 0xb8b   : > { %v6318_v53 = vpop.eup %6317  ;;  %v5283_v38 = vsel %vm5282_vm2, %v6312_v39, %v5279_v37  ;;  %v5347_v43 = vor.u32 1.1754944e-38, %v5346_v52  ;;  %v5322_v7 = vsub.f32 1.0, %v5321_v56  ;;  %v5331_v14 = vand.u32 2147483648, %v10113_v40  ;;  %vm5342_vm6 = vmor %vm5340_vm0, %vm5341_vm3  ;;  %v4080_v52 = vld [vmem:[#allocation5 + $0x118] sm:$0xff] }
 0xb8c   : > { %5480 = vst [vmem:[%s6778_s30 + $0x1b8] sm:$0xff] %v5304_v32  ;;  %v5288_v12 = vsel %vm10166_vm1, %v5287_v51, %v5283_v38  ;;  %v5339_v31 = vadd.f32 %v6314_v33, %v5338_v23  ;;  %vm5325_vm5 = vweird.f32 %v10113_v40  ;;  %v5381_v26 = vmul.f32 %v6318_v53, %v10146_v45 }
 0xb8d   : > { %v5289_v25 = vmul.f32 %v5288_v12, %v4071_v15  ;;  %v5323_v49 = vmul.f32 %v6316_v10, %v5322_v7  ;;  %vm5326_vm7 = vweird.f32 %v6316_v10  ;;  %v5329_v17 = vand.u32 2147483647, %v10113_v40 }
 0xb8e   : > { %v6320_v3 = vpop.eup %6319  ;;  %v5343_v60 = vsel %vm5342_vm6, %v6314_v33, %v5339_v31  ;;  %v5382_v0 = vsub.f32 1.0, %v5381_v26  ;;  %v5391_v63 = vand.u32 2147483648, %v10146_v45  ;;  %6321 = vrcp.f32 %v10181_v58  ;;  %vm5327_vm8 = vmor %vm5325_vm5, %vm5326_vm7  ;;  %v4077_v33 = vld [vmem:[#allocation5 + $0x1f8] sm:$0xff] }
 0xb8f   : > { %5479 = vst [vmem:[%s6778_s30 + $0x1b0] sm:$0xff] %v5289_v25  ;;  %v5348_v47 = vsel %vm10176_vm4, %v5347_v43, %v5343_v60  ;;  %v5324_v46 = vadd.f32 %v6316_v10, %v5323_v49  ;;  %v5332_v59 = vor.u32 1.1754944e-38, %v5331_v14  ;;  %v5366_v18 = vmul.f32 %v6320_v3, %v10142_v22 }
 0xb90   : > { %v5349_v1 = vmul.f32 %v5348_v47, %v4075_v24  ;;  %v5383_v41 = vmul.f32 %v6318_v53, %v5382_v0  ;;  %vm5386_vm9 = vweird.f32 %v6318_v53  ;;  %v5389_v5 = vand.u32 2147483647, %v10146_v45 }
 0xb91   : > { %v5328_v19 = vsel %vm5327_vm8, %v6316_v10, %v5324_v46  ;;  %vm5330_vm10 = vcmp.eq.f32.partialorder %v5329_v17, 8.507059e+37  ;;  %vm5385_vm11 = vweird.f32 %v10146_v45  ;;  %v5367_v35 = vsub.f32 1.0, %v5366_v18 }
 0xb92   : > { %5483 = vst [vmem:[%s6778_s30 + $0x1d0] sm:$0xff] %v5349_v1  ;;  %v5333_v11 = vsel %vm5330_vm10, %v5332_v59, %v5328_v19  ;;  %v5384_v16 = vadd.f32 %v6318_v53, %v5383_v41  ;;  %v5392_v39 = vor.u32 1.1754944e-38, %v5391_v63  ;;  %v5376_v48 = vand.u32 2147483648, %v10142_v22  ;;  %vm5387_vm12 = vmor %vm5385_vm11, %vm5386_vm9 }
 0xb93   : > { %v5334_v29 = vmul.f32 %v5333_v11, %v4074_v9  ;;  %v5368_v40 = vmul.f32 %v6320_v3, %v5367_v35  ;;  %vm5371_vm13 = vweird.f32 %v6320_v3  ;;  %v5374_v50 = vand.u32 2147483647, %v10142_v22 }
 0xb94   : > { %v6322_v13 = vpop.eup %6321  ;;  %v5388_v42 = vsel %vm5387_vm12, %v6318_v53, %v5384_v16  ;;  %vm5390_vm14 = vcmp.eq.f32.partialorder %v5389_v5, 8.507059e+37  ;;  %vm5370_vm15 = vweird.f32 %v10142_v22  ;;  %v5377_v36 = vor.u32 1.1754944e-38, %v5376_v48 }
 0xb95   : > { %5482 = vst [vmem:[%s6778_s30 + $0x1c8] sm:$0xff] %v5334_v29  ;;  %v5393_v45 = vsel %vm5390_vm14, %v5392_v39, %v5388_v42  ;;  %v5369_v34 = vadd.f32 %v6320_v3, %v5368_v40  ;;  %v5411_v61 = vmul.f32 %v6322_v13, %v10181_v58  ;;  %vm5372_vm0 = vmor %vm5370_vm15, %vm5371_vm13  ;;  %vm5375_vm1 = vcmp.eq.f32.partialorder %v5374_v50, 8.507059e+37 }
 0xb96   : > { %v5394_v54 = vmul.f32 %v5393_v45, %v4078_v8  ;;  %v5421_v27 = vand.u32 2147483648, %v10181_v58  ;;  %vm5416_vm2 = vweird.f32 %v6322_v13  ;;  %v5419_v22 = vand.u32 2147483647, %v10181_v58 }
 0xb97   : > { %v5373_v62 = vsel %vm5372_vm0, %v6320_v3, %v5369_v34  ;;  %v5412_v6 = vsub.f32 1.0, %v5411_v61  ;;  %vm5415_vm3 = vweird.f32 %v10181_v58 }
 0xb98   : > { %5486 = vst [vmem:[%s6778_s30 + $0x1e8] sm:$0xff] %v5394_v54  ;;  %v5378_v44 = vsel %vm5375_vm1, %v5377_v36, %v5373_v62  ;;  %vm5417_vm4 = vmor %vm5415_vm3, %vm5416_vm2  ;;  %v5422_v10 = vor.u32 1.1754944e-38, %v5421_v27  ;;  %vm5420_vm5 = vcmp.eq.f32.partialorder %v5419_v22, 8.507059e+37 }
 0xb99   : > { %v5379_v30 = vmul.f32 %v5378_v44, %v4077_v33  ;;  %v5413_v4 = vmul.f32 %v6322_v13, %v5412_v6 }
 0xb9b   : > { %5485 = vst [vmem:[%s6778_s30 + $0x1e0] sm:$0xff] %v5379_v30  ;;  %v5414_v28 = vadd.f32 %v6322_v13, %v5413_v4 }
 0xb9d   : > { %v5418_v55 = vsel %vm5417_vm4, %v6322_v13, %v5414_v28 }
 0xb9e   : > { %v5423_v20 = vsel %vm5420_vm5, %v5422_v10, %v5418_v55 }
 0xb9f   : > { %v5424_v2 = vmul.f32 %v5423_v20, %v4080_v52 }
 0xba1   : > { %5488 = vst [vmem:[%s6778_s30 + $0x1f8] sm:$0xff] %v5424_v2 }
 0xba2 PF: > { %s10867_s8 = sld [smem:[#allocation21_spill]]  ;;  %s5504_s9 = sshll.u32 %s6778_s30, 4  ;;  %s5505_s9 = int_to_ptr.vmem [resolvable:$true] %s5504_s9 }
 0xba3   : > { %s10869_s6 = sld [smem:[#allocation102_spill]]  ;;  %s5490_s4 = scalar_lea.sflag [#allocation9], %s6758_s19 }
 0xba8   : > { %s5677_s5 = sshll.u32 %s10867_s8, 9 }
 0xba9   : > { %s5503_s12 = scalar_lea.hbm %s10869_s6, %s5677_s5  ;;  %s6433_s10 = scalar_lea.hbm %s10869_s6, 1024 }
 0xbaa   : > { %s5506_s17 = sshll.u32 %s5503_s12, 4  ;;  %s5507_s17 = int_to_ptr.hbm [resolvable:$true] %s5506_s17 }
 0xbab   : > { %s6427_s22 = sshra.s32 %s5507_s17, 4  ;;  %s6428_s22 = int_to_ptr.hbm [resolvable:$true] %s6427_s22 }
 0xbac   : > { %s6429_s23 = scalar_lea.hbm %s6428_s22, 512  ;;  %p6434_p2 = scmp.lt.s32.totalorder %s6428_s22, %s10869_s6 }
 0xbad   : > { %p6430_p11 = scmp.ne.s32.totalorder %s6428_s22, %s6429_s23  ;;  %p6435_p3 = scmp.lt.s32.totalorder %s6433_s10, %s6429_s23 }
 0xbaf   : > { %p6431_p13 = pnand %p6430_p11, %p6729_p1  ;;  %p6436_p4 = por %p6435_p3, %p6434_p2 }
 0xbb1   : > { %p6432_p0 = pneg %p6431_p13 }
 0xbb3   : > { %p6437_p7 = pnand %p6436_p4, %p6432_p0 }
 0xbb5   : > { %6440 = shalt.err (!%p6437_p7)
}
 0xbb6   : > { %s6550_s19 = smov 128   ;;  %s6551_s14 = smov 8  }
 0xbb7   : > { %5686 = dma.vmem_to_hbm [thread:$0]  (%p6729_p1), %s5505_s9, 8192, %s5507_s17, %s5490_s4, %s6550_s19, %s6550_s19, %s6551_s14  }
 0xbb8 PF: > { %s10870_s30 = sld [smem:[#allocation18_spill]]  ;;  %p5703_p9 = scmp.ge.s32.totalorder %s6539_s26, 2 }
 0xbba   : > { %p5699_p10 = pnand %p5703_p9, %p6733_p12 }
 0xbbc   : > { %p5700_p5 = pneg %p5699_p10 }
 0xbbe   : > { %s5521_s11 = sand.u32 1, %s10870_s30  }
 0xbbf   : > { %s5522_s7 = scalar_lea.sflag [#allocation9], %s5521_s11 }
 0xbc0   : > { %6494 = dma.done.wait (%p5700_p5), %s5522_s7, 8192  }
 0xbc1   : > { %6496 = vsyncadd (%p5700_p5), %s5522_s7, 4294959104  ;;  %s24_s26 = sadd.s32 1, %s6539_s26   ;;  %s10872_s15 = sld [smem:[#allocation17_spill]] }
 0xbc2   : > { %p21_p6 = scmp.ge.s32.totalorder %s24_s26, 6   ;;  %s10873_s19 = sld [smem:[#allocation24_spill]] }
 0xbc3   : > { %s10874_s8 = sld [smem:[#allocation19_spill]]  ;;  %s10878_s17 = smov %s6503_s18 }
 0xbc4   : > { %s10875_s22 = sld [smem:[#allocation25_spill]]  ;;  %s10880_s20 = smov %s6515_s21 }
 0xbc5   : > { %s10876_s28 = sld [smem:[#allocation22_spill]]  ;;  %s10882_s23 = smov %s6531_s24 }
 0xbc6   : > { %s10877_s5 = sld [smem:[#allocation23_spill]]  ;;  %s10883_s0 = smov %s6535_s25 }
 0xbc7   : > { %s10879_s18 = smov %s10872_s15 }
 0xbc8   :  { %23 = sbr.rel (!%p21_p6) target bundleno = 15 (0xf), region = 113 }
 0xbc9   : > { %s10881_s21 = smov %s10874_s8 }
 0xbcb   : > { %s10884_s24 = smov %s10876_s28 }
 0xbcc   : > { %s10885_s25 = smov %s10877_s5 }
 0xbcd   :  { %5528 = vsyncpa [#allocation8], 1 }
 0xbce   :  { %5530 = vsyncpa [#allocation8 + $0x1], 1 }
 0xbcf   :  { %5531 = vsyncpa [#allocation11], 1 }
 0xbd0   :  { %5533 = vsyncpa [#allocation11 + $0x1], 1 }
 0xbd1   :  { %5534 = vsyncpa [#allocation9], 1 }
 0xbd2   :  { %5536 = vsyncpa [#allocation9 + $0x1], 1 }

</bundles_post_ra>
